<compile_context>
chip_gen: v7x
topology: tpu7x:2x2x1
jax: 0.10.0
libtpu: 0.0.40
codegen_flags: <defaults>
</compile_context>

<pallas_src>
import functools

import numpy as np
import jax
import jax.numpy as jnp
from jax.experimental import pallas as pl
from jax.experimental.pallas import tpu as pltpu

# ----------------------------- model constants -----------------------------
LATENT_DIM = 32
N_CHANNELS = [4, 8, 16]
KERNEL = (3, 3)
STRIDE = (2, 2)
PADDING = (1, 1)
OUT_PADDING = (1, 1)          # what the reference's output-padding search finds for 16x16
NHEAD = 4
N_CLASSES = 3
DIM_FF = 2048
IN_HW = (16, 16)
BN_EPS = 1e-5
LN_EPS = 1e-5


def _enc_hw(hw):
    return tuple((hw[i] + 2 * PADDING[i] - KERNEL[i]) // STRIDE[i] + 1 for i in (0, 1))


ENC1_HW = _enc_hw(IN_HW)                                # (8, 8)
ENC2_HW = _enc_hw(ENC1_HW)                              # (4, 4)
FLAT_ENC = N_CHANNELS[2] * ENC2_HW[0] * ENC2_HW[1]      # 256
FLAT_IN = N_CHANNELS[0] * IN_HW[0] * IN_HW[1]           # 1024


# ---------------------------------------------------------------------------
# Single fused Pallas kernel: whole forward pass
# ---------------------------------------------------------------------------
def _sigmoid(y):
    # exp and reciprocal both land on the EUP slot (free next to the VPU epilogue).
    return pl.reciprocal(1.0 + jnp.exp(-y), approx=True)


def _fused_forward_kernel(*refs, nhead, dk):
    (x_ref, eps_ref,
     e1w, e1b, e2w, e2b,
     fmu_w, fmu_b, flv_w, flv_b, f3w, f3b,
     d1w, d1b, d2w, d2b,
     wq, bq, wk, bk, wv, bv, wo, ob,
     ln1g, ln1b, ff1w, ff1b, ff2w, ff2b, ln2g, ln2b,
     clsw, clsb,
     xr_ref, z_ref, mu_ref, lv_ref, pred_ref) = refs

    f32 = jnp.float32
    mm = lambda a, b: jnp.dot(a, b, preferred_element_type=f32)

    # ---- VAE encoder: (conv+BN+ReLU) x2 (dense, BN folded) -> fc1 / fc2 -> reparam ----
    x = x_ref[...]
    h = jnp.maximum(mm(x, e1w[...]) + e1b[...], 0.0)
    h = jnp.maximum(mm(h, e2w[...]) + e2b[...], 0.0)
    mu = mm(h, fmu_w[...]) + fmu_b[...]
    lv = mm(h, flv_w[...]) + flv_b[...]
    z = mu + jnp.exp(0.5 * lv) * eps_ref[...]
    mu_ref[...] = mu
    lv_ref[...] = lv
    z_ref[...] = z

    # ---- VAE decoder: fc3 -> (convT+BN+LeakyReLU(0.2)) -> (convT+BN+Sigmoid) ----
    d = mm(z, f3w[...]) + f3b[...]
    d = mm(d, d1w[...]) + d1b[...]
    d = jnp.where(d > 0.0, d, 0.2 * d)                     # LeakyReLU(0.2)
    d = mm(d, d2w[...]) + d2b[...]
    xr_ref[...] = _sigmoid(d)

    # ---- classifier: transformer encoder layer (seq=B, batch=1) + fc + sigmoid ----
    scale = 1.0 / float(dk) ** 0.5
    attn = jnp.zeros_like(z)
    for hd in range(nhead):                                # static unroll (4 heads)
        qh = mm(z, wq[hd]) + bq[hd]                        # (S, dk)
        kh = mm(z, wk[hd]) + bk[hd]
        vh = mm(z, wv[hd]) + bv[hd]
        s = mm(qh, kh.T) * scale                           # (S, S)
        s = s - jnp.max(s, axis=-1, keepdims=True)
        p = jnp.exp(s)
        p = p * pl.reciprocal(jnp.sum(p, axis=-1, keepdims=True), approx=True)
        attn = attn + mm(mm(p, vh), wo[hd])                # out_proj folded per head
    attn = attn + ob[...]

    def layernorm(v, g, b):
        m = jnp.mean(v, axis=-1, keepdims=True)
        c = v - m
        var = jnp.mean(c * c, axis=-1, keepdims=True)
        return c * jax.lax.rsqrt(var + LN_EPS) * g + b

    t = layernorm(z + attn, ln1g[...], ln1b[...])
    ff = jnp.maximum(mm(t, ff1w[...]) + ff1b[...], 0.0)
    ff = mm(ff, ff2w[...]) + ff2b[...]
    t = layernorm(t + ff, ln2g[...], ln2b[...])
    pred_ref[...] = _sigmoid(mm(t, clsw[...]) + clsb[...])


# ---------------------------------------------------------------------------
# pallas_call wrapper
# ---------------------------------------------------------------------------
_KP_ORDER = (
    "enc1_w", "enc1_b", "enc2_w", "enc2_b",
    "fc1_w", "fc1_b", "fc2_w", "fc2_b", "fc3_w", "fc3_b",
    "dec1_w", "dec1_b", "dec2_w", "dec2_b",
    "wq", "bq", "wk", "bk", "wv", "bv", "wo", "ob",
    "ln1_g", "ln1_b", "ff1_w", "ff1_b", "ff2_w", "ff2_b", "ln2_g", "ln2_b",
    "cls_w", "cls_b",
)


def _full_spec(shape):
    n = len(shape)
    return pl.BlockSpec(tuple(shape), lambda i, n=n: (0,) * n)


def vae_classifier_forward(kp, x_nchw, eps):
    B, C, H, W = x_nchw.shape
    xf = x_nchw.reshape(B, C * H * W).astype(jnp.float32)   # NCHW flatten (PyTorch order)
    args = [xf, eps.astype(jnp.float32)] + [kp[k] for k in _KP_ORDER]

    out_shape = (
        jax.ShapeDtypeStruct((B, C * H * W), jnp.float32),      # x_recon (flat NCHW)
        jax.ShapeDtypeStruct((B, LATENT_DIM), jnp.float32),     # z
        jax.ShapeDtypeStruct((B, LATENT_DIM), jnp.float32),     # mu
        jax.ShapeDtypeStruct((B, LATENT_DIM), jnp.float32),     # logvar
        jax.ShapeDtypeStruct((B, N_CLASSES - 1), jnp.float32),  # prediction
    )

    xr_flat, z, mu, logvar, pred = pl.pallas_call(
        functools.partial(_fused_forward_kernel, nhead=NHEAD, dk=LATENT_DIM // NHEAD),
        out_shape=out_shape,
        grid=(1,),   # B=2: sharding across cores would be pure overhead
        in_specs=[_full_spec(a.shape) for a in args],
        out_specs=tuple(_full_spec(s.shape) for s in out_shape),
        compiler_params=pltpu.CompilerParams(
            dimension_semantics=("arbitrary",),
            vmem_limit_bytes=32 * 1024 * 1024),  # safe w.r.t. v7x's 64 MiB physical VMEM
    )(*args)

    return xr_flat.reshape(B, C, H, W), z, mu, logvar, pred


# ---------------------------------------------------------------------------
# Parameter init (PyTorch layouts) and one-time host-side lowering
# ---------------------------------------------------------------------------
def init_params(key):
    keys = jax.random.split(key, 32)
    it = iter(keys)

    def nrm(shape, s=0.05):
        return s * jax.random.normal(next(it), shape, dtype=jnp.float32)

    p = {}
    # VAE encoder
    p["conv1_w"] = nrm((8, 4, 3, 3));    p["conv1_b"] = nrm((8,))
    p["bn1_g"] = jnp.ones((8,));         p["bn1_b"] = jnp.zeros((8,))
    p["conv2_w"] = nrm((16, 8, 3, 3));   p["conv2_b"] = nrm((16,))
    p["bn2_g"] = jnp.ones((16,));        p["bn2_b"] = jnp.zeros((16,))
    p["fc1_w"] = nrm((LATENT_DIM, FLAT_ENC)); p["fc1_b"] = nrm((LATENT_DIM,))
    p["fc2_w"] = nrm((LATENT_DIM, FLAT_ENC)); p["fc2_b"] = nrm((LATENT_DIM,))
    p["fc3_w"] = nrm((FLAT_ENC, LATENT_DIM)); p["fc3_b"] = nrm((FLAT_ENC,))
    # VAE decoder
    p["ct1_w"] = nrm((16, 8, 3, 3));     p["ct1_b"] = nrm((8,))
    p["bn3_g"] = jnp.ones((8,));         p["bn3_b"] = jnp.zeros((8,))
    p["ct2_w"] = nrm((8, 4, 3, 3));      p["ct2_b"] = nrm((4,))
    p["bn4_g"] = jnp.ones((4,));         p["bn4_b"] = jnp.zeros((4,))
    # Classifier: 1 TransformerEncoderLayer (PyTorch defaults) + Linear + Sigmoid
    p["in_proj_w"] = nrm((3 * LATENT_DIM, LATENT_DIM)); p["in_proj_b"] = nrm((3 * LATENT_DIM,))
    p["out_proj_w"] = nrm((LATENT_DIM, LATENT_DIM));    p["out_proj_b"] = nrm((LATENT_DIM,))
    p["lin1_w"] = nrm((DIM_FF, LATENT_DIM));            p["lin1_b"] = nrm((DIM_FF,))
    p["lin2_w"] = nrm((LATENT_DIM, DIM_FF));            p["lin2_b"] = nrm((LATENT_DIM,))
    p["ln1_g"] = jnp.ones((LATENT_DIM,)); p["ln1_b"] = jnp.zeros((LATENT_DIM,))
    p["ln2_g"] = jnp.ones((LATENT_DIM,)); p["ln2_b"] = jnp.zeros((LATENT_DIM,))
    p["fc_w"] = nrm((N_CLASSES - 1, LATENT_DIM));       p["fc_b"] = nrm((N_CLASSES - 1,))
    return p


def _conv2d_dense(w, hin, win, stride, padding):
    """Exact dense (Cin*Hin*Win, Cout*Hout*Wout) matrix of a Conv2d, NCHW-flatten order."""
    cout, cin, kh, kw = w.shape
    sh, sw = stride
    ph, pw = padding
    hout = (hin + 2 * ph - kh) // sh + 1
    wout = (win + 2 * pw - kw) // sw + 1
    D = np.zeros((cin * hin * win, cout * hout * wout), np.float32)
    for co in range(cout):
        for ci in range(cin):
            for ki in range(kh):
                for kj in range(kw):
                    val = w[co, ci, ki, kj]
                    for oh in range(hout):
                        ih = oh * sh + ki - ph
                        if ih < 0 or ih >= hin:
                            continue
                        ri = ci * hin * win + ih * win
                        ro = co * hout * wout + oh * wout
                        for ow in range(wout):
                            iw = ow * sw + kj - pw
                            if 0 <= iw < win:
                                D[ri + iw, ro + ow] += val
    return D, (hout, wout)


def _conv_transpose2d_dense(w, hin, win, stride, padding, out_padding):
    """Exact dense matrix of a ConvTranspose2d (PyTorch semantics), NCHW-flatten order."""
    cin, cout, kh, kw = w.shape
    sh, sw = stride
    ph, pw = padding
    oph, opw = out_padding
    hout = (hin - 1) * sh - 2 * ph + kh + oph
    wout = (win - 1) * sw - 2 * pw + kw + opw
    D = np.zeros((cin * hin * win, cout * hout * wout), np.float32)
    for ci in range(cin):
        for co in range(cout):
            for ki in range(kh):
                for kj in range(kw):
                    val = w[ci, co, ki, kj]
                    for ih in range(hin):
                        oh = ih * sh + ki - ph
                        if oh < 0 or oh >= hout:
                            continue
                        ri = ci * hin * win + ih * win
                        ro = co * hout * wout + oh * wout
                        for iw in range(win):
                            ow = iw * sw + kj - pw
                            if 0 <= ow < wout:
                                D[ri + iw, ro + ow] += val
    return D, (hout, wout)


def _fold_bn(D, hw, conv_b, gamma, beta):
    """Fold eval-mode BatchNorm (running mean 0, var 1, eps 1e-5) into the dense matrix."""
    hout, wout = hw
    s = np.asarray(gamma, np.float32) / np.sqrt(1.0 + BN_EPS)
    col_scale = np.repeat(s, hout * wout)
    bias = np.repeat(np.asarray(conv_b, np.float32) * s + np.asarray(beta, np.float32),
                     hout * wout)
    return (D * col_scale[None, :]).astype(np.float32), bias.reshape(1, -1).astype(np.float32)


def prepare_kernel_params(p):
    """One-time host-side lowering of PyTorch-layout params to fused-kernel operands."""
    f = lambda a: np.asarray(a, np.float32)
    kp = {}

    D1, hw1 = _conv2d_dense(f(p["conv1_w"]), IN_HW[0], IN_HW[1], STRIDE, PADDING)
    kp["enc1_w"], kp["enc1_b"] = _fold_bn(D1, hw1, p["conv1_b"], p["bn1_g"], p["bn1_b"])
    D2, hw2 = _conv2d_dense(f(p["conv2_w"]), hw1[0], hw1[1], STRIDE, PADDING)
    kp["enc2_w"], kp["enc2_b"] = _fold_bn(D2, hw2, p["conv2_b"], p["bn2_g"], p["bn2_b"])

    kp["fc1_w"] = f(p["fc1_w"]).T; kp["fc1_b"] = f(p["fc1_b"]).reshape(1, -1)
    kp["fc2_w"] = f(p["fc2_w"]).T; kp["fc2_b"] = f(p["fc2_b"]).reshape(1, -1)
    kp["fc3_w"] = f(p["fc3_w"]).T; kp["fc3_b"] = f(p["fc3_b"]).reshape(1, -1)

    Dt1, hwd1 = _conv_transpose2d_dense(f(p["ct1_w"]), ENC2_HW[0], ENC2_HW[1],
                                        STRIDE, PADDING, OUT_PADDING)
    kp["dec1_w"], kp["dec1_b"] = _fold_bn(Dt1, hwd1, p["ct1_b"], p["bn3_g"], p["bn3_b"])
    Dt2, hwd2 = _conv_transpose2d_dense(f(p["ct2_w"]), hwd1[0], hwd1[1],
                                        STRIDE, PADDING, OUT_PADDING)
    kp["dec2_w"], kp["dec2_b"] = _fold_bn(Dt2, hwd2, p["ct2_b"], p["bn4_g"], p["bn4_b"])

    d, H, dk = LATENT_DIM, NHEAD, LATENT_DIM // NHEAD
    inw, inb = f(p["in_proj_w"]), f(p["in_proj_b"])
    for name, Wm, bv_ in (("q", inw[:d].T, inb[:d]),
                          ("k", inw[d:2 * d].T, inb[d:2 * d]),
                          ("v", inw[2 * d:].T, inb[2 * d:])):
        kp["w" + name] = np.stack([Wm[:, h * dk:(h + 1) * dk] for h in range(H)])       # (H, d, dk)
        kp["b" + name] = np.stack([bv_[h * dk:(h + 1) * dk].reshape(1, dk) for h in range(H)])
    ow = f(p["out_proj_w"])
    kp["wo"] = np.stack([ow[:, h * dk:(h + 1) * dk].T for h in range(H)])                # (H, dk, d)
    kp["ob"] = f(p["out_proj_b"]).reshape(1, d)

    kp["ln1_g"] = f(p["ln1_g"]).reshape(1, d); kp["ln1_b"] = f(p["ln1_b"]).reshape(1, d)
    kp["ln2_g"] = f(p["ln2_g"]).reshape(1, d); kp["ln2_b"] = f(p["ln2_b"]).reshape(1, d)
    kp["ff1_w"] = f(p["lin1_w"]).T; kp["ff1_b"] = f(p["lin1_b"]).reshape(1, -1)
    kp["ff2_w"] = f(p["lin2_w"]).T; kp["ff2_b"] = f(p["lin2_b"]).reshape(1, -1)
    kp["cls_w"] = f(p["fc_w"]).T;   kp["cls_b"] = f(p["fc_b"]).reshape(1, -1)

    return {k: jnp.asarray(v, jnp.float32) for k, v in kp.items()}


# ---------------------------------------------------------------------------
if __name__ == "__main__":
    key = jax.random.PRNGKey(0)
    x_key, eps_key, param_key = jax.random.split(key, 3)

    x = jax.random.normal(x_key, (2, N_CHANNELS[0], IN_HW[0], IN_HW[1]), dtype=jnp.float32)
    eps = jax.random.normal(eps_key, (2, LATENT_DIM), dtype=jnp.float32)

    params = init_params(param_key)
    kparams = prepare_kernel_params(params)      # one-time weight lowering (host side)

    fwd = jax.jit(vae_classifier_forward)
    x_recon, z, mu, logvar, pred = jax.block_until_ready(fwd(kparams, x, eps))

    assert x_recon.shape == (2, 4, 16, 16)
    assert z.shape == (2, LATENT_DIM)
    assert mu.shape == (2, LATENT_DIM)
    assert logvar.shape == (2, LATENT_DIM)
    assert pred.shape == (2, N_CLASSES - 1)
    for t in (x_recon, z, mu, logvar, pred):
        assert bool(jnp.all(jnp.isfinite(t)))
    # sigmoid outputs (small tolerance for the EUP approx reciprocal)
    assert bool(jnp.all((x_recon > -1e-3) & (x_recon < 1.0 + 1e-3)))
    assert bool(jnp.all((pred > -1e-3) & (pred < 1.0 + 1e-3)))
    print("KERNEL_OK")
</pallas_src>

<mosaic_0001>
module attributes {stable_mosaic.version = 11 : i64} {
  func.func @_fused_forward_kernel(%arg0: i32, %arg1: memref<2x1024xf32, #tpu.memory_space<vmem>>, %arg2: memref<2x32xf32, #tpu.memory_space<vmem>>, %arg3: memref<1024x512xf32, #tpu.memory_space<vmem>>, %arg4: memref<1x512xf32, #tpu.memory_space<vmem>>, %arg5: memref<512x256xf32, #tpu.memory_space<vmem>>, %arg6: memref<1x256xf32, #tpu.memory_space<vmem>>, %arg7: memref<256x32xf32, #tpu.memory_space<vmem>>, %arg8: memref<1x32xf32, #tpu.memory_space<vmem>>, %arg9: memref<256x32xf32, #tpu.memory_space<vmem>>, %arg10: memref<1x32xf32, #tpu.memory_space<vmem>>, %arg11: memref<32x256xf32, #tpu.memory_space<vmem>>, %arg12: memref<1x256xf32, #tpu.memory_space<vmem>>, %arg13: memref<256x512xf32, #tpu.memory_space<vmem>>, %arg14: memref<1x512xf32, #tpu.memory_space<vmem>>, %arg15: memref<512x1024xf32, #tpu.memory_space<vmem>>, %arg16: memref<1x1024xf32, #tpu.memory_space<vmem>>, %arg17: memref<4x32x8xf32, #tpu.memory_space<vmem>>, %arg18: memref<4x1x8xf32, #tpu.memory_space<vmem>>, %arg19: memref<4x32x8xf32, #tpu.memory_space<vmem>>, %arg20: memref<4x1x8xf32, #tpu.memory_space<vmem>>, %arg21: memref<4x32x8xf32, #tpu.memory_space<vmem>>, %arg22: memref<4x1x8xf32, #tpu.memory_space<vmem>>, %arg23: memref<4x8x32xf32, #tpu.memory_space<vmem>>, %arg24: memref<1x32xf32, #tpu.memory_space<vmem>>, %arg25: memref<1x32xf32, #tpu.memory_space<vmem>>, %arg26: memref<1x32xf32, #tpu.memory_space<vmem>>, %arg27: memref<32x2048xf32, #tpu.memory_space<vmem>>, %arg28: memref<1x2048xf32, #tpu.memory_space<vmem>>, %arg29: memref<2048x32xf32, #tpu.memory_space<vmem>>, %arg30: memref<1x32xf32, #tpu.memory_space<vmem>>, %arg31: memref<1x32xf32, #tpu.memory_space<vmem>>, %arg32: memref<1x32xf32, #tpu.memory_space<vmem>>, %arg33: memref<32x2xf32, #tpu.memory_space<vmem>>, %arg34: memref<1x2xf32, #tpu.memory_space<vmem>>, %arg35: memref<2x1024xf32, #tpu.memory_space<vmem>>, %arg36: memref<2x32xf32, #tpu.memory_space<vmem>>, %arg37: memref<2x32xf32, #tpu.memory_space<vmem>>, %arg38: memref<2x32xf32, #tpu.memory_space<vmem>>, %arg39: memref<2x2xf32, #tpu.memory_space<vmem>>) attributes {dimension_semantics = [#tpu.dimension_semantics<arbitrary>], iteration_bounds = array<i64: 1>, scalar_prefetch = 0 : i64, scratch_operands = 0 : i64, tpu.core_type = #tpu.core_type<tc>, window_params = [{pipeline_mode = #tpu.pipeline_mode<synchronous>, transform_indices = @transform_0, window_bounds = array<i64: 2, 1024>}, {pipeline_mode = #tpu.pipeline_mode<synchronous>, transform_indices = @transform_1, window_bounds = array<i64: 2, 32>}, {pipeline_mode = #tpu.pipeline_mode<synchronous>, transform_indices = @transform_2, window_bounds = array<i64: 1024, 512>}, {pipeline_mode = #tpu.pipeline_mode<synchronous>, transform_indices = @transform_3, window_bounds = array<i64: 1, 512>}, {pipeline_mode = #tpu.pipeline_mode<synchronous>, transform_indices = @transform_4, window_bounds = array<i64: 512, 256>}, {pipeline_mode = #tpu.pipeline_mode<synchronous>, transform_indices = @transform_5, window_bounds = array<i64: 1, 256>}, {pipeline_mode = #tpu.pipeline_mode<synchronous>, transform_indices = @transform_6, window_bounds = array<i64: 256, 32>}, {pipeline_mode = #tpu.pipeline_mode<synchronous>, transform_indices = @transform_7, window_bounds = array<i64: 1, 32>}, {pipeline_mode = #tpu.pipeline_mode<synchronous>, transform_indices = @transform_8, window_bounds = array<i64: 256, 32>}, {pipeline_mode = #tpu.pipeline_mode<synchronous>, transform_indices = @transform_9, window_bounds = array<i64: 1, 32>}, {pipeline_mode = #tpu.pipeline_mode<synchronous>, transform_indices = @transform_10, window_bounds = array<i64: 32, 256>}, {pipeline_mode = #tpu.pipeline_mode<synchronous>, transform_indices = @transform_11, window_bounds = array<i64: 1, 256>}, {pipeline_mode = #tpu.pipeline_mode<synchronous>, transform_indices = @transform_12, window_bounds = array<i64: 256, 512>}, {pipeline_mode = #tpu.pipeline_mode<synchronous>, transform_indices = @transform_13, window_bounds = array<i64: 1, 512>}, {pipeline_mode = #tpu.pipeline_mode<synchronous>, transform_indices = @transform_14, window_bounds = array<i64: 512, 1024>}, {pipeline_mode = #tpu.pipeline_mode<synchronous>, transform_indices = @transform_15, window_bounds = array<i64: 1, 1024>}, {pipeline_mode = #tpu.pipeline_mode<synchronous>, transform_indices = @transform_16, window_bounds = array<i64: 4, 32, 8>}, {pipeline_mode = #tpu.pipeline_mode<synchronous>, transform_indices = @transform_17, window_bounds = array<i64: 4, 1, 8>}, {pipeline_mode = #tpu.pipeline_mode<synchronous>, transform_indices = @transform_18, window_bounds = array<i64: 4, 32, 8>}, {pipeline_mode = #tpu.pipeline_mode<synchronous>, transform_indices = @transform_19, window_bounds = array<i64: 4, 1, 8>}, {pipeline_mode = #tpu.pipeline_mode<synchronous>, transform_indices = @transform_20, window_bounds = array<i64: 4, 32, 8>}, {pipeline_mode = #tpu.pipeline_mode<synchronous>, transform_indices = @transform_21, window_bounds = array<i64: 4, 1, 8>}, {pipeline_mode = #tpu.pipeline_mode<synchronous>, transform_indices = @transform_22, window_bounds = array<i64: 4, 8, 32>}, {pipeline_mode = #tpu.pipeline_mode<synchronous>, transform_indices = @transform_23, window_bounds = array<i64: 1, 32>}, {pipeline_mode = #tpu.pipeline_mode<synchronous>, transform_indices = @transform_24, window_bounds = array<i64: 1, 32>}, {pipeline_mode = #tpu.pipeline_mode<synchronous>, transform_indices = @transform_25, window_bounds = array<i64: 1, 32>}, {pipeline_mode = #tpu.pipeline_mode<synchronous>, transform_indices = @transform_26, window_bounds = array<i64: 32, 2048>}, {pipeline_mode = #tpu.pipeline_mode<synchronous>, transform_indices = @transform_27, window_bounds = array<i64: 1, 2048>}, {pipeline_mode = #tpu.pipeline_mode<synchronous>, transform_indices = @transform_28, window_bounds = array<i64: 2048, 32>}, {pipeline_mode = #tpu.pipeline_mode<synchronous>, transform_indices = @transform_29, window_bounds = array<i64: 1, 32>}, {pipeline_mode = #tpu.pipeline_mode<synchronous>, transform_indices = @transform_30, window_bounds = array<i64: 1, 32>}, {pipeline_mode = #tpu.pipeline_mode<synchronous>, transform_indices = @transform_31, window_bounds = array<i64: 1, 32>}, {pipeline_mode = #tpu.pipeline_mode<synchronous>, transform_indices = @transform_32, window_bounds = array<i64: 32, 2>}, {pipeline_mode = #tpu.pipeline_mode<synchronous>, transform_indices = @transform_33, window_bounds = array<i64: 1, 2>}, {pipeline_mode = #tpu.pipeline_mode<synchronous>, transform_indices = @transform_34, window_bounds = array<i64: 2, 1024>}, {pipeline_mode = #tpu.pipeline_mode<synchronous>, transform_indices = @transform_35, window_bounds = array<i64: 2, 32>}, {pipeline_mode = #tpu.pipeline_mode<synchronous>, transform_indices = @transform_36, window_bounds = array<i64: 2, 32>}, {pipeline_mode = #tpu.pipeline_mode<synchronous>, transform_indices = @transform_37, window_bounds = array<i64: 2, 32>}, {pipeline_mode = #tpu.pipeline_mode<synchronous>, transform_indices = @transform_38, window_bounds = array<i64: 2, 2>}]} {
    %c0 = arith.constant 0 : index
    %c0_0 = arith.constant 0 : index
    %0 = vector.load %arg1[%c0, %c0_0] : memref<2x1024xf32, #tpu.memory_space<vmem>>, vector<2x1024xf32>
    %c0_1 = arith.constant 0 : index
    %c0_2 = arith.constant 0 : index
    %1 = vector.load %arg3[%c0_1, %c0_2] : memref<1024x512xf32, #tpu.memory_space<vmem>>, vector<1024x512xf32>
    %cst = arith.constant dense<0.000000e+00> : vector<2x512xf32>
    %2 = tpu.matmul %0, %1, %cst {dimension_numbers = #tpu.dot_dimension_numbers<[1], [0], [0], [1], [0, 0, 1, 1], [], []>} : vector<2x1024xf32>, vector<1024x512xf32>, vector<2x512xf32> -> vector<2x512xf32>
    %c0_3 = arith.constant 0 : index
    %c0_4 = arith.constant 0 : index
    %3 = vector.load %arg4[%c0_3, %c0_4] : memref<1x512xf32, #tpu.memory_space<vmem>>, vector<1x512xf32>
    %4 = vector.broadcast %3 : vector<1x512xf32> to vector<2x512xf32>
    %5 = arith.addf %2, %4 : vector<2x512xf32>
    %cst_5 = arith.constant 0.000000e+00 : f32
    %6 = vector.broadcast %cst_5 : f32 to vector<2x512xf32>
    %7 = arith.maximumf %5, %6 : vector<2x512xf32>
    %c0_6 = arith.constant 0 : index
    %c0_7 = arith.constant 0 : index
    %8 = vector.load %arg5[%c0_6, %c0_7] : memref<512x256xf32, #tpu.memory_space<vmem>>, vector<512x256xf32>
    %cst_8 = arith.constant dense<0.000000e+00> : vector<2x256xf32>
    %9 = tpu.matmul %7, %8, %cst_8 {dimension_numbers = #tpu.dot_dimension_numbers<[1], [0], [0], [1], [0, 0, 1, 1], [], []>} : vector<2x512xf32>, vector<512x256xf32>, vector<2x256xf32> -> vector<2x256xf32>
    %c0_9 = arith.constant 0 : index
    %c0_10 = arith.constant 0 : index
    %10 = vector.load %arg6[%c0_9, %c0_10] : memref<1x256xf32, #tpu.memory_space<vmem>>, vector<1x256xf32>
    %11 = vector.broadcast %10 : vector<1x256xf32> to vector<2x256xf32>
    %12 = arith.addf %9, %11 : vector<2x256xf32>
    %cst_11 = arith.constant 0.000000e+00 : f32
    %13 = vector.broadcast %cst_11 : f32 to vector<2x256xf32>
    %14 = arith.maximumf %12, %13 : vector<2x256xf32>
    %c0_12 = arith.constant 0 : index
    %c0_13 = arith.constant 0 : index
    %15 = vector.load %arg7[%c0_12, %c0_13] : memref<256x32xf32, #tpu.memory_space<vmem>>, vector<256x32xf32>
    %cst_14 = arith.constant dense<0.000000e+00> : vector<2x32xf32>
    %16 = tpu.matmul %14, %15, %cst_14 {dimension_numbers = #tpu.dot_dimension_numbers<[1], [0], [0], [1], [0, 0, 1, 1], [], []>} : vector<2x256xf32>, vector<256x32xf32>, vector<2x32xf32> -> vector<2x32xf32>
    %c0_15 = arith.constant 0 : index
    %c0_16 = arith.constant 0 : index
    %17 = vector.load %arg8[%c0_15, %c0_16] : memref<1x32xf32, #tpu.memory_space<vmem>>, vector<1x32xf32>
    %18 = vector.broadcast %17 : vector<1x32xf32> to vector<2x32xf32>
    %19 = arith.addf %16, %18 : vector<2x32xf32>
    %c0_17 = arith.constant 0 : index
    %c0_18 = arith.constant 0 : index
    %20 = vector.load %arg9[%c0_17, %c0_18] : memref<256x32xf32, #tpu.memory_space<vmem>>, vector<256x32xf32>
    %cst_19 = arith.constant dense<0.000000e+00> : vector<2x32xf32>
    %21 = tpu.matmul %14, %20, %cst_19 {dimension_numbers = #tpu.dot_dimension_numbers<[1], [0], [0], [1], [0, 0, 1, 1], [], []>} : vector<2x256xf32>, vector<256x32xf32>, vector<2x32xf32> -> vector<2x32xf32>
    %c0_20 = arith.constant 0 : index
    %c0_21 = arith.constant 0 : index
    %22 = vector.load %arg10[%c0_20, %c0_21] : memref<1x32xf32, #tpu.memory_space<vmem>>, vector<1x32xf32>
    %23 = vector.broadcast %22 : vector<1x32xf32> to vector<2x32xf32>
    %24 = arith.addf %21, %23 : vector<2x32xf32>
    %cst_22 = arith.constant 5.000000e-01 : f32
    %25 = vector.broadcast %cst_22 : f32 to vector<2x32xf32>
    %26 = arith.mulf %25, %24 : vector<2x32xf32>
    %27 = math.exp %26 : vector<2x32xf32>
    %c0_23 = arith.constant 0 : index
    %c0_24 = arith.constant 0 : index
    %28 = vector.load %arg2[%c0_23, %c0_24] : memref<2x32xf32, #tpu.memory_space<vmem>>, vector<2x32xf32>
    %29 = arith.mulf %27, %28 : vector<2x32xf32>
    %30 = arith.addf %19, %29 : vector<2x32xf32>
    %c0_25 = arith.constant 0 : index
    %c0_26 = arith.constant 0 : index
    %31 = vector.load %arg37[%c0_25, %c0_26] : memref<2x32xf32, #tpu.memory_space<vmem>>, vector<2x32xf32>
    tpu.vector_store %arg37[%c0_25, %c0_26], %19 {strides = array<i32>} : memref<2x32xf32, #tpu.memory_space<vmem>>, vector<2x32xf32>,
    %c0_27 = arith.constant 0 : index
    %c0_28 = arith.constant 0 : index
    %32 = vector.load %arg38[%c0_27, %c0_28] : memref<2x32xf32, #tpu.memory_space<vmem>>, vector<2x32xf32>
    tpu.vector_store %arg38[%c0_27, %c0_28], %24 {strides = array<i32>} : memref<2x32xf32, #tpu.memory_space<vmem>>, vector<2x32xf32>,
    %c0_29 = arith.constant 0 : index
    %c0_30 = arith.constant 0 : index
    %33 = vector.load %arg36[%c0_29, %c0_30] : memref<2x32xf32, #tpu.memory_space<vmem>>, vector<2x32xf32>
    tpu.vector_store %arg36[%c0_29, %c0_30], %30 {strides = array<i32>} : memref<2x32xf32, #tpu.memory_space<vmem>>, vector<2x32xf32>,
    %c0_31 = arith.constant 0 : index
    %c0_32 = arith.constant 0 : index
    %34 = vector.load %arg11[%c0_31, %c0_32] : memref<32x256xf32, #tpu.memory_space<vmem>>, vector<32x256xf32>
    %cst_33 = arith.constant dense<0.000000e+00> : vector<2x256xf32>
    %35 = tpu.matmul %30, %34, %cst_33 {dimension_numbers = #tpu.dot_dimension_numbers<[1], [0], [0], [1], [0, 0, 1, 1], [], []>} : vector<2x32xf32>, vector<32x256xf32>, vector<2x256xf32> -> vector<2x256xf32>
    %c0_34 = arith.constant 0 : index
    %c0_35 = arith.constant 0 : index
    %36 = vector.load %arg12[%c0_34, %c0_35] : memref<1x256xf32, #tpu.memory_space<vmem>>, vector<1x256xf32>
    %37 = vector.broadcast %36 : vector<1x256xf32> to vector<2x256xf32>
    %38 = arith.addf %35, %37 : vector<2x256xf32>
    %c0_36 = arith.constant 0 : index
    %c0_37 = arith.constant 0 : index
    %39 = vector.load %arg13[%c0_36, %c0_37] : memref<256x512xf32, #tpu.memory_space<vmem>>, vector<256x512xf32>
    %cst_38 = arith.constant dense<0.000000e+00> : vector<2x512xf32>
    %40 = tpu.matmul %38, %39, %cst_38 {dimension_numbers = #tpu.dot_dimension_numbers<[1], [0], [0], [1], [0, 0, 1, 1], [], []>} : vector<2x256xf32>, vector<256x512xf32>, vector<2x512xf32> -> vector<2x512xf32>
    %c0_39 = arith.constant 0 : index
    %c0_40 = arith.constant 0 : index
    %41 = vector.load %arg14[%c0_39, %c0_40] : memref<1x512xf32, #tpu.memory_space<vmem>>, vector<1x512xf32>
    %42 = vector.broadcast %41 : vector<1x512xf32> to vector<2x512xf32>
    %43 = arith.addf %40, %42 : vector<2x512xf32>
    %cst_41 = arith.constant 0.000000e+00 : f32
    %44 = vector.broadcast %cst_41 : f32 to vector<2x512xf32>
    %45 = arith.cmpf ogt, %43, %44 : vector<2x512xf32>
    %cst_42 = arith.constant 2.000000e-01 : f32
    %46 = vector.broadcast %cst_42 : f32 to vector<2x512xf32>
    %47 = arith.mulf %46, %43 : vector<2x512xf32>
    %48 = arith.select %45, %43, %47 : vector<2x512xi1>, vector<2x512xf32>
    %c0_43 = arith.constant 0 : index
    %c0_44 = arith.constant 0 : index
    %49 = vector.load %arg15[%c0_43, %c0_44] : memref<512x1024xf32, #tpu.memory_space<vmem>>, vector<512x1024xf32>
    %cst_45 = arith.constant dense<0.000000e+00> : vector<2x1024xf32>
    %50 = tpu.matmul %48, %49, %cst_45 {dimension_numbers = #tpu.dot_dimension_numbers<[1], [0], [0], [1], [0, 0, 1, 1], [], []>} : vector<2x512xf32>, vector<512x1024xf32>, vector<2x1024xf32> -> vector<2x1024xf32>
    %c0_46 = arith.constant 0 : index
    %c0_47 = arith.constant 0 : index
    %51 = vector.load %arg16[%c0_46, %c0_47] : memref<1x1024xf32, #tpu.memory_space<vmem>>, vector<1x1024xf32>
    %52 = vector.broadcast %51 : vector<1x1024xf32> to vector<2x1024xf32>
    %53 = arith.addf %50, %52 : vector<2x1024xf32>
    %cst_48 = arith.constant 0.000000e+00 : f32
    %54 = vector.broadcast %cst_48 : f32 to vector<2x1024xf32>
    %55 = arith.subf %54, %53 : vector<2x1024xf32>
    %56 = math.exp %55 : vector<2x1024xf32>
    %cst_49 = arith.constant 1.000000e+00 : f32
    %57 = vector.broadcast %cst_49 : f32 to vector<2x1024xf32>
    %58 = arith.addf %57, %56 : vector<2x1024xf32>
    %59 = tpu.reciprocal %58 {approx = true} : vector<2x1024xf32> -> vector<2x1024xf32>
    %c0_50 = arith.constant 0 : index
    %c0_51 = arith.constant 0 : index
    %60 = vector.load %arg35[%c0_50, %c0_51] : memref<2x1024xf32, #tpu.memory_space<vmem>>, vector<2x1024xf32>
    tpu.vector_store %arg35[%c0_50, %c0_51], %59 {strides = array<i32>} : memref<2x1024xf32, #tpu.memory_space<vmem>>, vector<2x1024xf32>,
    %cst_52 = arith.constant 0.000000e+00 : f32
    %61 = vector.broadcast %cst_52 : f32 to vector<2x32xf32>
    %c0_53 = arith.constant 0 : index
    %c0_54 = arith.constant 0 : index
    %c0_55 = arith.constant 0 : index
    %62 = vector.load %arg17[%c0_53, %c0_54, %c0_55] : memref<4x32x8xf32, #tpu.memory_space<vmem>>, vector<1x32x8xf32>
    %63 = vector.shape_cast %62 : vector<1x32x8xf32> to vector<32x8xf32>
    %cst_56 = arith.constant dense<0.000000e+00> : vector<2x8xf32>
    %64 = tpu.matmul %30, %63, %cst_56 {dimension_numbers = #tpu.dot_dimension_numbers<[1], [0], [0], [1], [0, 0, 1, 1], [], []>} : vector<2x32xf32>, vector<32x8xf32>, vector<2x8xf32> -> vector<2x8xf32>
    %c0_57 = arith.constant 0 : index
    %c0_58 = arith.constant 0 : index
    %c0_59 = arith.constant 0 : index
    %65 = vector.load %arg18[%c0_57, %c0_58, %c0_59] : memref<4x1x8xf32, #tpu.memory_space<vmem>>, vector<1x1x8xf32>
    %66 = vector.shape_cast %65 : vector<1x1x8xf32> to vector<1x8xf32>
    %67 = vector.broadcast %66 : vector<1x8xf32> to vector<2x8xf32>
    %68 = arith.addf %64, %67 : vector<2x8xf32>
    %c0_60 = arith.constant 0 : index
    %c0_61 = arith.constant 0 : index
    %c0_62 = arith.constant 0 : index
    %69 = vector.load %arg19[%c0_60, %c0_61, %c0_62] : memref<4x32x8xf32, #tpu.memory_space<vmem>>, vector<1x32x8xf32>
    %70 = vector.shape_cast %69 : vector<1x32x8xf32> to vector<32x8xf32>
    %cst_63 = arith.constant dense<0.000000e+00> : vector<2x8xf32>
    %71 = tpu.matmul %30, %70, %cst_63 {dimension_numbers = #tpu.dot_dimension_numbers<[1], [0], [0], [1], [0, 0, 1, 1], [], []>} : vector<2x32xf32>, vector<32x8xf32>, vector<2x8xf32> -> vector<2x8xf32>
    %c0_64 = arith.constant 0 : index
    %c0_65 = arith.constant 0 : index
    %c0_66 = arith.constant 0 : index
    %72 = vector.load %arg20[%c0_64, %c0_65, %c0_66] : memref<4x1x8xf32, #tpu.memory_space<vmem>>, vector<1x1x8xf32>
    %73 = vector.shape_cast %72 : vector<1x1x8xf32> to vector<1x8xf32>
    %74 = vector.broadcast %73 : vector<1x8xf32> to vector<2x8xf32>
    %75 = arith.addf %71, %74 : vector<2x8xf32>
    %c0_67 = arith.constant 0 : index
    %c0_68 = arith.constant 0 : index
    %c0_69 = arith.constant 0 : index
    %76 = vector.load %arg21[%c0_67, %c0_68, %c0_69] : memref<4x32x8xf32, #tpu.memory_space<vmem>>, vector<1x32x8xf32>
    %77 = vector.shape_cast %76 : vector<1x32x8xf32> to vector<32x8xf32>
    %cst_70 = arith.constant dense<0.000000e+00> : vector<2x8xf32>
    %78 = tpu.matmul %30, %77, %cst_70 {dimension_numbers = #tpu.dot_dimension_numbers<[1], [0], [0], [1], [0, 0, 1, 1], [], []>} : vector<2x32xf32>, vector<32x8xf32>, vector<2x8xf32> -> vector<2x8xf32>
    %c0_71 = arith.constant 0 : index
    %c0_72 = arith.constant 0 : index
    %c0_73 = arith.constant 0 : index
    %79 = vector.load %arg22[%c0_71, %c0_72, %c0_73] : memref<4x1x8xf32, #tpu.memory_space<vmem>>, vector<1x1x8xf32>
    %80 = vector.shape_cast %79 : vector<1x1x8xf32> to vector<1x8xf32>
    %81 = vector.broadcast %80 : vector<1x8xf32> to vector<2x8xf32>
    %82 = arith.addf %78, %81 : vector<2x8xf32>
    %83 = tpu.transpose %75, [1, 0] : vector<2x8xf32> -> vector<8x2xf32>
    %cst_74 = arith.constant dense<0.000000e+00> : vector<2x2xf32>
    %84 = tpu.matmul %68, %83, %cst_74 {dimension_numbers = #tpu.dot_dimension_numbers<[1], [0], [0], [1], [0, 0, 1, 1], [], []>} : vector<2x8xf32>, vector<8x2xf32>, vector<2x2xf32> -> vector<2x2xf32>
    %cst_75 = arith.constant 0.353553385 : f32
    %85 = vector.broadcast %cst_75 : f32 to vector<2x2xf32>
    %86 = arith.mulf %84, %85 : vector<2x2xf32>
    %cst_76 = arith.constant dense<0xFF800000> : vector<2xf32>
    %87 = vector.multi_reduction <maximumf>, %86, %cst_76 [1] : vector<2x2xf32> to vector<2xf32>
    %88 = vector.shape_cast %87 : vector<2xf32> to vector<2x1xf32>
    %89 = vector.broadcast %88 : vector<2x1xf32> to vector<2x2xf32>
    %90 = arith.subf %86, %89 : vector<2x2xf32>
    %91 = math.exp %90 : vector<2x2xf32>
    %cst_77 = arith.constant dense<0.000000e+00> : vector<2xf32>
    %92 = vector.multi_reduction <add>, %91, %cst_77 [1] : vector<2x2xf32> to vector<2xf32>
    %93 = vector.shape_cast %92 : vector<2xf32> to vector<2x1xf32>
    %94 = tpu.reciprocal %93 {approx = true} : vector<2x1xf32> -> vector<2x1xf32>
    %95 = vector.broadcast %94 : vector<2x1xf32> to vector<2x2xf32>
    %96 = arith.mulf %91, %95 : vector<2x2xf32>
    %cst_78 = arith.constant dense<0.000000e+00> : vector<2x8xf32>
    %97 = tpu.matmul %96, %82, %cst_78 {dimension_numbers = #tpu.dot_dimension_numbers<[1], [0], [0], [1], [0, 0, 1, 1], [], []>} : vector<2x2xf32>, vector<2x8xf32>, vector<2x8xf32> -> vector<2x8xf32>
    %c0_79 = arith.constant 0 : index
    %c0_80 = arith.constant 0 : index
    %c0_81 = arith.constant 0 : index
    %98 = vector.load %arg23[%c0_79, %c0_80, %c0_81] : memref<4x8x32xf32, #tpu.memory_space<vmem>>, vector<1x8x32xf32>
    %99 = vector.shape_cast %98 : vector<1x8x32xf32> to vector<8x32xf32>
    %cst_82 = arith.constant dense<0.000000e+00> : vector<2x32xf32>
    %100 = tpu.matmul %97, %99, %cst_82 {dimension_numbers = #tpu.dot_dimension_numbers<[1], [0], [0], [1], [0, 0, 1, 1], [], []>} : vector<2x8xf32>, vector<8x32xf32>, vector<2x32xf32> -> vector<2x32xf32>
    %101 = arith.addf %61, %100 : vector<2x32xf32>
    %c1 = arith.constant 1 : index
    %c0_83 = arith.constant 0 : index
    %c0_84 = arith.constant 0 : index
    %102 = vector.load %arg17[%c1, %c0_83, %c0_84] : memref<4x32x8xf32, #tpu.memory_space<vmem>>, vector<1x32x8xf32>
    %103 = vector.shape_cast %102 : vector<1x32x8xf32> to vector<32x8xf32>
    %cst_85 = arith.constant dense<0.000000e+00> : vector<2x8xf32>
    %104 = tpu.matmul %30, %103, %cst_85 {dimension_numbers = #tpu.dot_dimension_numbers<[1], [0], [0], [1], [0, 0, 1, 1], [], []>} : vector<2x32xf32>, vector<32x8xf32>, vector<2x8xf32> -> vector<2x8xf32>
    %c1_86 = arith.constant 1 : index
    %c0_87 = arith.constant 0 : index
    %c0_88 = arith.constant 0 : index
    %105 = vector.load %arg18[%c1_86, %c0_87, %c0_88] : memref<4x1x8xf32, #tpu.memory_space<vmem>>, vector<1x1x8xf32>
    %106 = vector.shape_cast %105 : vector<1x1x8xf32> to vector<1x8xf32>
    %107 = vector.broadcast %106 : vector<1x8xf32> to vector<2x8xf32>
    %108 = arith.addf %104, %107 : vector<2x8xf32>
    %c1_89 = arith.constant 1 : index
    %c0_90 = arith.constant 0 : index
    %c0_91 = arith.constant 0 : index
    %109 = vector.load %arg19[%c1_89, %c0_90, %c0_91] : memref<4x32x8xf32, #tpu.memory_space<vmem>>, vector<1x32x8xf32>
    %110 = vector.shape_cast %109 : vector<1x32x8xf32> to vector<32x8xf32>
    %cst_92 = arith.constant dense<0.000000e+00> : vector<2x8xf32>
    %111 = tpu.matmul %30, %110, %cst_92 {dimension_numbers = #tpu.dot_dimension_numbers<[1], [0], [0], [1], [0, 0, 1, 1], [], []>} : vector<2x32xf32>, vector<32x8xf32>, vector<2x8xf32> -> vector<2x8xf32>
    %c1_93 = arith.constant 1 : index
    %c0_94 = arith.constant 0 : index
    %c0_95 = arith.constant 0 : index
    %112 = vector.load %arg20[%c1_93, %c0_94, %c0_95] : memref<4x1x8xf32, #tpu.memory_space<vmem>>, vector<1x1x8xf32>
    %113 = vector.shape_cast %112 : vector<1x1x8xf32> to vector<1x8xf32>
    %114 = vector.broadcast %113 : vector<1x8xf32> to vector<2x8xf32>
    %115 = arith.addf %111, %114 : vector<2x8xf32>
    %c1_96 = arith.constant 1 : index
    %c0_97 = arith.constant 0 : index
    %c0_98 = arith.constant 0 : index
    %116 = vector.load %arg21[%c1_96, %c0_97, %c0_98] : memref<4x32x8xf32, #tpu.memory_space<vmem>>, vector<1x32x8xf32>
    %117 = vector.shape_cast %116 : vector<1x32x8xf32> to vector<32x8xf32>
    %cst_99 = arith.constant dense<0.000000e+00> : vector<2x8xf32>
    %118 = tpu.matmul %30, %117, %cst_99 {dimension_numbers = #tpu.dot_dimension_numbers<[1], [0], [0], [1], [0, 0, 1, 1], [], []>} : vector<2x32xf32>, vector<32x8xf32>, vector<2x8xf32> -> vector<2x8xf32>
    %c1_100 = arith.constant 1 : index
    %c0_101 = arith.constant 0 : index
    %c0_102 = arith.constant 0 : index
    %119 = vector.load %arg22[%c1_100, %c0_101, %c0_102] : memref<4x1x8xf32, #tpu.memory_space<vmem>>, vector<1x1x8xf32>
    %120 = vector.shape_cast %119 : vector<1x1x8xf32> to vector<1x8xf32>
    %121 = vector.broadcast %120 : vector<1x8xf32> to vector<2x8xf32>
    %122 = arith.addf %118, %121 : vector<2x8xf32>
    %123 = tpu.transpose %115, [1, 0] : vector<2x8xf32> -> vector<8x2xf32>
    %cst_103 = arith.constant dense<0.000000e+00> : vector<2x2xf32>
    %124 = tpu.matmul %108, %123, %cst_103 {dimension_numbers = #tpu.dot_dimension_numbers<[1], [0], [0], [1], [0, 0, 1, 1], [], []>} : vector<2x8xf32>, vector<8x2xf32>, vector<2x2xf32> -> vector<2x2xf32>
    %cst_104 = arith.constant 0.353553385 : f32
    %125 = vector.broadcast %cst_104 : f32 to vector<2x2xf32>
    %126 = arith.mulf %124, %125 : vector<2x2xf32>
    %cst_105 = arith.constant dense<0xFF800000> : vector<2xf32>
    %127 = vector.multi_reduction <maximumf>, %126, %cst_105 [1] : vector<2x2xf32> to vector<2xf32>
    %128 = vector.shape_cast %127 : vector<2xf32> to vector<2x1xf32>
    %129 = vector.broadcast %128 : vector<2x1xf32> to vector<2x2xf32>
    %130 = arith.subf %126, %129 : vector<2x2xf32>
    %131 = math.exp %130 : vector<2x2xf32>
    %cst_106 = arith.constant dense<0.000000e+00> : vector<2xf32>
    %132 = vector.multi_reduction <add>, %131, %cst_106 [1] : vector<2x2xf32> to vector<2xf32>
    %133 = vector.shape_cast %132 : vector<2xf32> to vector<2x1xf32>
    %134 = tpu.reciprocal %133 {approx = true} : vector<2x1xf32> -> vector<2x1xf32>
    %135 = vector.broadcast %134 : vector<2x1xf32> to vector<2x2xf32>
    %136 = arith.mulf %131, %135 : vector<2x2xf32>
    %cst_107 = arith.constant dense<0.000000e+00> : vector<2x8xf32>
    %137 = tpu.matmul %136, %122, %cst_107 {dimension_numbers = #tpu.dot_dimension_numbers<[1], [0], [0], [1], [0, 0, 1, 1], [], []>} : vector<2x2xf32>, vector<2x8xf32>, vector<2x8xf32> -> vector<2x8xf32>
    %c1_108 = arith.constant 1 : index
    %c0_109 = arith.constant 0 : index
    %c0_110 = arith.constant 0 : index
    %138 = vector.load %arg23[%c1_108, %c0_109, %c0_110] : memref<4x8x32xf32, #tpu.memory_space<vmem>>, vector<1x8x32xf32>
    %139 = vector.shape_cast %138 : vector<1x8x32xf32> to vector<8x32xf32>
    %cst_111 = arith.constant dense<0.000000e+00> : vector<2x32xf32>
    %140 = tpu.matmul %137, %139, %cst_111 {dimension_numbers = #tpu.dot_dimension_numbers<[1], [0], [0], [1], [0, 0, 1, 1], [], []>} : vector<2x8xf32>, vector<8x32xf32>, vector<2x32xf32> -> vector<2x32xf32>
    %141 = arith.addf %101, %140 : vector<2x32xf32>
    %c2 = arith.constant 2 : index
    %c0_112 = arith.constant 0 : index
    %c0_113 = arith.constant 0 : index
    %142 = vector.load %arg17[%c2, %c0_112, %c0_113] : memref<4x32x8xf32, #tpu.memory_space<vmem>>, vector<1x32x8xf32>
    %143 = vector.shape_cast %142 : vector<1x32x8xf32> to vector<32x8xf32>
    %cst_114 = arith.constant dense<0.000000e+00> : vector<2x8xf32>
    %144 = tpu.matmul %30, %143, %cst_114 {dimension_numbers = #tpu.dot_dimension_numbers<[1], [0], [0], [1], [0, 0, 1, 1], [], []>} : vector<2x32xf32>, vector<32x8xf32>, vector<2x8xf32> -> vector<2x8xf32>
    %c2_115 = arith.constant 2 : index
    %c0_116 = arith.constant 0 : index
    %c0_117 = arith.constant 0 : index
    %145 = vector.load %arg18[%c2_115, %c0_116, %c0_117] : memref<4x1x8xf32, #tpu.memory_space<vmem>>, vector<1x1x8xf32>
    %146 = vector.shape_cast %145 : vector<1x1x8xf32> to vector<1x8xf32>
    %147 = vector.broadcast %146 : vector<1x8xf32> to vector<2x8xf32>
    %148 = arith.addf %144, %147 : vector<2x8xf32>
    %c2_118 = arith.constant 2 : index
    %c0_119 = arith.constant 0 : index
    %c0_120 = arith.constant 0 : index
    %149 = vector.load %arg19[%c2_118, %c0_119, %c0_120] : memref<4x32x8xf32, #tpu.memory_space<vmem>>, vector<1x32x8xf32>
    %150 = vector.shape_cast %149 : vector<1x32x8xf32> to vector<32x8xf32>
    %cst_121 = arith.constant dense<0.000000e+00> : vector<2x8xf32>
    %151 = tpu.matmul %30, %150, %cst_121 {dimension_numbers = #tpu.dot_dimension_numbers<[1], [0], [0], [1], [0, 0, 1, 1], [], []>} : vector<2x32xf32>, vector<32x8xf32>, vector<2x8xf32> -> vector<2x8xf32>
    %c2_122 = arith.constant 2 : index
    %c0_123 = arith.constant 0 : index
    %c0_124 = arith.constant 0 : index
    %152 = vector.load %arg20[%c2_122, %c0_123, %c0_124] : memref<4x1x8xf32, #tpu.memory_space<vmem>>, vector<1x1x8xf32>
    %153 = vector.shape_cast %152 : vector<1x1x8xf32> to vector<1x8xf32>
    %154 = vector.broadcast %153 : vector<1x8xf32> to vector<2x8xf32>
    %155 = arith.addf %151, %154 : vector<2x8xf32>
    %c2_125 = arith.constant 2 : index
    %c0_126 = arith.constant 0 : index
    %c0_127 = arith.constant 0 : index
    %156 = vector.load %arg21[%c2_125, %c0_126, %c0_127] : memref<4x32x8xf32, #tpu.memory_space<vmem>>, vector<1x32x8xf32>
    %157 = vector.shape_cast %156 : vector<1x32x8xf32> to vector<32x8xf32>
    %cst_128 = arith.constant dense<0.000000e+00> : vector<2x8xf32>
    %158 = tpu.matmul %30, %157, %cst_128 {dimension_numbers = #tpu.dot_dimension_numbers<[1], [0], [0], [1], [0, 0, 1, 1], [], []>} : vector<2x32xf32>, vector<32x8xf32>, vector<2x8xf32> -> vector<2x8xf32>
    %c2_129 = arith.constant 2 : index
    %c0_130 = arith.constant 0 : index
    %c0_131 = arith.constant 0 : index
    %159 = vector.load %arg22[%c2_129, %c0_130, %c0_131] : memref<4x1x8xf32, #tpu.memory_space<vmem>>, vector<1x1x8xf32>
    %160 = vector.shape_cast %159 : vector<1x1x8xf32> to vector<1x8xf32>
    %161 = vector.broadcast %160 : vector<1x8xf32> to vector<2x8xf32>
    %162 = arith.addf %158, %161 : vector<2x8xf32>
    %163 = tpu.transpose %155, [1, 0] : vector<2x8xf32> -> vector<8x2xf32>
    %cst_132 = arith.constant dense<0.000000e+00> : vector<2x2xf32>
    %164 = tpu.matmul %148, %163, %cst_132 {dimension_numbers = #tpu.dot_dimension_numbers<[1], [0], [0], [1], [0, 0, 1, 1], [], []>} : vector<2x8xf32>, vector<8x2xf32>, vector<2x2xf32> -> vector<2x2xf32>
    %cst_133 = arith.constant 0.353553385 : f32
    %165 = vector.broadcast %cst_133 : f32 to vector<2x2xf32>
    %166 = arith.mulf %164, %165 : vector<2x2xf32>
    %cst_134 = arith.constant dense<0xFF800000> : vector<2xf32>
    %167 = vector.multi_reduction <maximumf>, %166, %cst_134 [1] : vector<2x2xf32> to vector<2xf32>
    %168 = vector.shape_cast %167 : vector<2xf32> to vector<2x1xf32>
    %169 = vector.broadcast %168 : vector<2x1xf32> to vector<2x2xf32>
    %170 = arith.subf %166, %169 : vector<2x2xf32>
    %171 = math.exp %170 : vector<2x2xf32>
    %cst_135 = arith.constant dense<0.000000e+00> : vector<2xf32>
    %172 = vector.multi_reduction <add>, %171, %cst_135 [1] : vector<2x2xf32> to vector<2xf32>
    %173 = vector.shape_cast %172 : vector<2xf32> to vector<2x1xf32>
    %174 = tpu.reciprocal %173 {approx = true} : vector<2x1xf32> -> vector<2x1xf32>
    %175 = vector.broadcast %174 : vector<2x1xf32> to vector<2x2xf32>
    %176 = arith.mulf %171, %175 : vector<2x2xf32>
    %cst_136 = arith.constant dense<0.000000e+00> : vector<2x8xf32>
    %177 = tpu.matmul %176, %162, %cst_136 {dimension_numbers = #tpu.dot_dimension_numbers<[1], [0], [0], [1], [0, 0, 1, 1], [], []>} : vector<2x2xf32>, vector<2x8xf32>, vector<2x8xf32> -> vector<2x8xf32>
    %c2_137 = arith.constant 2 : index
    %c0_138 = arith.constant 0 : index
    %c0_139 = arith.constant 0 : index
    %178 = vector.load %arg23[%c2_137, %c0_138, %c0_139] : memref<4x8x32xf32, #tpu.memory_space<vmem>>, vector<1x8x32xf32>
    %179 = vector.shape_cast %178 : vector<1x8x32xf32> to vector<8x32xf32>
    %cst_140 = arith.constant dense<0.000000e+00> : vector<2x32xf32>
    %180 = tpu.matmul %177, %179, %cst_140 {dimension_numbers = #tpu.dot_dimension_numbers<[1], [0], [0], [1], [0, 0, 1, 1], [], []>} : vector<2x8xf32>, vector<8x32xf32>, vector<2x32xf32> -> vector<2x32xf32>
    %181 = arith.addf %141, %180 : vector<2x32xf32>
    %c3 = arith.constant 3 : index
    %c0_141 = arith.constant 0 : index
    %c0_142 = arith.constant 0 : index
    %182 = vector.load %arg17[%c3, %c0_141, %c0_142] : memref<4x32x8xf32, #tpu.memory_space<vmem>>, vector<1x32x8xf32>
    %183 = vector.shape_cast %182 : vector<1x32x8xf32> to vector<32x8xf32>
    %cst_143 = arith.constant dense<0.000000e+00> : vector<2x8xf32>
    %184 = tpu.matmul %30, %183, %cst_143 {dimension_numbers = #tpu.dot_dimension_numbers<[1], [0], [0], [1], [0, 0, 1, 1], [], []>} : vector<2x32xf32>, vector<32x8xf32>, vector<2x8xf32> -> vector<2x8xf32>
    %c3_144 = arith.constant 3 : index
    %c0_145 = arith.constant 0 : index
    %c0_146 = arith.constant 0 : index
    %185 = vector.load %arg18[%c3_144, %c0_145, %c0_146] : memref<4x1x8xf32, #tpu.memory_space<vmem>>, vector<1x1x8xf32>
    %186 = vector.shape_cast %185 : vector<1x1x8xf32> to vector<1x8xf32>
    %187 = vector.broadcast %186 : vector<1x8xf32> to vector<2x8xf32>
    %188 = arith.addf %184, %187 : vector<2x8xf32>
    %c3_147 = arith.constant 3 : index
    %c0_148 = arith.constant 0 : index
    %c0_149 = arith.constant 0 : index
    %189 = vector.load %arg19[%c3_147, %c0_148, %c0_149] : memref<4x32x8xf32, #tpu.memory_space<vmem>>, vector<1x32x8xf32>
    %190 = vector.shape_cast %189 : vector<1x32x8xf32> to vector<32x8xf32>
    %cst_150 = arith.constant dense<0.000000e+00> : vector<2x8xf32>
    %191 = tpu.matmul %30, %190, %cst_150 {dimension_numbers = #tpu.dot_dimension_numbers<[1], [0], [0], [1], [0, 0, 1, 1], [], []>} : vector<2x32xf32>, vector<32x8xf32>, vector<2x8xf32> -> vector<2x8xf32>
    %c3_151 = arith.constant 3 : index
    %c0_152 = arith.constant 0 : index
    %c0_153 = arith.constant 0 : index
    %192 = vector.load %arg20[%c3_151, %c0_152, %c0_153] : memref<4x1x8xf32, #tpu.memory_space<vmem>>, vector<1x1x8xf32>
    %193 = vector.shape_cast %192 : vector<1x1x8xf32> to vector<1x8xf32>
    %194 = vector.broadcast %193 : vector<1x8xf32> to vector<2x8xf32>
    %195 = arith.addf %191, %194 : vector<2x8xf32>
    %c3_154 = arith.constant 3 : index
    %c0_155 = arith.constant 0 : index
    %c0_156 = arith.constant 0 : index
    %196 = vector.load %arg21[%c3_154, %c0_155, %c0_156] : memref<4x32x8xf32, #tpu.memory_space<vmem>>, vector<1x32x8xf32>
    %197 = vector.shape_cast %196 : vector<1x32x8xf32> to vector<32x8xf32>
    %cst_157 = arith.constant dense<0.000000e+00> : vector<2x8xf32>
    %198 = tpu.matmul %30, %197, %cst_157 {dimension_numbers = #tpu.dot_dimension_numbers<[1], [0], [0], [1], [0, 0, 1, 1], [], []>} : vector<2x32xf32>, vector<32x8xf32>, vector<2x8xf32> -> vector<2x8xf32>
    %c3_158 = arith.constant 3 : index
    %c0_159 = arith.constant 0 : index
    %c0_160 = arith.constant 0 : index
    %199 = vector.load %arg22[%c3_158, %c0_159, %c0_160] : memref<4x1x8xf32, #tpu.memory_space<vmem>>, vector<1x1x8xf32>
    %200 = vector.shape_cast %199 : vector<1x1x8xf32> to vector<1x8xf32>
    %201 = vector.broadcast %200 : vector<1x8xf32> to vector<2x8xf32>
    %202 = arith.addf %198, %201 : vector<2x8xf32>
    %203 = tpu.transpose %195, [1, 0] : vector<2x8xf32> -> vector<8x2xf32>
    %cst_161 = arith.constant dense<0.000000e+00> : vector<2x2xf32>
    %204 = tpu.matmul %188, %203, %cst_161 {dimension_numbers = #tpu.dot_dimension_numbers<[1], [0], [0], [1], [0, 0, 1, 1], [], []>} : vector<2x8xf32>, vector<8x2xf32>, vector<2x2xf32> -> vector<2x2xf32>
    %cst_162 = arith.constant 0.353553385 : f32
    %205 = vector.broadcast %cst_162 : f32 to vector<2x2xf32>
    %206 = arith.mulf %204, %205 : vector<2x2xf32>
    %cst_163 = arith.constant dense<0xFF800000> : vector<2xf32>
    %207 = vector.multi_reduction <maximumf>, %206, %cst_163 [1] : vector<2x2xf32> to vector<2xf32>
    %208 = vector.shape_cast %207 : vector<2xf32> to vector<2x1xf32>
    %209 = vector.broadcast %208 : vector<2x1xf32> to vector<2x2xf32>
    %210 = arith.subf %206, %209 : vector<2x2xf32>
    %211 = math.exp %210 : vector<2x2xf32>
    %cst_164 = arith.constant dense<0.000000e+00> : vector<2xf32>
    %212 = vector.multi_reduction <add>, %211, %cst_164 [1] : vector<2x2xf32> to vector<2xf32>
    %213 = vector.shape_cast %212 : vector<2xf32> to vector<2x1xf32>
    %214 = tpu.reciprocal %213 {approx = true} : vector<2x1xf32> -> vector<2x1xf32>
    %215 = vector.broadcast %214 : vector<2x1xf32> to vector<2x2xf32>
    %216 = arith.mulf %211, %215 : vector<2x2xf32>
    %cst_165 = arith.constant dense<0.000000e+00> : vector<2x8xf32>
    %217 = tpu.matmul %216, %202, %cst_165 {dimension_numbers = #tpu.dot_dimension_numbers<[1], [0], [0], [1], [0, 0, 1, 1], [], []>} : vector<2x2xf32>, vector<2x8xf32>, vector<2x8xf32> -> vector<2x8xf32>
    %c3_166 = arith.constant 3 : index
    %c0_167 = arith.constant 0 : index
    %c0_168 = arith.constant 0 : index
    %218 = vector.load %arg23[%c3_166, %c0_167, %c0_168] : memref<4x8x32xf32, #tpu.memory_space<vmem>>, vector<1x8x32xf32>
    %219 = vector.shape_cast %218 : vector<1x8x32xf32> to vector<8x32xf32>
    %cst_169 = arith.constant dense<0.000000e+00> : vector<2x32xf32>
    %220 = tpu.matmul %217, %219, %cst_169 {dimension_numbers = #tpu.dot_dimension_numbers<[1], [0], [0], [1], [0, 0, 1, 1], [], []>} : vector<2x8xf32>, vector<8x32xf32>, vector<2x32xf32> -> vector<2x32xf32>
    %221 = arith.addf %181, %220 : vector<2x32xf32>
    %c0_170 = arith.constant 0 : index
    %c0_171 = arith.constant 0 : index
    %222 = vector.load %arg24[%c0_170, %c0_171] : memref<1x32xf32, #tpu.memory_space<vmem>>, vector<1x32xf32>
    %223 = vector.broadcast %222 : vector<1x32xf32> to vector<2x32xf32>
    %224 = arith.addf %221, %223 : vector<2x32xf32>
    %225 = arith.addf %30, %224 : vector<2x32xf32>
    %c0_172 = arith.constant 0 : index
    %c0_173 = arith.constant 0 : index
    %226 = vector.load %arg25[%c0_172, %c0_173] : memref<1x32xf32, #tpu.memory_space<vmem>>, vector<1x32xf32>
    %c0_174 = arith.constant 0 : index
    %c0_175 = arith.constant 0 : index
    %227 = vector.load %arg26[%c0_174, %c0_175] : memref<1x32xf32, #tpu.memory_space<vmem>>, vector<1x32xf32>
    %cst_176 = arith.constant dense<0.000000e+00> : vector<2xf32>
    %228 = vector.multi_reduction <add>, %225, %cst_176 [1] : vector<2x32xf32> to vector<2xf32>
    %229 = vector.shape_cast %228 : vector<2xf32> to vector<2x1xf32>
    %cst_177 = arith.constant 3.200000e+01 : f32
    %230 = vector.broadcast %cst_177 : f32 to vector<2x1xf32>
    %231 = arith.divf %229, %230 : vector<2x1xf32>
    %232 = vector.broadcast %231 : vector<2x1xf32> to vector<2x32xf32>
    %233 = arith.subf %225, %232 : vector<2x32xf32>
    %234 = arith.mulf %233, %233 : vector<2x32xf32>
    %cst_178 = arith.constant dense<0.000000e+00> : vector<2xf32>
    %235 = vector.multi_reduction <add>, %234, %cst_178 [1] : vector<2x32xf32> to vector<2xf32>
    %236 = vector.shape_cast %235 : vector<2xf32> to vector<2x1xf32>
    %cst_179 = arith.constant 3.200000e+01 : f32
    %237 = vector.broadcast %cst_179 : f32 to vector<2x1xf32>
    %238 = arith.divf %236, %237 : vector<2x1xf32>
    %cst_180 = arith.constant 9.99999974E-6 : f32
    %239 = vector.broadcast %cst_180 : f32 to vector<2x1xf32>
    %240 = arith.addf %238, %239 : vector<2x1xf32>
    %241 = math.rsqrt %240 : vector<2x1xf32>
    %242 = vector.broadcast %241 : vector<2x1xf32> to vector<2x32xf32>
    %243 = arith.mulf %233, %242 : vector<2x32xf32>
    %244 = vector.broadcast %226 : vector<1x32xf32> to vector<2x32xf32>
    %245 = arith.mulf %243, %244 : vector<2x32xf32>
    %246 = vector.broadcast %227 : vector<1x32xf32> to vector<2x32xf32>
    %247 = arith.addf %245, %246 : vector<2x32xf32>
    %c0_181 = arith.constant 0 : index
    %c0_182 = arith.constant 0 : index
    %248 = vector.load %arg27[%c0_181, %c0_182] : memref<32x2048xf32, #tpu.memory_space<vmem>>, vector<32x2048xf32>
    %cst_183 = arith.constant dense<0.000000e+00> : vector<2x2048xf32>
    %249 = tpu.matmul %247, %248, %cst_183 {dimension_numbers = #tpu.dot_dimension_numbers<[1], [0], [0], [1], [0, 0, 1, 1], [], []>} : vector<2x32xf32>, vector<32x2048xf32>, vector<2x2048xf32> -> vector<2x2048xf32>
    %c0_184 = arith.constant 0 : index
    %c0_185 = arith.constant 0 : index
    %250 = vector.load %arg28[%c0_184, %c0_185] : memref<1x2048xf32, #tpu.memory_space<vmem>>, vector<1x2048xf32>
    %251 = vector.broadcast %250 : vector<1x2048xf32> to vector<2x2048xf32>
    %252 = arith.addf %249, %251 : vector<2x2048xf32>
    %cst_186 = arith.constant 0.000000e+00 : f32
    %253 = vector.broadcast %cst_186 : f32 to vector<2x2048xf32>
    %254 = arith.maximumf %252, %253 : vector<2x2048xf32>
    %c0_187 = arith.constant 0 : index
    %c0_188 = arith.constant 0 : index
    %255 = vector.load %arg29[%c0_187, %c0_188] : memref<2048x32xf32, #tpu.memory_space<vmem>>, vector<2048x32xf32>
    %cst_189 = arith.constant dense<0.000000e+00> : vector<2x32xf32>
    %256 = tpu.matmul %254, %255, %cst_189 {dimension_numbers = #tpu.dot_dimension_numbers<[1], [0], [0], [1], [0, 0, 1, 1], [], []>} : vector<2x2048xf32>, vector<2048x32xf32>, vector<2x32xf32> -> vector<2x32xf32>
    %c0_190 = arith.constant 0 : index
    %c0_191 = arith.constant 0 : index
    %257 = vector.load %arg30[%c0_190, %c0_191] : memref<1x32xf32, #tpu.memory_space<vmem>>, vector<1x32xf32>
    %258 = vector.broadcast %257 : vector<1x32xf32> to vector<2x32xf32>
    %259 = arith.addf %256, %258 : vector<2x32xf32>
    %260 = arith.addf %247, %259 : vector<2x32xf32>
    %c0_192 = arith.constant 0 : index
    %c0_193 = arith.constant 0 : index
    %261 = vector.load %arg31[%c0_192, %c0_193] : memref<1x32xf32, #tpu.memory_space<vmem>>, vector<1x32xf32>
    %c0_194 = arith.constant 0 : index
    %c0_195 = arith.constant 0 : index
    %262 = vector.load %arg32[%c0_194, %c0_195] : memref<1x32xf32, #tpu.memory_space<vmem>>, vector<1x32xf32>
    %cst_196 = arith.constant dense<0.000000e+00> : vector<2xf32>
    %263 = vector.multi_reduction <add>, %260, %cst_196 [1] : vector<2x32xf32> to vector<2xf32>
    %264 = vector.shape_cast %263 : vector<2xf32> to vector<2x1xf32>
    %cst_197 = arith.constant 3.200000e+01 : f32
    %265 = vector.broadcast %cst_197 : f32 to vector<2x1xf32>
    %266 = arith.divf %264, %265 : vector<2x1xf32>
    %267 = vector.broadcast %266 : vector<2x1xf32> to vector<2x32xf32>
    %268 = arith.subf %260, %267 : vector<2x32xf32>
    %269 = arith.mulf %268, %268 : vector<2x32xf32>
    %cst_198 = arith.constant dense<0.000000e+00> : vector<2xf32>
    %270 = vector.multi_reduction <add>, %269, %cst_198 [1] : vector<2x32xf32> to vector<2xf32>
    %271 = vector.shape_cast %270 : vector<2xf32> to vector<2x1xf32>
    %cst_199 = arith.constant 3.200000e+01 : f32
    %272 = vector.broadcast %cst_199 : f32 to vector<2x1xf32>
    %273 = arith.divf %271, %272 : vector<2x1xf32>
    %cst_200 = arith.constant 9.99999974E-6 : f32
    %274 = vector.broadcast %cst_200 : f32 to vector<2x1xf32>
    %275 = arith.addf %273, %274 : vector<2x1xf32>
    %276 = math.rsqrt %275 : vector<2x1xf32>
    %277 = vector.broadcast %276 : vector<2x1xf32> to vector<2x32xf32>
    %278 = arith.mulf %268, %277 : vector<2x32xf32>
    %279 = vector.broadcast %261 : vector<1x32xf32> to vector<2x32xf32>
    %280 = arith.mulf %278, %279 : vector<2x32xf32>
    %281 = vector.broadcast %262 : vector<1x32xf32> to vector<2x32xf32>
    %282 = arith.addf %280, %281 : vector<2x32xf32>
    %c0_201 = arith.constant 0 : index
    %c0_202 = arith.constant 0 : index
    %283 = vector.load %arg33[%c0_201, %c0_202] : memref<32x2xf32, #tpu.memory_space<vmem>>, vector<32x2xf32>
    %cst_203 = arith.constant dense<0.000000e+00> : vector<2x2xf32>
    %284 = tpu.matmul %282, %283, %cst_203 {dimension_numbers = #tpu.dot_dimension_numbers<[1], [0], [0], [1], [0, 0, 1, 1], [], []>} : vector<2x32xf32>, vector<32x2xf32>, vector<2x2xf32> -> vector<2x2xf32>
    %c0_204 = arith.constant 0 : index
    %c0_205 = arith.constant 0 : index
    %285 = vector.load %arg34[%c0_204, %c0_205] : memref<1x2xf32, #tpu.memory_space<vmem>>, vector<1x2xf32>
    %286 = vector.broadcast %285 : vector<1x2xf32> to vector<2x2xf32>
    %287 = arith.addf %284, %286 : vector<2x2xf32>
    %cst_206 = arith.constant 0.000000e+00 : f32
    %288 = vector.broadcast %cst_206 : f32 to vector<2x2xf32>
    %289 = arith.subf %288, %287 : vector<2x2xf32>
    %290 = math.exp %289 : vector<2x2xf32>
    %cst_207 = arith.constant 1.000000e+00 : f32
    %291 = vector.broadcast %cst_207 : f32 to vector<2x2xf32>
    %292 = arith.addf %291, %290 : vector<2x2xf32>
    %293 = tpu.reciprocal %292 {approx = true} : vector<2x2xf32> -> vector<2x2xf32>
    %c0_208 = arith.constant 0 : index
    %c0_209 = arith.constant 0 : index
    %294 = vector.load %arg39[%c0_208, %c0_209] : memref<2x2xf32, #tpu.memory_space<vmem>>, vector<2x2xf32>
    tpu.vector_store %arg39[%c0_208, %c0_209], %293 {strides = array<i32>} : memref<2x2xf32, #tpu.memory_space<vmem>>, vector<2x2xf32>,
    return
  }
  func.func @transform_0(%arg0: i32) -> (i32, i32) {
    %c0_i32 = arith.constant 0 : i32
    %c0_i32_0 = arith.constant 0 : i32
    %c0_i32_1 = arith.constant 0 : i32
    return %c0_i32, %c0_i32_0 : i32, i32
  }
  func.func @transform_1(%arg0: i32) -> (i32, i32) {
    %c0_i32 = arith.constant 0 : i32
    %c0_i32_0 = arith.constant 0 : i32
    %c0_i32_1 = arith.constant 0 : i32
    return %c0_i32, %c0_i32_0 : i32, i32
  }
  func.func @transform_2(%arg0: i32) -> (i32, i32) {
    %c0_i32 = arith.constant 0 : i32
    %c0_i32_0 = arith.constant 0 : i32
    %c0_i32_1 = arith.constant 0 : i32
    return %c0_i32, %c0_i32_0 : i32, i32
  }
  func.func @transform_3(%arg0: i32) -> (i32, i32) {
    %c0_i32 = arith.constant 0 : i32
    %c0_i32_0 = arith.constant 0 : i32
    %c0_i32_1 = arith.constant 0 : i32
    return %c0_i32, %c0_i32_0 : i32, i32
  }
  func.func @transform_4(%arg0: i32) -> (i32, i32) {
    %c0_i32 = arith.constant 0 : i32
    %c0_i32_0 = arith.constant 0 : i32
    %c0_i32_1 = arith.constant 0 : i32
    return %c0_i32, %c0_i32_0 : i32, i32
  }
  func.func @transform_5(%arg0: i32) -> (i32, i32) {
    %c0_i32 = arith.constant 0 : i32
    %c0_i32_0 = arith.constant 0 : i32
    %c0_i32_1 = arith.constant 0 : i32
    return %c0_i32, %c0_i32_0 : i32, i32
  }
  func.func @transform_6(%arg0: i32) -> (i32, i32) {
    %c0_i32 = arith.constant 0 : i32
    %c0_i32_0 = arith.constant 0 : i32
    %c0_i32_1 = arith.constant 0 : i32
    return %c0_i32, %c0_i32_0 : i32, i32
  }
  func.func @transform_7(%arg0: i32) -> (i32, i32) {
    %c0_i32 = arith.constant 0 : i32
    %c0_i32_0 = arith.constant 0 : i32
    %c0_i32_1 = arith.constant 0 : i32
    return %c0_i32, %c0_i32_0 : i32, i32
  }
  func.func @transform_8(%arg0: i32) -> (i32, i32) {
    %c0_i32 = arith.constant 0 : i32
    %c0_i32_0 = arith.constant 0 : i32
    %c0_i32_1 = arith.constant 0 : i32
    return %c0_i32, %c0_i32_0 : i32, i32
  }
  func.func @transform_9(%arg0: i32) -> (i32, i32) {
    %c0_i32 = arith.constant 0 : i32
    %c0_i32_0 = arith.constant 0 : i32
    %c0_i32_1 = arith.constant 0 : i32
    return %c0_i32, %c0_i32_0 : i32, i32
  }
  func.func @transform_10(%arg0: i32) -> (i32, i32) {
    %c0_i32 = arith.constant 0 : i32
    %c0_i32_0 = arith.constant 0 : i32
    %c0_i32_1 = arith.constant 0 : i32
    return %c0_i32, %c0_i32_0 : i32, i32
  }
  func.func @transform_11(%arg0: i32) -> (i32, i32) {
    %c0_i32 = arith.constant 0 : i32
    %c0_i32_0 = arith.constant 0 : i32
    %c0_i32_1 = arith.constant 0 : i32
    return %c0_i32, %c0_i32_0 : i32, i32
  }
  func.func @transform_12(%arg0: i32) -> (i32, i32) {
    %c0_i32 = arith.constant 0 : i32
    %c0_i32_0 = arith.constant 0 : i32
    %c0_i32_1 = arith.constant 0 : i32
    return %c0_i32, %c0_i32_0 : i32, i32
  }
  func.func @transform_13(%arg0: i32) -> (i32, i32) {
    %c0_i32 = arith.constant 0 : i32
    %c0_i32_0 = arith.constant 0 : i32
    %c0_i32_1 = arith.constant 0 : i32
    return %c0_i32, %c0_i32_0 : i32, i32
  }
  func.func @transform_14(%arg0: i32) -> (i32, i32) {
    %c0_i32 = arith.constant 0 : i32
    %c0_i32_0 = arith.constant 0 : i32
    %c0_i32_1 = arith.constant 0 : i32
    return %c0_i32, %c0_i32_0 : i32, i32
  }
  func.func @transform_15(%arg0: i32) -> (i32, i32) {
    %c0_i32 = arith.constant 0 : i32
    %c0_i32_0 = arith.constant 0 : i32
    %c0_i32_1 = arith.constant 0 : i32
    return %c0_i32, %c0_i32_0 : i32, i32
  }
  func.func @transform_16(%arg0: i32) -> (i32, i32, i32) {
    %c0_i32 = arith.constant 0 : i32
    %c0_i32_0 = arith.constant 0 : i32
    %c0_i32_1 = arith.constant 0 : i32
    %c0_i32_2 = arith.constant 0 : i32
    return %c0_i32, %c0_i32_0, %c0_i32_1 : i32, i32, i32
  }
  func.func @transform_17(%arg0: i32) -> (i32, i32, i32) {
    %c0_i32 = arith.constant 0 : i32
    %c0_i32_0 = arith.constant 0 : i32
    %c0_i32_1 = arith.constant 0 : i32
    %c0_i32_2 = arith.constant 0 : i32
    return %c0_i32, %c0_i32_0, %c0_i32_1 : i32, i32, i32
  }
  func.func @transform_18(%arg0: i32) -> (i32, i32, i32) {
    %c0_i32 = arith.constant 0 : i32
    %c0_i32_0 = arith.constant 0 : i32
    %c0_i32_1 = arith.constant 0 : i32
    %c0_i32_2 = arith.constant 0 : i32
    return %c0_i32, %c0_i32_0, %c0_i32_1 : i32, i32, i32
  }
  func.func @transform_19(%arg0: i32) -> (i32, i32, i32) {
    %c0_i32 = arith.constant 0 : i32
    %c0_i32_0 = arith.constant 0 : i32
    %c0_i32_1 = arith.constant 0 : i32
    %c0_i32_2 = arith.constant 0 : i32
    return %c0_i32, %c0_i32_0, %c0_i32_1 : i32, i32, i32
  }
  func.func @transform_20(%arg0: i32) -> (i32, i32, i32) {
    %c0_i32 = arith.constant 0 : i32
    %c0_i32_0 = arith.constant 0 : i32
    %c0_i32_1 = arith.constant 0 : i32
    %c0_i32_2 = arith.constant 0 : i32
    return %c0_i32, %c0_i32_0, %c0_i32_1 : i32, i32, i32
  }
  func.func @transform_21(%arg0: i32) -> (i32, i32, i32) {
    %c0_i32 = arith.constant 0 : i32
    %c0_i32_0 = arith.constant 0 : i32
    %c0_i32_1 = arith.constant 0 : i32
    %c0_i32_2 = arith.constant 0 : i32
    return %c0_i32, %c0_i32_0, %c0_i32_1 : i32, i32, i32
  }
  func.func @transform_22(%arg0: i32) -> (i32, i32, i32) {
    %c0_i32 = arith.constant 0 : i32
    %c0_i32_0 = arith.constant 0 : i32
    %c0_i32_1 = arith.constant 0 : i32
    %c0_i32_2 = arith.constant 0 : i32
    return %c0_i32, %c0_i32_0, %c0_i32_1 : i32, i32, i32
  }
  func.func @transform_23(%arg0: i32) -> (i32, i32) {
    %c0_i32 = arith.constant 0 : i32
    %c0_i32_0 = arith.constant 0 : i32
    %c0_i32_1 = arith.constant 0 : i32
    return %c0_i32, %c0_i32_0 : i32, i32
  }
  func.func @transform_24(%arg0: i32) -> (i32, i32) {
    %c0_i32 = arith.constant 0 : i32
    %c0_i32_0 = arith.constant 0 : i32
    %c0_i32_1 = arith.constant 0 : i32
    return %c0_i32, %c0_i32_0 : i32, i32
  }
  func.func @transform_25(%arg0: i32) -> (i32, i32) {
    %c0_i32 = arith.constant 0 : i32
    %c0_i32_0 = arith.constant 0 : i32
    %c0_i32_1 = arith.constant 0 : i32
    return %c0_i32, %c0_i32_0 : i32, i32
  }
  func.func @transform_26(%arg0: i32) -> (i32, i32) {
    %c0_i32 = arith.constant 0 : i32
    %c0_i32_0 = arith.constant 0 : i32
    %c0_i32_1 = arith.constant 0 : i32
    return %c0_i32, %c0_i32_0 : i32, i32
  }
  func.func @transform_27(%arg0: i32) -> (i32, i32) {
    %c0_i32 = arith.constant 0 : i32
    %c0_i32_0 = arith.constant 0 : i32
    %c0_i32_1 = arith.constant 0 : i32
    return %c0_i32, %c0_i32_0 : i32, i32
  }
  func.func @transform_28(%arg0: i32) -> (i32, i32) {
    %c0_i32 = arith.constant 0 : i32
    %c0_i32_0 = arith.constant 0 : i32
    %c0_i32_1 = arith.constant 0 : i32
    return %c0_i32, %c0_i32_0 : i32, i32
  }
  func.func @transform_29(%arg0: i32) -> (i32, i32) {
    %c0_i32 = arith.constant 0 : i32
    %c0_i32_0 = arith.constant 0 : i32
    %c0_i32_1 = arith.constant 0 : i32
    return %c0_i32, %c0_i32_0 : i32, i32
  }
  func.func @transform_30(%arg0: i32) -> (i32, i32) {
    %c0_i32 = arith.constant 0 : i32
    %c0_i32_0 = arith.constant 0 : i32
    %c0_i32_1 = arith.constant 0 : i32
    return %c0_i32, %c0_i32_0 : i32, i32
  }
  func.func @transform_31(%arg0: i32) -> (i32, i32) {
    %c0_i32 = arith.constant 0 : i32
    %c0_i32_0 = arith.constant 0 : i32
    %c0_i32_1 = arith.constant 0 : i32
    return %c0_i32, %c0_i32_0 : i32, i32
  }
  func.func @transform_32(%arg0: i32) -> (i32, i32) {
    %c0_i32 = arith.constant 0 : i32
    %c0_i32_0 = arith.constant 0 : i32
    %c0_i32_1 = arith.constant 0 : i32
    return %c0_i32, %c0_i32_0 : i32, i32
  }
  func.func @transform_33(%arg0: i32) -> (i32, i32) {
    %c0_i32 = arith.constant 0 : i32
    %c0_i32_0 = arith.constant 0 : i32
    %c0_i32_1 = arith.constant 0 : i32
    return %c0_i32, %c0_i32_0 : i32, i32
  }
  func.func @transform_34(%arg0: i32) -> (i32, i32) {
    %c0_i32 = arith.constant 0 : i32
    %c0_i32_0 = arith.constant 0 : i32
    %c0_i32_1 = arith.constant 0 : i32
    return %c0_i32, %c0_i32_0 : i32, i32
  }
  func.func @transform_35(%arg0: i32) -> (i32, i32) {
    %c0_i32 = arith.constant 0 : i32
    %c0_i32_0 = arith.constant 0 : i32
    %c0_i32_1 = arith.constant 0 : i32
    return %c0_i32, %c0_i32_0 : i32, i32
  }
  func.func @transform_36(%arg0: i32) -> (i32, i32) {
    %c0_i32 = arith.constant 0 : i32
    %c0_i32_0 = arith.constant 0 : i32
    %c0_i32_1 = arith.constant 0 : i32
    return %c0_i32, %c0_i32_0 : i32, i32
  }
  func.func @transform_37(%arg0: i32) -> (i32, i32) {
    %c0_i32 = arith.constant 0 : i32
    %c0_i32_0 = arith.constant 0 : i32
    %c0_i32_1 = arith.constant 0 : i32
    return %c0_i32, %c0_i32_0 : i32, i32
  }
  func.func @transform_38(%arg0: i32) -> (i32, i32) {
    %c0_i32 = arith.constant 0 : i32
    %c0_i32_0 = arith.constant 0 : i32
    %c0_i32_1 = arith.constant 0 : i32
    return %c0_i32, %c0_i32_0 : i32, i32
  }
}

</mosaic_0001>

<bundles_post_ra>
// kernel: vae_classifier_forward.1
= control target key start
LH: loop header
LB: loop body
LE: loop exit
PB: predicated region body
PF: predicated region fallthrough
CT: control target
= control target key end

     0   :  { %s10770_s6 = smov 1   ;;  %s10771_s10 = smov 2   ;;  %s12269_s0 = inlined_call_operand.smem [shape: u32[39], index: -1, kind: input, shape index: {}] }
   0x1   :  { %s10856_s5 = sld [smem:[%s12269_s0]]   ;;  %s10772_s14 = smov 3  }
   0x2   :  { %s10861_s9 = sld [smem:[%s12269_s0 + %s10770_s6]]   ;;  %s10773_s18 = smov 4  }
   0x3   :  { %s10866_s13 = sld [smem:[%s12269_s0 + %s10771_s10]]   ;;  %s10774_s22 = smov 5  }
   0x4   :  { %s10871_s17 = sld [smem:[%s12269_s0 + %s10772_s14]]   ;;  %s10775_s26 = smov 6  }
   0x5   :  { %s10876_s21 = sld [smem:[%s12269_s0 + %s10773_s18]]   ;;  %s10776_s30 = smov 7  }
   0x6   :  { %s10881_s25 = sld [smem:[%s12269_s0 + %s10774_s22]]   ;;  %s10777_s4 = smov 8  }
   0x7   :  { %12291 = sst [smem:[#allocation59_spill]] %s10856_s5  ;;  %s10778_s10 = smov 9  }
   0x8   :  { %s10886_s29 = sld [smem:[%s12269_s0 + %s10775_s26]]   ;;  %s10779_s15 = smov 10  }
   0x9   :  { %s10891_s3 = sld [smem:[%s12269_s0 + %s10776_s30]]   ;;  %s10780_s20 = smov 11  }
   0xa   :  { %s10896_s8 = sld [smem:[%s12269_s0 + %s10777_s4]]   ;;  %s10781_s26 = smov 12  }
   0xb   :  { %12292 = sst [smem:[#allocation60_spill]] %s10876_s21  ;;  %s10782_s1 = smov 13  }
   0xc   :  { %s10901_s14 = sld [smem:[%s12269_s0 + %s10778_s10]]   ;;  %s10783_s7 = smov 14  }
   0xd   :  { %s10906_s19 = sld [smem:[%s12269_s0 + %s10779_s15]]   ;;  %s10784_s15 = smov 15  }
   0xe   :  { %12293 = sst [smem:[#allocation61_spill]] %s10886_s29  ;;  %s10785_s22 = smov 16  }
   0xf   :  { %s10911_s24 = sld [smem:[%s12269_s0 + %s10780_s20]]   ;;  %s10786_s28 = smov 17  }
  0x10   :  { %12294 = sst [smem:[#allocation62_spill]] %s10896_s8 }
  0x11   :  { %s10916_s30 = sld [smem:[%s12269_s0 + %s10781_s26]]  }
  0x12   :  { %s10921_s6 = sld [smem:[%s12269_s0 + %s10782_s1]]  }
  0x13   :  { %12295 = sst [smem:[#allocation63_spill]] %s10906_s19 }
  0x14   :  { %s10926_s12 = sld [smem:[%s12269_s0 + %s10783_s7]]   ;;  %s10787_s7 = smov 18  }
  0x15   :  { %s10931_s20 = sld [smem:[%s12269_s0 + %s10784_s15]]   ;;  %s10788_s15 = smov 19  }
  0x16   :  { %s10936_s27 = sld [smem:[%s12269_s0 + %s10785_s22]]   ;;  %s10789_s22 = smov 20  }
  0x17   :  { %12296 = sst [smem:[#allocation64_spill]] %s10916_s30 }
  0x18   :  { %12297 = sst [smem:[#allocation65_spill]] %s10921_s6 }
  0x19   :  { %s10941_s4 = sld [smem:[%s12269_s0 + %s10786_s28]]   ;;  %s10790_s28 = smov 21  }
  0x1a   :  { %s10946_s30 = sld [smem:[%s12269_s0 + %s10787_s7]]   ;;  %s10791_s7 = smov 22  }
  0x1b   :  { %12298 = sst [smem:[#allocation66_spill]] %s10931_s20 }
  0x1c   :  { %12299 = sst [smem:[#allocation67_spill]] %s10936_s27 }
  0x1d   :  { %s10951_s8 = sld [smem:[%s12269_s0 + %s10788_s15]]   ;;  %s10792_s15 = smov 23  }
  0x1e   :  { %s10956_s27 = sld [smem:[%s12269_s0 + %s10789_s22]]   ;;  %s10793_s22 = smov 24  }
  0x1f   :  { %s10961_s29 = sld [smem:[%s12269_s0 + %s10790_s28]]   ;;  %s10794_s28 = smov 25  }
  0x20   :  { %12300 = sst [smem:[#allocation68_spill]] %s10946_s30 }
  0x21   :  { %s10966_s30 = sld [smem:[%s12269_s0 + %s10791_s7]]   ;;  %s10795_s7 = smov 26  }
  0x22   :  { %s10971_s21 = sld [smem:[%s12269_s0 + %s10792_s15]]   ;;  %s10796_s15 = smov 27  }
  0x23   :  { %12301 = sst [smem:[#allocation69_spill]] %s10951_s8 }
  0x24   :  { %12302 = sst [smem:[#allocation70_spill]] %s10956_s27 }
  0x25   :  { %s10976_s27 = sld [smem:[%s12269_s0 + %s10793_s22]]   ;;  %s10797_s22 = smov 28  }
  0x26   :  { %s10981_s5 = sld [smem:[%s12269_s0 + %s10794_s28]]   ;;  %s10798_s28 = smov 29  }
  0x27   :  { %12303 = sst [smem:[#allocation71_spill]] %s10966_s30 }
  0x28   :  { %s10986_s30 = sld [smem:[%s12269_s0 + %s10795_s7]]   ;;  %s10799_s7 = smov 30  }
  0x29   :  { %s10991_s8 = sld [smem:[%s12269_s0 + %s10796_s15]]   ;;  %s10800_s15 = smov 31  }
  0x2a   :  { %s11001_s20 = sld [smem:[%s12269_s0 + %s10798_s28]]   ;;  %s10802_s28 = smov 33  }
  0x2b   :  { %12304 = sst [smem:[#allocation72_spill]] %s10976_s27 }
  0x2c   :  { %s10996_s27 = sld [smem:[%s12269_s0 + %s10797_s22]]   ;;  %s10801_s22 = smov 32  }
  0x2d   :  { %s11021_s6 = sld [smem:[%s12269_s0 + %s10802_s28]]   ;;  %s10806_s28 = smov 37  }
  0x2e   :  { %12305 = sst [smem:[#allocation73_spill]] %s10986_s30 }
  0x2f   :  { %12306 = sst [smem:[#allocation74_spill]] %s10991_s8 }
  0x30   :  { %s11006_s30 = sld [smem:[%s12269_s0 + %s10799_s7]]   ;;  %s10803_s7 = smov 34  }
  0x31   :  { %s11011_s8 = sld [smem:[%s12269_s0 + %s10800_s15]]   ;;  %s10804_s15 = smov 35  }
  0x32   :  { %12307 = sst [smem:[#allocation75_spill]] %s10996_s27 }
  0x33   :  { %s11016_s27 = sld [smem:[%s12269_s0 + %s10801_s22]]   ;;  %s10805_s22 = smov 36  }
  0x34   :  { %12310 = sst [smem:[#allocation78_spill]] %s11021_s6 }
  0x35   :  { %s11031_s19 = sld [smem:[%s12269_s0 + %s10804_s15]]  }
  0x36   :  { %12308 = sst [smem:[#allocation76_spill]] %s11006_s30 }
  0x37   :  { %s11026_s30 = sld [smem:[%s12269_s0 + %s10803_s7]]   ;;  %s10807_s7 = smov 38  }
  0x38   :  { %s11041_s6 = sld [smem:[%s12269_s0 + %s10806_s28]]  }
  0x39   :  { %12309 = sst [smem:[#allocation77_spill]] %s11016_s27 }
  0x3a   :  { %s11036_s27 = sld [smem:[%s12269_s0 + %s10805_s22]]  }
  0x3d   :  { %12311 = sst [smem:[#allocation79_spill]] %s11026_s30 }
  0x3e   :  { %s11046_s30 = sld [smem:[%s12269_s0 + %s10807_s7]]  }
  0x3f   :  { %83 = vsyncpa [#allocation3], 0 }
  0x40   :  { %84 = vsyncpa [#allocation6], 0 }
  0x41   :  { %85 = vsyncpa [#allocation9], 0 }
  0x42   :  { %86 = vsyncpa [#allocation12], 0 }
  0x43   :  { %87 = vsyncpa [#allocation15], 0 }
  0x44   :  { %88 = vsyncpa [#allocation18], 0 }
  0x45   :  { %89 = vsyncpa [#allocation21], 0 }
  0x46   :  { %90 = vsyncpa [#allocation24], 0 }
  0x47   :  { %91 = vsyncpa [#allocation27], 0 }
  0x48   :  { %92 = vsyncpa [#allocation30], 0 }
  0x49   :  { %93 = vsyncpa [#allocation33], 0 }
  0x4a   :  { %94 = vsyncpa [#allocation36], 0 }
  0x4b   :  { %95 = vsyncpa [#allocation4], 0 }
  0x4c   :  { %96 = vsyncpa [#allocation40], 0 }
  0x4d   :  { %97 = vsyncpa [#allocation43], 0  ;;  %s10808_s0 = smov [#allocation5]   ;;  %s10146_s16 = scalar_lea.hbm %s10866_s13, 65536 }
  0x4e   :  { %s115_s15 = sshll.u32 %s10808_s0, 4  ;;  %p10147_p0 = scmp.ne.s32.totalorder %s10866_s13, %s10146_s16  ;;  %s116_s15 = int_to_ptr.vmem [resolvable:$true] %s115_s15 }
  0x4f   :  { %p10150_p1 = scmp.lt.u32.totalorder %s10146_s16, %s10866_s13 }
  0x51   :  { %p10152_p2 = pnand %p10150_p1, %p10147_p0 }
  0x53   :  { %10155 = shalt.err (!%p10152_p2)
}
  0x54   :  { %s10156_s18 = scalar_lea.vmem %s116_s15, 65536  ;;  %p10161_p4 = scmp.lt.s32.totalorder %s116_s15, %s116_s15 }
  0x55   :  { %p10157_p3 = scmp.ne.s32.totalorder %s116_s15, %s10156_s18  ;;  %p10162_p5 = scmp.lt.s32.totalorder %s10156_s18, %s10156_s18 }
  0x57   :  { %p10163_p6 = por %p10162_p5, %p10161_p4 }
  0x59   :  { %p10164_p7 = pnand %p10163_p6, %p10157_p3 }
  0x5b   :  { %10167 = shalt.err (!%p10164_p7)
}
  0x5c   :  { %s10809_s22 = smov 512   ;;  %s10810_s23 = smov 32  }
  0x5d   :  { %121 = dma.hbm_to_vmem [thread:$0]  %s10866_s13, 65536, %s116_s15, [#allocation6], %s10809_s22, %s10809_s22, %s10810_s23  }
  0x5e   :  { %s10811_s26 = smov [#allocation8]   ;;  %s10812_s1 = smov [#allocation11]  }
  0x5f   :  { %s140_s28 = sshll.u32 %s10811_s26, 4  ;;  %s164_s2 = sshll.u32 %s10812_s1, 4  ;;  %s141_s28 = int_to_ptr.vmem [resolvable:$true] %s140_s28  ;;  %s165_s2 = int_to_ptr.vmem [resolvable:$true] %s164_s2 }
  0x60   :  { %s10168_s7 = scalar_lea.hbm %s10881_s25, 32 }
  0x61   :  { %p10169_p8 = scmp.ne.s32.totalorder %s10881_s25, %s10168_s7  ;;  %p10172_p9 = scmp.lt.u32.totalorder %s10168_s7, %s10881_s25 }
  0x63   :  { %p10174_p10 = pnand %p10172_p9, %p10169_p8 }
  0x65   :  { %10177 = shalt.err (!%p10174_p10)
}
  0x66   :  { %s10178_s10 = scalar_lea.vmem %s141_s28, 32  ;;  %p10183_p12 = scmp.lt.s32.totalorder %s141_s28, %s141_s28 }
  0x67   :  { %p10179_p11 = scmp.ne.s32.totalorder %s141_s28, %s10178_s10  ;;  %p10184_p13 = scmp.lt.s32.totalorder %s10178_s10, %s10178_s10 }
  0x69   :  { %p10185_p0 = por %p10184_p13, %p10183_p12 }
  0x6b   :  { %p10186_p1 = pnand %p10185_p0, %p10179_p11 }
  0x6d   :  { %10189 = shalt.err (!%p10186_p1)
}
  0x6e   :  { %143 = dma.hbm_to_vmem [thread:$0]  %s10881_s25, 32, %s141_s28, [#allocation9]  }
  0x6f   :  { %s10190_s13 = scalar_lea.hbm %s10901_s14, 16 }
  0x70   :  { %p10191_p2 = scmp.ne.s32.totalorder %s10901_s14, %s10190_s13  ;;  %p10194_p3 = scmp.lt.u32.totalorder %s10190_s13, %s10901_s14 }
  0x72   :  { %p10196_p4 = pnand %p10194_p3, %p10191_p2 }
  0x74   :  { %10199 = shalt.err (!%p10196_p4)
}
  0x75   :  { %s10200_s11 = scalar_lea.vmem %s165_s2, 16  ;;  %s10204_s0 = scalar_lea.vmem %s165_s2, 32 }
  0x76   :  { %p10201_p5 = scmp.ne.s32.totalorder %s165_s2, %s10200_s11  ;;  %p10205_p6 = scmp.lt.s32.totalorder %s165_s2, %s165_s2 }
  0x77   :  { %p10206_p7 = scmp.lt.s32.totalorder %s10204_s0, %s10200_s11 }
  0x79   :  { %p10207_p8 = por %p10206_p7, %p10205_p6 }
  0x7b   :  { %p10208_p9 = pnand %p10207_p8, %p10201_p5 }
  0x7d   :  { %10211 = shalt.err (!%p10208_p9)
}
  0x7e   :  { %167 = dma.hbm_to_vmem [thread:$0]  %s10901_s14, 16, %s165_s2, [#allocation12]  }
  0x7f   :  { %s10813_s25 = smov [#allocation14]   ;;  %s10814_s16 = smov [#allocation17]  }
  0x80   :  { %s186_s15 = sshll.u32 %s10813_s25, 4  ;;  %s207_s18 = sshll.u32 %s10814_s16, 4  ;;  %s187_s15 = int_to_ptr.vmem [resolvable:$true] %s186_s15  ;;  %s208_s18 = int_to_ptr.vmem [resolvable:$true] %s207_s18 }
  0x81   :  { %s10212_s22 = scalar_lea.hbm %s10911_s24, 32 }
  0x82   :  { %p10213_p10 = scmp.ne.s32.totalorder %s10911_s24, %s10212_s22  ;;  %p10216_p11 = scmp.lt.u32.totalorder %s10212_s22, %s10911_s24 }
  0x84   :  { %p10218_p12 = pnand %p10216_p11, %p10213_p10 }
  0x86   :  { %10221 = shalt.err (!%p10218_p12)
}
  0x87   :  { %s10222_s23 = scalar_lea.vmem %s187_s15, 32  ;;  %p10227_p0 = scmp.lt.s32.totalorder %s187_s15, %s187_s15 }
  0x88   :  { %p10223_p13 = scmp.ne.s32.totalorder %s187_s15, %s10222_s23  ;;  %p10228_p1 = scmp.lt.s32.totalorder %s10222_s23, %s10222_s23 }
  0x8a   :  { %p10229_p2 = por %p10228_p1, %p10227_p0 }
  0x8c   :  { %p10230_p3 = pnand %p10229_p2, %p10223_p13 }
  0x8e   :  { %10233 = shalt.err (!%p10230_p3)
}
  0x8f   :  { %189 = dma.hbm_to_vmem [thread:$0]  %s10911_s24, 32, %s187_s15, [#allocation15]  }
  0x90   :  { %s10234_s14 = scalar_lea.hbm %s10926_s12, 65536 }
  0x91   :  { %p10235_p4 = scmp.ne.s32.totalorder %s10926_s12, %s10234_s14  ;;  %p10238_p5 = scmp.lt.u32.totalorder %s10234_s14, %s10926_s12 }
  0x93   :  { %p10240_p6 = pnand %p10238_p5, %p10235_p4 }
  0x95   :  { %10243 = shalt.err (!%p10240_p6)
}
  0x96   :  { %s10244_s26 = scalar_lea.vmem %s208_s18, 65536  ;;  %p10249_p8 = scmp.lt.s32.totalorder %s208_s18, %s208_s18 }
  0x97   :  { %p10245_p7 = scmp.ne.s32.totalorder %s208_s18, %s10244_s26  ;;  %p10250_p9 = scmp.lt.s32.totalorder %s10244_s26, %s10244_s26 }
  0x99   :  { %p10251_p10 = por %p10250_p9, %p10249_p8 }
  0x9b   :  { %p10252_p11 = pnand %p10251_p10, %p10245_p7 }
  0x9d   :  { %10255 = shalt.err (!%p10252_p11)
}
  0x9e   :  { %s10815_s28 = smov 1024   ;;  %s10816_s1 = smov 64  }
  0x9f   :  { %213 = dma.hbm_to_vmem [thread:$0]  %s10926_s12, 65536, %s208_s18, [#allocation18], %s10815_s28, %s10815_s28, %s10816_s1  }
  0xa0   :  { %s10817_s24 = smov [#allocation20]   ;;  %s10818_s7 = smov [#allocation23]  }
  0xa1   :  { %s231_s2 = sshll.u32 %s10817_s24, 4  ;;  %s259_s10 = sshll.u32 %s10818_s7, 4  ;;  %s232_s2 = int_to_ptr.vmem [resolvable:$true] %s231_s2  ;;  %s260_s10 = int_to_ptr.vmem [resolvable:$true] %s259_s10 }
  0xa2   :  { %s10256_s13 = scalar_lea.hbm %s10941_s4, 64 }
  0xa3   :  { %p10257_p12 = scmp.ne.s32.totalorder %s10941_s4, %s10256_s13  ;;  %p10260_p13 = scmp.lt.u32.totalorder %s10256_s13, %s10941_s4 }
  0xa5   :  { %p10262_p0 = pnand %p10260_p13, %p10257_p12 }
  0xa7   :  { %10265 = shalt.err (!%p10262_p0)
}
  0xa8   :  { %s10266_s11 = scalar_lea.vmem %s232_s2, 64  ;;  %p10271_p2 = scmp.lt.s32.totalorder %s232_s2, %s232_s2 }
  0xa9   :  { %p10267_p1 = scmp.ne.s32.totalorder %s232_s2, %s10266_s11  ;;  %p10272_p3 = scmp.lt.s32.totalorder %s10266_s11, %s10266_s11 }
  0xab   :  { %p10273_p4 = por %p10272_p3, %p10271_p2 }
  0xad   :  { %p10274_p5 = pnand %p10273_p4, %p10267_p1 }
  0xaf   :  { %10277 = shalt.err (!%p10274_p5)
}
  0xb0   :  { %s10819_s0 = smov 16   ;;  %s10820_s12 = smov 1  }
  0xb1   :  { %237 = dma.hbm_to_vmem [thread:$0]  %s10941_s4, 64, %s232_s2, [#allocation21], %s10819_s0, %s10819_s0, %s10820_s12  }
  0xb2   :  { %s10278_s25 = scalar_lea.hbm %s10961_s29, 64 }
  0xb3   :  { %p10279_p6 = scmp.ne.s32.totalorder %s10961_s29, %s10278_s25  ;;  %p10282_p7 = scmp.lt.u32.totalorder %s10278_s25, %s10961_s29 }
  0xb5   :  { %p10284_p8 = pnand %p10282_p7, %p10279_p6 }
  0xb7   :  { %10287 = shalt.err (!%p10284_p8)
}
  0xb8   :  { %s10288_s15 = scalar_lea.vmem %s260_s10, 64  ;;  %p10293_p10 = scmp.lt.s32.totalorder %s260_s10, %s260_s10 }
  0xb9   :  { %p10289_p9 = scmp.ne.s32.totalorder %s260_s10, %s10288_s15  ;;  %p10294_p11 = scmp.lt.s32.totalorder %s10288_s15, %s10288_s15 }
  0xbb   :  { %p10295_p12 = por %p10294_p11, %p10293_p10 }
  0xbd   :  { %p10296_p13 = pnand %p10295_p12, %p10289_p9 }
  0xbf   :  { %10299 = shalt.err (!%p10296_p13)
}
  0xc0   :  { %265 = dma.hbm_to_vmem [thread:$0]  %s10961_s29, 64, %s260_s10, [#allocation24], %s10819_s0, %s10819_s0, %s10820_s12  }
  0xc1   :  { %s10821_s4 = smov [#allocation26]   ;;  %s10822_s18 = smov [#allocation29]  }
  0xc2   :  { %s284_s16 = sshll.u32 %s10821_s4, 4  ;;  %s304_s22 = sshll.u32 %s10822_s18, 4  ;;  %s285_s16 = int_to_ptr.vmem [resolvable:$true] %s284_s16  ;;  %s305_s22 = int_to_ptr.vmem [resolvable:$true] %s304_s22 }
  0xc3   :  { %s10300_s23 = scalar_lea.hbm %s10971_s21, 16 }
  0xc4   :  { %p10301_p0 = scmp.ne.s32.totalorder %s10971_s21, %s10300_s23  ;;  %p10304_p1 = scmp.lt.u32.totalorder %s10300_s23, %s10971_s21 }
  0xc6   :  { %p10306_p2 = pnand %p10304_p1, %p10301_p0 }
  0xc8   :  { %10309 = shalt.err (!%p10306_p2)
}
  0xc9   :  { %s10310_s14 = scalar_lea.vmem %s285_s16, 16  ;;  %s10314_s26 = scalar_lea.vmem %s285_s16, 32 }
  0xca   :  { %p10311_p3 = scmp.ne.s32.totalorder %s285_s16, %s10310_s14  ;;  %p10315_p4 = scmp.lt.s32.totalorder %s285_s16, %s285_s16 }
  0xcb   :  { %p10316_p5 = scmp.lt.s32.totalorder %s10314_s26, %s10310_s14 }
  0xcd   :  { %p10317_p6 = por %p10316_p5, %p10315_p4 }
  0xcf   :  { %p10318_p7 = pnand %p10317_p6, %p10311_p3 }
  0xd1   :  { %10321 = shalt.err (!%p10318_p7)
}
  0xd2   :  { %287 = dma.hbm_to_vmem [thread:$0]  %s10971_s21, 16, %s285_s16, [#allocation27]  }
  0xd3   :  { %s10322_s29 = scalar_lea.hbm %s10981_s5, 16 }
  0xd4   :  { %p10323_p8 = scmp.ne.s32.totalorder %s10981_s5, %s10322_s29  ;;  %p10326_p9 = scmp.lt.u32.totalorder %s10322_s29, %s10981_s5 }
  0xd6   :  { %p10328_p10 = pnand %p10326_p9, %p10323_p8 }
  0xd8   :  { %10331 = shalt.err (!%p10328_p10)
}
  0xd9   :  { %s10332_s28 = scalar_lea.vmem %s305_s22, 16  ;;  %s10336_s1 = scalar_lea.vmem %s305_s22, 32 }
  0xda   :  { %p10333_p11 = scmp.ne.s32.totalorder %s305_s22, %s10332_s28  ;;  %p10337_p12 = scmp.lt.s32.totalorder %s305_s22, %s305_s22 }
  0xdb   :  { %p10338_p13 = scmp.lt.s32.totalorder %s10336_s1, %s10332_s28 }
  0xdd   :  { %p10339_p0 = por %p10338_p13, %p10337_p12 }
  0xdf   :  { %p10340_p1 = pnand %p10339_p0, %p10333_p11 }
  0xe1   :  { %10343 = shalt.err (!%p10340_p1)
}
  0xe2   :  { %307 = dma.hbm_to_vmem [thread:$0]  %s10981_s5, 16, %s305_s22, [#allocation30]  }
  0xe3   :  { %s10823_s21 = smov [#allocation32]   ;;  %s10824_s2 = smov [#allocation35]  }
  0xe4   :  { %s328_s24 = sshll.u32 %s10823_s21, 4  ;;  %s348_s7 = sshll.u32 %s10824_s2, 4  ;;  %s329_s24 = int_to_ptr.vmem [resolvable:$true] %s328_s24  ;;  %s349_s7 = int_to_ptr.vmem [resolvable:$true] %s348_s7 }
  0xe5   :  { %s10344_s10 = scalar_lea.hbm %s11001_s20, 16 }
  0xe6   :  { %p10345_p2 = scmp.ne.s32.totalorder %s11001_s20, %s10344_s10  ;;  %p10348_p3 = scmp.lt.u32.totalorder %s10344_s10, %s11001_s20 }
  0xe8   :  { %p10350_p4 = pnand %p10348_p3, %p10345_p2 }
  0xea   :  { %10353 = shalt.err (!%p10350_p4)
}
  0xeb   :  { %s10354_s13 = scalar_lea.vmem %s329_s24, 16  ;;  %s10358_s11 = scalar_lea.vmem %s329_s24, 32 }
  0xec   :  { %p10355_p5 = scmp.ne.s32.totalorder %s329_s24, %s10354_s13  ;;  %p10359_p6 = scmp.lt.s32.totalorder %s329_s24, %s329_s24 }
  0xed   :  { %p10360_p7 = scmp.lt.s32.totalorder %s10358_s11, %s10354_s13 }
  0xef   :  { %p10361_p8 = por %p10360_p7, %p10359_p6 }
  0xf1   :  { %p10362_p9 = pnand %p10361_p8, %p10355_p5 }
  0xf3   :  { %10365 = shalt.err (!%p10362_p9)
}
  0xf4   :  { %331 = dma.hbm_to_vmem [thread:$0]  %s11001_s20, 16, %s329_s24, [#allocation33]  }
  0xf5   :  { %s10366_s5 = scalar_lea.hbm %s11011_s8, 16 }
  0xf6   :  { %p10367_p10 = scmp.ne.s32.totalorder %s11011_s8, %s10366_s5  ;;  %p10370_p11 = scmp.lt.u32.totalorder %s10366_s5, %s11011_s8 }
  0xf8   :  { %p10372_p12 = pnand %p10370_p11, %p10367_p10 }
  0xfa   :  { %10375 = shalt.err (!%p10372_p12)
}
  0xfb   :  { %s10376_s25 = scalar_lea.vmem %s349_s7, 16  ;;  %s10380_s15 = scalar_lea.vmem %s349_s7, 32 }
  0xfc   :  { %p10377_p13 = scmp.ne.s32.totalorder %s349_s7, %s10376_s25  ;;  %p10381_p0 = scmp.lt.s32.totalorder %s349_s7, %s349_s7 }
  0xfd   :  { %p10382_p1 = scmp.lt.s32.totalorder %s10380_s15, %s10376_s25 }
  0xff   :  { %p10383_p2 = por %p10382_p1, %p10381_p0 }
 0x101   :  { %p10384_p3 = pnand %p10383_p2, %p10377_p13 }
 0x103   :  { %10387 = shalt.err (!%p10384_p3)
}
 0x104   :  { %351 = dma.hbm_to_vmem [thread:$0]  %s11011_s8, 16, %s349_s7, [#allocation36]  }
 0x105   :  { %s10825_s20 = smov [#allocation2]   ;;  %s10826_s16 = smov [#allocation7]  }
 0x106   :  { %s106_s4 = sshll.u32 %s10825_s20, 4  ;;  %s128_s18 = sshll.u32 %s10826_s16, 4  ;;  %s107_s4 = int_to_ptr.vmem [resolvable:$true] %s106_s4  ;;  %s129_s18 = int_to_ptr.vmem [resolvable:$true] %s128_s18 }
 0x107   :  { %s10388_s22 = scalar_lea.hbm %s10861_s9, 32 }
 0x108   :  { %p10389_p4 = scmp.ne.s32.totalorder %s10861_s9, %s10388_s22  ;;  %p10392_p5 = scmp.lt.u32.totalorder %s10388_s22, %s10861_s9 }
 0x10a   :  { %p10394_p6 = pnand %p10392_p5, %p10389_p4 }
 0x10c   :  { %10397 = shalt.err (!%p10394_p6)
}
 0x10d   :  { %s10398_s23 = scalar_lea.vmem %s107_s4, 32  ;;  %p10403_p8 = scmp.lt.s32.totalorder %s107_s4, %s107_s4 }
 0x10e   :  { %p10399_p7 = scmp.ne.s32.totalorder %s107_s4, %s10398_s23  ;;  %p10404_p9 = scmp.lt.s32.totalorder %s10398_s23, %s10398_s23 }
 0x110   :  { %p10405_p10 = por %p10404_p9, %p10403_p8 }
 0x112   :  { %p10406_p11 = pnand %p10405_p10, %p10399_p7 }
 0x114   :  { %10409 = shalt.err (!%p10406_p11)
}
 0x115   :  { %109 = dma.hbm_to_vmem [thread:$0]  %s10861_s9, 32, %s107_s4, [#allocation3]  }
 0x116   :  { %s10410_s8 = scalar_lea.hbm %s10871_s17, 64 }
 0x117   :  { %p10411_p12 = scmp.ne.s32.totalorder %s10871_s17, %s10410_s8  ;;  %p10414_p13 = scmp.lt.u32.totalorder %s10410_s8, %s10871_s17 }
 0x119   :  { %p10416_p0 = pnand %p10414_p13, %p10411_p12 }
 0x11b   :  { %10419 = shalt.err (!%p10416_p0)
}
 0x11c   :  { %s10420_s14 = scalar_lea.vmem %s129_s18, 64  ;;  %p10425_p2 = scmp.lt.s32.totalorder %s129_s18, %s129_s18 }
 0x11d   :  { %p10421_p1 = scmp.ne.s32.totalorder %s129_s18, %s10420_s14  ;;  %p10426_p3 = scmp.lt.s32.totalorder %s10420_s14, %s10420_s14 }
 0x11f   :  { %p10427_p4 = por %p10426_p3, %p10425_p2 }
 0x121   :  { %p10428_p5 = pnand %p10427_p4, %p10421_p1 }
 0x123   :  { %10431 = shalt.err (!%p10428_p5)
}
 0x124   :  { %131 = dma.hbm_to_vmem [thread:$0]  %s10871_s17, 64, %s129_s18, [#allocation6]  }
 0x125   :  { %s10827_s26 = smov [#allocation10]   ;;  %s10828_s29 = smov [#allocation13]  }
 0x126   :  { %s152_s9 = sshll.u32 %s10827_s26, 4  ;;  %s173_s28 = sshll.u32 %s10828_s29, 4  ;;  %s153_s9 = int_to_ptr.vmem [resolvable:$true] %s152_s9  ;;  %s174_s28 = int_to_ptr.vmem [resolvable:$true] %s173_s28 }
 0x127   :  { %s10432_s1 = scalar_lea.hbm %s10891_s3, 16 }
 0x128   :  { %p10433_p6 = scmp.ne.s32.totalorder %s10891_s3, %s10432_s1  ;;  %p10436_p7 = scmp.lt.u32.totalorder %s10432_s1, %s10891_s3 }
 0x12a   :  { %p10438_p8 = pnand %p10436_p7, %p10433_p6 }
 0x12c   :  { %10441 = shalt.err (!%p10438_p8)
}
 0x12d   :  { %s10442_s21 = scalar_lea.vmem %s153_s9, 16  ;;  %s10446_s24 = scalar_lea.vmem %s153_s9, 32 }
 0x12e   :  { %p10443_p9 = scmp.ne.s32.totalorder %s153_s9, %s10442_s21  ;;  %p10447_p10 = scmp.lt.s32.totalorder %s153_s9, %s153_s9 }
 0x12f   :  { %p10448_p11 = scmp.lt.s32.totalorder %s10446_s24, %s10442_s21 }
 0x131   :  { %p10449_p12 = por %p10448_p11, %p10447_p10 }
 0x133   :  { %p10450_p13 = pnand %p10449_p12, %p10443_p9 }
 0x135   :  { %10453 = shalt.err (!%p10450_p13)
}
 0x136   :  { %s12312_s17 = sld [smem:[#allocation63_spill]] }
 0x137   :  { %155 = dma.hbm_to_vmem [thread:$0]  %s10891_s3, 16, %s153_s9, [#allocation9]  }
 0x13c   :  { %s10454_s2 = scalar_lea.hbm %s12312_s17, 1024 }
 0x13d   :  { %p10455_p0 = scmp.ne.s32.totalorder %s12312_s17, %s10454_s2  ;;  %p10458_p1 = scmp.lt.u32.totalorder %s10454_s2, %s12312_s17 }
 0x13f   :  { %p10460_p2 = pnand %p10458_p1, %p10455_p0 }
 0x141   :  { %10463 = shalt.err (!%p10460_p2)
}
 0x142   :  { %s10464_s7 = scalar_lea.vmem %s174_s28, 1024  ;;  %p10469_p4 = scmp.lt.s32.totalorder %s174_s28, %s174_s28 }
 0x143   :  { %p10465_p3 = scmp.ne.s32.totalorder %s174_s28, %s10464_s7  ;;  %p10470_p5 = scmp.lt.s32.totalorder %s10464_s7, %s10464_s7 }
 0x145   :  { %p10471_p6 = por %p10470_p5, %p10469_p4 }
 0x147   :  { %p10472_p7 = pnand %p10471_p6, %p10465_p3 }
 0x149   :  { %10475 = shalt.err (!%p10472_p7)
}
 0x14a   :  { %s10829_s10 = smov 256   ;;  %s12313_s13 = sld [smem:[#allocation65_spill]] }
 0x14b   :  { %179 = dma.hbm_to_vmem [thread:$0]  %s12312_s17, 1024, %s174_s28, [#allocation12], %s10829_s10, %s10829_s10, %s10819_s0  }
 0x14c   :  { %s10830_s3 = smov [#allocation16]   ;;  %s10831_s5 = smov [#allocation19]  }
 0x14d   :  { %s198_s11 = sshll.u32 %s10830_s3, 4  ;;  %s220_s25 = sshll.u32 %s10831_s5, 4  ;;  %s199_s11 = int_to_ptr.vmem [resolvable:$true] %s198_s11  ;;  %s221_s25 = int_to_ptr.vmem [resolvable:$true] %s220_s25 }
 0x150   :  { %s10476_s15 = scalar_lea.hbm %s12313_s13, 64 }
 0x151   :  { %p10477_p8 = scmp.ne.s32.totalorder %s12313_s13, %s10476_s15  ;;  %p10480_p9 = scmp.lt.u32.totalorder %s10476_s15, %s12313_s13 }
 0x153   :  { %p10482_p10 = pnand %p10480_p9, %p10477_p8 }
 0x155   :  { %10485 = shalt.err (!%p10482_p10)
}
 0x156   :  { %s10486_s20 = scalar_lea.vmem %s199_s11, 64  ;;  %p10491_p12 = scmp.lt.s32.totalorder %s199_s11, %s199_s11 }
 0x157   :  { %p10487_p11 = scmp.ne.s32.totalorder %s199_s11, %s10486_s20  ;;  %p10492_p13 = scmp.lt.s32.totalorder %s10486_s20, %s10486_s20 }
 0x159   :  { %p10493_p0 = por %p10492_p13, %p10491_p12 }
 0x15b   :  { %p10494_p1 = pnand %p10493_p0, %p10487_p11 }
 0x15d   :  { %10497 = shalt.err (!%p10494_p1)
}
 0x15e   :  { %s12314_s4 = sld [smem:[#allocation66_spill]] }
 0x15f   :  { %201 = dma.hbm_to_vmem [thread:$0]  %s12313_s13, 64, %s199_s11, [#allocation15]  }
 0x164   :  { %s10498_s16 = scalar_lea.hbm %s12314_s4, 128 }
 0x165   :  { %p10499_p2 = scmp.ne.s32.totalorder %s12314_s4, %s10498_s16  ;;  %p10502_p3 = scmp.lt.u32.totalorder %s10498_s16, %s12314_s4 }
 0x167   :  { %p10504_p4 = pnand %p10502_p3, %p10499_p2 }
 0x169   :  { %10507 = shalt.err (!%p10504_p4)
}
 0x16a   :  { %s10508_s18 = scalar_lea.vmem %s221_s25, 128  ;;  %p10513_p6 = scmp.lt.s32.totalorder %s221_s25, %s221_s25 }
 0x16b   :  { %p10509_p5 = scmp.ne.s32.totalorder %s221_s25, %s10508_s18  ;;  %p10514_p7 = scmp.lt.s32.totalorder %s10508_s18, %s10508_s18 }
 0x16d   :  { %p10515_p8 = por %p10514_p7, %p10513_p6 }
 0x16f   :  { %p10516_p9 = pnand %p10515_p8, %p10509_p5 }
 0x171   :  { %10519 = shalt.err (!%p10516_p9)
}
 0x172   :  { %s12315_s22 = sld [smem:[#allocation69_spill]]  ;;  %s10832_s23 = smov [#allocation22]  }
 0x173   :  { %223 = dma.hbm_to_vmem [thread:$0]  %s12314_s4, 128, %s221_s25, [#allocation18]  }
 0x174   :  { %s245_s8 = sshll.u32 %s10832_s23, 4  ;;  %s10833_s14 = smov [#allocation25]   ;;  %s246_s8 = int_to_ptr.vmem [resolvable:$true] %s245_s8 }
 0x175   :  { %s271_s26 = sshll.u32 %s10833_s14, 4  ;;  %s11123_s26 = int_to_ptr.vmem [resolvable:$true] %s271_s26 }
 0x178   :  { %s10520_s9 = scalar_lea.hbm %s12315_s22, 64 }
 0x179   :  { %p10521_p10 = scmp.ne.s32.totalorder %s12315_s22, %s10520_s9  ;;  %p10524_p11 = scmp.lt.u32.totalorder %s10520_s9, %s12315_s22 }
 0x17b   :  { %p10526_p12 = pnand %p10524_p11, %p10521_p10 }
 0x17d   :  { %10529 = shalt.err (!%p10526_p12)
}
 0x17e   :  { %s10530_s29 = scalar_lea.vmem %s246_s8, 64  ;;  %p10535_p0 = scmp.lt.s32.totalorder %s246_s8, %s246_s8 }
 0x17f   :  { %p10531_p13 = scmp.ne.s32.totalorder %s246_s8, %s10530_s29  ;;  %p10536_p1 = scmp.lt.s32.totalorder %s10530_s29, %s10530_s29 }
 0x181   :  { %p10537_p2 = por %p10536_p1, %p10535_p0 }
 0x183   :  { %p10538_p3 = pnand %p10537_p2, %p10531_p13 }
 0x185   :  { %10541 = shalt.err (!%p10538_p3)
}
 0x186   :  { %s12316_s28 = sld [smem:[#allocation71_spill]] }
 0x187   :  { %251 = dma.hbm_to_vmem [thread:$0]  %s12315_s22, 64, %s246_s8, [#allocation21], %s10819_s0, %s10819_s0, %s10820_s12  }
 0x18c   :  { %s10542_s1 = scalar_lea.hbm %s12316_s28, 512 }
 0x18d   :  { %p10543_p4 = scmp.ne.s32.totalorder %s12316_s28, %s10542_s1  ;;  %p10546_p5 = scmp.lt.u32.totalorder %s10542_s1, %s12316_s28 }
 0x18f   :  { %p10548_p6 = pnand %p10546_p5, %p10543_p4 }
 0x191   :  { %10551 = shalt.err (!%p10548_p6)
}
 0x192   :  { %s10552_s21 = scalar_lea.vmem %s11123_s26, 512  ;;  %p10557_p8 = scmp.lt.s32.totalorder %s11123_s26, %s11123_s26 }
 0x193   :  { %p10553_p7 = scmp.ne.s32.totalorder %s11123_s26, %s10552_s21  ;;  %p10558_p9 = scmp.lt.s32.totalorder %s10552_s21, %s10552_s21 }
 0x195   :  { %p10559_p10 = por %p10558_p9, %p10557_p8 }
 0x197   :  { %p10560_p11 = pnand %p10559_p10, %p10553_p7 }
 0x199   :  { %10563 = shalt.err (!%p10560_p11)
}
 0x19a   :  { %s10834_s24 = smov 128   ;;  %s12317_s0 = sld [smem:[#allocation72_spill]] }
 0x19b   :  { %s10835_s12 = smov 8   ;;  %s10836_s17 = smov [#allocation28]  }
 0x19c   :  { %277 = dma.hbm_to_vmem [thread:$0]  %s12316_s28, 512, %s11123_s26, [#allocation24], %s10834_s24, %s10834_s24, %s10835_s12  }
 0x19d   :  { %s294_s2 = sshll.u32 %s10836_s17, 4  ;;  %s10837_s7 = smov [#allocation31]   ;;  %s295_s2 = int_to_ptr.vmem [resolvable:$true] %s294_s2 }
 0x19e   :  { %s316_s10 = sshll.u32 %s10837_s7, 4  ;;  %s317_s10 = int_to_ptr.vmem [resolvable:$true] %s316_s10 }
 0x1a0   :  { %s10564_s13 = scalar_lea.hbm %s12317_s0, 16 }
 0x1a1   :  { %p10565_p12 = scmp.ne.s32.totalorder %s12317_s0, %s10564_s13  ;;  %p10568_p13 = scmp.lt.u32.totalorder %s10564_s13, %s12317_s0 }
 0x1a3   :  { %p10570_p0 = pnand %p10568_p13, %p10565_p12 }
 0x1a5   :  { %10573 = shalt.err (!%p10570_p0)
}
 0x1a6   :  { %s10574_s3 = scalar_lea.vmem %s295_s2, 16  ;;  %s10578_s11 = scalar_lea.vmem %s295_s2, 32 }
 0x1a7   :  { %p10575_p1 = scmp.ne.s32.totalorder %s295_s2, %s10574_s3  ;;  %p10579_p2 = scmp.lt.s32.totalorder %s295_s2, %s295_s2 }
 0x1a8   :  { %p10580_p3 = scmp.lt.s32.totalorder %s10578_s11, %s10574_s3 }
 0x1aa   :  { %p10581_p4 = por %p10580_p3, %p10579_p2 }
 0x1ac   :  { %p10582_p5 = pnand %p10581_p4, %p10575_p1 }
 0x1ae   :  { %10585 = shalt.err (!%p10582_p5)
}
 0x1af   :  { %s12318_s5 = sld [smem:[#allocation74_spill]] }
 0x1b0   :  { %297 = dma.hbm_to_vmem [thread:$0]  %s12317_s0, 16, %s295_s2, [#allocation27]  }
 0x1b5   :  { %s10586_s25 = scalar_lea.hbm %s12318_s5, 256 }
 0x1b6   :  { %p10587_p6 = scmp.ne.s32.totalorder %s12318_s5, %s10586_s25  ;;  %p10590_p7 = scmp.lt.u32.totalorder %s10586_s25, %s12318_s5 }
 0x1b8   :  { %p10592_p8 = pnand %p10590_p7, %p10587_p6 }
 0x1ba   :  { %10595 = shalt.err (!%p10592_p8)
}
 0x1bb   :  { %s10596_s15 = scalar_lea.vmem %s317_s10, 256  ;;  %p10601_p10 = scmp.lt.s32.totalorder %s317_s10, %s317_s10 }
 0x1bc   :  { %p10597_p9 = scmp.ne.s32.totalorder %s317_s10, %s10596_s15  ;;  %p10602_p11 = scmp.lt.s32.totalorder %s10596_s15, %s10596_s15 }
 0x1be   :  { %p10603_p12 = por %p10602_p11, %p10601_p10 }
 0x1c0   :  { %p10604_p13 = pnand %p10603_p12, %p10597_p9 }
 0x1c2   :  { %10607 = shalt.err (!%p10604_p13)
}
 0x1c3   :  { %s12319_s20 = sld [smem:[#allocation76_spill]]  ;;  %s10838_s4 = smov [#allocation34]  }
 0x1c4   :  { %319 = dma.hbm_to_vmem [thread:$0]  %s12318_s5, 256, %s317_s10, [#allocation30]  }
 0x1c5   :  { %s338_s16 = sshll.u32 %s10838_s4, 4  ;;  %s10839_s18 = smov [#allocation37]   ;;  %s339_s16 = int_to_ptr.vmem [resolvable:$true] %s338_s16 }
 0x1c6   :  { %s360_s22 = sshll.u32 %s10839_s18, 4  ;;  %s361_s22 = int_to_ptr.vmem [resolvable:$true] %s360_s22 }
 0x1c9   :  { %s10608_s23 = scalar_lea.hbm %s12319_s20, 16 }
 0x1ca   :  { %p10609_p0 = scmp.ne.s32.totalorder %s12319_s20, %s10608_s23  ;;  %p10612_p1 = scmp.lt.u32.totalorder %s10608_s23, %s12319_s20 }
 0x1cc   :  { %p10614_p2 = pnand %p10612_p1, %p10609_p0 }
 0x1ce   :  { %10617 = shalt.err (!%p10614_p2)
}
 0x1cf   :  { %s10618_s8 = scalar_lea.vmem %s339_s16, 16  ;;  %s10622_s14 = scalar_lea.vmem %s339_s16, 32 }
 0x1d0   :  { %p10619_p3 = scmp.ne.s32.totalorder %s339_s16, %s10618_s8  ;;  %p10623_p4 = scmp.lt.s32.totalorder %s339_s16, %s339_s16 }
 0x1d1   :  { %p10624_p5 = scmp.lt.s32.totalorder %s10622_s14, %s10618_s8 }
 0x1d3   :  { %p10625_p6 = por %p10624_p5, %p10623_p4 }
 0x1d5   :  { %p10626_p7 = pnand %p10625_p6, %p10619_p3 }
 0x1d7   :  { %10629 = shalt.err (!%p10626_p7)
}
 0x1d8   :  { %s12320_s26 = sld [smem:[#allocation78_spill]] }
 0x1d9   :  { %341 = dma.hbm_to_vmem [thread:$0]  %s12319_s20, 16, %s339_s16, [#allocation33]  }
 0x1de   :  { %s10630_s9 = scalar_lea.hbm %s12320_s26, 16 }
 0x1df   :  { %p10631_p8 = scmp.ne.s32.totalorder %s12320_s26, %s10630_s9  ;;  %p10634_p9 = scmp.lt.u32.totalorder %s10630_s9, %s12320_s26 }
 0x1e1   :  { %p10636_p10 = pnand %p10634_p9, %p10631_p8 }
 0x1e3   :  { %10639 = shalt.err (!%p10636_p10)
}
 0x1e4   :  { %s10640_s29 = scalar_lea.vmem %s361_s22, 16  ;;  %s10644_s28 = scalar_lea.vmem %s361_s22, 32 }
 0x1e5   :  { %p10641_p11 = scmp.ne.s32.totalorder %s361_s22, %s10640_s29  ;;  %p10645_p12 = scmp.lt.s32.totalorder %s361_s22, %s361_s22 }
 0x1e6   :  { %p10646_p13 = scmp.lt.s32.totalorder %s10644_s28, %s10640_s29 }
 0x1e8   :  { %p10647_p0 = por %p10646_p13, %p10645_p12 }
 0x1ea   :  { %p10648_p1 = pnand %p10647_p0, %p10641_p11 }
 0x1ec   :  { %10651 = shalt.err (!%p10648_p1)
}
 0x1ed   :  { %363 = dma.hbm_to_vmem [thread:$0]  %s12320_s26, 16, %s361_s22, [#allocation36]  }
 0x1ee   :  { %10740 = dma.done.wait [#allocation3], 32  }
 0x1ef   :  { %10741 = vsyncadd [#allocation3], 4294967264 }
 0x1f0   :  { %10742 = dma.done.wait [#allocation6], 65600  }
 0x1f1   :  { %10743 = vsyncadd [#allocation6], 4294901696 }
 0x1f2   :  { %10744 = dma.done.wait [#allocation9], 48  }
 0x1f3   :  { %10745 = vsyncadd [#allocation9], 4294967248 }
 0x1f4   :  { %10746 = dma.done.wait [#allocation12], 1040  }
 0x1f5   :  { %10747 = vsyncadd [#allocation12], 4294966256 }
 0x1f6   :  { %10748 = dma.done.wait [#allocation15], 96  }
 0x1f7   :  { %10749 = vsyncadd [#allocation15], 4294967200 }
 0x1f8   :  { %10750 = dma.done.wait [#allocation18], 65664  }
 0x1f9   :  { %10751 = vsyncadd [#allocation18], 4294901632 }
 0x1fa   :  { %10752 = dma.done.wait [#allocation21], 128  }
 0x1fb   :  { %10753 = vsyncadd [#allocation21], 4294967168 }
 0x1fc   :  { %10754 = dma.done.wait [#allocation24], 576  }
 0x1fd   :  { %10755 = vsyncadd [#allocation24], 4294966720 }
 0x1fe   :  { %10756 = dma.done.wait [#allocation27], 32  }
 0x1ff   :  { %10757 = vsyncadd [#allocation27], 4294967264 }
 0x200   :  { %10758 = dma.done.wait [#allocation30], 272  }
 0x201   :  { %10759 = vsyncadd [#allocation30], 4294967024 }
 0x202   :  { %10760 = dma.done.wait [#allocation33], 32  }
 0x203   :  { %10761 = vsyncadd [#allocation33], 4294967264 }
 0x204   :  { %10762 = dma.done.wait [#allocation36], 32  }
 0x205   :  { %10763 = vsyncadd [#allocation36], 4294967264  ;;  %v436_v0 = vld [vmem:[#allocation5 + $0x8] sm:$0xff]  ;;  %v438_v2 = vld [vmem:[#allocation5 + $0x18] sm:$0xff]  ;;  %s12321_s1 = sld [smem:[#allocation59_spill]]  ;;  %s12322_s21 = sld [smem:[#allocation60_spill]] }
 0x206   :  { %v440_v1 = vld [vmem:[#allocation5 + $0x28] sm:$0xff]  ;;  %v442_v4 = vld [vmem:[#allocation5 + $0x38] sm:$0xff]  ;;  %v435_v5 = vld [vmem:[#allocation5] sm:$0xff]  ;;  %s12323_s24 = sld [smem:[#allocation61_spill]]  ;;  %s12324_s0 = sld [smem:[#allocation62_spill]]  ;;  %vm2093_vm0 = vcmask 254976  }
 0x207   :  { %v8222_v3 = vpack.c.bf16 %v440_v1, %v436_v0  ;;  %v439_v6 = vld [vmem:[#allocation5 + $0x20] sm:$0xff]  ;;  %v8478_v7 = vpack.c.bf16 %v442_v4, %v438_v2  ;;  %v437_v9 = vld [vmem:[#allocation5 + $0x10] sm:$0xff]  ;;  %v444_v11 = vld [vmem:[#allocation5 + $0x48] sm:$0xff]  ;;  %s12325_s12 = sld [smem:[#allocation64_spill]]  ;;  %vm2117_vm1 = vcmask 261120   ;;  %s12326_s17 = sld [smem:[#allocation67_spill]] }
 0x208   :  { %v8224_v8 = vpack.c.bf16 %v439_v6, %v435_v5  ;;  %v441_v10 = vld [vmem:[#allocation5 + $0x30] sm:$0xff]  ;;  %v448_v13 = vld [vmem:[#allocation5 + $0x68] sm:$0xff]  ;;  %v446_v14 = vld [vmem:[#allocation5 + $0x58] sm:$0xff]  ;;  %s12327_s2 = sld [smem:[#allocation68_spill]]  ;;  %s12328_s7 = sld [smem:[#allocation70_spill]]  ;;  %vm10843_vm6 = vmmov 0  }
 0x209   :  { %8223 = vmatprep.subr.bf16.mxu0 %v8222_v3  ;;  %v8480_v12 = vpack.c.bf16 %v441_v10, %v437_v9  ;;  %v450_v15 = vld [vmem:[#allocation5 + $0x78] sm:$0xff]  ;;  %8479 = vmatprep.subr.bf16.mxu1 %v8478_v7  ;;  %v8226_v16 = vpack.c.bf16 %v448_v13, %v444_v11  ;;  %v443_v18 = vld [vmem:[#allocation5 + $0x40] sm:$0xff]  ;;  %v445_v20 = vld [vmem:[#allocation5 + $0x50] sm:$0xff]  ;;  %s12329_s10 = sld [smem:[#allocation79_spill]]  ;;  %vm3947_vm7 = vcmask 64512   ;;  %vm4041_vm8 = vcmask 1041408  }
 0x20a   :  { %8225 = vmatpush1.bf16.msra.mxu0 %v8224_v8  ;;  %v8482_v17 = vpack.c.bf16 %v450_v15, %v446_v14  ;;  %v447_v19 = vld [vmem:[#allocation5 + $0x60] sm:$0xff]  ;;  %v449_v22 = vld [vmem:[#allocation5 + $0x70] sm:$0xff]  ;;  %v452_v23 = vld [vmem:[#allocation5 + $0x88] sm:$0xff]  ;;  %vm4025_vm9 = vcmask 9216   ;;  %vm4037_vm10 = vcmask 15360   ;;  %s12330_s13 = sld [smem:[#allocation73_spill]] }
 0x20b   :  { %8481 = vmatpush1.bf16.msra.mxu1 %v8480_v12  ;;  %v8228_v21 = vpack.c.bf16 %v447_v19, %v443_v18  ;;  %v456_v24 = vld [vmem:[#allocation5 + $0xa8] sm:$0xff]  ;;  %8227 = vmatprep.subr.bf16.mxu0 %v8226_v16  ;;  %v8484_v25 = vpack.c.bf16 %v449_v22, %v445_v20  ;;  %v454_v27 = vld [vmem:[#allocation5 + $0x98] sm:$0xff]  ;;  %v451_v29 = vld [vmem:[#allocation5 + $0x80] sm:$0xff]  ;;  %s12331_s3 = sld [smem:[#allocation75_spill]]  ;;  %s12332_s11 = sld [smem:[#allocation77_spill]] }
 0x20c   :  { %8483 = vmatprep.subr.bf16.mxu1 %v8482_v17  ;;  %v8230_v26 = vpack.c.bf16 %v456_v24, %v452_v23  ;;  %v458_v28 = vld [vmem:[#allocation5 + $0xb8] sm:$0xff]  ;;  %v455_v31 = vld [vmem:[#allocation5 + $0xa0] sm:$0xff]  ;;  %v453_v32 = vld [vmem:[#allocation5 + $0x90] sm:$0xff]  ;;  %s10844_s5 = smov [#allocation39]   ;;  %s10845_s15 = smov [#allocation38]  }
 0x20d   :  { %v8486_v30 = vpack.c.bf16 %v458_v28, %v454_v27  ;;  %v457_v33 = vld [vmem:[#allocation5 + $0xb0] sm:$0xff]  ;;  %v8232_v34 = vpack.c.bf16 %v455_v31, %v451_v29  ;;  %v460_v35 = vld [vmem:[#allocation5 + $0xc8] sm:$0xff]  ;;  %v462_v37 = vld [vmem:[#allocation5 + $0xd8] sm:$0xff]  ;;  %s7390_s25 = sshll.u32 %s10844_s5, 4  ;;  %s7380_s20 = sshll.u32 %s10845_s15, 4  ;;  %s7391_s25 = int_to_ptr.vmem [resolvable:$true] %s7390_s25  ;;  %s7381_s20 = int_to_ptr.vmem [resolvable:$true] %s7380_s20 }
 0x20e   :  { %8229 = vmatpush1.bf16.msra.mxu0 %v8228_v21  ;;  %v464_v36 = vld [vmem:[#allocation5 + $0xe8] sm:$0xff]  ;;  %v8488_v38 = vpack.c.bf16 %v457_v33, %v453_v32  ;;  %v466_v40 = vld [vmem:[#allocation5 + $0xf8] sm:$0xff]  ;;  %v459_v41 = vld [vmem:[#allocation5 + $0xc0] sm:$0xff]  ;;  %s10652_s4 = scalar_lea.vmem %s7391_s25, 32  ;;  %p10657_p3 = scmp.lt.s32.totalorder %s7391_s25, %s7391_s25 }
 0x20f   :  { %8485 = vmatpush1.bf16.msra.mxu1 %v8484_v25  ;;  %8231 = vmatprep.subr.bf16.mxu0 %v8230_v26  ;;  %v8234_v39 = vpack.c.bf16 %v464_v36, %v460_v35  ;;  %v463_v42 = vld [vmem:[#allocation5 + $0xe0] sm:$0xff]  ;;  %v8490_v43 = vpack.c.bf16 %v466_v40, %v462_v37  ;;  %v461_v44 = vld [vmem:[#allocation5 + $0xd0] sm:$0xff]  ;;  %v468_v46 = vld [vmem:[#allocation5 + $0x108] sm:$0xff]  ;;  %p10653_p2 = scmp.ne.s32.totalorder %s7391_s25, %s10652_s4  ;;  %p10658_p4 = scmp.lt.s32.totalorder %s10652_s4, %s10652_s4 }
 0x210   :  { %8487 = vmatprep.subr.bf16.mxu1 %v8486_v30  ;;  %v465_v45 = vld [vmem:[#allocation5 + $0xf0] sm:$0xff]  ;;  %v472_v47 = vld [vmem:[#allocation5 + $0x128] sm:$0xff]  ;;  %v470_v48 = vld [vmem:[#allocation5 + $0x118] sm:$0xff]  ;;  %v8236_v50 = vpack.c.bf16 %v463_v42, %v459_v41 }
 0x211   :  { %v474_v49 = vld [vmem:[#allocation5 + $0x138] sm:$0xff]  ;;  %v8492_v51 = vpack.c.bf16 %v465_v45, %v461_v44  ;;  %v8238_v52 = vpack.c.bf16 %v472_v47, %v468_v46  ;;  %v467_v53 = vld [vmem:[#allocation5 + $0x100] sm:$0xff]  ;;  %v469_v55 = vld [vmem:[#allocation5 + $0x110] sm:$0xff]  ;;  %v949_v46 = vlaneseq  ;;  %v10840_v47 = vmov 1983009808   ;;  %p10659_p5 = por %p10658_p4, %p10657_p3 }
 0x212   :  { %8233 = vmatpush1.bf16.msra.mxu0 %v8232_v34  ;;  %v471_v54 = vld [vmem:[#allocation5 + $0x120] sm:$0xff]  ;;  %v8494_v56 = vpack.c.bf16 %v474_v49, %v470_v48  ;;  %v473_v57 = vld [vmem:[#allocation5 + $0x130] sm:$0xff]  ;;  %v476_v58 = vld [vmem:[#allocation5 + $0x148] sm:$0xff]  ;;  %v973_v48 = vunpack.c.l.s4 %v10840_v47 }
 0x213   :  { %8489 = vmatpush1.bf16.msra.mxu1 %v8488_v38  ;;  %8235 = vmatprep.subr.bf16.mxu0 %v8234_v39  ;;  %v480_v59 = vld [vmem:[#allocation5 + $0x168] sm:$0xff]  ;;  %v478_v60 = vld [vmem:[#allocation5 + $0x158] sm:$0xff]  ;;  %v8240_v62 = vpack.c.bf16 %v471_v54, %v467_v53  ;;  %v8496_v63 = vpack.c.bf16 %v473_v57, %v469_v55  ;;  %v475_v1 = vld [vmem:[#allocation5 + $0x140] sm:$0xff]  ;;  %p10660_p6 = pnand %p10659_p5, %p10653_p2 }
 0x214   :  { %8491 = vmatprep.subr.bf16.mxu1 %v8490_v43  ;;  %v482_v61 = vld [vmem:[#allocation5 + $0x178] sm:$0xff]  ;;  %v8242_v0 = vpack.c.bf16 %v480_v59, %v476_v58  ;;  %v479_v2 = vld [vmem:[#allocation5 + $0x160] sm:$0xff]  ;;  %v477_v3 = vld [vmem:[#allocation5 + $0x150] sm:$0xff] }
 0x215   :  { %v8498_v4 = vpack.c.bf16 %v482_v61, %v478_v60  ;;  %v481_v5 = vld [vmem:[#allocation5 + $0x170] sm:$0xff]  ;;  %v484_v6 = vld [vmem:[#allocation5 + $0x188] sm:$0xff]  ;;  %v486_v8 = vld [vmem:[#allocation5 + $0x198] sm:$0xff]  ;;  %v8244_v10 = vpack.c.bf16 %v479_v2, %v475_v1  ;;  %v11157_v61 = vshrl.u32 %v949_v46, 7 }
 0x216   :  { %8237 = vmatpush1.bf16.msra.mxu0 %v8236_v50  ;;  %v488_v7 = vld [vmem:[#allocation5 + $0x1a8] sm:$0xff]  ;;  %v490_v9 = vld [vmem:[#allocation5 + $0x1b8] sm:$0xff]  ;;  %v8500_v11 = vpack.c.bf16 %v481_v5, %v477_v3  ;;  %v483_v13 = vld [vmem:[#allocation5 + $0x180] sm:$0xff] }
 0x217   :  { %8493 = vmatpush1.bf16.msra.mxu1 %v8492_v51  ;;  %8239 = vmatprep.subr.bf16.mxu0 %v8238_v52  ;;  %v8246_v12 = vpack.c.bf16 %v488_v7, %v484_v6  ;;  %v487_v14 = vld [vmem:[#allocation5 + $0x1a0] sm:$0xff]  ;;  %v485_v15 = vld [vmem:[#allocation5 + $0x190] sm:$0xff]  ;;  %v8502_v16 = vpack.c.bf16 %v490_v9, %v486_v8  ;;  %v492_v18 = vld [vmem:[#allocation5 + $0x1c8] sm:$0xff] }
 0x218   :  { %8495 = vmatprep.subr.bf16.mxu1 %v8494_v56  ;;  %v489_v17 = vld [vmem:[#allocation5 + $0x1b0] sm:$0xff]  ;;  %v496_v19 = vld [vmem:[#allocation5 + $0x1e8] sm:$0xff]  ;;  %v494_v20 = vld [vmem:[#allocation5 + $0x1d8] sm:$0xff]  ;;  %v8248_v22 = vpack.c.bf16 %v487_v14, %v483_v13 }
 0x219   :  { %v498_v21 = vld [vmem:[#allocation5 + $0x1f8] sm:$0xff]  ;;  %v8504_v23 = vpack.c.bf16 %v489_v17, %v485_v15  ;;  %v8250_v24 = vpack.c.bf16 %v496_v19, %v492_v18  ;;  %v491_v25 = vld [vmem:[#allocation5 + $0x1c0] sm:$0xff]  ;;  %v493_v27 = vld [vmem:[#allocation5 + $0x1d0] sm:$0xff] }
 0x21a   :  { %8241 = vmatpush1.bf16.msra.mxu0 %v8240_v62  ;;  %v495_v26 = vld [vmem:[#allocation5 + $0x1e0] sm:$0xff]  ;;  %v8506_v28 = vpack.c.bf16 %v498_v21, %v494_v20  ;;  %v497_v29 = vld [vmem:[#allocation5 + $0x1f0] sm:$0xff]  ;;  %v500_v30 = vld [vmem:[#allocation5 + $0x208] sm:$0xff]  ;;  %v974_v62 = vunpack.c.0.s8 %v973_v48 }
 0x21b   :  { %8497 = vmatpush1.bf16.msra.mxu1 %v8496_v63  ;;  %8243 = vmatprep.subr.bf16.mxu0 %v8242_v0  ;;  %v504_v31 = vld [vmem:[#allocation5 + $0x228] sm:$0xff]  ;;  %v502_v32 = vld [vmem:[#allocation5 + $0x218] sm:$0xff]  ;;  %v8252_v34 = vpack.c.bf16 %v495_v26, %v491_v25  ;;  %v8508_v35 = vpack.c.bf16 %v497_v29, %v493_v27  ;;  %v499_v37 = vld [vmem:[#allocation5 + $0x200] sm:$0xff] }
 0x21c   :  { %8499 = vmatprep.subr.bf16.mxu1 %v8498_v4  ;;  %v506_v33 = vld [vmem:[#allocation5 + $0x238] sm:$0xff]  ;;  %v8254_v36 = vpack.c.bf16 %v504_v31, %v500_v30  ;;  %v503_v38 = vld [vmem:[#allocation5 + $0x220] sm:$0xff]  ;;  %v501_v39 = vld [vmem:[#allocation5 + $0x210] sm:$0xff] }
 0x21d   :  { %v8510_v40 = vpack.c.bf16 %v506_v33, %v502_v32  ;;  %v505_v41 = vld [vmem:[#allocation5 + $0x230] sm:$0xff]  ;;  %v508_v42 = vld [vmem:[#allocation5 + $0x248] sm:$0xff]  ;;  %v510_v44 = vld [vmem:[#allocation5 + $0x258] sm:$0xff]  ;;  %v8256_v49 = vpack.c.bf16 %v503_v38, %v499_v37 }
 0x21e   :  { %8245 = vmatpush1.bf16.msra.mxu0 %v8244_v10  ;;  %v512_v43 = vld [vmem:[#allocation5 + $0x268] sm:$0xff]  ;;  %v514_v45 = vld [vmem:[#allocation5 + $0x278] sm:$0xff]  ;;  %v8512_v50 = vpack.c.bf16 %v505_v41, %v501_v39  ;;  %v507_v52 = vld [vmem:[#allocation5 + $0x240] sm:$0xff] }
 0x21f   :  { %8501 = vmatpush1.bf16.msra.mxu1 %v8500_v11  ;;  %8247 = vmatprep.subr.bf16.mxu0 %v8246_v12  ;;  %v8258_v51 = vpack.c.bf16 %v512_v43, %v508_v42  ;;  %v511_v53 = vld [vmem:[#allocation5 + $0x260] sm:$0xff]  ;;  %v509_v54 = vld [vmem:[#allocation5 + $0x250] sm:$0xff]  ;;  %v8514_v55 = vpack.c.bf16 %v514_v45, %v510_v44  ;;  %v516_v57 = vld [vmem:[#allocation5 + $0x288] sm:$0xff]  ;;  %v11160_v11 = vsub.s32 %v974_v62, %v11157_v61 }
 0x220   :  { %8503 = vmatprep.subr.bf16.mxu1 %v8502_v16  ;;  %v513_v56 = vld [vmem:[#allocation5 + $0x270] sm:$0xff]  ;;  %v520_v58 = vld [vmem:[#allocation5 + $0x2a8] sm:$0xff]  ;;  %v518_v59 = vld [vmem:[#allocation5 + $0x298] sm:$0xff]  ;;  %v8260_v63 = vpack.c.bf16 %v511_v53, %v507_v52 }
 0x221   :  { %v522_v60 = vld [vmem:[#allocation5 + $0x2b8] sm:$0xff]  ;;  %v8516_v0 = vpack.c.bf16 %v513_v56, %v509_v54  ;;  %v8262_v1 = vpack.c.bf16 %v520_v58, %v516_v57  ;;  %v515_v2 = vld [vmem:[#allocation5 + $0x280] sm:$0xff]  ;;  %v517_v4 = vld [vmem:[#allocation5 + $0x290] sm:$0xff] }
 0x222   :  { %8249 = vmatpush1.bf16.msra.mxu0 %v8248_v22  ;;  %v519_v3 = vld [vmem:[#allocation5 + $0x2a0] sm:$0xff]  ;;  %v8518_v5 = vpack.c.bf16 %v522_v60, %v518_v59  ;;  %v521_v6 = vld [vmem:[#allocation5 + $0x2b0] sm:$0xff]  ;;  %v524_v7 = vld [vmem:[#allocation5 + $0x2c8] sm:$0xff] }
 0x223   :  { %8505 = vmatpush1.bf16.msra.mxu1 %v8504_v23  ;;  %8251 = vmatprep.subr.bf16.mxu0 %v8250_v24  ;;  %v528_v8 = vld [vmem:[#allocation5 + $0x2e8] sm:$0xff]  ;;  %v526_v9 = vld [vmem:[#allocation5 + $0x2d8] sm:$0xff]  ;;  %v8264_v12 = vpack.c.bf16 %v519_v3, %v515_v2  ;;  %v523_v13 = vld [vmem:[#allocation5 + $0x2c0] sm:$0xff]  ;;  %v8520_v14 = vpack.c.bf16 %v521_v6, %v517_v4 }
 0x224   :  { %8507 = vmatprep.subr.bf16.mxu1 %v8506_v28  ;;  %v530_v10 = vld [vmem:[#allocation5 + $0x2f8] sm:$0xff]  ;;  %v8266_v15 = vpack.c.bf16 %v528_v8, %v524_v7  ;;  %v527_v16 = vld [vmem:[#allocation5 + $0x2e0] sm:$0xff]  ;;  %v525_v17 = vld [vmem:[#allocation5 + $0x2d0] sm:$0xff] }
 0x225   :  { %v529_v18 = vld [vmem:[#allocation5 + $0x2f0] sm:$0xff]  ;;  %v8522_v19 = vpack.c.bf16 %v530_v10, %v526_v9  ;;  %v532_v20 = vld [vmem:[#allocation5 + $0x308] sm:$0xff]  ;;  %v11163_v22 = vld [vmem:[%s12321_s1] sm:$0xff]  ;;  %v8268_v26 = vpack.c.bf16 %v527_v16, %v523_v13 }
 0x226   :  { %8253 = vmatpush1.bf16.msra.mxu0 %v8252_v34  ;;  %v536_v21 = vld [vmem:[#allocation5 + $0x328] sm:$0xff]  ;;  %v534_v23 = vld [vmem:[#allocation5 + $0x318] sm:$0xff]  ;;  %v11167_v25 = vrot.slane %v11163_v22, %v11160_v11  ;;  %v8524_v27 = vpack.c.bf16 %v529_v18, %v525_v17  ;;  %v531_v29 = vld [vmem:[#allocation5 + $0x300] sm:$0xff]  ;;  %v971_v8 = vcombine.high %v11163_v22, %v11163_v22 }
 0x227   :  { %8509 = vmatpush1.bf16.msra.mxu1 %v8508_v35  ;;  %8255 = vmatprep.subr.bf16.mxu0 %v8254_v36  ;;  %v538_v24 = vld [vmem:[#allocation5 + $0x338] sm:$0xff]  ;;  %v8270_v28 = vpack.c.bf16 %v536_v21, %v532_v20  ;;  %v535_v30 = vld [vmem:[#allocation5 + $0x320] sm:$0xff]  ;;  %v533_v31 = vld [vmem:[#allocation5 + $0x310] sm:$0xff] }
 0x228   :  { %8511 = vmatprep.subr.bf16.mxu1 %v8510_v40  ;;  %v986_v32 = vcombine.high %v11167_v25, %v11167_v25  ;;  %v8526_v33 = vpack.c.bf16 %v538_v24, %v534_v23  ;;  %v537_v34 = vld [vmem:[#allocation5 + $0x330] sm:$0xff]  ;;  %v540_v35 = vld [vmem:[#allocation5 + $0x348] sm:$0xff]  ;;  %v542_v37 = vld [vmem:[#allocation5 + $0x358] sm:$0xff]  ;;  %v8272_v39 = vpack.c.bf16 %v535_v30, %v531_v29  ;;  %v11174_v22 = vrot.slane %v971_v8, %v11160_v11 }
 0x229   :  { %v544_v36 = vld [vmem:[#allocation5 + $0x368] sm:$0xff]  ;;  %v546_v38 = vld [vmem:[#allocation5 + $0x378] sm:$0xff]  ;;  %v8528_v40 = vpack.c.bf16 %v537_v34, %v533_v31  ;;  %v539_v42 = vld [vmem:[#allocation5 + $0x340] sm:$0xff] }
 0x22a   :  { %8257 = vmatpush1.bf16.msra.mxu0 %v8256_v49  ;;  %1077 = vmatprep.mubr.f32.mxu0 %v986_v32  ;;  %v8274_v41 = vpack.c.bf16 %v544_v36, %v540_v35  ;;  %v543_v43 = vld [vmem:[#allocation5 + $0x360] sm:$0xff]  ;;  %v541_v44 = vld [vmem:[#allocation5 + $0x350] sm:$0xff]  ;;  %v8530_v45 = vpack.c.bf16 %v546_v38, %v542_v37  ;;  %v548_v47 = vld [vmem:[#allocation5 + $0x388] sm:$0xff]  ;;  %v987_v38 = vcombine.high %v11174_v22, %v11174_v22 }
 0x22b   :  { %8513 = vmatpush1.bf16.msra.mxu1 %v8512_v50  ;;  %8259 = vmatprep.subr.bf16.mxu0 %v8258_v51  ;;  %v545_v46 = vld [vmem:[#allocation5 + $0x370] sm:$0xff]  ;;  %v552_v48 = vld [vmem:[#allocation5 + $0x3a8] sm:$0xff]  ;;  %v550_v49 = vld [vmem:[#allocation5 + $0x398] sm:$0xff]  ;;  %v8276_v51 = vpack.c.bf16 %v543_v43, %v539_v42 }
 0x22c   :  { %8515 = vmatprep.subr.bf16.mxu1 %v8514_v55  ;;  %1361 = vmatprep.mubr.f32.mxu1 %v986_v32  ;;  %v554_v50 = vld [vmem:[#allocation5 + $0x3b8] sm:$0xff]  ;;  %v8532_v52 = vpack.c.bf16 %v545_v46, %v541_v44  ;;  %v8278_v53 = vpack.c.bf16 %v552_v48, %v548_v47  ;;  %v547_v54 = vld [vmem:[#allocation5 + $0x380] sm:$0xff]  ;;  %v549_v56 = vld [vmem:[#allocation5 + $0x390] sm:$0xff] }
 0x22d   :  { %v551_v55 = vld [vmem:[#allocation5 + $0x3a0] sm:$0xff]  ;;  %v8534_v57 = vpack.c.bf16 %v554_v50, %v550_v49  ;;  %v553_v58 = vld [vmem:[#allocation5 + $0x3b0] sm:$0xff]  ;;  %v556_v59 = vld [vmem:[#allocation5 + $0x3c8] sm:$0xff] }
 0x22e   :  { %8261 = vmatpush1.bf16.msra.mxu0 %v8260_v63  ;;  %v560_v60 = vld [vmem:[#allocation5 + $0x3e8] sm:$0xff]  ;;  %v558_v62 = vld [vmem:[#allocation5 + $0x3d8] sm:$0xff]  ;;  %v555_v3 = vld [vmem:[#allocation5 + $0x3c0] sm:$0xff] }
 0x22f   :  { %8517 = vmatpush1.bf16.msra.mxu1 %v8516_v0  ;;  %8263 = vmatprep.subr.bf16.mxu0 %v8262_v1  ;;  %v562_v63 = vld [vmem:[#allocation5 + $0x3f8] sm:$0xff]  ;;  %v8280_v0 = vpack.c.bf16 %v551_v55, %v547_v54  ;;  %v8536_v1 = vpack.c.bf16 %v553_v58, %v549_v56  ;;  %v8282_v2 = vpack.c.bf16 %v560_v60, %v556_v59  ;;  %v559_v4 = vld [vmem:[#allocation5 + $0x3e0] sm:$0xff]  ;;  %v561_v7 = vld [vmem:[#allocation5 + $0x3f0] sm:$0xff] }
 0x230   :  { %8519 = vmatprep.subr.bf16.mxu1 %v8518_v5  ;;  %v557_v5 = vld [vmem:[#allocation5 + $0x3d0] sm:$0xff]  ;;  %v8538_v6 = vpack.c.bf16 %v562_v63, %v558_v62  ;;  %v564_v9 = vld [vmem:[#allocation5 + $0x408] sm:$0xff]  ;;  %v570_v13 = vld [vmem:[#allocation5 + $0x438] sm:$0xff] }
 0x231   :  { %v568_v10 = vld [vmem:[#allocation5 + $0x428] sm:$0xff]  ;;  %v563_v17 = vld [vmem:[#allocation5 + $0x400] sm:$0xff]  ;;  %v569_v21 = vld [vmem:[#allocation5 + $0x430] sm:$0xff] }
 0x232   :  { %8265 = vmatpush1.bf16.msra.mxu0 %v8264_v12  ;;  %v566_v12 = vld [vmem:[#allocation5 + $0x418] sm:$0xff]  ;;  %v8286_v16 = vpack.c.bf16 %v568_v10, %v564_v9  ;;  %v567_v18 = vld [vmem:[#allocation5 + $0x420] sm:$0xff]  ;;  %v572_v23 = vld [vmem:[#allocation5 + $0x448] sm:$0xff] }
 0x233   :  { %8521 = vmatpush1.bf16.msra.mxu1 %v8520_v14  ;;  %8267 = vmatprep.subr.bf16.mxu0 %v8266_v15  ;;  %v8284_v14 = vpack.c.bf16 %v559_v4, %v555_v3  ;;  %v8540_v15 = vpack.c.bf16 %v561_v7, %v557_v5  ;;  %v8542_v20 = vpack.c.bf16 %v570_v13, %v566_v12  ;;  %v576_v24 = vld [vmem:[#allocation5 + $0x468] sm:$0xff]  ;;  %v571_v31 = vld [vmem:[#allocation5 + $0x440] sm:$0xff]  ;;  %v577_v35 = vld [vmem:[#allocation5 + $0x470] sm:$0xff] }
 0x234   :  { %8523 = vmatprep.subr.bf16.mxu1 %v8522_v19  ;;  %v565_v19 = vld [vmem:[#allocation5 + $0x410] sm:$0xff]  ;;  %v8290_v30 = vpack.c.bf16 %v576_v24, %v572_v23  ;;  %v575_v32 = vld [vmem:[#allocation5 + $0x460] sm:$0xff]  ;;  %v580_v36 = vld [vmem:[#allocation5 + $0x488] sm:$0xff] }
 0x235   :  { %v8544_v29 = vpack.c.bf16 %v569_v21, %v565_v19  ;;  %v584_v37 = vld [vmem:[#allocation5 + $0x4a8] sm:$0xff]  ;;  %v579_v44 = vld [vmem:[#allocation5 + $0x480] sm:$0xff]  ;;  %v581_v46 = vld [vmem:[#allocation5 + $0x490] sm:$0xff] }
 0x236   :  { %8269 = vmatpush1.bf16.msra.mxu0 %v8268_v26  ;;  %v574_v26 = vld [vmem:[#allocation5 + $0x458] sm:$0xff]  ;;  %v8294_v43 = vpack.c.bf16 %v584_v37, %v580_v36  ;;  %v585_v48 = vld [vmem:[#allocation5 + $0x4b0] sm:$0xff]  ;;  %v588_v49 = vld [vmem:[#allocation5 + $0x4c8] sm:$0xff] }
 0x237   :  { %8525 = vmatpush1.bf16.msra.mxu1 %v8524_v27  ;;  %8271 = vmatprep.subr.bf16.mxu0 %v8270_v28  ;;  %v578_v27 = vld [vmem:[#allocation5 + $0x478] sm:$0xff]  ;;  %v8288_v28 = vpack.c.bf16 %v567_v18, %v563_v17  ;;  %v592_v50 = vld [vmem:[#allocation5 + $0x4e8] sm:$0xff]  ;;  %v587_v55 = vld [vmem:[#allocation5 + $0x4c0] sm:$0xff] }
 0x238   :  { %8527 = vmatprep.subr.bf16.mxu1 %v8526_v33  ;;  %v573_v33 = vld [vmem:[#allocation5 + $0x450] sm:$0xff]  ;;  %v8546_v34 = vpack.c.bf16 %v578_v27, %v574_v26  ;;  %v8298_v54 = vpack.c.bf16 %v592_v50, %v588_v49  ;;  %v591_v56 = vld [vmem:[#allocation5 + $0x4e0] sm:$0xff]  ;;  %v596_v60 = vld [vmem:[#allocation5 + $0x508] sm:$0xff] }
 0x239   :  { %v8548_v42 = vpack.c.bf16 %v577_v35, %v573_v33  ;;  %v593_v59 = vld [vmem:[#allocation5 + $0x4f0] sm:$0xff]  ;;  %v600_v62 = vld [vmem:[#allocation5 + $0x528] sm:$0xff]  ;;  %v598_v63 = vld [vmem:[#allocation5 + $0x518] sm:$0xff] }
 0x23a   :  { %8273 = vmatpush1.bf16.msra.mxu0 %v8272_v39  ;;  %v582_v39 = vld [vmem:[#allocation5 + $0x498] sm:$0xff]  ;;  %v8302_v3 = vpack.c.bf16 %v600_v62, %v596_v60  ;;  %v595_v4 = vld [vmem:[#allocation5 + $0x500] sm:$0xff]  ;;  %v601_v8 = vld [vmem:[#allocation5 + $0x530] sm:$0xff] }
 0x23b   :  { %8529 = vmatpush1.bf16.msra.mxu1 %v8528_v40  ;;  %8275 = vmatprep.subr.bf16.mxu0 %v8274_v41  ;;  %v586_v40 = vld [vmem:[#allocation5 + $0x4b8] sm:$0xff]  ;;  %v8292_v41 = vpack.c.bf16 %v575_v32, %v571_v31  ;;  %v599_v5 = vld [vmem:[#allocation5 + $0x520] sm:$0xff]  ;;  %v604_v9 = vld [vmem:[#allocation5 + $0x548] sm:$0xff] }
 0x23c   :  { %8531 = vmatprep.subr.bf16.mxu1 %v8530_v45  ;;  %v583_v45 = vld [vmem:[#allocation5 + $0x4a0] sm:$0xff]  ;;  %v8550_v47 = vpack.c.bf16 %v586_v40, %v582_v39  ;;  %v608_v10 = vld [vmem:[#allocation5 + $0x568] sm:$0xff]  ;;  %v606_v12 = vld [vmem:[#allocation5 + $0x558] sm:$0xff] }
 0x23d   :  { %v610_v13 = vld [vmem:[#allocation5 + $0x578] sm:$0xff]  ;;  %v603_v17 = vld [vmem:[#allocation5 + $0x540] sm:$0xff]  ;;  %v605_v19 = vld [vmem:[#allocation5 + $0x550] sm:$0xff] }
 0x23e   :  { %8277 = vmatpush1.bf16.msra.mxu0 %v8276_v51  ;;  %v590_v51 = vld [vmem:[#allocation5 + $0x4d8] sm:$0xff]  ;;  %v607_v18 = vld [vmem:[#allocation5 + $0x560] sm:$0xff]  ;;  %v609_v21 = vld [vmem:[#allocation5 + $0x570] sm:$0xff] }
 0x23f   :  { %8533 = vmatpush1.bf16.msra.mxu1 %v8532_v52  ;;  %8279 = vmatprep.subr.bf16.mxu0 %v8278_v53  ;;  %v594_v52 = vld [vmem:[#allocation5 + $0x4f8] sm:$0xff]  ;;  %v8296_v53 = vpack.c.bf16 %v583_v45, %v579_v44  ;;  %v612_v23 = vld [vmem:[#allocation5 + $0x588] sm:$0xff]  ;;  %v611_v31 = vld [vmem:[#allocation5 + $0x580] sm:$0xff] }
 0x240   :  { %8535 = vmatprep.subr.bf16.mxu1 %v8534_v57  ;;  %v589_v57 = vld [vmem:[#allocation5 + $0x4d0] sm:$0xff]  ;;  %v8554_v58 = vpack.c.bf16 %v594_v52, %v590_v51  ;;  %v616_v24 = vld [vmem:[#allocation5 + $0x5a8] sm:$0xff]  ;;  %v614_v26 = vld [vmem:[#allocation5 + $0x598] sm:$0xff] }
 0x241   :  { %v618_v27 = vld [vmem:[#allocation5 + $0x5b8] sm:$0xff]  ;;  %v615_v32 = vld [vmem:[#allocation5 + $0x5a0] sm:$0xff]  ;;  %v613_v33 = vld [vmem:[#allocation5 + $0x590] sm:$0xff] }
 0x242   :  { %8281 = vmatpush1.bf16.msra.mxu0 %v8280_v0  ;;  %v602_v0 = vld [vmem:[#allocation5 + $0x538] sm:$0xff]  ;;  %v617_v35 = vld [vmem:[#allocation5 + $0x5b0] sm:$0xff]  ;;  %v620_v36 = vld [vmem:[#allocation5 + $0x5c8] sm:$0xff]  ;;  %v8312_v40 = vpack.c.bf16 %v615_v32, %v611_v31 }
 0x243   :  { %8537 = vmatpush1.bf16.msra.mxu1 %v8536_v1  ;;  %8283 = vmatprep.subr.bf16.mxu0 %v8282_v2  ;;  %v8300_v1 = vpack.c.bf16 %v591_v56, %v587_v55  ;;  %v8556_v2 = vpack.c.bf16 %v593_v59, %v589_v57  ;;  %v8558_v7 = vpack.c.bf16 %v602_v0, %v598_v63  ;;  %v624_v37 = vld [vmem:[#allocation5 + $0x5e8] sm:$0xff]  ;;  %v626_v39 = vld [vmem:[#allocation5 + $0x5f8] sm:$0xff]  ;;  %v623_v44 = vld [vmem:[#allocation5 + $0x5e0] sm:$0xff] }
 0x244   :  { %8539 = vmatprep.subr.bf16.mxu1 %v8538_v6  ;;  %v597_v6 = vld [vmem:[#allocation5 + $0x510] sm:$0xff]  ;;  %v632_v49 = vld [vmem:[#allocation5 + $0x628] sm:$0xff]  ;;  %v630_v50 = vld [vmem:[#allocation5 + $0x618] sm:$0xff] }
 0x245   :  { %v621_v45 = vld [vmem:[#allocation5 + $0x5d0] sm:$0xff]  ;;  %v634_v51 = vld [vmem:[#allocation5 + $0x638] sm:$0xff]  ;;  %v631_v55 = vld [vmem:[#allocation5 + $0x620] sm:$0xff] }
 0x246   :  { %8285 = vmatpush1.bf16.msra.mxu0 %v8284_v14  ;;  %v8304_v14 = vpack.c.bf16 %v599_v5, %v595_v4  ;;  %v629_v56 = vld [vmem:[#allocation5 + $0x610] sm:$0xff]  ;;  %v8574_v57 = vpack.c.bf16 %v634_v51, %v630_v50  ;;  %v636_v59 = vld [vmem:[#allocation5 + $0x648] sm:$0xff]  ;;  %v638_v62 = vld [vmem:[#allocation5 + $0x658] sm:$0xff] }
 0x247   :  { %8541 = vmatpush1.bf16.msra.mxu1 %v8540_v15  ;;  %8287 = vmatprep.subr.bf16.mxu0 %v8286_v16  ;;  %v8560_v15 = vpack.c.bf16 %v601_v8, %v597_v6  ;;  %v8306_v16 = vpack.c.bf16 %v608_v10, %v604_v9  ;;  %v640_v60 = vld [vmem:[#allocation5 + $0x668] sm:$0xff]  ;;  %v642_v63 = vld [vmem:[#allocation5 + $0x678] sm:$0xff]  ;;  %v639_v4 = vld [vmem:[#allocation5 + $0x660] sm:$0xff] }
 0x248   :  { %8543 = vmatprep.subr.bf16.mxu1 %v8542_v20  ;;  %v8562_v20 = vpack.c.bf16 %v610_v13, %v606_v12  ;;  %v637_v5 = vld [vmem:[#allocation5 + $0x650] sm:$0xff]  ;;  %v8578_v6 = vpack.c.bf16 %v642_v63, %v638_v62  ;;  %v644_v8 = vld [vmem:[#allocation5 + $0x688] sm:$0xff]  ;;  %v646_v10 = vld [vmem:[#allocation5 + $0x698] sm:$0xff] }
 0x249   :  { %1078 = vmatmul.mubr.f32.vlgmr.msra.gmra.mrb[0].mxu0 %v11167_v25  ;;  %v648_v9 = vld [vmem:[#allocation5 + $0x6a8] sm:$0xff]  ;;  %v650_v12 = vld [vmem:[#allocation5 + $0x6b8] sm:$0xff]  ;;  %v655_v31 = vld [vmem:[#allocation5 + $0x6e0] sm:$0xff] }
 0x24a   :  { %8289 = vmatpush1.bf16.msra.mxu0 %v8288_v28  ;;  %1362 = vmatmul.mubr.f32.vlgmr.msra.gmra.mrb[0].mxu1 %v11167_v25  ;;  %v8552_v25 = vpack.c.bf16 %v585_v48, %v581_v46  ;;  %v8308_v28 = vpack.c.bf16 %v607_v18, %v603_v17  ;;  %v628_v48 = vld [vmem:[#allocation5 + $0x608] sm:$0xff]  ;;  %v647_v17 = vld [vmem:[#allocation5 + $0x6a0] sm:$0xff]  ;;  %v645_v18 = vld [vmem:[#allocation5 + $0x690] sm:$0xff] }
 0x24b   :  { %8545 = vmatpush1.bf16.msra.mxu1 %v8544_v29  ;;  %8291 = vmatprep.subr.bf16.mxu0 %v8290_v30  ;;  %v8564_v29 = vpack.c.bf16 %v609_v21, %v605_v19  ;;  %v8310_v30 = vpack.c.bf16 %v616_v24, %v612_v23  ;;  %v8582_v19 = vpack.c.bf16 %v650_v12, %v646_v10  ;;  %v652_v21 = vld [vmem:[#allocation5 + $0x6c8] sm:$0xff]  ;;  %v654_v24 = vld [vmem:[#allocation5 + $0x6d8] sm:$0xff]  ;;  %v653_v32 = vld [vmem:[#allocation5 + $0x6d0] sm:$0xff] }
 0x24c   :  { %8547 = vmatprep.subr.bf16.mxu1 %v8546_v34  ;;  %1148 = vmatprep.mubr.f32.mxu0 %v987_v38  ;;  %v8566_v34 = vpack.c.bf16 %v618_v27, %v614_v26  ;;  %v656_v23 = vld [vmem:[#allocation5 + $0x6e8] sm:$0xff]  ;;  %v658_v26 = vld [vmem:[#allocation5 + $0x6f8] sm:$0xff] }
 0x24d   :  { %1432 = vmatprep.mubr.f32.mxu1 %v987_v38  ;;  %v622_v38 = vld [vmem:[#allocation5 + $0x5d8] sm:$0xff] }
 0x24e   :  { %8293 = vmatpush1.bf16.msra.mxu0 %v8292_v41  ;;  %v8568_v41 = vpack.c.bf16 %v617_v35, %v613_v33  ;;  %v8570_v46 = vpack.c.bf16 %v626_v39, %v622_v38  ;;  %v8586_v33 = vpack.c.bf16 %v658_v26, %v654_v24  ;;  %v660_v35 = vld [vmem:[#allocation5 + $0x708] sm:$0xff]  ;;  %v666_v38 = vld [vmem:[#allocation5 + $0x738] sm:$0xff] }
 0x24f   :  { %8549 = vmatpush1.bf16.msra.mxu1 %v8548_v42  ;;  %8295 = vmatprep.subr.bf16.mxu0 %v8294_v43  ;;  %v8314_v42 = vpack.c.bf16 %v624_v37, %v620_v36  ;;  %v619_v43 = vld [vmem:[#allocation5 + $0x5c0] sm:$0xff]  ;;  %v664_v36 = vld [vmem:[#allocation5 + $0x728] sm:$0xff]  ;;  %v662_v37 = vld [vmem:[#allocation5 + $0x718] sm:$0xff] }
 0x250   :  { %8551 = vmatprep.subr.bf16.mxu1 %v8550_v47  ;;  %v625_v47 = vld [vmem:[#allocation5 + $0x5f0] sm:$0xff]  ;;  %v8316_v52 = vpack.c.bf16 %v623_v44, %v619_v43  ;;  %v663_v43 = vld [vmem:[#allocation5 + $0x720] sm:$0xff]  ;;  %v674_v50 = vld [vmem:[#allocation5 + $0x778] sm:$0xff] }
 0x251   :  { %v661_v44 = vld [vmem:[#allocation5 + $0x710] sm:$0xff]  ;;  %v682_v62 = vld [vmem:[#allocation5 + $0x7b8] sm:$0xff] }
 0x252   :  { %8297 = vmatpush1.bf16.msra.mxu0 %v8296_v53  ;;  %v8572_v53 = vpack.c.bf16 %v625_v47, %v621_v45  ;;  %v8590_v45 = vpack.c.bf16 %v666_v38, %v662_v37  ;;  %v668_v47 = vld [vmem:[#allocation5 + $0x748] sm:$0xff]  ;;  %v690_v10 = vld [vmem:[#allocation5 + $0x7f8] sm:$0xff] }
 0x253   :  { %8553 = vmatpush1.bf16.msra.mxu1 %v8552_v25  ;;  %8299 = vmatprep.subr.bf16.mxu0 %v8298_v54  ;;  %v8318_v25 = vpack.c.bf16 %v632_v49, %v628_v48  ;;  %v627_v54 = vld [vmem:[#allocation5 + $0x600] sm:$0xff]  ;;  %v672_v48 = vld [vmem:[#allocation5 + $0x768] sm:$0xff]  ;;  %v670_v49 = vld [vmem:[#allocation5 + $0x758] sm:$0xff] }
 0x254   :  { %8555 = vmatprep.subr.bf16.mxu1 %v8554_v58  ;;  %v633_v58 = vld [vmem:[#allocation5 + $0x630] sm:$0xff]  ;;  %v8320_v0 = vpack.c.bf16 %v631_v55, %v627_v54  ;;  %v671_v54 = vld [vmem:[#allocation5 + $0x760] sm:$0xff]  ;;  %v698_v24 = vld [vmem:[#allocation5 + $0x838] sm:$0xff] }
 0x255   :  { %v669_v55 = vld [vmem:[#allocation5 + $0x750] sm:$0xff]  ;;  %v706_v37 = vld [vmem:[#allocation5 + $0x878] sm:$0xff] }
 0x256   :  { %8301 = vmatpush1.bf16.msra.mxu0 %v8300_v1  ;;  %v8576_v1 = vpack.c.bf16 %v633_v58, %v629_v56  ;;  %v8594_v56 = vpack.c.bf16 %v674_v50, %v670_v49  ;;  %v676_v58 = vld [vmem:[#allocation5 + $0x788] sm:$0xff]  ;;  %v710_v50 = vld [vmem:[#allocation5 + $0x898] sm:$0xff] }
 0x257   :  { %8557 = vmatpush1.bf16.msra.mxu1 %v8556_v2  ;;  %8303 = vmatprep.subr.bf16.mxu0 %v8302_v3  ;;  %v8322_v2 = vpack.c.bf16 %v640_v60, %v636_v59  ;;  %v635_v3 = vld [vmem:[#allocation5 + $0x640] sm:$0xff]  ;;  %v680_v59 = vld [vmem:[#allocation5 + $0x7a8] sm:$0xff]  ;;  %v678_v60 = vld [vmem:[#allocation5 + $0x798] sm:$0xff] }
 0x258   :  { %8559 = vmatprep.subr.bf16.mxu1 %v8558_v7  ;;  %v641_v7 = vld [vmem:[#allocation5 + $0x670] sm:$0xff]  ;;  %v8324_v13 = vpack.c.bf16 %v639_v4, %v635_v3  ;;  %v679_v3 = vld [vmem:[#allocation5 + $0x7a0] sm:$0xff]  ;;  %v712_v49 = vld [vmem:[#allocation5 + $0x8a8] sm:$0xff] }
 0x259   :  { %v677_v4 = vld [vmem:[#allocation5 + $0x790] sm:$0xff] }
 0x25a   :  { %8305 = vmatpush1.bf16.msra.mxu0 %v8304_v14  ;;  %v8580_v14 = vpack.c.bf16 %v641_v7, %v637_v5  ;;  %v8598_v5 = vpack.c.bf16 %v682_v62, %v678_v60  ;;  %v684_v7 = vld [vmem:[#allocation5 + $0x7c8] sm:$0xff] }
 0x25b   :  { %8561 = vmatpush1.bf16.msra.mxu1 %v8560_v15  ;;  %8307 = vmatprep.subr.bf16.mxu0 %v8306_v16  ;;  %v8326_v15 = vpack.c.bf16 %v648_v9, %v644_v8  ;;  %v643_v16 = vld [vmem:[#allocation5 + $0x680] sm:$0xff]  ;;  %v688_v8 = vld [vmem:[#allocation5 + $0x7e8] sm:$0xff]  ;;  %v686_v9 = vld [vmem:[#allocation5 + $0x7d8] sm:$0xff] }
 0x25c   :  { %8563 = vmatprep.subr.bf16.mxu1 %v8562_v20  ;;  %v649_v20 = vld [vmem:[#allocation5 + $0x6b0] sm:$0xff]  ;;  %v8328_v27 = vpack.c.bf16 %v647_v17, %v643_v16  ;;  %v687_v16 = vld [vmem:[#allocation5 + $0x7e0] sm:$0xff]  ;;  %v716_v60 = vld [vmem:[#allocation5 + $0x8c8] sm:$0xff] }
 0x25d   :  { %v685_v17 = vld [vmem:[#allocation5 + $0x7d0] sm:$0xff]  ;;  %v720_v62 = vld [vmem:[#allocation5 + $0x8e8] sm:$0xff] }
 0x25e   :  { %8309 = vmatpush1.bf16.msra.mxu0 %v8308_v28  ;;  %v8584_v28 = vpack.c.bf16 %v649_v20, %v645_v18  ;;  %v8602_v18 = vpack.c.bf16 %v690_v10, %v686_v9  ;;  %v692_v20 = vld [vmem:[#allocation5 + $0x808] sm:$0xff]  ;;  %v726_v10 = vld [vmem:[#allocation5 + $0x918] sm:$0xff] }
 0x25f   :  { %8565 = vmatpush1.bf16.msra.mxu1 %v8564_v29  ;;  %8311 = vmatprep.subr.bf16.mxu0 %v8310_v30  ;;  %v8330_v29 = vpack.c.bf16 %v656_v23, %v652_v21  ;;  %v651_v30 = vld [vmem:[#allocation5 + $0x6c0] sm:$0xff]  ;;  %v696_v21 = vld [vmem:[#allocation5 + $0x828] sm:$0xff]  ;;  %v694_v23 = vld [vmem:[#allocation5 + $0x818] sm:$0xff] }
 0x260   :  { %8567 = vmatprep.subr.bf16.mxu1 %v8566_v34  ;;  %v657_v34 = vld [vmem:[#allocation5 + $0x6f0] sm:$0xff]  ;;  %v8332_v39 = vpack.c.bf16 %v655_v31, %v651_v30  ;;  %v695_v30 = vld [vmem:[#allocation5 + $0x820] sm:$0xff]  ;;  %v728_v9 = vld [vmem:[#allocation5 + $0x928] sm:$0xff] }
 0x261   :  { %v693_v31 = vld [vmem:[#allocation5 + $0x810] sm:$0xff] }
 0x262   :  { %8313 = vmatpush1.bf16.msra.mxu0 %v8312_v40  ;;  %v8588_v40 = vpack.c.bf16 %v657_v34, %v653_v32  ;;  %v8606_v32 = vpack.c.bf16 %v698_v24, %v694_v23  ;;  %v700_v34 = vld [vmem:[#allocation5 + $0x848] sm:$0xff]  ;;  %v734_v24 = vld [vmem:[#allocation5 + $0x958] sm:$0xff] }
 0x263   :  { %8569 = vmatpush1.bf16.msra.mxu1 %v8568_v41  ;;  %8315 = vmatprep.subr.bf16.mxu0 %v8314_v42  ;;  %v8334_v41 = vpack.c.bf16 %v664_v36, %v660_v35  ;;  %v659_v42 = vld [vmem:[#allocation5 + $0x700] sm:$0xff]  ;;  %v704_v35 = vld [vmem:[#allocation5 + $0x868] sm:$0xff]  ;;  %v702_v36 = vld [vmem:[#allocation5 + $0x858] sm:$0xff] }
 0x264   :  { %8571 = vmatprep.subr.bf16.mxu1 %v8570_v46  ;;  %v665_v46 = vld [vmem:[#allocation5 + $0x730] sm:$0xff]  ;;  %v8336_v51 = vpack.c.bf16 %v663_v43, %v659_v42  ;;  %v699_v42 = vld [vmem:[#allocation5 + $0x840] sm:$0xff]  ;;  %v736_v23 = vld [vmem:[#allocation5 + $0x968] sm:$0xff] }
 0x265   :  { %v703_v43 = vld [vmem:[#allocation5 + $0x860] sm:$0xff] }
 0x266   :  { %8317 = vmatpush1.bf16.msra.mxu0 %v8316_v52  ;;  %v8592_v52 = vpack.c.bf16 %v665_v46, %v661_v44  ;;  %v701_v44 = vld [vmem:[#allocation5 + $0x850] sm:$0xff]  ;;  %v8610_v46 = vpack.c.bf16 %v706_v37, %v702_v36  ;;  %v744_v36 = vld [vmem:[#allocation5 + $0x9a8] sm:$0xff]  ;;  %v742_v37 = vld [vmem:[#allocation5 + $0x998] sm:$0xff] }
 0x267   :  { %8573 = vmatpush1.bf16.msra.mxu1 %v8572_v53  ;;  %8319 = vmatprep.subr.bf16.mxu0 %v8318_v25  ;;  %v8338_v53 = vpack.c.bf16 %v672_v48, %v668_v47  ;;  %v667_v25 = vld [vmem:[#allocation5 + $0x740] sm:$0xff]  ;;  %v705_v47 = vld [vmem:[#allocation5 + $0x870] sm:$0xff]  ;;  %v708_v48 = vld [vmem:[#allocation5 + $0x888] sm:$0xff] }
 0x268   :  { %8575 = vmatprep.subr.bf16.mxu1 %v8574_v57  ;;  %v673_v57 = vld [vmem:[#allocation5 + $0x770] sm:$0xff]  ;;  %v8340_v63 = vpack.c.bf16 %v671_v54, %v667_v25  ;;  %v8612_v25 = vpack.c.bf16 %v705_v47, %v701_v44  ;;  %v8358_v54 = vpack.c.bf16 %v712_v49, %v708_v48  ;;  %v743_v44 = vld [vmem:[#allocation5 + $0x9a0] sm:$0xff]  ;;  %v748_v49 = vld [vmem:[#allocation5 + $0x9c8] sm:$0xff] }
 0x269   :  { %v745_v48 = vld [vmem:[#allocation5 + $0x9b0] sm:$0xff] }
 0x26a   :  { %8321 = vmatpush1.bf16.msra.mxu0 %v8320_v0  ;;  %v8596_v0 = vpack.c.bf16 %v673_v57, %v669_v55  ;;  %v707_v55 = vld [vmem:[#allocation5 + $0x880] sm:$0xff]  ;;  %v709_v57 = vld [vmem:[#allocation5 + $0x890] sm:$0xff] }
 0x26b   :  { %8577 = vmatpush1.bf16.msra.mxu1 %v8576_v1  ;;  %8323 = vmatprep.subr.bf16.mxu0 %v8322_v2  ;;  %v8342_v1 = vpack.c.bf16 %v680_v59, %v676_v58  ;;  %v675_v2 = vld [vmem:[#allocation5 + $0x780] sm:$0xff]  ;;  %v713_v59 = vld [vmem:[#allocation5 + $0x8b0] sm:$0xff] }
 0x26c   :  { %8579 = vmatprep.subr.bf16.mxu1 %v8578_v6  ;;  %v681_v6 = vld [vmem:[#allocation5 + $0x7b0] sm:$0xff]  ;;  %v8344_v12 = vpack.c.bf16 %v679_v3, %v675_v2  ;;  %v8362_v2 = vpack.c.bf16 %v720_v62, %v716_v60  ;;  %v715_v3 = vld [vmem:[#allocation5 + $0x8c0] sm:$0xff]  ;;  %v756_v60 = vld [vmem:[#allocation5 + $0xa08] sm:$0xff] }
 0x26d   :  { %v760_v62 = vld [vmem:[#allocation5 + $0xa28] sm:$0xff] }
 0x26e   :  { %8325 = vmatpush1.bf16.msra.mxu0 %v8324_v13  ;;  %v8600_v13 = vpack.c.bf16 %v681_v6, %v677_v4  ;;  %v719_v4 = vld [vmem:[#allocation5 + $0x8e0] sm:$0xff] }
 0x26f   :  { %8581 = vmatpush1.bf16.msra.mxu1 %v8580_v14  ;;  %8327 = vmatprep.subr.bf16.mxu0 %v8326_v15  ;;  %v8346_v14 = vpack.c.bf16 %v688_v8, %v684_v7  ;;  %v683_v15 = vld [vmem:[#allocation5 + $0x7c0] sm:$0xff]  ;;  %v721_v7 = vld [vmem:[#allocation5 + $0x8f0] sm:$0xff]  ;;  %v724_v8 = vld [vmem:[#allocation5 + $0x908] sm:$0xff] }
 0x270   :  { %8583 = vmatprep.subr.bf16.mxu1 %v8582_v19  ;;  %v689_v19 = vld [vmem:[#allocation5 + $0x7f0] sm:$0xff]  ;;  %v8348_v26 = vpack.c.bf16 %v687_v16, %v683_v15  ;;  %v8366_v15 = vpack.c.bf16 %v728_v9, %v724_v8  ;;  %v723_v16 = vld [vmem:[#allocation5 + $0x900] sm:$0xff]  ;;  %v764_v8 = vld [vmem:[#allocation5 + $0xa48] sm:$0xff] }
 0x271   :  { %v768_v9 = vld [vmem:[#allocation5 + $0xa68] sm:$0xff] }
 0x272   :  { %8329 = vmatpush1.bf16.msra.mxu0 %v8328_v27  ;;  %v8604_v27 = vpack.c.bf16 %v689_v19, %v685_v17  ;;  %v727_v17 = vld [vmem:[#allocation5 + $0x920] sm:$0xff] }
 0x273   :  { %8585 = vmatpush1.bf16.msra.mxu1 %v8584_v28  ;;  %8331 = vmatprep.subr.bf16.mxu0 %v8330_v29  ;;  %v8350_v28 = vpack.c.bf16 %v696_v21, %v692_v20  ;;  %v691_v29 = vld [vmem:[#allocation5 + $0x800] sm:$0xff]  ;;  %v729_v20 = vld [vmem:[#allocation5 + $0x930] sm:$0xff]  ;;  %v732_v21 = vld [vmem:[#allocation5 + $0x948] sm:$0xff] }
 0x274   :  { %8587 = vmatprep.subr.bf16.mxu1 %v8586_v33  ;;  %v697_v33 = vld [vmem:[#allocation5 + $0x830] sm:$0xff]  ;;  %v8352_v38 = vpack.c.bf16 %v695_v30, %v691_v29  ;;  %v8370_v29 = vpack.c.bf16 %v736_v23, %v732_v21  ;;  %v731_v30 = vld [vmem:[#allocation5 + $0x940] sm:$0xff]  ;;  %v772_v21 = vld [vmem:[#allocation5 + $0xa88] sm:$0xff] }
 0x275   :  { %v776_v23 = vld [vmem:[#allocation5 + $0xaa8] sm:$0xff] }
 0x276   :  { %8333 = vmatpush1.bf16.msra.mxu0 %v8332_v39  ;;  %v11181_v39 = vld [vmem:[%s12321_s1 + $0x8] sm:$0xff] }
 0x277   :  { %8589 = vmatpush1.bf16.msra.mxu1 %v8588_v40  ;;  %8335 = vmatprep.subr.bf16.mxu0 %v8334_v41  ;;  %v8608_v40 = vpack.c.bf16 %v697_v33, %v693_v31  ;;  %v8354_v41 = vpack.c.bf16 %v704_v35, %v700_v34  ;;  %v735_v31 = vld [vmem:[#allocation5 + $0x960] sm:$0xff]  ;;  %v737_v34 = vld [vmem:[#allocation5 + $0x970] sm:$0xff]  ;;  %v740_v35 = vld [vmem:[#allocation5 + $0x988] sm:$0xff] }
 0x278   :  { %8591 = vmatprep.subr.bf16.mxu1 %v8590_v45  ;;  %v11185_v45 = vrot.slane %v11181_v39, %v11160_v11 }
 0x27a   :  { %8337 = vmatpush1.bf16.msra.mxu0 %v8336_v51  ;;  %v714_v51 = vld [vmem:[#allocation5 + $0x8b8] sm:$0xff] }
 0x27b   :  { %8593 = vmatpush1.bf16.msra.mxu1 %v8592_v52  ;;  %8339 = vmatprep.subr.bf16.mxu0 %v8338_v53  ;;  %v1003_v52 = vcombine.high %v11185_v45, %v11185_v45  ;;  %v8356_v53 = vpack.c.bf16 %v703_v43, %v699_v42  ;;  %v8614_v58 = vpack.c.bf16 %v714_v51, %v710_v50  ;;  %v739_v43 = vld [vmem:[#allocation5 + $0x980] sm:$0xff]  ;;  %v752_v50 = vld [vmem:[#allocation5 + $0x9e8] sm:$0xff]  ;;  %v750_v51 = vld [vmem:[#allocation5 + $0x9d8] sm:$0xff] }
 0x27c   :  { %8595 = vmatprep.subr.bf16.mxu1 %v8594_v56  ;;  %v711_v56 = vld [vmem:[#allocation5 + $0x8a0] sm:$0xff]  ;;  %v8374_v42 = vpack.c.bf16 %v744_v36, %v740_v35  ;;  %v780_v35 = vld [vmem:[#allocation5 + $0xac8] sm:$0xff] }
 0x27d   :  { %v784_v36 = vld [vmem:[#allocation5 + $0xae8] sm:$0xff] }
 0x27e   :  { %8341 = vmatpush1.bf16.msra.mxu0 %v8340_v63  ;;  %v718_v63 = vld [vmem:[#allocation5 + $0x8d8] sm:$0xff] }
 0x27f   :  { %8597 = vmatpush1.bf16.msra.mxu1 %v8596_v0  ;;  %8343 = vmatprep.subr.bf16.mxu0 %v8342_v1  ;;  %v722_v0 = vld [vmem:[#allocation5 + $0x8f8] sm:$0xff]  ;;  %v8360_v1 = vpack.c.bf16 %v711_v56, %v707_v55  ;;  %v747_v55 = vld [vmem:[#allocation5 + $0x9c0] sm:$0xff] }
 0x280   :  { %8599 = vmatprep.subr.bf16.mxu1 %v8598_v5  ;;  %v717_v5 = vld [vmem:[#allocation5 + $0x8d0] sm:$0xff]  ;;  %v8618_v6 = vpack.c.bf16 %v722_v0, %v718_v63  ;;  %v751_v56 = vld [vmem:[#allocation5 + $0x9e0] sm:$0xff]  ;;  %v758_v63 = vld [vmem:[#allocation5 + $0xa18] sm:$0xff] }
 0x281   :  { %v762_v0 = vld [vmem:[#allocation5 + $0xa38] sm:$0xff] }
 0x282   :  { %8345 = vmatpush1.bf16.msra.mxu0 %v8344_v12  ;;  %v730_v12 = vld [vmem:[#allocation5 + $0x938] sm:$0xff] }
 0x283   :  { %8601 = vmatpush1.bf16.msra.mxu1 %v8600_v13  ;;  %8347 = vmatprep.subr.bf16.mxu0 %v8346_v14  ;;  %v8364_v13 = vpack.c.bf16 %v719_v4, %v715_v3  ;;  %v8620_v14 = vpack.c.bf16 %v721_v7, %v717_v5  ;;  %v8622_v19 = vpack.c.bf16 %v730_v12, %v726_v10  ;;  %v755_v3 = vld [vmem:[#allocation5 + $0xa00] sm:$0xff]  ;;  %v757_v5 = vld [vmem:[#allocation5 + $0xa10] sm:$0xff]  ;;  %v766_v10 = vld [vmem:[#allocation5 + $0xa58] sm:$0xff] }
 0x284   :  { %8603 = vmatprep.subr.bf16.mxu1 %v8602_v18  ;;  %v725_v18 = vld [vmem:[#allocation5 + $0x910] sm:$0xff]  ;;  %v759_v4 = vld [vmem:[#allocation5 + $0xa20] sm:$0xff]  ;;  %v770_v12 = vld [vmem:[#allocation5 + $0xa78] sm:$0xff] }
 0x285   :  { %v761_v7 = vld [vmem:[#allocation5 + $0xa30] sm:$0xff] }
 0x286   :  { %8349 = vmatpush1.bf16.msra.mxu0 %v8348_v26  ;;  %v738_v26 = vld [vmem:[#allocation5 + $0x978] sm:$0xff] }
 0x287   :  { %8605 = vmatpush1.bf16.msra.mxu1 %v8604_v27  ;;  %8351 = vmatprep.subr.bf16.mxu0 %v8350_v28  ;;  %v8368_v27 = vpack.c.bf16 %v727_v17, %v723_v16  ;;  %v8624_v28 = vpack.c.bf16 %v729_v20, %v725_v18  ;;  %v8626_v33 = vpack.c.bf16 %v738_v26, %v734_v24  ;;  %v763_v16 = vld [vmem:[#allocation5 + $0xa40] sm:$0xff]  ;;  %v765_v18 = vld [vmem:[#allocation5 + $0xa50] sm:$0xff]  ;;  %v774_v24 = vld [vmem:[#allocation5 + $0xa98] sm:$0xff] }
 0x288   :  { %8607 = vmatprep.subr.bf16.mxu1 %v8606_v32  ;;  %v733_v32 = vld [vmem:[#allocation5 + $0x950] sm:$0xff]  ;;  %v767_v17 = vld [vmem:[#allocation5 + $0xa60] sm:$0xff]  ;;  %v778_v26 = vld [vmem:[#allocation5 + $0xab8] sm:$0xff] }
 0x289   :  { %1149 = vmatmul.mubr.f32.vlgmr.msra.gmra.mrb[0].mxu0 %v11174_v22  ;;  %v769_v20 = vld [vmem:[#allocation5 + $0xa70] sm:$0xff] }
 0x28a   :  { %8353 = vmatpush1.bf16.msra.mxu0 %v8352_v38  ;;  %1433 = vmatmul.mubr.f32.vlgmr.msra.gmra.mrb[0].mxu1 %v11174_v22  ;;  %v8616_v22 = vpack.c.bf16 %v713_v59, %v709_v57  ;;  %v746_v38 = vld [vmem:[#allocation5 + $0x9b8] sm:$0xff]  ;;  %v749_v57 = vld [vmem:[#allocation5 + $0x9d0] sm:$0xff] }
 0x28b   :  { %8609 = vmatpush1.bf16.msra.mxu1 %v8608_v40  ;;  %8355 = vmatprep.subr.bf16.mxu0 %v8354_v41  ;;  %v8372_v40 = vpack.c.bf16 %v735_v31, %v731_v30  ;;  %v8628_v41 = vpack.c.bf16 %v737_v34, %v733_v32  ;;  %v8630_v47 = vpack.c.bf16 %v746_v38, %v742_v37  ;;  %v753_v59 = vld [vmem:[#allocation5 + $0x9f0] sm:$0xff]  ;;  %v771_v30 = vld [vmem:[#allocation5 + $0xa80] sm:$0xff]  ;;  %v782_v37 = vld [vmem:[#allocation5 + $0xad8] sm:$0xff] }
 0x28c   :  { %8611 = vmatprep.subr.bf16.mxu1 %v8610_v46  ;;  %1219 = vmatprep.mubr.f32.mxu0 %v1003_v52  ;;  %v741_v46 = vld [vmem:[#allocation5 + $0x990] sm:$0xff]  ;;  %v775_v31 = vld [vmem:[#allocation5 + $0xaa0] sm:$0xff]  ;;  %v786_v38 = vld [vmem:[#allocation5 + $0xaf8] sm:$0xff] }
 0x28d   :  { %1503 = vmatprep.mubr.f32.mxu1 %v1003_v52  ;;  %v754_v52 = vld [vmem:[#allocation5 + $0x9f8] sm:$0xff]  ;;  %v773_v32 = vld [vmem:[#allocation5 + $0xa90] sm:$0xff] }
 0x28e   :  { %8357 = vmatpush1.bf16.msra.mxu0 %v8356_v53  ;;  %v8376_v53 = vpack.c.bf16 %v743_v44, %v739_v43  ;;  %v777_v34 = vld [vmem:[#allocation5 + $0xab0] sm:$0xff]  ;;  %v779_v43 = vld [vmem:[#allocation5 + $0xac0] sm:$0xff] }
 0x28f   :  { %8613 = vmatpush1.bf16.msra.mxu1 %v8612_v25  ;;  %8359 = vmatprep.subr.bf16.mxu0 %v8358_v54  ;;  %v8632_v25 = vpack.c.bf16 %v745_v48, %v741_v46  ;;  %v8378_v54 = vpack.c.bf16 %v752_v50, %v748_v49  ;;  %v783_v44 = vld [vmem:[#allocation5 + $0xae0] sm:$0xff]  ;;  %v781_v46 = vld [vmem:[#allocation5 + $0xad0] sm:$0xff]  ;;  %v788_v49 = vld [vmem:[#allocation5 + $0xb08] sm:$0xff] }
 0x290   :  { %8615 = vmatprep.subr.bf16.mxu1 %v8614_v58  ;;  %v8634_v58 = vpack.c.bf16 %v754_v52, %v750_v51  ;;  %v785_v48 = vld [vmem:[#allocation5 + $0xaf0] sm:$0xff]  ;;  %v792_v50 = vld [vmem:[#allocation5 + $0xb28] sm:$0xff]  ;;  %v790_v51 = vld [vmem:[#allocation5 + $0xb18] sm:$0xff] }
 0x291   :  { %v794_v52 = vld [vmem:[#allocation5 + $0xb38] sm:$0xff] }
 0x292   :  { %8361 = vmatpush1.bf16.msra.mxu0 %v8360_v1  ;;  %v8380_v1 = vpack.c.bf16 %v751_v56, %v747_v55  ;;  %v787_v55 = vld [vmem:[#allocation5 + $0xb00] sm:$0xff] }
 0x293   :  { %8617 = vmatpush1.bf16.msra.mxu1 %v8616_v22  ;;  %8363 = vmatprep.subr.bf16.mxu0 %v8362_v2  ;;  %v8636_v22 = vpack.c.bf16 %v753_v59, %v749_v57  ;;  %v8382_v2 = vpack.c.bf16 %v760_v62, %v756_v60  ;;  %v791_v56 = vld [vmem:[#allocation5 + $0xb20] sm:$0xff]  ;;  %v789_v57 = vld [vmem:[#allocation5 + $0xb10] sm:$0xff]  ;;  %v796_v60 = vld [vmem:[#allocation5 + $0xb48] sm:$0xff] }
 0x294   :  { %8619 = vmatprep.subr.bf16.mxu1 %v8618_v6  ;;  %v8638_v6 = vpack.c.bf16 %v762_v0, %v758_v63  ;;  %v793_v59 = vld [vmem:[#allocation5 + $0xb30] sm:$0xff]  ;;  %v800_v62 = vld [vmem:[#allocation5 + $0xb68] sm:$0xff]  ;;  %v798_v63 = vld [vmem:[#allocation5 + $0xb58] sm:$0xff] }
 0x295   :  { %v802_v0 = vld [vmem:[#allocation5 + $0xb78] sm:$0xff] }
 0x296   :  { %8365 = vmatpush1.bf16.msra.mxu0 %v8364_v13  ;;  %v8384_v13 = vpack.c.bf16 %v759_v4, %v755_v3  ;;  %v795_v3 = vld [vmem:[#allocation5 + $0xb40] sm:$0xff] }
 0x297   :  { %8621 = vmatpush1.bf16.msra.mxu1 %v8620_v14  ;;  %8367 = vmatprep.subr.bf16.mxu0 %v8366_v15  ;;  %v8640_v14 = vpack.c.bf16 %v761_v7, %v757_v5  ;;  %v8386_v15 = vpack.c.bf16 %v768_v9, %v764_v8  ;;  %v799_v4 = vld [vmem:[#allocation5 + $0xb60] sm:$0xff]  ;;  %v797_v5 = vld [vmem:[#allocation5 + $0xb50] sm:$0xff]  ;;  %v804_v8 = vld [vmem:[#allocation5 + $0xb88] sm:$0xff] }
 0x298   :  { %8623 = vmatprep.subr.bf16.mxu1 %v8622_v19  ;;  %v8642_v19 = vpack.c.bf16 %v770_v12, %v766_v10  ;;  %v801_v7 = vld [vmem:[#allocation5 + $0xb70] sm:$0xff]  ;;  %v808_v9 = vld [vmem:[#allocation5 + $0xba8] sm:$0xff]  ;;  %v806_v10 = vld [vmem:[#allocation5 + $0xb98] sm:$0xff] }
 0x299   :  { %v810_v12 = vld [vmem:[#allocation5 + $0xbb8] sm:$0xff] }
 0x29a   :  { %8369 = vmatpush1.bf16.msra.mxu0 %v8368_v27  ;;  %v8388_v27 = vpack.c.bf16 %v767_v17, %v763_v16  ;;  %v803_v16 = vld [vmem:[#allocation5 + $0xb80] sm:$0xff] }
 0x29b   :  { %8625 = vmatpush1.bf16.msra.mxu1 %v8624_v28  ;;  %8371 = vmatprep.subr.bf16.mxu0 %v8370_v29  ;;  %v8644_v28 = vpack.c.bf16 %v769_v20, %v765_v18  ;;  %v8390_v29 = vpack.c.bf16 %v776_v23, %v772_v21  ;;  %v807_v17 = vld [vmem:[#allocation5 + $0xba0] sm:$0xff]  ;;  %v805_v18 = vld [vmem:[#allocation5 + $0xb90] sm:$0xff]  ;;  %v812_v21 = vld [vmem:[#allocation5 + $0xbc8] sm:$0xff] }
 0x29c   :  { %8627 = vmatprep.subr.bf16.mxu1 %v8626_v33  ;;  %v8646_v33 = vpack.c.bf16 %v778_v26, %v774_v24  ;;  %v809_v20 = vld [vmem:[#allocation5 + $0xbb0] sm:$0xff]  ;;  %v816_v23 = vld [vmem:[#allocation5 + $0xbe8] sm:$0xff]  ;;  %v814_v24 = vld [vmem:[#allocation5 + $0xbd8] sm:$0xff] }
 0x29d   :  { %v818_v26 = vld [vmem:[#allocation5 + $0xbf8] sm:$0xff] }
 0x29e   :  { %8373 = vmatpush1.bf16.msra.mxu0 %v8372_v40  ;;  %v8392_v40 = vpack.c.bf16 %v775_v31, %v771_v30  ;;  %v811_v30 = vld [vmem:[#allocation5 + $0xbc0] sm:$0xff] }
 0x29f   :  { %8629 = vmatpush1.bf16.msra.mxu1 %v8628_v41  ;;  %8375 = vmatprep.subr.bf16.mxu0 %v8374_v42  ;;  %v8648_v41 = vpack.c.bf16 %v777_v34, %v773_v32  ;;  %v8394_v42 = vpack.c.bf16 %v784_v36, %v780_v35  ;;  %v815_v31 = vld [vmem:[#allocation5 + $0xbe0] sm:$0xff]  ;;  %v813_v32 = vld [vmem:[#allocation5 + $0xbd0] sm:$0xff]  ;;  %v820_v35 = vld [vmem:[#allocation5 + $0xc08] sm:$0xff] }
 0x2a0   :  { %8631 = vmatprep.subr.bf16.mxu1 %v8630_v47  ;;  %v8650_v47 = vpack.c.bf16 %v786_v38, %v782_v37  ;;  %v817_v34 = vld [vmem:[#allocation5 + $0xbf0] sm:$0xff]  ;;  %v824_v36 = vld [vmem:[#allocation5 + $0xc28] sm:$0xff]  ;;  %v988_v37 = vcombine.high %v11181_v39, %v11181_v39  ;;  %v822_v38 = vld [vmem:[#allocation5 + $0xc18] sm:$0xff] }
 0x2a1   :  { %v830_v39 = vld [vmem:[#allocation5 + $0xc58] sm:$0xff] }
 0x2a2   :  { %8377 = vmatpush1.bf16.msra.mxu0 %v8376_v53  ;;  %v8396_v53 = vpack.c.bf16 %v783_v44, %v779_v43  ;;  %v8414_v43 = vpack.c.bf16 %v824_v36, %v820_v35  ;;  %v819_v44 = vld [vmem:[#allocation5 + $0xc00] sm:$0xff]  ;;  %v857_v35 = vld [vmem:[#allocation5 + $0xd30] sm:$0xff]  ;;  %v860_v36 = vld [vmem:[#allocation5 + $0xd48] sm:$0xff] }
 0x2a3   :  { %8633 = vmatpush1.bf16.msra.mxu1 %v8632_v25  ;;  %8379 = vmatprep.subr.bf16.mxu0 %v8378_v54  ;;  %v8652_v25 = vpack.c.bf16 %v785_v48, %v781_v46  ;;  %v8398_v54 = vpack.c.bf16 %v792_v50, %v788_v49  ;;  %v823_v46 = vld [vmem:[#allocation5 + $0xc20] sm:$0xff]  ;;  %v825_v49 = vld [vmem:[#allocation5 + $0xc30] sm:$0xff]  ;;  %v828_v50 = vld [vmem:[#allocation5 + $0xc48] sm:$0xff] }
 0x2a4   :  { %8635 = vmatprep.subr.bf16.mxu1 %v8634_v58  ;;  %v8654_v58 = vpack.c.bf16 %v794_v52, %v790_v51  ;;  %v832_v51 = vld [vmem:[#allocation5 + $0xc68] sm:$0xff]  ;;  %v11194_v52 = vrot.slane %v988_v37, %v11160_v11 }
 0x2a5   :  { %v864_v37 = vld [vmem:[#allocation5 + $0xd68] sm:$0xff] }
 0x2a6   :  { %8381 = vmatpush1.bf16.msra.mxu0 %v8380_v1  ;;  %v8400_v1 = vpack.c.bf16 %v791_v56, %v787_v55  ;;  %v8418_v55 = vpack.c.bf16 %v832_v51, %v828_v50  ;;  %v827_v56 = vld [vmem:[#allocation5 + $0xc40] sm:$0xff]  ;;  %v868_v50 = vld [vmem:[#allocation5 + $0xd88] sm:$0xff] }
 0x2a7   :  { %8637 = vmatpush1.bf16.msra.mxu1 %v8636_v22  ;;  %8383 = vmatprep.subr.bf16.mxu0 %v8382_v2  ;;  %v8656_v22 = vpack.c.bf16 %v793_v59, %v789_v57  ;;  %v8402_v2 = vpack.c.bf16 %v800_v62, %v796_v60  ;;  %v831_v57 = vld [vmem:[#allocation5 + $0xc60] sm:$0xff]  ;;  %v833_v60 = vld [vmem:[#allocation5 + $0xc70] sm:$0xff]  ;;  %v836_v62 = vld [vmem:[#allocation5 + $0xc88] sm:$0xff] }
 0x2a8   :  { %8639 = vmatprep.subr.bf16.mxu1 %v8638_v6  ;;  %v8658_v6 = vpack.c.bf16 %v802_v0, %v798_v63  ;;  %v840_v63 = vld [vmem:[#allocation5 + $0xca8] sm:$0xff]  ;;  %v1004_v0 = vcombine.high %v11194_v52, %v11194_v52 }
 0x2a9   :  { %v872_v51 = vld [vmem:[#allocation5 + $0xda8] sm:$0xff] }
 0x2aa   :  { %8385 = vmatpush1.bf16.msra.mxu0 %v8384_v13  ;;  %v8404_v13 = vpack.c.bf16 %v799_v4, %v795_v3  ;;  %v8422_v4 = vpack.c.bf16 %v840_v63, %v836_v62  ;;  %v876_v62 = vld [vmem:[#allocation5 + $0xdc8] sm:$0xff] }
 0x2ab   :  { %8641 = vmatpush1.bf16.msra.mxu1 %v8640_v14  ;;  %8387 = vmatprep.subr.bf16.mxu0 %v8386_v15  ;;  %v8660_v14 = vpack.c.bf16 %v801_v7, %v797_v5  ;;  %v8406_v15 = vpack.c.bf16 %v808_v9, %v804_v8  ;;  %v835_v5 = vld [vmem:[#allocation5 + $0xc80] sm:$0xff]  ;;  %v837_v7 = vld [vmem:[#allocation5 + $0xc90] sm:$0xff]  ;;  %v880_v63 = vld [vmem:[#allocation5 + $0xde8] sm:$0xff] }
 0x2ac   :  { %8643 = vmatprep.subr.bf16.mxu1 %v8642_v19  ;;  %v8662_v19 = vpack.c.bf16 %v810_v12, %v806_v10  ;;  %v841_v9 = vld [vmem:[#allocation5 + $0xcb0] sm:$0xff]  ;;  %v844_v10 = vld [vmem:[#allocation5 + $0xcc8] sm:$0xff] }
 0x2ad   :  { %v848_v12 = vld [vmem:[#allocation5 + $0xce8] sm:$0xff] }
 0x2ae   :  { %8389 = vmatpush1.bf16.msra.mxu0 %v8388_v27  ;;  %v8408_v27 = vpack.c.bf16 %v807_v17, %v803_v16  ;;  %v8426_v16 = vpack.c.bf16 %v848_v12, %v844_v10  ;;  %v843_v17 = vld [vmem:[#allocation5 + $0xcc0] sm:$0xff]  ;;  %v888_v10 = vld [vmem:[#allocation5 + $0xe28] sm:$0xff]  ;;  %v886_v12 = vld [vmem:[#allocation5 + $0xe18] sm:$0xff] }
 0x2af   :  { %8645 = vmatpush1.bf16.msra.mxu1 %v8644_v28  ;;  %8391 = vmatprep.subr.bf16.mxu0 %v8390_v29  ;;  %v8664_v28 = vpack.c.bf16 %v809_v20, %v805_v18  ;;  %v8410_v29 = vpack.c.bf16 %v816_v23, %v812_v21  ;;  %v847_v18 = vld [vmem:[#allocation5 + $0xce0] sm:$0xff]  ;;  %v849_v21 = vld [vmem:[#allocation5 + $0xcf0] sm:$0xff]  ;;  %v852_v23 = vld [vmem:[#allocation5 + $0xd08] sm:$0xff] }
 0x2b0   :  { %8647 = vmatprep.subr.bf16.mxu1 %v8646_v33  ;;  %v8666_v33 = vpack.c.bf16 %v818_v26, %v814_v24  ;;  %v856_v24 = vld [vmem:[#allocation5 + $0xd28] sm:$0xff]  ;;  %v854_v26 = vld [vmem:[#allocation5 + $0xd18] sm:$0xff] }
 0x2b2   :  { %8393 = vmatpush1.bf16.msra.mxu0 %v8392_v40  ;;  %v826_v40 = vld [vmem:[#allocation5 + $0xc38] sm:$0xff] }
 0x2b3   :  { %8649 = vmatpush1.bf16.msra.mxu1 %v8648_v41  ;;  %8395 = vmatprep.subr.bf16.mxu0 %v8394_v42  ;;  %v8412_v41 = vpack.c.bf16 %v815_v31, %v811_v30  ;;  %v8668_v42 = vpack.c.bf16 %v817_v34, %v813_v32  ;;  %v8670_v48 = vpack.c.bf16 %v826_v40, %v822_v38  ;;  %v851_v31 = vld [vmem:[#allocation5 + $0xd00] sm:$0xff]  ;;  %v862_v38 = vld [vmem:[#allocation5 + $0xd58] sm:$0xff] }
 0x2b4   :  { %8651 = vmatprep.subr.bf16.mxu1 %v8650_v47  ;;  %v821_v47 = vld [vmem:[#allocation5 + $0xc10] sm:$0xff]  ;;  %v8430_v30 = vpack.c.bf16 %v856_v24, %v852_v23  ;;  %v855_v32 = vld [vmem:[#allocation5 + $0xd20] sm:$0xff]  ;;  %v866_v40 = vld [vmem:[#allocation5 + $0xd78] sm:$0xff] }
 0x2b5   :  { %v896_v23 = vld [vmem:[#allocation5 + $0xe68] sm:$0xff]  ;;  %v894_v24 = vld [vmem:[#allocation5 + $0xe58] sm:$0xff] }
 0x2b6   :  { %8397 = vmatpush1.bf16.msra.mxu0 %v8396_v53  ;;  %v834_v53 = vld [vmem:[#allocation5 + $0xc78] sm:$0xff] }
 0x2b7   :  { %8653 = vmatpush1.bf16.msra.mxu1 %v8652_v25  ;;  %8399 = vmatprep.subr.bf16.mxu0 %v8398_v54  ;;  %v8416_v25 = vpack.c.bf16 %v823_v46, %v819_v44  ;;  %v8672_v54 = vpack.c.bf16 %v825_v49, %v821_v47  ;;  %v8674_v59 = vpack.c.bf16 %v834_v53, %v830_v39  ;;  %v859_v44 = vld [vmem:[#allocation5 + $0xd40] sm:$0xff]  ;;  %v861_v47 = vld [vmem:[#allocation5 + $0xd50] sm:$0xff]  ;;  %v870_v39 = vld [vmem:[#allocation5 + $0xd98] sm:$0xff] }
 0x2b8   :  { %8655 = vmatprep.subr.bf16.mxu1 %v8654_v58  ;;  %v829_v58 = vld [vmem:[#allocation5 + $0xc50] sm:$0xff]  ;;  %v863_v46 = vld [vmem:[#allocation5 + $0xd60] sm:$0xff]  ;;  %v874_v53 = vld [vmem:[#allocation5 + $0xdb8] sm:$0xff] }
 0x2b9   :  { %v8676_v3 = vpack.c.bf16 %v833_v60, %v829_v58  ;;  %v865_v49 = vld [vmem:[#allocation5 + $0xd70] sm:$0xff] }
 0x2ba   :  { %8401 = vmatpush1.bf16.msra.mxu0 %v8400_v1  ;;  %v838_v1 = vld [vmem:[#allocation5 + $0xc98] sm:$0xff]  ;;  %v869_v58 = vld [vmem:[#allocation5 + $0xd90] sm:$0xff] }
 0x2bb   :  { %8657 = vmatpush1.bf16.msra.mxu1 %v8656_v22  ;;  %8403 = vmatprep.subr.bf16.mxu0 %v8402_v2  ;;  %v842_v22 = vld [vmem:[#allocation5 + $0xcb8] sm:$0xff]  ;;  %v8420_v2 = vpack.c.bf16 %v831_v57, %v827_v56  ;;  %v867_v56 = vld [vmem:[#allocation5 + $0xd80] sm:$0xff]  ;;  %v873_v60 = vld [vmem:[#allocation5 + $0xdb0] sm:$0xff] }
 0x2bc   :  { %8659 = vmatprep.subr.bf16.mxu1 %v8658_v6  ;;  %v839_v6 = vld [vmem:[#allocation5 + $0xca0] sm:$0xff]  ;;  %v8678_v8 = vpack.c.bf16 %v842_v22, %v838_v1  ;;  %v882_v1 = vld [vmem:[#allocation5 + $0xdf8] sm:$0xff] }
 0x2bd   :  { %v871_v57 = vld [vmem:[#allocation5 + $0xda0] sm:$0xff] }
 0x2be   :  { %8405 = vmatpush1.bf16.msra.mxu0 %v8404_v13  ;;  %v846_v13 = vld [vmem:[#allocation5 + $0xcd8] sm:$0xff]  ;;  %v8440_v22 = vpack.c.bf16 %v871_v57, %v867_v56  ;;  %v911_v56 = vld [vmem:[#allocation5 + $0xee0] sm:$0xff]  ;;  %v909_v57 = vld [vmem:[#allocation5 + $0xed0] sm:$0xff] }
 0x2bf   :  { %8661 = vmatpush1.bf16.msra.mxu1 %v8660_v14  ;;  %8407 = vmatprep.subr.bf16.mxu0 %v8406_v15  ;;  %v850_v14 = vld [vmem:[#allocation5 + $0xcf8] sm:$0xff]  ;;  %v8424_v15 = vpack.c.bf16 %v839_v6, %v835_v5  ;;  %v879_v5 = vld [vmem:[#allocation5 + $0xde0] sm:$0xff]  ;;  %v877_v6 = vld [vmem:[#allocation5 + $0xdd0] sm:$0xff] }
 0x2c0   :  { %8663 = vmatprep.subr.bf16.mxu1 %v8662_v19  ;;  %v845_v19 = vld [vmem:[#allocation5 + $0xcd0] sm:$0xff]  ;;  %v8682_v20 = vpack.c.bf16 %v850_v14, %v846_v13  ;;  %v890_v13 = vld [vmem:[#allocation5 + $0xe38] sm:$0xff] }
 0x2c2   :  { %8409 = vmatpush1.bf16.msra.mxu0 %v8408_v27  ;;  %v858_v27 = vld [vmem:[#allocation5 + $0xd38] sm:$0xff] }
 0x2c3   :  { %8665 = vmatpush1.bf16.msra.mxu1 %v8664_v28  ;;  %8411 = vmatprep.subr.bf16.mxu0 %v8410_v29  ;;  %v8428_v28 = vpack.c.bf16 %v847_v18, %v843_v17  ;;  %v8684_v29 = vpack.c.bf16 %v849_v21, %v845_v19  ;;  %v8686_v34 = vpack.c.bf16 %v858_v27, %v854_v26  ;;  %v887_v17 = vld [vmem:[#allocation5 + $0xe20] sm:$0xff]  ;;  %v885_v18 = vld [vmem:[#allocation5 + $0xe10] sm:$0xff]  ;;  %v892_v21 = vld [vmem:[#allocation5 + $0xe48] sm:$0xff] }
 0x2c4   :  { %8667 = vmatprep.subr.bf16.mxu1 %v8666_v33  ;;  %v853_v33 = vld [vmem:[#allocation5 + $0xd10] sm:$0xff]  ;;  %v8702_v19 = vpack.c.bf16 %v890_v13, %v886_v12  ;;  %v898_v26 = vld [vmem:[#allocation5 + $0xe78] sm:$0xff] }
 0x2c5   :  { %v930_v12 = vld [vmem:[#allocation5 + $0xf78] sm:$0xff] }
 0x2c6   :  { %8413 = vmatpush1.bf16.msra.mxu0 %v8412_v41  ;;  %v8432_v41 = vpack.c.bf16 %v855_v32, %v851_v31  ;;  %v895_v31 = vld [vmem:[#allocation5 + $0xe60] sm:$0xff]  ;;  %v893_v32 = vld [vmem:[#allocation5 + $0xe50] sm:$0xff] }
 0x2c7   :  { %8669 = vmatpush1.bf16.msra.mxu1 %v8668_v42  ;;  %8415 = vmatprep.subr.bf16.mxu0 %v8414_v43  ;;  %v8688_v42 = vpack.c.bf16 %v857_v35, %v853_v33  ;;  %v8434_v43 = vpack.c.bf16 %v864_v37, %v860_v36  ;;  %v8706_v33 = vpack.c.bf16 %v898_v26, %v894_v24  ;;  %v900_v35 = vld [vmem:[#allocation5 + $0xe88] sm:$0xff]  ;;  %v902_v37 = vld [vmem:[#allocation5 + $0xe98] sm:$0xff] }
 0x2c8   :  { %8671 = vmatprep.subr.bf16.mxu1 %v8670_v48  ;;  %v8690_v48 = vpack.c.bf16 %v866_v40, %v862_v38  ;;  %v904_v36 = vld [vmem:[#allocation5 + $0xea8] sm:$0xff]  ;;  %v906_v38 = vld [vmem:[#allocation5 + $0xeb8] sm:$0xff] }
 0x2c9   :  { %1220 = vmatmul.mubr.f32.vlgmr.msra.gmra.mrb[0].mxu0 %v11185_v45  ;;  %v938_v24 = vld [vmem:[#allocation5 + $0xfb8] sm:$0xff] }
 0x2ca   :  { %8417 = vmatpush1.bf16.msra.mxu0 %v8416_v25  ;;  %1504 = vmatmul.mubr.f32.vlgmr.msra.gmra.mrb[0].mxu1 %v11185_v45  ;;  %v8680_v45 = vpack.c.bf16 %v841_v9, %v837_v7  ;;  %v8436_v25 = vpack.c.bf16 %v863_v46, %v859_v44  ;;  %v884_v9 = vld [vmem:[#allocation5 + $0xe08] sm:$0xff]  ;;  %v903_v44 = vld [vmem:[#allocation5 + $0xea0] sm:$0xff]  ;;  %v901_v46 = vld [vmem:[#allocation5 + $0xe90] sm:$0xff] }
 0x2cb   :  { %8673 = vmatpush1.bf16.msra.mxu1 %v8672_v54  ;;  %8419 = vmatprep.subr.bf16.mxu0 %v8418_v55  ;;  %v8692_v54 = vpack.c.bf16 %v865_v49, %v861_v47  ;;  %v8438_v55 = vpack.c.bf16 %v872_v51, %v868_v50  ;;  %v8710_v47 = vpack.c.bf16 %v906_v38, %v902_v37  ;;  %v908_v49 = vld [vmem:[#allocation5 + $0xec8] sm:$0xff]  ;;  %v910_v51 = vld [vmem:[#allocation5 + $0xed8] sm:$0xff] }
 0x2cc   :  { %8675 = vmatprep.subr.bf16.mxu1 %v8674_v59  ;;  %1290 = vmatprep.mubr.f32.mxu0 %v1004_v0  ;;  %v8694_v59 = vpack.c.bf16 %v874_v53, %v870_v39  ;;  %v912_v50 = vld [vmem:[#allocation5 + $0xee8] sm:$0xff]  ;;  %v914_v39 = vld [vmem:[#allocation5 + $0xef8] sm:$0xff] }
 0x2cd   :  { %1574 = vmatprep.mubr.f32.mxu1 %v1004_v0  ;;  %v878_v0 = vld [vmem:[#allocation5 + $0xdd8] sm:$0xff] }
 0x2ce   :  { %8421 = vmatpush1.bf16.msra.mxu0 %v8420_v2  ;;  %v8696_v2 = vpack.c.bf16 %v873_v60, %v869_v58  ;;  %v8698_v7 = vpack.c.bf16 %v882_v1, %v878_v0  ;;  %v8714_v58 = vpack.c.bf16 %v914_v39, %v910_v51  ;;  %v916_v60 = vld [vmem:[#allocation5 + $0xf08] sm:$0xff]  ;;  %v922_v0 = vld [vmem:[#allocation5 + $0xf38] sm:$0xff] }
 0x2cf   :  { %8677 = vmatpush1.bf16.msra.mxu1 %v8676_v3  ;;  %8423 = vmatprep.subr.bf16.mxu0 %v8422_v4  ;;  %v8442_v3 = vpack.c.bf16 %v880_v63, %v876_v62  ;;  %v875_v4 = vld [vmem:[#allocation5 + $0xdc0] sm:$0xff]  ;;  %v920_v62 = vld [vmem:[#allocation5 + $0xf28] sm:$0xff]  ;;  %v918_v63 = vld [vmem:[#allocation5 + $0xf18] sm:$0xff] }
 0x2d0   :  { %8679 = vmatprep.subr.bf16.mxu1 %v8678_v8  ;;  %v881_v8 = vld [vmem:[#allocation5 + $0xdf0] sm:$0xff]  ;;  %v8444_v14 = vpack.c.bf16 %v879_v5, %v875_v4  ;;  %v919_v4 = vld [vmem:[#allocation5 + $0xf20] sm:$0xff]  ;;  %v946_v37 = vld [vmem:[#allocation5 + $0xff8] sm:$0xff] }
 0x2d1   :  { %v917_v5 = vld [vmem:[#allocation5 + $0xf10] sm:$0xff] }
 0x2d2   :  { %8425 = vmatpush1.bf16.msra.mxu0 %v8424_v15  ;;  %v8700_v15 = vpack.c.bf16 %v881_v8, %v877_v6  ;;  %v8718_v6 = vpack.c.bf16 %v922_v0, %v918_v63  ;;  %v924_v8 = vld [vmem:[#allocation5 + $0xf48] sm:$0xff] }
 0x2d3   :  { %8681 = vmatpush1.bf16.msra.mxu1 %v8680_v45  ;;  %8427 = vmatprep.subr.bf16.mxu0 %v8426_v16  ;;  %v8446_v45 = vpack.c.bf16 %v888_v10, %v884_v9  ;;  %v883_v16 = vld [vmem:[#allocation5 + $0xe00] sm:$0xff]  ;;  %v928_v9 = vld [vmem:[#allocation5 + $0xf68] sm:$0xff]  ;;  %v926_v10 = vld [vmem:[#allocation5 + $0xf58] sm:$0xff] }
 0x2d4   :  { %8683 = vmatprep.subr.bf16.mxu1 %v8682_v20  ;;  %v889_v20 = vld [vmem:[#allocation5 + $0xe30] sm:$0xff]  ;;  %v8448_v27 = vpack.c.bf16 %v887_v17, %v883_v16  ;;  %v927_v16 = vld [vmem:[#allocation5 + $0xf60] sm:$0xff] }
 0x2d5   :  { %v925_v17 = vld [vmem:[#allocation5 + $0xf50] sm:$0xff] }
 0x2d6   :  { %8429 = vmatpush1.bf16.msra.mxu0 %v8428_v28  ;;  %v8704_v28 = vpack.c.bf16 %v889_v20, %v885_v18  ;;  %v8722_v18 = vpack.c.bf16 %v930_v12, %v926_v10  ;;  %v932_v20 = vld [vmem:[#allocation5 + $0xf88] sm:$0xff]  ;;  %v1601_v12 = vld [vmem:[%s12322_s21 + $0x80] sm:$0xff] }
 0x2d7   :  { %8685 = vmatpush1.bf16.msra.mxu1 %v8684_v29  ;;  %8431 = vmatprep.subr.bf16.mxu0 %v8430_v30  ;;  %v8450_v29 = vpack.c.bf16 %v896_v23, %v892_v21  ;;  %v891_v30 = vld [vmem:[#allocation5 + $0xe40] sm:$0xff]  ;;  %v936_v21 = vld [vmem:[#allocation5 + $0xfa8] sm:$0xff]  ;;  %v934_v23 = vld [vmem:[#allocation5 + $0xf98] sm:$0xff] }
 0x2d8   :  { %8687 = vmatprep.subr.bf16.mxu1 %v8686_v34  ;;  %v897_v34 = vld [vmem:[#allocation5 + $0xe70] sm:$0xff]  ;;  %v8452_v40 = vpack.c.bf16 %v895_v31, %v891_v30  ;;  %v935_v30 = vld [vmem:[#allocation5 + $0xfa0] sm:$0xff] }
 0x2d9   :  { %v933_v31 = vld [vmem:[#allocation5 + $0xf90] sm:$0xff] }
 0x2da   :  { %8433 = vmatpush1.bf16.msra.mxu0 %v8432_v41  ;;  %v8708_v41 = vpack.c.bf16 %v897_v34, %v893_v32  ;;  %v8726_v32 = vpack.c.bf16 %v938_v24, %v934_v23  ;;  %v940_v34 = vld [vmem:[#allocation5 + $0xfc8] sm:$0xff]  ;;  %v1609_v24 = vld [vmem:[%s12322_s21 + $0xc0] sm:$0xff] }
 0x2db   :  { %8689 = vmatpush1.bf16.msra.mxu1 %v8688_v42  ;;  %8435 = vmatprep.subr.bf16.mxu0 %v8434_v43  ;;  %v8454_v42 = vpack.c.bf16 %v904_v36, %v900_v35  ;;  %v899_v43 = vld [vmem:[#allocation5 + $0xe80] sm:$0xff]  ;;  %v944_v35 = vld [vmem:[#allocation5 + $0xfe8] sm:$0xff]  ;;  %v942_v36 = vld [vmem:[#allocation5 + $0xfd8] sm:$0xff] }
 0x2dc   :  { %8691 = vmatprep.subr.bf16.mxu1 %v8690_v48  ;;  %v905_v48 = vld [vmem:[#allocation5 + $0xeb0] sm:$0xff]  ;;  %v8456_v53 = vpack.c.bf16 %v903_v44, %v899_v43  ;;  %v943_v43 = vld [vmem:[#allocation5 + $0xfe0] sm:$0xff] }
 0x2dd   :  { %v941_v44 = vld [vmem:[#allocation5 + $0xfd0] sm:$0xff] }
 0x2de   :  { %8437 = vmatpush1.bf16.msra.mxu0 %v8436_v25  ;;  %v8712_v25 = vpack.c.bf16 %v905_v48, %v901_v46  ;;  %v8730_v46 = vpack.c.bf16 %v946_v37, %v942_v36  ;;  %v1586_v48 = vld [vmem:[%s12322_s21 + $0x8] sm:$0xff]  ;;  %v1617_v37 = vld [vmem:[%s12322_s21 + $0x100] sm:$0xff] }
 0x2df   :  { %8693 = vmatpush1.bf16.msra.mxu1 %v8692_v54  ;;  %8439 = vmatprep.subr.bf16.mxu0 %v8438_v55  ;;  %v8458_v54 = vpack.c.bf16 %v912_v50, %v908_v49  ;;  %v907_v55 = vld [vmem:[#allocation5 + $0xec0] sm:$0xff]  ;;  %v1588_v49 = vld [vmem:[%s12322_s21 + $0x18] sm:$0xff] }
 0x2e0   :  { %8695 = vmatprep.subr.bf16.mxu1 %v8694_v59  ;;  %v913_v59 = vld [vmem:[#allocation5 + $0xef0] sm:$0xff]  ;;  %v8460_v1 = vpack.c.bf16 %v911_v56, %v907_v55  ;;  %v8734_v39 = vpack.c.bf16 %v1588_v49, %v1586_v48 }
 0x2e1   :  { %v1592_v55 = vld [vmem:[%s12322_s21 + $0x38] sm:$0xff] }
 0x2e2   :  { %8441 = vmatpush1.bf16.msra.mxu0 %v8440_v22  ;;  %v8716_v22 = vpack.c.bf16 %v913_v59, %v909_v57  ;;  %v1591_v59 = vld [vmem:[%s12322_s21 + $0x30] sm:$0xff]  ;;  %v1628_v48 = vld [vmem:[%s12322_s21 + $0x158] sm:$0xff] }
 0x2e3   :  { %8697 = vmatpush1.bf16.msra.mxu1 %v8696_v2  ;;  %8443 = vmatprep.subr.bf16.mxu0 %v8442_v3  ;;  %v8462_v2 = vpack.c.bf16 %v920_v62, %v916_v60  ;;  %v915_v3 = vld [vmem:[#allocation5 + $0xf00] sm:$0xff]  ;;  %v1596_v62 = vld [vmem:[%s12322_s21 + $0x58] sm:$0xff] }
 0x2e4   :  { %8699 = vmatprep.subr.bf16.mxu1 %v8698_v7  ;;  %v921_v7 = vld [vmem:[#allocation5 + $0xf30] sm:$0xff]  ;;  %v8464_v13 = vpack.c.bf16 %v919_v4, %v915_v3  ;;  %v1594_v60 = vld [vmem:[%s12322_s21 + $0x48] sm:$0xff] }
 0x2e5   :  { %v8742_v0 = vpack.c.bf16 %v1596_v62, %v1594_v60  ;;  %v1600_v3 = vld [vmem:[%s12322_s21 + $0x78] sm:$0xff] }
 0x2e6   :  { %8445 = vmatpush1.bf16.msra.mxu0 %v8444_v14  ;;  %v8720_v14 = vpack.c.bf16 %v921_v7, %v917_v5  ;;  %v1602_v7 = vld [vmem:[%s12322_s21 + $0x88] sm:$0xff] }
 0x2e7   :  { %8701 = vmatpush1.bf16.msra.mxu1 %v8700_v15  ;;  %8447 = vmatprep.subr.bf16.mxu0 %v8446_v45  ;;  %v8466_v15 = vpack.c.bf16 %v928_v9, %v924_v8  ;;  %v923_v45 = vld [vmem:[#allocation5 + $0xf40] sm:$0xff]  ;;  %v1604_v8 = vld [vmem:[%s12322_s21 + $0x98] sm:$0xff] }
 0x2e8   :  { %8703 = vmatprep.subr.bf16.mxu1 %v8702_v19  ;;  %v929_v19 = vld [vmem:[#allocation5 + $0xf70] sm:$0xff]  ;;  %v8468_v26 = vpack.c.bf16 %v927_v16, %v923_v45  ;;  %v8750_v10 = vpack.c.bf16 %v1604_v8, %v1602_v7 }
 0x2ea   :  { %8449 = vmatpush1.bf16.msra.mxu0 %v8448_v27  ;;  %v8724_v27 = vpack.c.bf16 %v929_v19, %v925_v17  ;;  %v1605_v17 = vld [vmem:[%s12322_s21 + $0xa0] sm:$0xff]  ;;  %v1610_v19 = vld [vmem:[%s12322_s21 + $0xc8] sm:$0xff] }
 0x2eb   :  { %8705 = vmatpush1.bf16.msra.mxu1 %v8704_v28  ;;  %8451 = vmatprep.subr.bf16.mxu0 %v8450_v29  ;;  %v8470_v28 = vpack.c.bf16 %v936_v21, %v932_v20  ;;  %v931_v29 = vld [vmem:[#allocation5 + $0xf80] sm:$0xff]  ;;  %v1612_v20 = vld [vmem:[%s12322_s21 + $0xd8] sm:$0xff] }
 0x2ec   :  { %8707 = vmatprep.subr.bf16.mxu1 %v8706_v33  ;;  %v937_v33 = vld [vmem:[#allocation5 + $0xfb0] sm:$0xff]  ;;  %v8472_v38 = vpack.c.bf16 %v935_v30, %v931_v29  ;;  %v8758_v23 = vpack.c.bf16 %v1612_v20, %v1610_v19 }
 0x2ed   :  { %v1652_v19 = vld [vmem:[%s12322_s21 + $0x218] sm:$0xff] }
 0x2ee   :  { %8453 = vmatpush1.bf16.msra.mxu0 %v8452_v40  ;;  %v8728_v40 = vpack.c.bf16 %v937_v33, %v933_v31  ;;  %v1613_v31 = vld [vmem:[%s12322_s21 + $0xe0] sm:$0xff]  ;;  %v1618_v33 = vld [vmem:[%s12322_s21 + $0x108] sm:$0xff] }
 0x2ef   :  { %8709 = vmatpush1.bf16.msra.mxu1 %v8708_v41  ;;  %8455 = vmatprep.subr.bf16.mxu0 %v8454_v42  ;;  %v8474_v41 = vpack.c.bf16 %v944_v35, %v940_v34  ;;  %v939_v42 = vld [vmem:[#allocation5 + $0xfc0] sm:$0xff]  ;;  %v1620_v34 = vld [vmem:[%s12322_s21 + $0x118] sm:$0xff] }
 0x2f0   :  { %8711 = vmatprep.subr.bf16.mxu1 %v8710_v47  ;;  %v945_v47 = vld [vmem:[#allocation5 + $0xff0] sm:$0xff]  ;;  %v8476_v50 = vpack.c.bf16 %v943_v43, %v939_v42  ;;  %v8766_v36 = vpack.c.bf16 %v1620_v34, %v1618_v33  ;;  %v1889_v34 = vld [vmem:[%s12323_s24 + $0xa0] sm:$0xff] }
 0x2f1   :  { %v8732_v51 = vpack.c.bf16 %v945_v47, %v941_v44  ;;  %v1621_v44 = vld [vmem:[%s12322_s21 + $0x120] sm:$0xff]  ;;  %v1626_v47 = vld [vmem:[%s12322_s21 + $0x148] sm:$0xff]  ;;  %v1872_v33 = vld [vmem:[%s12323_s24 + $0x18] sm:$0xff] }
 0x2f2   :  { %8457 = vmatpush1.bf16.msra.mxu0 %v8456_v53  ;;  %v1585_v53 = vld [vmem:[%s12322_s21] sm:$0xff] }
 0x2f3   :  { %8713 = vmatpush1.bf16.msra.mxu1 %v8712_v25  ;;  %8459 = vmatprep.subr.bf16.mxu0 %v8458_v54  ;;  %v1587_v25 = vld [vmem:[%s12322_s21 + $0x10] sm:$0xff]  ;;  %v1590_v54 = vld [vmem:[%s12322_s21 + $0x28] sm:$0xff] }
 0x2f4   :  { %8715 = vmatprep.subr.bf16.mxu1 %v8714_v58  ;;  %v8736_v56 = vpack.c.bf16 %v1587_v25, %v1585_v53  ;;  %v8738_v57 = vpack.c.bf16 %v1592_v55, %v1590_v54  ;;  %v1589_v58 = vld [vmem:[%s12322_s21 + $0x20] sm:$0xff]  ;;  %v1630_v53 = vld [vmem:[%s12322_s21 + $0x168] sm:$0xff]  ;;  %v1632_v25 = vld [vmem:[%s12322_s21 + $0x178] sm:$0xff] }
 0x2f5   :  { %v8740_v63 = vpack.c.bf16 %v1591_v59, %v1589_v58  ;;  %v8778_v55 = vpack.c.bf16 %v1632_v25, %v1630_v53  ;;  %v1634_v58 = vld [vmem:[%s12322_s21 + $0x188] sm:$0xff]  ;;  %v1636_v59 = vld [vmem:[%s12322_s21 + $0x198] sm:$0xff]  ;;  %v1895_v25 = vld [vmem:[%s12323_s24 + $0xd0] sm:$0xff] }
 0x2f6   :  { %8461 = vmatpush1.bf16.msra.mxu0 %v8460_v1  ;;  %v1593_v1 = vld [vmem:[%s12322_s21 + $0x40] sm:$0xff]  ;;  %v8782_v62 = vpack.c.bf16 %v1636_v59, %v1634_v58  ;;  %v1878_v53 = vld [vmem:[%s12323_s24 + $0x48] sm:$0xff]  ;;  %v1880_v58 = vld [vmem:[%s12323_s24 + $0x58] sm:$0xff] }
 0x2f7   :  { %8717 = vmatpush1.bf16.msra.mxu1 %v8716_v22  ;;  %8463 = vmatprep.subr.bf16.mxu0 %v8462_v2  ;;  %v1595_v22 = vld [vmem:[%s12322_s21 + $0x50] sm:$0xff]  ;;  %v1598_v2 = vld [vmem:[%s12322_s21 + $0x68] sm:$0xff]  ;;  %v1897_v59 = vld [vmem:[%s12323_s24 + $0xe0] sm:$0xff] }
 0x2f8   :  { %8719 = vmatprep.subr.bf16.mxu1 %v8718_v6  ;;  %v8744_v4 = vpack.c.bf16 %v1595_v22, %v1593_v1  ;;  %v8746_v5 = vpack.c.bf16 %v1600_v3, %v1598_v2  ;;  %v1597_v6 = vld [vmem:[%s12322_s21 + $0x60] sm:$0xff]  ;;  %v1638_v1 = vld [vmem:[%s12322_s21 + $0x1a8] sm:$0xff]  ;;  %v1640_v22 = vld [vmem:[%s12322_s21 + $0x1b8] sm:$0xff] }
 0x2f9   :  { %v8786_v3 = vpack.c.bf16 %v1640_v22, %v1638_v1  ;;  %v1882_v1 = vld [vmem:[%s12323_s24 + $0x68] sm:$0xff] }
 0x2fa   :  { %8465 = vmatpush1.bf16.msra.mxu0 %v8464_v13  ;;  %v1603_v13 = vld [vmem:[%s12322_s21 + $0x90] sm:$0xff] }
 0x2fb   :  { %8721 = vmatpush1.bf16.msra.mxu1 %v8720_v14  ;;  %8467 = vmatprep.subr.bf16.mxu0 %v8466_v15  ;;  %v1606_v14 = vld [vmem:[%s12322_s21 + $0xa8] sm:$0xff]  ;;  %v1608_v15 = vld [vmem:[%s12322_s21 + $0xb8] sm:$0xff]  ;;  %v8752_v45 = vpack.c.bf16 %v1603_v13, %v1601_v12 }
 0x2fc   :  { %8723 = vmatprep.subr.bf16.mxu1 %v8722_v18  ;;  %v8754_v16 = vpack.c.bf16 %v1608_v15, %v1606_v14  ;;  %v1607_v18 = vld [vmem:[%s12322_s21 + $0xb0] sm:$0xff]  ;;  %v1646_v13 = vld [vmem:[%s12322_s21 + $0x1e8] sm:$0xff]  ;;  %v1648_v14 = vld [vmem:[%s12322_s21 + $0x1f8] sm:$0xff] }
 0x2fd   :  { %v8756_v21 = vpack.c.bf16 %v1607_v18, %v1605_v17  ;;  %v8794_v15 = vpack.c.bf16 %v1648_v14, %v1646_v13  ;;  %v1650_v18 = vld [vmem:[%s12322_s21 + $0x208] sm:$0xff]  ;;  %v1649_v13 = vld [vmem:[%s12322_s21 + $0x200] sm:$0xff]  ;;  %v1651_v14 = vld [vmem:[%s12322_s21 + $0x210] sm:$0xff] }
 0x2fe   :  { %8469 = vmatpush1.bf16.msra.mxu0 %v8468_v26  ;;  %v1611_v26 = vld [vmem:[%s12322_s21 + $0xd0] sm:$0xff]  ;;  %v8798_v20 = vpack.c.bf16 %v1652_v19, %v1650_v18 }
 0x2ff   :  { %8725 = vmatpush1.bf16.msra.mxu1 %v8724_v27  ;;  %8471 = vmatprep.subr.bf16.mxu0 %v8470_v28  ;;  %v1614_v27 = vld [vmem:[%s12322_s21 + $0xe8] sm:$0xff]  ;;  %v1616_v28 = vld [vmem:[%s12322_s21 + $0xf8] sm:$0xff]  ;;  %v8760_v29 = vpack.c.bf16 %v1611_v26, %v1609_v24  ;;  %v1869_v24 = vld [vmem:[%s12323_s24] sm:$0xff] }
 0x300   :  { %8727 = vmatprep.subr.bf16.mxu1 %v8726_v32  ;;  %v8762_v30 = vpack.c.bf16 %v1616_v28, %v1614_v27  ;;  %v1615_v32 = vld [vmem:[%s12322_s21 + $0xf0] sm:$0xff]  ;;  %v1870_v27 = vld [vmem:[%s12323_s24 + $0x8] sm:$0xff] }
 0x301   :  { %v8764_v35 = vpack.c.bf16 %v1615_v32, %v1613_v31  ;;  %v1887_v28 = vld [vmem:[%s12323_s24 + $0x90] sm:$0xff] }
 0x302   :  { %8473 = vmatpush1.bf16.msra.mxu0 %v8472_v38  ;;  %v1619_v38 = vld [vmem:[%s12322_s21 + $0x110] sm:$0xff] }
 0x303   :  { %8729 = vmatpush1.bf16.msra.mxu1 %v8728_v40  ;;  %8475 = vmatprep.subr.bf16.mxu0 %v8474_v41  ;;  %v1622_v40 = vld [vmem:[%s12322_s21 + $0x128] sm:$0xff]  ;;  %v1624_v41 = vld [vmem:[%s12322_s21 + $0x138] sm:$0xff]  ;;  %v8768_v42 = vpack.c.bf16 %v1619_v38, %v1617_v37  ;;  %v1871_v32 = vld [vmem:[%s12323_s24 + $0x10] sm:$0xff] }
 0x304   :  { %8731 = vmatprep.subr.bf16.mxu1 %v8730_v46  ;;  %v8770_v43 = vpack.c.bf16 %v1624_v41, %v1622_v40  ;;  %v1623_v46 = vld [vmem:[%s12322_s21 + $0x130] sm:$0xff]  ;;  %v1873_v38 = vld [vmem:[%s12323_s24 + $0x20] sm:$0xff]  ;;  %v1874_v40 = vld [vmem:[%s12323_s24 + $0x28] sm:$0xff] }
 0x305   :  { %v8772_v49 = vpack.c.bf16 %v1623_v46, %v1621_v44  ;;  %v1891_v41 = vld [vmem:[%s12323_s24 + $0xb0] sm:$0xff] }
 0x306   :  { %8477 = vmatpush1.bf16.msra.mxu0 %v8476_v50  ;;  %v8774_v50 = vpack.c.bf16 %v1628_v48, %v1626_v47  ;;  %v1875_v46 = vld [vmem:[%s12323_s24 + $0x30] sm:$0xff]  ;;  %v1876_v47 = vld [vmem:[%s12323_s24 + $0x38] sm:$0xff]  ;;  %v1893_v48 = vld [vmem:[%s12323_s24 + $0xc0] sm:$0xff] }
 0x307   :  { %8733 = vmatpush1.bf16.msra.mxu1 %v8732_v51  ;;  %8735 = vmatprep.subr.bf16.mxu0 %v8734_v39  ;;  %v1625_v51 = vld [vmem:[%s12322_s21 + $0x140] sm:$0xff]  ;;  %v1627_v39 = vld [vmem:[%s12322_s21 + $0x150] sm:$0xff] }
 0x308   :  { %v8776_v54 = vpack.c.bf16 %v1627_v39, %v1625_v51  ;;  %v1877_v39 = vld [vmem:[%s12323_s24 + $0x40] sm:$0xff] }
 0x309   :  { %1291 = vmatmul.mubr.f32.vlgmr.msra.gmra.mrb[0].mxu0 %v11194_v52 }
 0x30a   :  { %1575 = vmatmul.mubr.f32.vlgmr.msra.gmra.mrb[0].mxu1 %v11194_v52  ;;  %8737 = vmatpush1.bf16.msra.mxu0 %v8736_v56  ;;  %v1599_v52 = vld [vmem:[%s12322_s21 + $0x70] sm:$0xff]  ;;  %v1629_v56 = vld [vmem:[%s12322_s21 + $0x160] sm:$0xff] }
 0x30b   :  { %8739 = vmatprep.subr.bf16.mxu0 %v8738_v57  ;;  %v8748_v9 = vpack.c.bf16 %v1599_v52, %v1597_v6  ;;  %v1631_v57 = vld [vmem:[%s12322_s21 + $0x170] sm:$0xff]  ;;  %v1642_v6 = vld [vmem:[%s12322_s21 + $0x1c8] sm:$0xff]  ;;  %v1644_v52 = vld [vmem:[%s12322_s21 + $0x1d8] sm:$0xff] }
 0x30c   :  { %v8780_v60 = vpack.c.bf16 %v1631_v57, %v1629_v56  ;;  %v8790_v8 = vpack.c.bf16 %v1644_v52, %v1642_v6  ;;  %v1879_v57 = vld [vmem:[%s12323_s24 + $0x50] sm:$0xff] }
 0x30e   :  { %8741 = vmatpush1.bf16.msra.mxu0 %v8740_v63  ;;  %v1633_v63 = vld [vmem:[%s12322_s21 + $0x180] sm:$0xff] }
 0x30f   :  { %8743 = vmatprep.subr.bf16.mxu0 %v8742_v0  ;;  %v1635_v0 = vld [vmem:[%s12322_s21 + $0x190] sm:$0xff] }
 0x310   :  { %v8784_v2 = vpack.c.bf16 %v1635_v0, %v1633_v63  ;;  %v1881_v0 = vld [vmem:[%s12323_s24 + $0x60] sm:$0xff] }
 0x311   :  { %v8888_v22 = vpack.c.bf16 %v1882_v1, %v1881_v0  ;;  %v1677_v0 = vld [vmem:[%s12322_s21 + $0x2e0] sm:$0xff]  ;;  %v1679_v1 = vld [vmem:[%s12322_s21 + $0x2f0] sm:$0xff] }
 0x312   :  { %8745 = vmatpush1.bf16.msra.mxu0 %v8744_v4  ;;  %v1637_v4 = vld [vmem:[%s12322_s21 + $0x1a0] sm:$0xff] }
 0x313   :  { %8747 = vmatprep.subr.bf16.mxu0 %v8746_v5  ;;  %v1639_v5 = vld [vmem:[%s12322_s21 + $0x1b0] sm:$0xff] }
 0x314   :  { %v8788_v7 = vpack.c.bf16 %v1639_v5, %v1637_v4  ;;  %v11302_v4 = vsub.s32 1, %v11157_v61  ;;  %v11305_v5 = vsub.s32 3, %v11157_v61 }
 0x316   :  { %8749 = vmatpush1.bf16.msra.mxu0 %v8748_v9  ;;  %v1641_v9 = vld [vmem:[%s12322_s21 + $0x1c0] sm:$0xff] }
 0x317   :  { %8751 = vmatprep.subr.bf16.mxu0 %v8750_v10  ;;  %v1643_v10 = vld [vmem:[%s12322_s21 + $0x1d0] sm:$0xff] }
 0x318   :  { %v8792_v12 = vpack.c.bf16 %v1643_v10, %v1641_v9 }
 0x31a   :  { %8753 = vmatpush1.bf16.msra.mxu0 %v8752_v45  ;;  %v1645_v45 = vld [vmem:[%s12322_s21 + $0x1e0] sm:$0xff] }
 0x31b   :  { %8755 = vmatprep.subr.bf16.mxu0 %v8754_v16  ;;  %v1647_v16 = vld [vmem:[%s12322_s21 + $0x1f0] sm:$0xff] }
 0x31c   :  { %v8796_v17 = vpack.c.bf16 %v1647_v16, %v1645_v45  ;;  %v1654_v16 = vld [vmem:[%s12322_s21 + $0x228] sm:$0xff] }
 0x31e   :  { %8757 = vmatpush1.bf16.msra.mxu0 %v8756_v21  ;;  %v1885_v21 = vld [vmem:[%s12323_s24 + $0x80] sm:$0xff] }
 0x31f   :  { %8759 = vmatprep.subr.bf16.mxu0 %v8758_v23  ;;  %v1886_v23 = vld [vmem:[%s12323_s24 + $0x88] sm:$0xff] }
 0x320   :  { %v8862_v26 = vpack.c.bf16 %v1886_v23, %v1885_v21 }
 0x322   :  { %8761 = vmatpush1.bf16.msra.mxu0 %v8760_v29  ;;  %v1888_v29 = vld [vmem:[%s12323_s24 + $0x98] sm:$0xff]  ;;  %8863 = vmatprep.subr.bf16.mxu1 %v8862_v26  ;;  %v1655_v26 = vld [vmem:[%s12322_s21 + $0x230] sm:$0xff] }
 0x323   :  { %8763 = vmatprep.subr.bf16.mxu0 %v8762_v30  ;;  %v8864_v30 = vpack.c.bf16 %v1870_v27, %v1869_v24  ;;  %v8866_v31 = vpack.c.bf16 %v1888_v29, %v1887_v28  ;;  %v1653_v24 = vld [vmem:[%s12322_s21 + $0x220] sm:$0xff]  ;;  %v1658_v28 = vld [vmem:[%s12322_s21 + $0x248] sm:$0xff]  ;;  %v1660_v29 = vld [vmem:[%s12322_s21 + $0x258] sm:$0xff] }
 0x325   :  { %8865 = vmatpush3.bf16.msra.mxu1 %v8864_v30  ;;  %v8804_v30 = vpack.c.bf16 %v1655_v26, %v1653_v24  ;;  %v1694_v24 = vld [vmem:[%s12322_s21 + $0x368] sm:$0xff]  ;;  %v1696_v26 = vld [vmem:[%s12322_s21 + $0x378] sm:$0xff] }
 0x326   :  { %8765 = vmatpush1.bf16.msra.mxu0 %v8764_v35  ;;  %v1890_v35 = vld [vmem:[%s12323_s24 + $0xa8] sm:$0xff]  ;;  %8867 = vmatprep.subr.bf16.mxu1 %v8866_v31  ;;  %v8806_v31 = vpack.c.bf16 %v1660_v29, %v1658_v28  ;;  %v8842_v28 = vpack.c.bf16 %v1696_v26, %v1694_v24  ;;  %v1693_v29 = vld [vmem:[%s12322_s21 + $0x360] sm:$0xff]  ;;  %v1980_v24 = vld [vmem:[%s12324_s0 + $0x10] sm:$0xff] }
 0x327   :  { %8767 = vmatprep.subr.bf16.mxu0 %v8766_v36  ;;  %v8868_v36 = vpack.c.bf16 %v1872_v33, %v1871_v32  ;;  %v8870_v37 = vpack.c.bf16 %v1890_v35, %v1889_v34  ;;  %v1657_v32 = vld [vmem:[%s12322_s21 + $0x240] sm:$0xff]  ;;  %v1659_v33 = vld [vmem:[%s12322_s21 + $0x250] sm:$0xff]  ;;  %v1662_v34 = vld [vmem:[%s12322_s21 + $0x268] sm:$0xff] }
 0x328   :  { %v1664_v35 = vld [vmem:[%s12322_s21 + $0x278] sm:$0xff] }
 0x329   :  { %8869 = vmatpush3.bf16.msra.mxu1 %v8868_v36  ;;  %v8808_v36 = vpack.c.bf16 %v1659_v33, %v1657_v32  ;;  %v1700_v32 = vld [vmem:[%s12322_s21 + $0x398] sm:$0xff] }
 0x32a   :  { %8769 = vmatpush1.bf16.msra.mxu0 %v8768_v42  ;;  %v1892_v42 = vld [vmem:[%s12323_s24 + $0xb8] sm:$0xff]  ;;  %8871 = vmatprep.subr.bf16.mxu1 %v8870_v37  ;;  %v8810_v37 = vpack.c.bf16 %v1664_v35, %v1662_v34  ;;  %v1697_v35 = vld [vmem:[%s12322_s21 + $0x380] sm:$0xff] }
 0x32b   :  { %8771 = vmatprep.subr.bf16.mxu0 %v8770_v43  ;;  %v8872_v43 = vpack.c.bf16 %v1874_v40, %v1873_v38  ;;  %v8874_v44 = vpack.c.bf16 %v1892_v42, %v1891_v41  ;;  %v1661_v38 = vld [vmem:[%s12322_s21 + $0x260] sm:$0xff]  ;;  %v1663_v40 = vld [vmem:[%s12322_s21 + $0x270] sm:$0xff]  ;;  %v1666_v41 = vld [vmem:[%s12322_s21 + $0x288] sm:$0xff] }
 0x32c   :  { %v1668_v42 = vld [vmem:[%s12322_s21 + $0x298] sm:$0xff] }
 0x32d   :  { %8873 = vmatpush3.bf16.msra.mxu1 %v8872_v43  ;;  %v8812_v43 = vpack.c.bf16 %v1663_v40, %v1661_v38  ;;  %v1704_v38 = vld [vmem:[%s12322_s21 + $0x3b8] sm:$0xff] }
 0x32e   :  { %8773 = vmatpush1.bf16.msra.mxu0 %v8772_v49  ;;  %v1894_v49 = vld [vmem:[%s12323_s24 + $0xc8] sm:$0xff]  ;;  %8875 = vmatprep.subr.bf16.mxu1 %v8874_v44  ;;  %v8814_v44 = vpack.c.bf16 %v1668_v42, %v1666_v41  ;;  %v1701_v42 = vld [vmem:[%s12322_s21 + $0x3a0] sm:$0xff]  ;;  %v1981_v26 = vld [vmem:[%s12324_s0 + $0x18] sm:$0xff] }
 0x32f   :  { %8775 = vmatprep.subr.bf16.mxu0 %v8774_v50  ;;  %v8876_v50 = vpack.c.bf16 %v1876_v47, %v1875_v46  ;;  %v8878_v51 = vpack.c.bf16 %v1894_v49, %v1893_v48  ;;  %v1665_v46 = vld [vmem:[%s12322_s21 + $0x280] sm:$0xff]  ;;  %v1667_v47 = vld [vmem:[%s12322_s21 + $0x290] sm:$0xff]  ;;  %v1670_v48 = vld [vmem:[%s12322_s21 + $0x2a8] sm:$0xff] }
 0x330   :  { %v1672_v49 = vld [vmem:[%s12322_s21 + $0x2b8] sm:$0xff] }
 0x331   :  { %8877 = vmatpush3.bf16.msra.mxu1 %v8876_v50  ;;  %v8816_v50 = vpack.c.bf16 %v1667_v47, %v1665_v46  ;;  %v1708_v46 = vld [vmem:[%s12322_s21 + $0x3d8] sm:$0xff] }
 0x332   :  { %8777 = vmatpush1.bf16.msra.mxu0 %v8776_v54  ;;  %v1896_v54 = vld [vmem:[%s12323_s24 + $0xd8] sm:$0xff]  ;;  %8879 = vmatprep.subr.bf16.mxu1 %v8878_v51  ;;  %v8818_v51 = vpack.c.bf16 %v1672_v49, %v1670_v48  ;;  %v11372_v48 = vsub.s32 2, %v11157_v61 }
 0x333   :  { %8779 = vmatprep.subr.bf16.mxu0 %v8778_v55  ;;  %v8880_v55 = vpack.c.bf16 %v1878_v53, %v1877_v39  ;;  %v8882_v56 = vpack.c.bf16 %v1896_v54, %v1895_v25  ;;  %v1669_v39 = vld [vmem:[%s12322_s21 + $0x2a0] sm:$0xff]  ;;  %v1671_v53 = vld [vmem:[%s12322_s21 + $0x2b0] sm:$0xff]  ;;  %v1674_v25 = vld [vmem:[%s12322_s21 + $0x2c8] sm:$0xff] }
 0x334   :  { %v1676_v54 = vld [vmem:[%s12322_s21 + $0x2d8] sm:$0xff] }
 0x335   :  { %8881 = vmatpush3.bf16.msra.mxu1 %v8880_v55  ;;  %v8820_v55 = vpack.c.bf16 %v1671_v53, %v1669_v39  ;;  %v1710_v39 = vld [vmem:[%s12322_s21 + $0x3e8] sm:$0xff]  ;;  %v1712_v53 = vld [vmem:[%s12322_s21 + $0x3f8] sm:$0xff] }
 0x336   :  { %8781 = vmatpush1.bf16.msra.mxu0 %v8780_v60  ;;  %v1898_v60 = vld [vmem:[%s12323_s24 + $0xe8] sm:$0xff]  ;;  %8883 = vmatprep.subr.bf16.mxu1 %v8882_v56  ;;  %v8822_v56 = vpack.c.bf16 %v1676_v54, %v1674_v25 }
 0x337   :  { %8783 = vmatprep.subr.bf16.mxu0 %v8782_v62  ;;  %v8884_v62 = vpack.c.bf16 %v1880_v58, %v1879_v57  ;;  %v8886_v63 = vpack.c.bf16 %v1898_v60, %v1897_v59  ;;  %v1673_v57 = vld [vmem:[%s12322_s21 + $0x2c0] sm:$0xff]  ;;  %v1675_v58 = vld [vmem:[%s12322_s21 + $0x2d0] sm:$0xff]  ;;  %v1678_v59 = vld [vmem:[%s12322_s21 + $0x2e8] sm:$0xff] }
 0x338   :  { %v1680_v60 = vld [vmem:[%s12322_s21 + $0x2f8] sm:$0xff] }
 0x339   :  { %8885 = vmatpush3.bf16.msra.mxu1 %v8884_v62  ;;  %v8824_v62 = vpack.c.bf16 %v1675_v58, %v1673_v57  ;;  %v1711_v57 = vld [vmem:[%s12322_s21 + $0x3f0] sm:$0xff] }
 0x33a   :  { %8785 = vmatpush1.bf16.msra.mxu0 %v8784_v2  ;;  %8887 = vmatprep.subr.bf16.mxu1 %v8886_v63  ;;  %v11297_v2 = vsub.s32 0, %v11157_v61  ;;  %v8826_v63 = vpack.c.bf16 %v1680_v60, %v1678_v59 }
 0x33b   :  { %8787 = vmatprep.subr.bf16.mxu0 %v8786_v3  ;;  %v11299_v3 = vld [vmem:[#allocation7] sm:$0xf] }
 0x33c   :  { %v952_v6 = vrot.slane %v11299_v3, %v11297_v2  ;;  %v956_v52 = vrot.slane %v11299_v3, %v11302_v4  ;;  %v960_v54 = vrot.slane %v11299_v3, %v11372_v48 }
 0x33d   :  { %8889 = vmatpush3.bf16.msra.mxu1 %v8888_v22  ;;  %v1682_v22 = vld [vmem:[%s12322_s21 + $0x308] sm:$0xff] }
 0x33e   :  { %8789 = vmatpush1.bf16.msra.mxu0 %v8788_v7  ;;  %v964_v7 = vrot.slane %v11299_v3, %v11305_v5  ;;  %v1883_v3 = vld [vmem:[%s12323_s24 + $0x70] sm:$0xff] }
 0x33f   :  { %8791 = vmatprep.subr.bf16.mxu0 %v8790_v8 }
 0x342   :  { %8793 = vmatpush1.bf16.msra.mxu0 %v8792_v12 }
 0x343   :  { %8795 = vmatprep.subr.bf16.mxu0 %v8794_v15 }
 0x346   :  { %8797 = vmatpush1.bf16.msra.mxu0 %v8796_v17  ;;  %v1656_v17 = vld [vmem:[%s12322_s21 + $0x238] sm:$0xff] }
 0x347   :  { %8799 = vmatprep.subr.bf16.mxu0 %v8798_v20  ;;  %v8800_v20 = vpack.c.bf16 %v1651_v14, %v1649_v13  ;;  %v8802_v23 = vpack.c.bf16 %v1656_v17, %v1654_v16  ;;  %v1688_v13 = vld [vmem:[%s12322_s21 + $0x338] sm:$0xff]  ;;  %v1687_v16 = vld [vmem:[%s12322_s21 + $0x330] sm:$0xff]  ;;  %v1690_v17 = vld [vmem:[%s12322_s21 + $0x348] sm:$0xff] }
 0x3dc   :  { %v1292_v8 = vpop.f32.mrb[0].mxu0 }
 0x3dd   :  { %v9972_v9 = vadd.f32 %v1292_v8, %v952_v6  ;;  %v11313_v10 = vpop.f32.mrb[0].mxu1  ;;  %v1294_v12 = vpop.f32.mrb[1].mxu0  ;;  %v1684_v6 = vld [vmem:[%s12322_s21 + $0x318] sm:$0xff]  ;;  %v1681_v8 = vld [vmem:[%s12322_s21 + $0x300] sm:$0xff] }
 0x3de   :  { %v9973_v15 = vadd.f32 %v1294_v12, %v956_v52  ;;  %v1578_v45 = vpop.f32.mrb[1].mxu1  ;;  %v8828_v52 = vpack.c.bf16 %v1679_v1, %v1677_v0  ;;  %v1686_v12 = vld [vmem:[%s12322_s21 + $0x328] sm:$0xff]  ;;  %v9974_v59 = vadd.f32 %v11313_v10, %v960_v54  ;;  %v1884_v1 = vld [vmem:[%s12323_s24 + $0x78] sm:$0xff]  ;;  %v1713_v10 = vld [vmem:[#allocation8] sm:$0x3] }
 0x3df   :  { %v9975_v18 = vadd.f32 %v1578_v45, %v964_v7  ;;  %v1581_v21 = vmax.f32 %v9972_v9, 0.0  ;;  %v8830_v7 = vpack.c.bf16 %v1684_v6, %v1682_v22  ;;  %v1683_v9 = vld [vmem:[%s12322_s21 + $0x310] sm:$0xff]  ;;  %v1685_v45 = vld [vmem:[%s12322_s21 + $0x320] sm:$0xff]  ;;  %v8892_v22 = vpack.c.bf16 %v1884_v1, %v1883_v3  ;;  %v2007_v54 = vld [vmem:[%s12324_s0 + $0xe8] sm:$0xff] }
 0x3e0   :  { %v1582_v19 = vmax.f32 %v9973_v15, 0.0  ;;  %v8832_v14 = vpack.c.bf16 %v1683_v9, %v1681_v8  ;;  %v8834_v15 = vpack.c.bf16 %v1688_v13, %v1686_v12  ;;  %v1583_v60 = vmax.f32 %v9974_v59, 0.0  ;;  %v1994_v6 = vld [vmem:[%s12324_s0 + $0x80] sm:$0xff]  ;;  %v2008_v59 = vld [vmem:[%s12324_s0 + $0xf0] sm:$0xff]  ;;  %v1993_v3 = vld [vmem:[%s12324_s0 + $0x78] sm:$0xff] }
 0x3e1   :  { %v1584_v27 = vmax.f32 %v9975_v18, 0.0  ;;  %v1692_v18 = vld [vmem:[%s12322_s21 + $0x358] sm:$0xff]  ;;  %v1718_v8 = vrot.slane %v1713_v10, %v11297_v2  ;;  %v1722_v9 = vrot.slane %v1713_v10, %v11302_v4 }
 0x3e2   :  { %1789 = vmatprep.mubr.f32.mxu0 %v1582_v19  ;;  %v8836_v19 = vpack.c.bf16 %v1687_v16, %v1685_v45  ;;  %v1979_v45 = vld [vmem:[%s12324_s0 + $0x8] sm:$0xff]  ;;  %v2099_v10 = vld [vmem:[#allocation13 + $0x10] sm:$0xff] }
 0x3e3   :  { %1790 = vmatmul.mubr.f32.vlgmr.msra.gmra.mrb[2].mxu0 %v1581_v21  ;;  %v1689_v21 = vld [vmem:[%s12322_s21 + $0x340] sm:$0xff] }
 0x3e4   :  { %8801 = vmatpush1.bf16.msra.mxu0 %v8800_v20  ;;  %1860 = vmatprep.mubr.f32.mxu0 %v1584_v27  ;;  %v8838_v20 = vpack.c.bf16 %v1692_v18, %v1690_v17  ;;  %v1996_v17 = vld [vmem:[%s12324_s0 + $0x90] sm:$0xff]  ;;  %v1997_v18 = vld [vmem:[%s12324_s0 + $0x98] sm:$0xff] }
 0x3e5   :  { %8803 = vmatprep.subr.bf16.mxu0 %v8802_v23  ;;  %v1691_v23 = vld [vmem:[%s12322_s21 + $0x350] sm:$0xff] }
 0x3e6   :  { %v8840_v27 = vpack.c.bf16 %v1691_v23, %v1689_v21  ;;  %v8898_v23 = vpack.c.bf16 %v1997_v18, %v1996_v17  ;;  %v2193_v17 = vld [vmem:[%s12325_s12 + $0x8] sm:$0xff] }
 0x3e7   :  { %v2197_v18 = vld [vmem:[%s12325_s12 + $0x28] sm:$0xff] }
 0x3e8   :  { %8805 = vmatpush1.bf16.msra.mxu0 %v8804_v30  ;;  %v1695_v30 = vld [vmem:[%s12322_s21 + $0x370] sm:$0xff] }
 0x3e9   :  { %8807 = vmatprep.subr.bf16.mxu0 %v8806_v31  ;;  %v1698_v31 = vld [vmem:[%s12322_s21 + $0x388] sm:$0xff]  ;;  %v8844_v33 = vpack.c.bf16 %v1695_v30, %v1693_v29  ;;  %v8900_v29 = vpack.c.bf16 %v1981_v26, %v1980_v24  ;;  %v2194_v24 = vld [vmem:[%s12325_s12 + $0x10] sm:$0xff] }
 0x3ea   :  { %v8846_v34 = vpack.c.bf16 %v1700_v32, %v1698_v31  ;;  %v1982_v31 = vld [vmem:[%s12324_s0 + $0x20] sm:$0xff]  ;;  %v1983_v32 = vld [vmem:[%s12324_s0 + $0x28] sm:$0xff]  ;;  %v2198_v26 = vld [vmem:[%s12325_s12 + $0x30] sm:$0xff] }
 0x3ec   :  { %8809 = vmatpush1.bf16.msra.mxu0 %v8808_v36  ;;  %v1699_v36 = vld [vmem:[%s12322_s21 + $0x390] sm:$0xff] }
 0x3ed   :  { %8811 = vmatprep.subr.bf16.mxu0 %v8810_v37  ;;  %v1702_v37 = vld [vmem:[%s12322_s21 + $0x3a8] sm:$0xff]  ;;  %v8848_v40 = vpack.c.bf16 %v1699_v36, %v1697_v35  ;;  %v8904_v35 = vpack.c.bf16 %v1983_v32, %v1982_v31  ;;  %v2202_v31 = vld [vmem:[%s12325_s12 + $0x50] sm:$0xff] }
 0x3ee   :  { %v8850_v41 = vpack.c.bf16 %v1704_v38, %v1702_v37  ;;  %v1984_v37 = vld [vmem:[%s12324_s0 + $0x30] sm:$0xff]  ;;  %v1985_v38 = vld [vmem:[%s12324_s0 + $0x38] sm:$0xff] }
 0x3ef   :  { %v2206_v32 = vld [vmem:[%s12325_s12 + $0x70] sm:$0xff] }
 0x3f0   :  { %8813 = vmatpush1.bf16.msra.mxu0 %v8812_v43  ;;  %v1703_v43 = vld [vmem:[%s12322_s21 + $0x3b0] sm:$0xff] }
 0x3f1   :  { %8815 = vmatprep.subr.bf16.mxu0 %v8814_v44  ;;  %v1706_v44 = vld [vmem:[%s12322_s21 + $0x3c8] sm:$0xff]  ;;  %v8852_v47 = vpack.c.bf16 %v1703_v43, %v1701_v42  ;;  %v8908_v42 = vpack.c.bf16 %v1985_v38, %v1984_v37  ;;  %v2210_v37 = vld [vmem:[%s12325_s12 + $0x90] sm:$0xff] }
 0x3f2   :  { %v8854_v49 = vpack.c.bf16 %v1708_v46, %v1706_v44  ;;  %v1986_v44 = vld [vmem:[%s12324_s0 + $0x40] sm:$0xff]  ;;  %v1987_v46 = vld [vmem:[%s12324_s0 + $0x48] sm:$0xff]  ;;  %v2214_v38 = vld [vmem:[%s12325_s12 + $0xb0] sm:$0xff] }
 0x3f4   :  { %8817 = vmatpush1.bf16.msra.mxu0 %v8816_v50  ;;  %v1705_v50 = vld [vmem:[%s12322_s21 + $0x3c0] sm:$0xff] }
 0x3f5   :  { %8819 = vmatprep.subr.bf16.mxu0 %v8818_v51  ;;  %v1707_v51 = vld [vmem:[%s12322_s21 + $0x3d0] sm:$0xff] }
 0x3f6   :  { %v8856_v25 = vpack.c.bf16 %v1707_v51, %v1705_v50  ;;  %v8912_v50 = vpack.c.bf16 %v1987_v46, %v1986_v44  ;;  %v2218_v44 = vld [vmem:[%s12325_s12 + $0xd0] sm:$0xff] }
 0x3f7   :  { %v2222_v46 = vld [vmem:[%s12325_s12 + $0xf0] sm:$0xff] }
 0x3f8   :  { %8821 = vmatpush1.bf16.msra.mxu0 %v8820_v55  ;;  %v8858_v55 = vpack.c.bf16 %v1712_v53, %v1710_v39  ;;  %v1988_v39 = vld [vmem:[%s12324_s0 + $0x50] sm:$0xff]  ;;  %v1989_v53 = vld [vmem:[%s12324_s0 + $0x58] sm:$0xff] }
 0x3f9   :  { %8823 = vmatprep.subr.bf16.mxu0 %v8822_v56  ;;  %v1709_v56 = vld [vmem:[%s12322_s21 + $0x3e0] sm:$0xff] }
 0x3fa   :  { %v8860_v58 = vpack.c.bf16 %v1711_v57, %v1709_v56  ;;  %v1990_v57 = vld [vmem:[%s12324_s0 + $0x60] sm:$0xff] }
 0x3fc   :  { %8825 = vmatpush1.bf16.msra.mxu0 %v8824_v62  ;;  %v1899_v62 = vld [vmem:[%s12323_s24 + $0xf0] sm:$0xff] }
 0x3fd   :  { %8827 = vmatprep.subr.bf16.mxu0 %v8826_v63  ;;  %v1900_v63 = vld [vmem:[%s12323_s24 + $0xf8] sm:$0xff] }
 0x3fe   :  { %v8890_v0 = vpack.c.bf16 %v1900_v63, %v1899_v62 }
 0x400   :  { %8829 = vmatpush1.bf16.msra.mxu0 %v8828_v52  ;;  %8891 = vmatprep.subr.bf16.mxu1 %v8890_v0  ;;  %v1995_v52 = vld [vmem:[%s12324_s0 + $0x88] sm:$0xff]  ;;  %v1992_v0 = vld [vmem:[%s12324_s0 + $0x70] sm:$0xff] }
 0x401   :  { %8831 = vmatprep.subr.bf16.mxu0 %v8830_v7  ;;  %8893 = vmatpush3.bf16.msra.mxu1 %v8892_v22  ;;  %v8894_v7 = vpack.c.bf16 %v1995_v52, %v1994_v6  ;;  %v8924_v1 = vpack.c.bf16 %v1993_v3, %v1992_v0  ;;  %v2098_v22 = vld [vmem:[#allocation13 + $0x8] sm:$0xff]  ;;  %v2100_v6 = vld [vmem:[#allocation13 + $0x18] sm:$0xff] }
 0x402   :  { %v8926_v52 = vpack.c.bf16 %v2100_v6, %v2098_v22  ;;  %v2242_v0 = vld [vmem:[%s12325_s12 + $0x190] sm:$0xff]  ;;  %v2251_v22 = vld [vmem:[%s12325_s12 + $0x1d8] sm:$0xff] }
 0x403   :  { %8895 = vmatprep.subr.bf16.mxu1 %v8894_v7  ;;  %v2097_v7 = vld [vmem:[#allocation13] sm:$0xff]  ;;  %v2255_v6 = vld [vmem:[%s12325_s12 + $0x1f8] sm:$0xff] }
 0x404   :  { %8833 = vmatpush1.bf16.msra.mxu0 %v8832_v14  ;;  %v2246_v3 = vld [vmem:[%s12325_s12 + $0x1b0] sm:$0xff] }
 0x405   :  { %8835 = vmatprep.subr.bf16.mxu0 %v8834_v15  ;;  %v1978_v15 = vld [vmem:[%s12324_s0] sm:$0xff] }
 0x408   :  { %8837 = vmatpush1.bf16.msra.mxu0 %v8836_v19 }
 0x409   :  { %8839 = vmatprep.subr.bf16.mxu0 %v8838_v20  ;;  %v8896_v20 = vpack.c.bf16 %v1979_v45, %v1978_v15  ;;  %v2103_v15 = vld [vmem:[#allocation13 + $0x30] sm:$0xff] }
 0x40c   :  { %8841 = vmatpush1.bf16.msra.mxu0 %v8840_v27  ;;  %v1998_v27 = vld [vmem:[%s12324_s0 + $0xa0] sm:$0xff] }
 0x40d   :  { %8843 = vmatprep.subr.bf16.mxu0 %v8842_v28  ;;  %v1999_v28 = vld [vmem:[%s12324_s0 + $0xa8] sm:$0xff] }
 0x40e   :  { %v8902_v30 = vpack.c.bf16 %v1999_v28, %v1998_v27  ;;  %v9000_v27 = vpack.c.bf16 %v2198_v26, %v2194_v24  ;;  %v2203_v28 = vld [vmem:[%s12325_s12 + $0x58] sm:$0xff] }
 0x40f   :  { %v2275_v24 = vld [vmem:[%s12325_s12 + $0x298] sm:$0xff] }
 0x410   :  { %8845 = vmatpush1.bf16.msra.mxu0 %v8844_v33  ;;  %v2000_v33 = vld [vmem:[%s12324_s0 + $0xb0] sm:$0xff]  ;;  %v2279_v26 = vld [vmem:[%s12325_s12 + $0x2b8] sm:$0xff] }
 0x411   :  { %8847 = vmatprep.subr.bf16.mxu0 %v8846_v34  ;;  %v2001_v34 = vld [vmem:[%s12324_s0 + $0xb8] sm:$0xff] }
 0x412   :  { %v8906_v36 = vpack.c.bf16 %v2001_v34, %v2000_v33  ;;  %v9004_v33 = vpack.c.bf16 %v2206_v32, %v2202_v31  ;;  %v2211_v34 = vld [vmem:[%s12325_s12 + $0x98] sm:$0xff] }
 0x413   :  { %v2283_v31 = vld [vmem:[%s12325_s12 + $0x2d8] sm:$0xff] }
 0x414   :  { %8849 = vmatpush1.bf16.msra.mxu0 %v8848_v40  ;;  %v2002_v40 = vld [vmem:[%s12324_s0 + $0xc0] sm:$0xff]  ;;  %v2287_v32 = vld [vmem:[%s12325_s12 + $0x2f8] sm:$0xff] }
 0x415   :  { %8851 = vmatprep.subr.bf16.mxu0 %v8850_v41  ;;  %v2003_v41 = vld [vmem:[%s12324_s0 + $0xc8] sm:$0xff] }
 0x416   :  { %v8910_v43 = vpack.c.bf16 %v2003_v41, %v2002_v40  ;;  %v9008_v40 = vpack.c.bf16 %v2214_v38, %v2210_v37  ;;  %v2219_v41 = vld [vmem:[%s12325_s12 + $0xd8] sm:$0xff] }
 0x417   :  { %v2291_v37 = vld [vmem:[%s12325_s12 + $0x318] sm:$0xff] }
 0x418   :  { %8853 = vmatpush1.bf16.msra.mxu0 %v8852_v47  ;;  %v2004_v47 = vld [vmem:[%s12324_s0 + $0xd0] sm:$0xff]  ;;  %v2295_v38 = vld [vmem:[%s12325_s12 + $0x338] sm:$0xff] }
 0x419   :  { %8855 = vmatprep.subr.bf16.mxu0 %v8854_v49  ;;  %v2005_v49 = vld [vmem:[%s12324_s0 + $0xd8] sm:$0xff] }
 0x41a   :  { %v8914_v51 = vpack.c.bf16 %v2005_v49, %v2004_v47  ;;  %v9012_v47 = vpack.c.bf16 %v2222_v46, %v2218_v44  ;;  %v2227_v49 = vld [vmem:[%s12325_s12 + $0x118] sm:$0xff] }
 0x41b   :  { %v2299_v44 = vld [vmem:[%s12325_s12 + $0x358] sm:$0xff] }
 0x41c   :  { %8857 = vmatpush1.bf16.msra.mxu0 %v8856_v25  ;;  %v2006_v25 = vld [vmem:[%s12324_s0 + $0xe0] sm:$0xff]  ;;  %v2303_v46 = vld [vmem:[%s12325_s12 + $0x378] sm:$0xff] }
 0x41d   :  { %8859 = vmatprep.subr.bf16.mxu0 %v8858_v55  ;;  %v8916_v55 = vpack.c.bf16 %v1989_v53, %v1988_v39  ;;  %v8918_v56 = vpack.c.bf16 %v2007_v54, %v2006_v25  ;;  %v2226_v39 = vld [vmem:[%s12325_s12 + $0x110] sm:$0xff]  ;;  %v2235_v54 = vld [vmem:[%s12325_s12 + $0x158] sm:$0xff] }
 0x41e   :  { %v2230_v53 = vld [vmem:[%s12325_s12 + $0x130] sm:$0xff] }
 0x41f   :  { %v9016_v25 = vpack.c.bf16 %v2230_v53, %v2226_v39  ;;  %v2307_v39 = vld [vmem:[%s12325_s12 + $0x398] sm:$0xff] }
 0x420   :  { %8861 = vmatpush1.bf16.msra.mxu0 %v8860_v58  ;;  %v1991_v58 = vld [vmem:[%s12324_s0 + $0x68] sm:$0xff]  ;;  %v2311_v53 = vld [vmem:[%s12325_s12 + $0x3b8] sm:$0xff] }
 0x421   :  { %v8920_v62 = vpack.c.bf16 %v1991_v58, %v1990_v57  ;;  %v2234_v57 = vld [vmem:[%s12325_s12 + $0x150] sm:$0xff] }
 0x422   :  { %v2238_v58 = vld [vmem:[%s12325_s12 + $0x170] sm:$0xff] }
 0x423   :  { %1861 = vmatmul.mubr.f32.vlgmr.msra.gmra.mrb[2].mxu0 %v1583_v60  ;;  %v2009_v60 = vld [vmem:[%s12324_s0 + $0xf8] sm:$0xff] }
 0x424   :  { %v8922_v63 = vpack.c.bf16 %v2009_v60, %v2008_v59  ;;  %v9020_v59 = vpack.c.bf16 %v2238_v58, %v2234_v57  ;;  %v2243_v60 = vld [vmem:[%s12325_s12 + $0x198] sm:$0xff]  ;;  %v7481_v58 = vld [vmem:[#allocation10] ss:$0 sm:$0xff] }
 0x4f6   :  { %v1862_v12 = vpop.f32.mrb[2].mxu0 }
 0x4f7   :  { %v11391_v13 = vadd.f32 %v1862_v12, %v1718_v8  ;;  %v1864_v14 = vpop.f32.mrb[3].mxu0  ;;  %v8928_v8 = vpack.c.bf16 %v2099_v10, %v2097_v7  ;;  %v2104_v12 = vld [vmem:[#allocation13 + $0x38] sm:$0xff]  ;;  %v2250_v7 = vld [vmem:[%s12325_s12 + $0x1d0] sm:$0xff] }
 0x4f8   :  { %v9977_v16 = vadd.f32 %v1864_v14, %v1722_v9  ;;  %v2102_v9 = vld [vmem:[#allocation13 + $0x28] sm:$0xff]  ;;  %v2101_v14 = vld [vmem:[#allocation13 + $0x20] sm:$0xff] }
 0x4f9   :  { %v1867_v21 = vmax.f32 %v11391_v13, 0.0  ;;  %v8930_v13 = vpack.c.bf16 %v2104_v12, %v2102_v9  ;;  %v8932_v45 = vpack.c.bf16 %v2103_v15, %v2101_v14  ;;  %v2254_v10 = vld [vmem:[%s12325_s12 + $0x1f0] sm:$0xff]  ;;  %v2259_v9 = vld [vmem:[%s12325_s12 + $0x218] sm:$0xff] }
 0x4fa   :  { %v1868_v19 = vmax.f32 %v9977_v16, 0.0  ;;  %v10841_v16 = vmov 0.0   ;;  %v2263_v12 = vld [vmem:[%s12325_s12 + $0x238] sm:$0xff]  ;;  %v2258_v14 = vld [vmem:[%s12325_s12 + $0x210] sm:$0xff] }
 0x4fb   :  { %v2262_v15 = vld [vmem:[%s12325_s12 + $0x230] sm:$0xff] }
 0x4fc   :  { %1972 = vmatprep.mubr.f32.mxu1 %v1868_v19 }
 0x4fd   :  { %1973 = vmatmul.mubr.f32.vlgmr.msra.gmra.mrb[2].mxu1 %v1867_v21 }
 0x4fe   :  { %8897 = vmatpush3.bf16.msra.mxu1 %v8896_v20  ;;  %2081 = vmatprep.mubr.f32.mxu1 %v1868_v19  ;;  %v2195_v19 = vld [vmem:[%s12325_s12 + $0x18] sm:$0xff]  ;;  %v8934_v20 = vpack.c.bf16 %v2197_v18, %v2193_v17 }
 0x4ff   :  { %8899 = vmatprep.subr.bf16.mxu1 %v8898_v23  ;;  %v2267_v17 = vld [vmem:[%s12325_s12 + $0x258] sm:$0xff] }
 0x500   :  { %v2271_v18 = vld [vmem:[%s12325_s12 + $0x278] sm:$0xff] }
 0x502   :  { %8901 = vmatpush3.bf16.msra.mxu1 %v8900_v29  ;;  %v2207_v29 = vld [vmem:[%s12325_s12 + $0x78] sm:$0xff] }
 0x503   :  { %8903 = vmatprep.subr.bf16.mxu1 %v8902_v30  ;;  %v9002_v30 = vpack.c.bf16 %v2207_v29, %v2203_v28  ;;  %v2274_v28 = vld [vmem:[%s12325_s12 + $0x290] sm:$0xff] }
 0x504   :  { %v2278_v29 = vld [vmem:[%s12325_s12 + $0x2b0] sm:$0xff] }
 0x506   :  { %8905 = vmatpush3.bf16.msra.mxu1 %v8904_v35  ;;  %v2215_v35 = vld [vmem:[%s12325_s12 + $0xb8] sm:$0xff] }
 0x507   :  { %8907 = vmatprep.subr.bf16.mxu1 %v8906_v36  ;;  %v9006_v36 = vpack.c.bf16 %v2215_v35, %v2211_v34  ;;  %v2282_v34 = vld [vmem:[%s12325_s12 + $0x2d0] sm:$0xff] }
 0x508   :  { %v2286_v35 = vld [vmem:[%s12325_s12 + $0x2f0] sm:$0xff] }
 0x50a   :  { %8909 = vmatpush3.bf16.msra.mxu1 %v8908_v42  ;;  %v2223_v42 = vld [vmem:[%s12325_s12 + $0xf8] sm:$0xff] }
 0x50b   :  { %8911 = vmatprep.subr.bf16.mxu1 %v8910_v43  ;;  %v9010_v43 = vpack.c.bf16 %v2223_v42, %v2219_v41  ;;  %v2290_v41 = vld [vmem:[%s12325_s12 + $0x310] sm:$0xff] }
 0x50c   :  { %v2294_v42 = vld [vmem:[%s12325_s12 + $0x330] sm:$0xff] }
 0x50e   :  { %8913 = vmatpush3.bf16.msra.mxu1 %v8912_v50  ;;  %v2231_v50 = vld [vmem:[%s12325_s12 + $0x138] sm:$0xff] }
 0x50f   :  { %8915 = vmatprep.subr.bf16.mxu1 %v8914_v51  ;;  %v9014_v51 = vpack.c.bf16 %v2231_v50, %v2227_v49  ;;  %v2298_v49 = vld [vmem:[%s12325_s12 + $0x350] sm:$0xff] }
 0x510   :  { %v2302_v50 = vld [vmem:[%s12325_s12 + $0x370] sm:$0xff] }
 0x512   :  { %8917 = vmatpush3.bf16.msra.mxu1 %v8916_v55  ;;  %v2239_v55 = vld [vmem:[%s12325_s12 + $0x178] sm:$0xff] }
 0x513   :  { %8919 = vmatprep.subr.bf16.mxu1 %v8918_v56  ;;  %v9018_v56 = vpack.c.bf16 %v2239_v55, %v2235_v54  ;;  %v2306_v54 = vld [vmem:[%s12325_s12 + $0x390] sm:$0xff] }
 0x514   :  { %v2310_v55 = vld [vmem:[%s12325_s12 + $0x3b0] sm:$0xff] }
 0x516   :  { %8921 = vmatpush3.bf16.msra.mxu1 %v8920_v62  ;;  %v2247_v62 = vld [vmem:[%s12325_s12 + $0x1b8] sm:$0xff] }
 0x517   :  { %8923 = vmatprep.subr.bf16.mxu1 %v8922_v63  ;;  %v9022_v63 = vpack.c.bf16 %v2247_v62, %v2243_v60 }
 0x51a   :  { %8925 = vmatpush3.bf16.msra.mxu1 %v8924_v1  ;;  %v9024_v1 = vpack.c.bf16 %v2246_v3, %v2242_v0  ;;  %v7482_v0 = vld [vmem:[#allocation11] ss:$0 sm:$0xff] }
 0x51b   :  { %8927 = vmatprep.subr.bf16.mxu1 %v8926_v52  ;;  %v9026_v52 = vpack.c.bf16 %v2255_v6, %v2251_v22 }
 0x51d   :  { %2082 = vmatmul.mubr.f32.vlgmr.msra.gmra.mrb[4].mxu1 %v1867_v21  ;;  %v2199_v21 = vld [vmem:[%s12325_s12 + $0x38] sm:$0xff] }
 0x51e   :  { %8929 = vmatpush1.bf16.msra.mxu1 %v8928_v8  ;;  %2185 = vmatprep.mubr.f32.mxu1 %v10841_v16  ;;  %v8998_v23 = vpack.c.bf16 %v2199_v21, %v2195_v19  ;;  %v9028_v8 = vpack.c.bf16 %v2254_v10, %v2250_v7  ;;  %v9034_v19 = vpack.c.bf16 %v2271_v18, %v2267_v17  ;;  %v2270_v21 = vld [vmem:[%s12325_s12 + $0x270] sm:$0xff]  ;;  %v2090_v7 = vld [vmem:[#allocation2] sm:$0x3] }
 0x51f   :  { %8931 = vmatprep.subr.bf16.mxu1 %v8930_v13  ;;  %v9030_v13 = vpack.c.bf16 %v2263_v12, %v2259_v9  ;;  %v2192_v10 = vld [vmem:[%s12325_s12] sm:$0xff]  ;;  %v2201_v12 = vld [vmem:[%s12325_s12 + $0x48] sm:$0xff] }
 0x520   :  { %8999 = vmatprep.subr.bf16.mxu0 %v8998_v23  ;;  %v2200_v18 = vld [vmem:[%s12325_s12 + $0x40] sm:$0xff] }
 0x521   :  { %9001 = vmatpush1.bf16.msra.mxu0 %v9000_v27  ;;  %v9038_v27 = vpack.c.bf16 %v2279_v26, %v2275_v24  ;;  %v2208_v26 = vld [vmem:[%s12325_s12 + $0x80] sm:$0xff] }
 0x522   :  { %8933 = vmatpush1.bf16.msra.mxu1 %v8932_v45  ;;  %9003 = vmatprep.subr.bf16.mxu0 %v9002_v30  ;;  %v9032_v45 = vpack.c.bf16 %v2262_v15, %v2258_v14  ;;  %v9040_v30 = vpack.c.bf16 %v2278_v29, %v2274_v28  ;;  %v2217_v28 = vld [vmem:[%s12325_s12 + $0xc8] sm:$0xff] }
 0x523   :  { %8935 = vmatprep.subr.bf16.mxu1 %v8934_v20  ;;  %v2266_v20 = vld [vmem:[%s12325_s12 + $0x250] sm:$0xff]  ;;  %v2221_v29 = vld [vmem:[%s12325_s12 + $0xe8] sm:$0xff] }
 0x524   :  { %v9036_v23 = vpack.c.bf16 %v2270_v21, %v2266_v20  ;;  %v2209_v20 = vld [vmem:[%s12325_s12 + $0x88] sm:$0xff] }
 0x525   :  { %9005 = vmatpush1.bf16.msra.mxu0 %v9004_v33  ;;  %v9042_v33 = vpack.c.bf16 %v2287_v32, %v2283_v31  ;;  %v2213_v21 = vld [vmem:[%s12325_s12 + $0xa8] sm:$0xff]  ;;  %v8946_v31 = vpack.c.bf16 %v2221_v29, %v2217_v28  ;;  %v2216_v32 = vld [vmem:[%s12325_s12 + $0xc0] sm:$0xff] }
 0x526   :  { %9007 = vmatprep.subr.bf16.mxu0 %v9006_v36  ;;  %v9044_v36 = vpack.c.bf16 %v2286_v35, %v2282_v34  ;;  %v8942_v24 = vpack.c.bf16 %v2213_v21, %v2209_v20  ;;  %v2225_v34 = vld [vmem:[%s12325_s12 + $0x108] sm:$0xff] }
 0x527   :  { %v2229_v35 = vld [vmem:[%s12325_s12 + $0x128] sm:$0xff] }
 0x529   :  { %9009 = vmatpush1.bf16.msra.mxu0 %v9008_v40  ;;  %v9046_v40 = vpack.c.bf16 %v2295_v38, %v2291_v37  ;;  %v8950_v37 = vpack.c.bf16 %v2229_v35, %v2225_v34  ;;  %v2224_v38 = vld [vmem:[%s12325_s12 + $0x100] sm:$0xff] }
 0x52a   :  { %9011 = vmatprep.subr.bf16.mxu0 %v9010_v43  ;;  %v9048_v43 = vpack.c.bf16 %v2294_v42, %v2290_v41  ;;  %v2233_v41 = vld [vmem:[%s12325_s12 + $0x148] sm:$0xff] }
 0x52b   :  { %v2237_v42 = vld [vmem:[%s12325_s12 + $0x168] sm:$0xff] }
 0x52d   :  { %9013 = vmatpush1.bf16.msra.mxu0 %v9012_v47  ;;  %v9050_v47 = vpack.c.bf16 %v2303_v46, %v2299_v44  ;;  %v8954_v44 = vpack.c.bf16 %v2237_v42, %v2233_v41  ;;  %v2232_v46 = vld [vmem:[%s12325_s12 + $0x140] sm:$0xff] }
 0x52e   :  { %9015 = vmatprep.subr.bf16.mxu0 %v9014_v51  ;;  %v9052_v51 = vpack.c.bf16 %v2302_v50, %v2298_v49  ;;  %v2241_v49 = vld [vmem:[%s12325_s12 + $0x188] sm:$0xff] }
 0x52f   :  { %v2245_v50 = vld [vmem:[%s12325_s12 + $0x1a8] sm:$0xff] }
 0x531   :  { %9017 = vmatpush1.bf16.msra.mxu0 %v9016_v25  ;;  %v9054_v25 = vpack.c.bf16 %v2311_v53, %v2307_v39  ;;  %v8958_v39 = vpack.c.bf16 %v2245_v50, %v2241_v49  ;;  %v2240_v53 = vld [vmem:[%s12325_s12 + $0x180] sm:$0xff]  ;;  %v2317_v49 = vld [vmem:[%s12325_s12 + $0x3e8] sm:$0xff]  ;;  %v2315_v50 = vld [vmem:[%s12325_s12 + $0x3d8] sm:$0xff] }
 0x532   :  { %9019 = vmatprep.subr.bf16.mxu0 %v9018_v56  ;;  %v9056_v56 = vpack.c.bf16 %v2310_v55, %v2306_v54  ;;  %v2249_v54 = vld [vmem:[%s12325_s12 + $0x1c8] sm:$0xff] }
 0x533   :  { %v2253_v55 = vld [vmem:[%s12325_s12 + $0x1e8] sm:$0xff] }
 0x535   :  { %9021 = vmatpush1.bf16.msra.mxu0 %v9020_v59 }
 0x536   :  { %9023 = vmatprep.subr.bf16.mxu0 %v9022_v63 }
 0x539   :  { %9025 = vmatpush1.bf16.msra.mxu0 %v9024_v1 }
 0x53a   :  { %9027 = vmatprep.subr.bf16.mxu0 %v9026_v52 }
 0x53d   :  { %9029 = vmatpush1.bf16.msra.mxu0 %v9028_v8  ;;  %v2196_v8 = vld [vmem:[%s12325_s12 + $0x20] sm:$0xff] }
 0x53e   :  { %9031 = vmatprep.subr.bf16.mxu0 %v9030_v13  ;;  %v2205_v13 = vld [vmem:[%s12325_s12 + $0x68] sm:$0xff]  ;;  %v8936_v15 = vpack.c.bf16 %v2196_v8, %v2192_v10  ;;  %v2264_v10 = vld [vmem:[%s12325_s12 + $0x240] sm:$0xff] }
 0x53f   :  { %v8938_v17 = vpack.c.bf16 %v2205_v13, %v2201_v12  ;;  %v2268_v8 = vld [vmem:[%s12325_s12 + $0x260] sm:$0xff]  ;;  %v2277_v12 = vld [vmem:[%s12325_s12 + $0x2a8] sm:$0xff] }
 0x540   :  { %v8972_v13 = vpack.c.bf16 %v2268_v8, %v2264_v10  ;;  %v2498_v10 = vld [vmem:[#allocation17 + $0x10] sm:$0xff] }
 0x541   :  { %9033 = vmatpush1.bf16.msra.mxu0 %v9032_v45  ;;  %v2506_v8 = vld [vmem:[#allocation17 + $0x50] sm:$0xff] }
 0x542   :  { %9035 = vmatprep.subr.bf16.mxu0 %v9034_v19  ;;  %v2204_v19 = vld [vmem:[%s12325_s12 + $0x60] sm:$0xff] }
 0x545   :  { %9037 = vmatpush1.bf16.msra.mxu0 %v9036_v23  ;;  %v8940_v23 = vpack.c.bf16 %v2204_v19, %v2200_v18  ;;  %v2281_v18 = vld [vmem:[%s12325_s12 + $0x2c8] sm:$0xff] }
 0x546   :  { %9039 = vmatprep.subr.bf16.mxu0 %v9038_v27  ;;  %v2212_v27 = vld [vmem:[%s12325_s12 + $0xa0] sm:$0xff]  ;;  %v2285_v19 = vld [vmem:[%s12325_s12 + $0x2e8] sm:$0xff] }
 0x547   :  { %v8978_v21 = vpack.c.bf16 %v2285_v19, %v2281_v18 }
 0x549   :  { %9041 = vmatpush1.bf16.msra.mxu0 %v9040_v30  ;;  %v8944_v30 = vpack.c.bf16 %v2212_v27, %v2208_v26  ;;  %v2289_v26 = vld [vmem:[%s12325_s12 + $0x308] sm:$0xff] }
 0x54a   :  { %9043 = vmatprep.subr.bf16.mxu0 %v9042_v33  ;;  %v2220_v33 = vld [vmem:[%s12325_s12 + $0xe0] sm:$0xff]  ;;  %v2293_v27 = vld [vmem:[%s12325_s12 + $0x328] sm:$0xff] }
 0x54b   :  { %v8982_v29 = vpack.c.bf16 %v2293_v27, %v2289_v26 }
 0x54d   :  { %9045 = vmatpush1.bf16.msra.mxu0 %v9044_v36  ;;  %v8948_v36 = vpack.c.bf16 %v2220_v33, %v2216_v32  ;;  %v2297_v32 = vld [vmem:[%s12325_s12 + $0x348] sm:$0xff] }
 0x54e   :  { %9047 = vmatprep.subr.bf16.mxu0 %v9046_v40  ;;  %v2228_v40 = vld [vmem:[%s12325_s12 + $0x120] sm:$0xff]  ;;  %v2301_v33 = vld [vmem:[%s12325_s12 + $0x368] sm:$0xff] }
 0x54f   :  { %v8986_v35 = vpack.c.bf16 %v2301_v33, %v2297_v32  ;;  %v2531_v32 = vld [vmem:[#allocation17 + $0x118] sm:$0xff] }
 0x550   :  { %v2539_v33 = vld [vmem:[#allocation17 + $0x158] sm:$0xff] }
 0x551   :  { %9049 = vmatpush1.bf16.msra.mxu0 %v9048_v43  ;;  %v8952_v43 = vpack.c.bf16 %v2228_v40, %v2224_v38  ;;  %v2305_v38 = vld [vmem:[%s12325_s12 + $0x388] sm:$0xff] }
 0x552   :  { %9051 = vmatprep.subr.bf16.mxu0 %v9050_v47  ;;  %v2236_v47 = vld [vmem:[%s12325_s12 + $0x160] sm:$0xff]  ;;  %v2309_v40 = vld [vmem:[%s12325_s12 + $0x3a8] sm:$0xff] }
 0x553   :  { %v8990_v42 = vpack.c.bf16 %v2309_v40, %v2305_v38  ;;  %v9198_v40 = vpack.c.bf16 %v2539_v33, %v2531_v32  ;;  %v2594_v32 = vld [vmem:[#allocation17 + $0x310] sm:$0xff] }
 0x554   :  { %v2602_v33 = vld [vmem:[#allocation17 + $0x350] sm:$0xff] }
 0x555   :  { %9053 = vmatpush1.bf16.msra.mxu0 %v9052_v51  ;;  %v8956_v51 = vpack.c.bf16 %v2236_v47, %v2232_v46  ;;  %v2313_v47 = vld [vmem:[%s12325_s12 + $0x3c8] sm:$0xff] }
 0x556   :  { %9055 = vmatprep.subr.bf16.mxu0 %v9054_v25  ;;  %v2244_v25 = vld [vmem:[%s12325_s12 + $0x1a0] sm:$0xff] }
 0x559   :  { %9057 = vmatpush1.bf16.msra.mxu0 %v9056_v56  ;;  %v8960_v56 = vpack.c.bf16 %v2244_v25, %v2240_v53  ;;  %v2312_v53 = vld [vmem:[%s12325_s12 + $0x3c0] sm:$0xff] }
 0x55a   :  { %v2316_v25 = vld [vmem:[%s12325_s12 + $0x3e0] sm:$0xff] }
 0x5d0   :  { %v7612_v57 = vpop.f32.mrb[2].mxu1 }
 0x5d1   :  { %v7613_v59 = vpop.f32.mrb[3].mxu1 }
 0x5d2   :  { %v7614_v60 = vadd.f32 %v7613_v59, %v7612_v57  ;;  %v8962_v57 = vpack.c.bf16 %v2253_v55, %v2249_v54  ;;  %v2252_v59 = vld [vmem:[%s12325_s12 + $0x1e0] sm:$0xff]  ;;  %v8996_v55 = vpack.c.bf16 %v2316_v25, %v2312_v53 }
 0x5d4   :  { %v1975_v62 = vadd.f32 %v7614_v60, %v7481_v58  ;;  %v2248_v58 = vld [vmem:[%s12325_s12 + $0x1c0] sm:$0xff]  ;;  %v2257_v60 = vld [vmem:[%s12325_s12 + $0x208] sm:$0xff] }
 0x5d6   :  { %2094 = vst.msk [vmem:[#allocation39] sm:$0x3] %vm2093_vm0, %v1975_v62 }
 0x5f0   :  { %v7647_v63 = vpop.f32.mrb[4].mxu1 }
 0x5f1   :  { %v7648_v3 = vpop.f32.mrb[5].mxu1 }
 0x5f2   :  { %v7649_v1 = vadd.f32 %v7648_v3, %v7647_v63  ;;  %v8964_v63 = vpack.c.bf16 %v2252_v59, %v2248_v58  ;;  %v2256_v3 = vld [vmem:[%s12325_s12 + $0x200] sm:$0xff] }
 0x5f3   :  { %v2497_v59 = vld [vmem:[#allocation17 + $0x8] sm:$0xff] }
 0x5f4   :  { %v2084_v22 = vadd.f32 %v7649_v1, %v7482_v0  ;;  %v2260_v1 = vld [vmem:[%s12325_s12 + $0x220] sm:$0xff] }
 0x5f6   :  { %v2087_v6 = vmul.f32 0.5, %v2084_v22  ;;  %2095 = vst.msk [vmem:[#allocation41] sm:$0x3] %vm2093_vm0, %v2084_v22  ;;  %v2265_v22 = vld [vmem:[%s12325_s12 + $0x248] sm:$0xff] }
 0x5f8   :  { %v2088_v52 = vmul.f32 1.442695, %v2087_v6  ;;  %v2269_v6 = vld [vmem:[%s12325_s12 + $0x268] sm:$0xff] }
 0x5fa   :  { %10088 = vpow2.f32 %v2088_v52  ;;  %v8968_v52 = vpack.c.bf16 %v2260_v1, %v2256_v3  ;;  %v2105_v1 = vld [vmem:[#allocation14] sm:$0x3] }
 0x604   :  { %v10089_v9 = vpop.eup %10088 }
 0x605   :  { %v2091_v14 = vmul.f32 %v10089_v9, %v2090_v7  ;;  %v8970_v7 = vpack.c.bf16 %v2269_v6, %v2265_v22  ;;  %v2273_v9 = vld [vmem:[%s12325_s12 + $0x288] sm:$0xff]  ;;  %v2114_v22 = vrot.slane %v2105_v1, %v11302_v4  ;;  %v2496_v6 = vld [vmem:[#allocation17] sm:$0xff] }
 0x607   :  { %v11493_v45 = vadd.f32 %v2091_v14, %v1975_v62  ;;  %v2261_v62 = vld [vmem:[%s12325_s12 + $0x228] sm:$0xff]  ;;  %v8974_v14 = vpack.c.bf16 %v2277_v12, %v2273_v9  ;;  %v2513_v9 = vld [vmem:[#allocation17 + $0x88] sm:$0xff] }
 0x608   :  { %v8966_v0 = vpack.c.bf16 %v2261_v62, %v2257_v60  ;;  %v2505_v60 = vld [vmem:[#allocation17 + $0x48] sm:$0xff]  ;;  %v2499_v62 = vld [vmem:[#allocation17 + $0x18] sm:$0xff] }
 0x609   :  { %7483 = vmatmul.mubr.msk.f32.vlgmr.msra.gmra.mrb[6].mxu1 %vm2117_vm1, %v11493_v45  ;;  %2096 = vst.msk [vmem:[#allocation38] sm:$0x3] %vm2093_vm0, %v11493_v45 }
 0x60a   :  { %8937 = vmatpush1.bf16.msra.mxu1 %v8936_v15  ;;  %v2272_v15 = vld [vmem:[%s12325_s12 + $0x280] sm:$0xff] }
 0x60b   :  { %8939 = vmatprep.subr.bf16.mxu1 %v8938_v17  ;;  %v2276_v17 = vld [vmem:[%s12325_s12 + $0x2a0] sm:$0xff] }
 0x60c   :  { %v8976_v20 = vpack.c.bf16 %v2276_v17, %v2272_v15  ;;  %v2523_v15 = vld [vmem:[#allocation17 + $0xd8] sm:$0xff] }
 0x60e   :  { %8941 = vmatpush1.bf16.msra.mxu1 %v8940_v23  ;;  %v2280_v23 = vld [vmem:[%s12325_s12 + $0x2c0] sm:$0xff] }
 0x60f   :  { %8943 = vmatprep.subr.bf16.mxu1 %v8942_v24  ;;  %v2284_v24 = vld [vmem:[%s12325_s12 + $0x2e0] sm:$0xff] }
 0x610   :  { %v8980_v28 = vpack.c.bf16 %v2284_v24, %v2280_v23  ;;  %v2520_v23 = vld [vmem:[#allocation17 + $0xc0] sm:$0xff] }
 0x612   :  { %8945 = vmatpush1.bf16.msra.mxu1 %v8944_v30  ;;  %v2288_v30 = vld [vmem:[%s12325_s12 + $0x300] sm:$0xff] }
 0x613   :  { %8947 = vmatprep.subr.bf16.mxu1 %v8946_v31  ;;  %v2292_v31 = vld [vmem:[%s12325_s12 + $0x320] sm:$0xff] }
 0x614   :  { %v8984_v34 = vpack.c.bf16 %v2292_v31, %v2288_v30  ;;  %v2529_v30 = vld [vmem:[#allocation17 + $0x108] sm:$0xff] }
 0x615   :  { %v2537_v31 = vld [vmem:[#allocation17 + $0x148] sm:$0xff] }
 0x616   :  { %8949 = vmatpush1.bf16.msra.mxu1 %v8948_v36  ;;  %v2296_v36 = vld [vmem:[%s12325_s12 + $0x340] sm:$0xff]  ;;  %v9070_v38 = vpack.c.bf16 %v2537_v31, %v2529_v30 }
 0x617   :  { %8951 = vmatprep.subr.bf16.mxu1 %v8950_v37  ;;  %v2300_v37 = vld [vmem:[%s12325_s12 + $0x360] sm:$0xff] }
 0x618   :  { %v8988_v41 = vpack.c.bf16 %v2300_v37, %v2296_v36  ;;  %v2528_v36 = vld [vmem:[#allocation17 + $0x100] sm:$0xff] }
 0x619   :  { %v2536_v37 = vld [vmem:[#allocation17 + $0x140] sm:$0xff] }
 0x61a   :  { %8953 = vmatpush1.bf16.msra.mxu1 %v8952_v43  ;;  %v2304_v43 = vld [vmem:[%s12325_s12 + $0x380] sm:$0xff] }
 0x61b   :  { %8955 = vmatprep.subr.bf16.mxu1 %v8954_v44  ;;  %v2308_v44 = vld [vmem:[%s12325_s12 + $0x3a0] sm:$0xff] }
 0x61c   :  { %v8992_v46 = vpack.c.bf16 %v2308_v44, %v2304_v43  ;;  %v2545_v43 = vld [vmem:[#allocation17 + $0x188] sm:$0xff] }
 0x61d   :  { %v2553_v44 = vld [vmem:[#allocation17 + $0x1c8] sm:$0xff] }
 0x61e   :  { %8957 = vmatpush1.bf16.msra.mxu1 %v8956_v51  ;;  %v8994_v51 = vpack.c.bf16 %v2317_v49, %v2313_v47  ;;  %v2555_v47 = vld [vmem:[#allocation17 + $0x1d8] sm:$0xff]  ;;  %v9072_v49 = vpack.c.bf16 %v2536_v37, %v2528_v36  ;;  %v9074_v53 = vpack.c.bf16 %v2553_v44, %v2545_v43 }
 0x61f   :  { %8959 = vmatprep.subr.bf16.mxu1 %v8958_v39  ;;  %v2319_v39 = vld [vmem:[%s12325_s12 + $0x3f8] sm:$0xff]  ;;  %v2611_v36 = vld [vmem:[#allocation17 + $0x398] sm:$0xff] }
 0x620   :  { %v9058_v54 = vpack.c.bf16 %v2319_v39, %v2315_v50  ;;  %v2552_v39 = vld [vmem:[#allocation17 + $0x1c0] sm:$0xff]  ;;  %v2619_v37 = vld [vmem:[#allocation17 + $0x3d8] sm:$0xff] }
 0x621   :  { %v9218_v44 = vpack.c.bf16 %v2619_v37, %v2611_v36  ;;  %v2674_v36 = vld [vmem:[#allocation17 + $0x590] sm:$0xff] }
 0x622   :  { %8961 = vmatpush1.bf16.msra.mxu1 %v8960_v56  ;;  %v2314_v56 = vld [vmem:[%s12325_s12 + $0x3d0] sm:$0xff]  ;;  %9059 = vmatprep.subr.bf16.mxu0 %v9058_v54  ;;  %v2546_v54 = vld [vmem:[#allocation17 + $0x190] sm:$0xff] }
 0x623   :  { %8963 = vmatprep.subr.bf16.mxu1 %v8962_v57  ;;  %v2318_v57 = vld [vmem:[%s12325_s12 + $0x3f0] sm:$0xff]  ;;  %v2682_v37 = vld [vmem:[#allocation17 + $0x5d0] sm:$0xff] }
 0x624   :  { %v9060_v58 = vpack.c.bf16 %v2318_v57, %v2314_v56  ;;  %v2561_v56 = vld [vmem:[#allocation17 + $0x208] sm:$0xff] }
 0x625   :  { %v2569_v57 = vld [vmem:[#allocation17 + $0x248] sm:$0xff] }
 0x626   :  { %8965 = vmatpush1.bf16.msra.mxu1 %v8964_v63  ;;  %9061 = vmatpush1.bf16.msra.mxu0 %v9060_v58  ;;  %v9062_v63 = vpack.c.bf16 %v2505_v60, %v2497_v59  ;;  %v2563_v58 = vld [vmem:[#allocation17 + $0x218] sm:$0xff] }
 0x627   :  { %8967 = vmatprep.subr.bf16.mxu1 %v8966_v0  ;;  %v2507_v0 = vld [vmem:[#allocation17 + $0x58] sm:$0xff] }
 0x628   :  { %v9190_v3 = vpack.c.bf16 %v2507_v0, %v2499_v62  ;;  %v2571_v59 = vld [vmem:[#allocation17 + $0x258] sm:$0xff]  ;;  %v2568_v0 = vld [vmem:[#allocation17 + $0x240] sm:$0xff] }
 0x62a   :  { %8969 = vmatpush1.bf16.msra.mxu1 %v8968_v52  ;;  %9191 = vmatprep.subr.bf16.mxu0 %v9190_v3  ;;  %v2504_v52 = vld [vmem:[#allocation17 + $0x40] sm:$0xff]  ;;  %v9078_v3 = vpack.c.bf16 %v2569_v57, %v2561_v56 }
 0x62b   :  { %8971 = vmatprep.subr.bf16.mxu1 %v8970_v7  ;;  %v2110_v7 = vrot.slane %v2105_v1, %v11297_v2  ;;  %v9064_v19 = vpack.c.bf16 %v2504_v52, %v2496_v6  ;;  %v9206_v1 = vpack.c.bf16 %v2571_v59, %v2563_v58  ;;  %v2570_v6 = vld [vmem:[#allocation17 + $0x250] sm:$0xff]  ;;  %v2577_v52 = vld [vmem:[#allocation17 + $0x288] sm:$0xff] }
 0x62c   :  { %v2626_v58 = vld [vmem:[#allocation17 + $0x410] sm:$0xff] }
 0x62d   :  { %v2634_v59 = vld [vmem:[#allocation17 + $0x450] sm:$0xff] }
 0x62e   :  { %8973 = vmatpush1.bf16.msra.mxu1 %v8972_v13  ;;  %v2521_v13 = vld [vmem:[#allocation17 + $0xc8] sm:$0xff] }
 0x62f   :  { %8975 = vmatprep.subr.bf16.mxu1 %v8974_v14  ;;  %v2515_v14 = vld [vmem:[#allocation17 + $0x98] sm:$0xff]  ;;  %v9066_v26 = vpack.c.bf16 %v2521_v13, %v2513_v9  ;;  %v2576_v13 = vld [vmem:[#allocation17 + $0x280] sm:$0xff] }
 0x630   :  { %v9194_v27 = vpack.c.bf16 %v2523_v15, %v2515_v14  ;;  %v2584_v14 = vld [vmem:[#allocation17 + $0x2c0] sm:$0xff] }
 0x632   :  { %8977 = vmatpush1.bf16.msra.mxu1 %v8976_v20  ;;  %v9192_v20 = vpack.c.bf16 %v2506_v8, %v2498_v10  ;;  %v2579_v10 = vld [vmem:[#allocation17 + $0x298] sm:$0xff] }
 0x633   :  { %8979 = vmatprep.subr.bf16.mxu1 %v8978_v21  ;;  %v2512_v21 = vld [vmem:[#allocation17 + $0x80] sm:$0xff]  ;;  %v2587_v8 = vld [vmem:[#allocation17 + $0x2d8] sm:$0xff] }
 0x636   :  { %8981 = vmatpush1.bf16.msra.mxu1 %v8980_v28  ;;  %v2514_v28 = vld [vmem:[#allocation17 + $0x90] sm:$0xff] }
 0x637   :  { %8983 = vmatprep.subr.bf16.mxu1 %v8982_v29  ;;  %v2522_v29 = vld [vmem:[#allocation17 + $0xd0] sm:$0xff] }
 0x63a   :  { %8985 = vmatpush1.bf16.msra.mxu1 %v8984_v34  ;;  %v9068_v34 = vpack.c.bf16 %v2520_v23, %v2512_v21  ;;  %v2601_v21 = vld [vmem:[#allocation17 + $0x348] sm:$0xff]  ;;  %v2595_v23 = vld [vmem:[#allocation17 + $0x318] sm:$0xff] }
 0x63b   :  { %8987 = vmatprep.subr.bf16.mxu1 %v8986_v35  ;;  %v9196_v35 = vpack.c.bf16 %v2522_v29, %v2514_v28  ;;  %v2592_v28 = vld [vmem:[#allocation17 + $0x300] sm:$0xff] }
 0x63c   :  { %v2600_v29 = vld [vmem:[#allocation17 + $0x340] sm:$0xff] }
 0x63e   :  { %8989 = vmatpush1.bf16.msra.mxu1 %v8988_v41  ;;  %v2530_v41 = vld [vmem:[#allocation17 + $0x110] sm:$0xff] }
 0x63f   :  { %8991 = vmatprep.subr.bf16.mxu1 %v8990_v42  ;;  %v2538_v42 = vld [vmem:[#allocation17 + $0x150] sm:$0xff] }
 0x640   :  { %v9200_v50 = vpack.c.bf16 %v2538_v42, %v2530_v41  ;;  %v2608_v41 = vld [vmem:[#allocation17 + $0x380] sm:$0xff] }
 0x641   :  { %v2616_v42 = vld [vmem:[#allocation17 + $0x3c0] sm:$0xff] }
 0x642   :  { %8993 = vmatpush1.bf16.msra.mxu1 %v8992_v46  ;;  %v2547_v46 = vld [vmem:[#allocation17 + $0x198] sm:$0xff] }
 0x643   :  { %8995 = vmatprep.subr.bf16.mxu1 %v8994_v51  ;;  %v2544_v51 = vld [vmem:[#allocation17 + $0x180] sm:$0xff]  ;;  %v9202_v25 = vpack.c.bf16 %v2555_v47, %v2547_v46  ;;  %v2610_v46 = vld [vmem:[#allocation17 + $0x390] sm:$0xff] }
 0x644   :  { %v9076_v60 = vpack.c.bf16 %v2552_v39, %v2544_v51  ;;  %v2618_v47 = vld [vmem:[#allocation17 + $0x3d0] sm:$0xff]  ;;  %v2627_v51 = vld [vmem:[#allocation17 + $0x418] sm:$0xff] }
 0x645   :  { %v2635_v39 = vld [vmem:[#allocation17 + $0x458] sm:$0xff] }
 0x646   :  { %8997 = vmatpush1.bf16.msra.mxu1 %v8996_v55  ;;  %v2554_v55 = vld [vmem:[#allocation17 + $0x1d0] sm:$0xff]  ;;  %v9222_v57 = vpack.c.bf16 %v2635_v39, %v2627_v51 }
 0x647   :  { %9063 = vmatprep.subr.bf16.mxu1 %v9062_v63  ;;  %v9204_v62 = vpack.c.bf16 %v2554_v55, %v2546_v54  ;;  %v2560_v63 = vld [vmem:[#allocation17 + $0x200] sm:$0xff]  ;;  %v2690_v51 = vld [vmem:[#allocation17 + $0x610] sm:$0xff] }
 0x648   :  { %v9080_v9 = vpack.c.bf16 %v2568_v0, %v2560_v63  ;;  %v2624_v54 = vld [vmem:[#allocation17 + $0x400] sm:$0xff]  ;;  %v2643_v63 = vld [vmem:[#allocation17 + $0x498] sm:$0xff]  ;;  %v2698_v39 = vld [vmem:[#allocation17 + $0x650] sm:$0xff] }
 0x649   :  { %v2632_v55 = vld [vmem:[#allocation17 + $0x440] sm:$0xff]  ;;  %v2651_v0 = vld [vmem:[#allocation17 + $0x4d8] sm:$0xff] }
 0x6dc   :  { %v2187_v12 = vpop.f32.mrb[6].mxu1 }
 0x6dd   :  { %v2189_v17 = vpop.f32.mrb[7].mxu1  ;;  %v2188_v24 = vadd.f32 %v2187_v12, %v2110_v7  ;;  %v2585_v7 = vld [vmem:[#allocation17 + $0x2c8] sm:$0xff] }
 0x6de   :  { %v2190_v18 = vadd.f32 %v2189_v17, %v2114_v22  ;;  %v2562_v22 = vld [vmem:[#allocation17 + $0x210] sm:$0xff]  ;;  %v9082_v15 = vpack.c.bf16 %v2585_v7, %v2577_v52  ;;  %v9210_v17 = vpack.c.bf16 %v2587_v8, %v2579_v10  ;;  %v9226_v7 = vpack.c.bf16 %v2651_v0, %v2643_v63 }
 0x6df   :  { %v9208_v12 = vpack.c.bf16 %v2570_v6, %v2562_v22  ;;  %v2640_v22 = vld [vmem:[#allocation17 + $0x480] sm:$0xff]  ;;  %v2642_v10 = vld [vmem:[#allocation17 + $0x490] sm:$0xff] }
 0x6e0   :  { %2406 = vmatprep.mubr.f32.mxu1 %v2190_v18  ;;  %2477 = vmatprep.mubr.f32.mxu0 %v2190_v18  ;;  %v2578_v18 = vld [vmem:[#allocation17 + $0x290] sm:$0xff]  ;;  %v2648_v6 = vld [vmem:[#allocation17 + $0x4c0] sm:$0xff] }
 0x6e1   :  { %2407 = vmatmul.mubr.f32.vlgmr.msra.gmra.mrb[8].mxu1 %v2188_v24  ;;  %2478 = vmatmul.mubr.f32.vlgmr.msra.gmra.mrb[4].mxu0 %v2188_v24  ;;  %v2603_v24 = vld [vmem:[#allocation17 + $0x358] sm:$0xff]  ;;  %v2650_v8 = vld [vmem:[#allocation17 + $0x4d0] sm:$0xff] }
 0x6e2   :  { %9065 = vmatpush1.bf16.msra.mxu1 %v9064_v19  ;;  %9193 = vmatpush1.bf16.msra.mxu0 %v9192_v20  ;;  %v2586_v19 = vld [vmem:[#allocation17 + $0x2d0] sm:$0xff]  ;;  %v2593_v20 = vld [vmem:[#allocation17 + $0x308] sm:$0xff]  ;;  %v9214_v31 = vpack.c.bf16 %v2603_v24, %v2595_v23 }
 0x6e3   :  { %9067 = vmatprep.subr.bf16.mxu1 %v9066_v26  ;;  %9195 = vmatprep.subr.bf16.mxu0 %v9194_v27  ;;  %v9084_v26 = vpack.c.bf16 %v2584_v14, %v2576_v13  ;;  %v9212_v27 = vpack.c.bf16 %v2586_v19, %v2578_v18  ;;  %v9086_v30 = vpack.c.bf16 %v2601_v21, %v2593_v20  ;;  %v2659_v13 = vld [vmem:[#allocation17 + $0x518] sm:$0xff]  ;;  %v2656_v18 = vld [vmem:[#allocation17 + $0x500] sm:$0xff]  ;;  %v2658_v23 = vld [vmem:[#allocation17 + $0x510] sm:$0xff] }
 0x6e4   :  { %v2667_v14 = vld [vmem:[#allocation17 + $0x558] sm:$0xff]  ;;  %v2664_v19 = vld [vmem:[#allocation17 + $0x540] sm:$0xff]  ;;  %v2666_v24 = vld [vmem:[#allocation17 + $0x550] sm:$0xff] }
 0x6e5   :  { %v9230_v21 = vpack.c.bf16 %v2667_v14, %v2659_v13  ;;  %v2706_v63 = vld [vmem:[#allocation17 + $0x690] sm:$0xff] }
 0x6e6   :  { %9069 = vmatpush1.bf16.msra.mxu1 %v9068_v34  ;;  %9197 = vmatpush1.bf16.msra.mxu0 %v9196_v35  ;;  %v2609_v34 = vld [vmem:[#allocation17 + $0x388] sm:$0xff]  ;;  %v2714_v0 = vld [vmem:[#allocation17 + $0x6d0] sm:$0xff] }
 0x6e7   :  { %9071 = vmatprep.subr.bf16.mxu1 %v9070_v38  ;;  %9199 = vmatprep.subr.bf16.mxu0 %v9198_v40  ;;  %v2617_v35 = vld [vmem:[#allocation17 + $0x3c8] sm:$0xff]  ;;  %v9088_v38 = vpack.c.bf16 %v2600_v29, %v2592_v28  ;;  %v9216_v40 = vpack.c.bf16 %v2602_v33, %v2594_v32  ;;  %v2675_v28 = vld [vmem:[#allocation17 + $0x598] sm:$0xff]  ;;  %v2672_v32 = vld [vmem:[#allocation17 + $0x580] sm:$0xff] }
 0x6e8   :  { %v9090_v43 = vpack.c.bf16 %v2617_v35, %v2609_v34  ;;  %v2683_v29 = vld [vmem:[#allocation17 + $0x5d8] sm:$0xff]  ;;  %v2680_v33 = vld [vmem:[#allocation17 + $0x5c0] sm:$0xff]  ;;  %v2722_v13 = vld [vmem:[#allocation17 + $0x710] sm:$0xff] }
 0x6e9   :  { %v9234_v35 = vpack.c.bf16 %v2683_v29, %v2675_v28  ;;  %v2738_v29 = vld [vmem:[#allocation17 + $0x790] sm:$0xff] }
 0x6ea   :  { %9073 = vmatpush1.bf16.msra.mxu1 %v9072_v49  ;;  %9201 = vmatpush1.bf16.msra.mxu0 %v9200_v50  ;;  %v2625_v49 = vld [vmem:[#allocation17 + $0x408] sm:$0xff] }
 0x6eb   :  { %9075 = vmatprep.subr.bf16.mxu1 %v9074_v53  ;;  %9203 = vmatprep.subr.bf16.mxu0 %v9202_v25  ;;  %v2633_v50 = vld [vmem:[#allocation17 + $0x448] sm:$0xff]  ;;  %v9092_v53 = vpack.c.bf16 %v2616_v42, %v2608_v41  ;;  %v9220_v25 = vpack.c.bf16 %v2618_v47, %v2610_v46  ;;  %v2691_v41 = vld [vmem:[#allocation17 + $0x618] sm:$0xff]  ;;  %v2688_v46 = vld [vmem:[#allocation17 + $0x600] sm:$0xff] }
 0x6ec   :  { %v9094_v56 = vpack.c.bf16 %v2633_v50, %v2625_v49  ;;  %v2699_v42 = vld [vmem:[#allocation17 + $0x658] sm:$0xff]  ;;  %v2696_v47 = vld [vmem:[#allocation17 + $0x640] sm:$0xff] }
 0x6ed   :  { %v9238_v50 = vpack.c.bf16 %v2699_v42, %v2691_v41 }
 0x6ee   :  { %9077 = vmatpush1.bf16.msra.mxu1 %v9076_v60  ;;  %9205 = vmatpush1.bf16.msra.mxu0 %v9204_v62  ;;  %v2641_v60 = vld [vmem:[#allocation17 + $0x488] sm:$0xff] }
 0x6ef   :  { %9079 = vmatprep.subr.bf16.mxu1 %v9078_v3  ;;  %9207 = vmatprep.subr.bf16.mxu0 %v9206_v1  ;;  %v2649_v62 = vld [vmem:[#allocation17 + $0x4c8] sm:$0xff]  ;;  %v9096_v3 = vpack.c.bf16 %v2632_v55, %v2624_v54  ;;  %v9224_v1 = vpack.c.bf16 %v2634_v59, %v2626_v58  ;;  %v2707_v54 = vld [vmem:[#allocation17 + $0x698] sm:$0xff]  ;;  %v2704_v58 = vld [vmem:[#allocation17 + $0x680] sm:$0xff] }
 0x6f0   :  { %v9098_v52 = vpack.c.bf16 %v2649_v62, %v2641_v60  ;;  %v2715_v55 = vld [vmem:[#allocation17 + $0x6d8] sm:$0xff]  ;;  %v2712_v59 = vld [vmem:[#allocation17 + $0x6c0] sm:$0xff] }
 0x6f1   :  { %v9242_v62 = vpack.c.bf16 %v2715_v55, %v2707_v54  ;;  %v2762_v54 = vld [vmem:[#allocation17 + $0x850] sm:$0xff] }
 0x6f2   :  { %9081 = vmatpush1.bf16.msra.mxu1 %v9080_v9  ;;  %9209 = vmatpush1.bf16.msra.mxu0 %v9208_v12  ;;  %v2657_v9 = vld [vmem:[#allocation17 + $0x508] sm:$0xff] }
 0x6f3   :  { %9083 = vmatprep.subr.bf16.mxu1 %v9082_v15  ;;  %9211 = vmatprep.subr.bf16.mxu0 %v9210_v17  ;;  %v2665_v12 = vld [vmem:[#allocation17 + $0x548] sm:$0xff]  ;;  %v9100_v15 = vpack.c.bf16 %v2648_v6, %v2640_v22  ;;  %v9228_v17 = vpack.c.bf16 %v2650_v8, %v2642_v10  ;;  %v2723_v22 = vld [vmem:[#allocation17 + $0x718] sm:$0xff] }
 0x6f4   :  { %v9102_v20 = vpack.c.bf16 %v2665_v12, %v2657_v9  ;;  %v2731_v6 = vld [vmem:[#allocation17 + $0x758] sm:$0xff]  ;;  %v2720_v9 = vld [vmem:[#allocation17 + $0x700] sm:$0xff] }
 0x6f5   :  { %v9246_v8 = vpack.c.bf16 %v2731_v6, %v2723_v22  ;;  %v2728_v12 = vld [vmem:[#allocation17 + $0x740] sm:$0xff]  ;;  %v2770_v6 = vld [vmem:[#allocation17 + $0x890] sm:$0xff] }
 0x6f6   :  { %9085 = vmatpush1.bf16.msra.mxu1 %v9084_v26  ;;  %9213 = vmatpush1.bf16.msra.mxu0 %v9212_v27  ;;  %v2673_v26 = vld [vmem:[#allocation17 + $0x588] sm:$0xff]  ;;  %v9120_v14 = vpack.c.bf16 %v2728_v12, %v2720_v9 }
 0x6f7   :  { %9087 = vmatprep.subr.bf16.mxu1 %v9086_v30  ;;  %9215 = vmatprep.subr.bf16.mxu0 %v9214_v31  ;;  %v2681_v27 = vld [vmem:[#allocation17 + $0x5c8] sm:$0xff]  ;;  %v9104_v30 = vpack.c.bf16 %v2664_v19, %v2656_v18  ;;  %v9232_v31 = vpack.c.bf16 %v2666_v24, %v2658_v23  ;;  %v2747_v23 = vld [vmem:[#allocation17 + $0x7d8] sm:$0xff]  ;;  %v2736_v24 = vld [vmem:[#allocation17 + $0x780] sm:$0xff] }
 0x6f8   :  { %v9106_v34 = vpack.c.bf16 %v2681_v27, %v2673_v26  ;;  %v2737_v18 = vld [vmem:[#allocation17 + $0x788] sm:$0xff]  ;;  %v2744_v26 = vld [vmem:[#allocation17 + $0x7c0] sm:$0xff] }
 0x6f9   :  { %v2745_v19 = vld [vmem:[#allocation17 + $0x7c8] sm:$0xff]  ;;  %v9124_v28 = vpack.c.bf16 %v2744_v26, %v2736_v24  ;;  %v2786_v24 = vld [vmem:[#allocation17 + $0x910] sm:$0xff] }
 0x6fa   :  { %9089 = vmatpush1.bf16.msra.mxu1 %v9088_v38  ;;  %9217 = vmatpush1.bf16.msra.mxu0 %v9216_v40  ;;  %v2689_v38 = vld [vmem:[#allocation17 + $0x608] sm:$0xff]  ;;  %v2794_v26 = vld [vmem:[#allocation17 + $0x950] sm:$0xff] }
 0x6fb   :  { %9091 = vmatprep.subr.bf16.mxu1 %v9090_v43  ;;  %9219 = vmatprep.subr.bf16.mxu0 %v9218_v44  ;;  %v2697_v40 = vld [vmem:[#allocation17 + $0x648] sm:$0xff]  ;;  %v9108_v43 = vpack.c.bf16 %v2680_v33, %v2672_v32  ;;  %v9236_v44 = vpack.c.bf16 %v2682_v37, %v2674_v36  ;;  %v2763_v36 = vld [vmem:[#allocation17 + $0x858] sm:$0xff] }
 0x6fc   :  { %v9110_v49 = vpack.c.bf16 %v2697_v40, %v2689_v38  ;;  %v2753_v32 = vld [vmem:[#allocation17 + $0x808] sm:$0xff]  ;;  %v11563_v38 = vld [vmem:[#allocation16] sm:$0xf] }
 0x6fd   :  { %v2761_v33 = vld [vmem:[#allocation17 + $0x848] sm:$0xff]  ;;  %v2325_v40 = vrot.slane %v11563_v38, %v11297_v2  ;;  %v2329_v41 = vrot.slane %v11563_v38, %v11302_v4  ;;  %v2337_v42 = vrot.slane %v11563_v38, %v11305_v5 }
 0x6fe   :  { %9093 = vmatpush1.bf16.msra.mxu1 %v9092_v53  ;;  %9221 = vmatpush1.bf16.msra.mxu0 %v9220_v25  ;;  %v2705_v53 = vld [vmem:[#allocation17 + $0x688] sm:$0xff] }
 0x6ff   :  { %9095 = vmatprep.subr.bf16.mxu1 %v9094_v56  ;;  %9223 = vmatprep.subr.bf16.mxu0 %v9222_v57  ;;  %v2713_v25 = vld [vmem:[#allocation17 + $0x6c8] sm:$0xff]  ;;  %v9112_v56 = vpack.c.bf16 %v2696_v47, %v2688_v46  ;;  %v9240_v57 = vpack.c.bf16 %v2698_v39, %v2690_v51 }
 0x700   :  { %v9114_v60 = vpack.c.bf16 %v2713_v25, %v2705_v53  ;;  %v2760_v53 = vld [vmem:[#allocation17 + $0x840] sm:$0xff]  ;;  %v2754_v25 = vld [vmem:[#allocation17 + $0x810] sm:$0xff]  ;;  %v2793_v12 = vld [vmem:[#allocation17 + $0x948] sm:$0xff] }
 0x702   :  { %9097 = vmatpush1.bf16.msra.mxu1 %v9096_v3  ;;  %9225 = vmatpush1.bf16.msra.mxu0 %v9224_v1  ;;  %v2721_v3 = vld [vmem:[#allocation17 + $0x708] sm:$0xff] }
 0x703   :  { %9099 = vmatprep.subr.bf16.mxu1 %v9098_v52  ;;  %9227 = vmatprep.subr.bf16.mxu0 %v9226_v7  ;;  %v2729_v1 = vld [vmem:[#allocation17 + $0x748] sm:$0xff]  ;;  %v9116_v52 = vpack.c.bf16 %v2712_v59, %v2704_v58  ;;  %v9244_v7 = vpack.c.bf16 %v2714_v0, %v2706_v63  ;;  %v2771_v59 = vld [vmem:[#allocation17 + $0x898] sm:$0xff]  ;;  %v9256_v0 = vpack.c.bf16 %v2762_v54, %v2754_v25  ;;  %v2818_v25 = vld [vmem:[#allocation17 + $0xa10] sm:$0xff] }
 0x704   :  { %v9118_v10 = vpack.c.bf16 %v2729_v1, %v2721_v3  ;;  %v2768_v3 = vld [vmem:[#allocation17 + $0x880] sm:$0xff]  ;;  %v2826_v54 = vld [vmem:[#allocation17 + $0xa50] sm:$0xff] }
 0x705   :  { %v2776_v1 = vld [vmem:[#allocation17 + $0x8c0] sm:$0xff] }
 0x706   :  { %9101 = vmatpush1.bf16.msra.mxu1 %v9100_v15  ;;  %9229 = vmatpush1.bf16.msra.mxu0 %v9228_v17  ;;  %v2730_v15 = vld [vmem:[#allocation17 + $0x750] sm:$0xff] }
 0x707   :  { %9103 = vmatprep.subr.bf16.mxu1 %v9102_v20  ;;  %9231 = vmatprep.subr.bf16.mxu0 %v9230_v21  ;;  %v9248_v17 = vpack.c.bf16 %v2730_v15, %v2722_v13  ;;  %v2739_v20 = vld [vmem:[#allocation17 + $0x798] sm:$0xff]  ;;  %v9122_v21 = vpack.c.bf16 %v2745_v19, %v2737_v18  ;;  %v2784_v19 = vld [vmem:[#allocation17 + $0x900] sm:$0xff] }
 0x708   :  { %v9250_v27 = vpack.c.bf16 %v2747_v23, %v2739_v20  ;;  %v2787_v13 = vld [vmem:[#allocation17 + $0x918] sm:$0xff]  ;;  %v2792_v20 = vld [vmem:[#allocation17 + $0x940] sm:$0xff] }
 0x70a   :  { %9105 = vmatpush1.bf16.msra.mxu1 %v9104_v30  ;;  %9233 = vmatpush1.bf16.msra.mxu0 %v9232_v31  ;;  %v2746_v30 = vld [vmem:[#allocation17 + $0x7d0] sm:$0xff] }
 0x70b   :  { %9107 = vmatprep.subr.bf16.mxu1 %v9106_v34  ;;  %9235 = vmatprep.subr.bf16.mxu0 %v9234_v35  ;;  %v9252_v31 = vpack.c.bf16 %v2746_v30, %v2738_v29  ;;  %v2755_v34 = vld [vmem:[#allocation17 + $0x818] sm:$0xff]  ;;  %v9126_v35 = vpack.c.bf16 %v2761_v33, %v2753_v32  ;;  %v9264_v32 = vpack.c.bf16 %v2794_v26, %v2786_v24  ;;  %v2800_v33 = vld [vmem:[#allocation17 + $0x980] sm:$0xff]  ;;  %v2873_v24 = vld [vmem:[#allocation17 + $0xbc8] sm:$0xff] }
 0x70c   :  { %v9254_v37 = vpack.c.bf16 %v2763_v36, %v2755_v34  ;;  %v2803_v29 = vld [vmem:[#allocation17 + $0x998] sm:$0xff]  ;;  %v2808_v34 = vld [vmem:[#allocation17 + $0x9c0] sm:$0xff] }
 0x70d   :  { %v2811_v30 = vld [vmem:[#allocation17 + $0x9d8] sm:$0xff] }
 0x70e   :  { %9109 = vmatpush1.bf16.msra.mxu1 %v9108_v43  ;;  %9237 = vmatpush1.bf16.msra.mxu0 %v9236_v44  ;;  %v9266_v36 = vpack.c.bf16 %v2811_v30, %v2803_v29  ;;  %v2867_v26 = vld [vmem:[#allocation17 + $0xb98] sm:$0xff]  ;;  %v2864_v30 = vld [vmem:[#allocation17 + $0xb80] sm:$0xff] }
 0x70f   :  { %9111 = vmatprep.subr.bf16.mxu1 %v9110_v49  ;;  %9239 = vmatprep.subr.bf16.mxu0 %v9238_v50  ;;  %v2752_v50 = vld [vmem:[#allocation17 + $0x800] sm:$0xff] }
 0x710   :  { %v9128_v63 = vpack.c.bf16 %v2760_v53, %v2752_v50  ;;  %v2816_v50 = vld [vmem:[#allocation17 + $0xa00] sm:$0xff] }
 0x712   :  { %9113 = vmatpush1.bf16.msra.mxu1 %v9112_v56  ;;  %9241 = vmatpush1.bf16.msra.mxu0 %v9240_v57  ;;  %v2769_v56 = vld [vmem:[#allocation17 + $0x888] sm:$0xff] }
 0x713   :  { %9115 = vmatprep.subr.bf16.mxu1 %v9114_v60  ;;  %9243 = vmatprep.subr.bf16.mxu0 %v9242_v62  ;;  %v2777_v57 = vld [vmem:[#allocation17 + $0x8c8] sm:$0xff]  ;;  %v2779_v60 = vld [vmem:[#allocation17 + $0x8d8] sm:$0xff] }
 0x714   :  { %v9258_v9 = vpack.c.bf16 %v2779_v60, %v2771_v59  ;;  %v9272_v60 = vpack.c.bf16 %v2826_v54, %v2818_v25  ;;  %v2905_v25 = vld [vmem:[#allocation17 + $0xcc8] sm:$0xff]  ;;  %v2899_v54 = vld [vmem:[#allocation17 + $0xc98] sm:$0xff] }
 0x716   :  { %9117 = vmatpush1.bf16.msra.mxu1 %v9116_v52  ;;  %9245 = vmatpush1.bf16.msra.mxu0 %v9244_v7  ;;  %v2778_v52 = vld [vmem:[#allocation17 + $0x8d0] sm:$0xff]  ;;  %v2785_v7 = vld [vmem:[#allocation17 + $0x908] sm:$0xff] }
 0x717   :  { %9119 = vmatprep.subr.bf16.mxu1 %v9118_v10  ;;  %9247 = vmatprep.subr.bf16.mxu0 %v9246_v8  ;;  %v9130_v8 = vpack.c.bf16 %v2777_v57, %v2769_v56  ;;  %v9260_v18 = vpack.c.bf16 %v2778_v52, %v2770_v6  ;;  %v2841_v56 = vld [vmem:[#allocation17 + $0xac8] sm:$0xff]  ;;  %v2835_v57 = vld [vmem:[#allocation17 + $0xa98] sm:$0xff]  ;;  %v2842_v6 = vld [vmem:[#allocation17 + $0xad0] sm:$0xff] }
 0x718   :  { %v2849_v52 = vld [vmem:[#allocation17 + $0xb08] sm:$0xff] }
 0x71a   :  { %9121 = vmatpush1.bf16.msra.mxu1 %v9120_v14  ;;  %9249 = vmatpush1.bf16.msra.mxu0 %v9248_v17  ;;  %v2795_v14 = vld [vmem:[#allocation17 + $0x958] sm:$0xff]  ;;  %v9132_v17 = vpack.c.bf16 %v2776_v1, %v2768_v3  ;;  %v2834_v1 = vld [vmem:[#allocation17 + $0xa90] sm:$0xff] }
 0x71b   :  { %9123 = vmatprep.subr.bf16.mxu1 %v9122_v21  ;;  %9251 = vmatprep.subr.bf16.mxu0 %v9250_v27  ;;  %v9134_v21 = vpack.c.bf16 %v2793_v12, %v2785_v7  ;;  %v9262_v23 = vpack.c.bf16 %v2795_v14, %v2787_v13  ;;  %v2801_v27 = vld [vmem:[#allocation17 + $0x988] sm:$0xff]  ;;  %v9276_v13 = vpack.c.bf16 %v2842_v6, %v2834_v1  ;;  %v2848_v14 = vld [vmem:[#allocation17 + $0xb00] sm:$0xff]  ;;  %v2915_v6 = vld [vmem:[#allocation17 + $0xd18] sm:$0xff] }
 0x71c   :  { %v2857_v7 = vld [vmem:[#allocation17 + $0xb48] sm:$0xff] }
 0x71d   :  { %v2921_v1 = vld [vmem:[#allocation17 + $0xd48] sm:$0xff] }
 0x71e   :  { %9125 = vmatpush1.bf16.msra.mxu1 %v9124_v28  ;;  %9253 = vmatpush1.bf16.msra.mxu0 %v9252_v31  ;;  %v2809_v28 = vld [vmem:[#allocation17 + $0x9c8] sm:$0xff]  ;;  %v9136_v31 = vpack.c.bf16 %v2792_v20, %v2784_v19  ;;  %v2850_v20 = vld [vmem:[#allocation17 + $0xb10] sm:$0xff] }
 0x71f   :  { %9127 = vmatprep.subr.bf16.mxu1 %v9126_v35  ;;  %9255 = vmatprep.subr.bf16.mxu0 %v9254_v37  ;;  %v9138_v35 = vpack.c.bf16 %v2809_v28, %v2801_v27  ;;  %v2802_v37 = vld [vmem:[#allocation17 + $0x990] sm:$0xff]  ;;  %v2875_v27 = vld [vmem:[#allocation17 + $0xbd8] sm:$0xff] }
 0x7b4   :  { %v2408_v43 = vpop.f32.mrb[8].mxu1  ;;  %v11571_v44 = vpop.f32.mrb[4].mxu0 }
 0x7b5   :  { %v2409_v46 = vadd.f32 %v2408_v43, %v2325_v40  ;;  %v2410_v47 = vpop.f32.mrb[9].mxu1  ;;  %v2481_v49 = vpop.f32.mrb[5].mxu0  ;;  %v2810_v40 = vld [vmem:[#allocation17 + $0x9d0] sm:$0xff]  ;;  %v2819_v43 = vld [vmem:[#allocation17 + $0xa18] sm:$0xff] }
 0x7b6   :  { %v2411_v51 = vadd.f32 %v2410_v47, %v2329_v41  ;;  %v2482_v39 = vadd.f32 %v2481_v49, %v2337_v42  ;;  %v2817_v41 = vld [vmem:[#allocation17 + $0xa08] sm:$0xff]  ;;  %v9140_v47 = vpack.c.bf16 %v2808_v34, %v2800_v33  ;;  %v9268_v49 = vpack.c.bf16 %v2810_v40, %v2802_v37  ;;  %v2866_v34 = vld [vmem:[#allocation17 + $0xb90] sm:$0xff]  ;;  %v2883_v40 = vld [vmem:[#allocation17 + $0xc18] sm:$0xff] }
 0x7b7   :  { %v2488_v55 = vmul.f32 0.2, %v2409_v46  ;;  %vm2484_vm2 = vcmp.gt.f32.partialorder %v2409_v46, 0.0  ;;  %v2825_v42 = vld [vmem:[#allocation17 + $0xa48] sm:$0xff]  ;;  %v9282_v33 = vpack.c.bf16 %v2875_v27, %v2867_v26  ;;  %v2928_v27 = vld [vmem:[#allocation17 + $0xd80] sm:$0xff] }
 0x7b8   :  { %vm2485_vm3 = vcmp.gt.f32.partialorder %v2411_v51, 0.0  ;;  %v2489_v58 = vmul.f32 0.2, %v2411_v51  ;;  %v2491_v62 = vmul.f32 0.2, %v2482_v39  ;;  %vm2487_vm4 = vcmp.gt.f32.partialorder %v2482_v39, 0.0 }
 0x7b9   :  { %v11578_v10 = vsel %vm2484_vm2, %v2409_v46, %v2488_v55  ;;  %v2827_v46 = vld [vmem:[#allocation17 + $0xa58] sm:$0xff]  ;;  %v2833_v55 = vld [vmem:[#allocation17 + $0xa88] sm:$0xff] }
 0x7ba   :  { %v11573_v22 = vsel %vm2485_vm3, %v2411_v51, %v2489_v58  ;;  %v11583_v15 = vsel %vm2487_vm4, %v2482_v39, %v2491_v62  ;;  %v2824_v51 = vld [vmem:[#allocation17 + $0xa40] sm:$0xff]  ;;  %v9142_v39 = vpack.c.bf16 %v2825_v42, %v2817_v41  ;;  %v9270_v53 = vpack.c.bf16 %v2827_v46, %v2819_v43  ;;  %v2843_v58 = vld [vmem:[#allocation17 + $0xad8] sm:$0xff]  ;;  %v2889_v37 = vld [vmem:[#allocation17 + $0xc48] sm:$0xff] }
 0x7bb   :  { %3114 = vmatprep.mubr.f32.mxu1 %v11573_v22  ;;  %3256 = vmatprep.mubr.f32.mxu0 %v11573_v22  ;;  %v9144_v59 = vpack.c.bf16 %v2824_v51, %v2816_v50  ;;  %v2832_v62 = vld [vmem:[#allocation17 + $0xa80] sm:$0xff]  ;;  %v9274_v3 = vpack.c.bf16 %v2843_v58, %v2835_v57  ;;  %v2891_v41 = vld [vmem:[#allocation17 + $0xc58] sm:$0xff]  ;;  %v2882_v51 = vld [vmem:[#allocation17 + $0xc10] sm:$0xff] }
 0x7bc   :  { %3115 = vmatmul.mubr.f32.vlgmr.msra.gmra.mrb[10].mxu1 %v11578_v10  ;;  %3257 = vmatmul.mubr.f32.vlgmr.msra.gmra.mrb[6].mxu0 %v11578_v10  ;;  %v2880_v46 = vld [vmem:[#allocation17 + $0xc00] sm:$0xff]  ;;  %v9286_v50 = vpack.c.bf16 %v2891_v41, %v2883_v40 }
 0x7bd   :  { %9129 = vmatpush1.bf16.msra.mxu1 %v9128_v63  ;;  %9257 = vmatpush1.bf16.msra.mxu0 %v9256_v0  ;;  %v2840_v63 = vld [vmem:[#allocation17 + $0xac0] sm:$0xff]  ;;  %v9146_v0 = vpack.c.bf16 %v2841_v56, %v2833_v55  ;;  %v2907_v55 = vld [vmem:[#allocation17 + $0xcd8] sm:$0xff] }
 0x7be   :  { %3185 = vmatprep.mubr.f32.mxu1 %v11583_v15  ;;  %3327 = vmatprep.mubr.f32.mxu0 %v11583_v15  ;;  %v9148_v12 = vpack.c.bf16 %v2840_v63, %v2832_v62  ;;  %v2896_v58 = vld [vmem:[#allocation17 + $0xc80] sm:$0xff]  ;;  %v9290_v62 = vpack.c.bf16 %v2907_v55, %v2899_v54  ;;  %v2898_v63 = vld [vmem:[#allocation17 + $0xc90] sm:$0xff] }
 0x7bf   :  { %9131 = vmatprep.subr.bf16.mxu1 %v9130_v8  ;;  %9259 = vmatprep.subr.bf16.mxu0 %v9258_v9  ;;  %v2851_v8 = vld [vmem:[#allocation17 + $0xb18] sm:$0xff]  ;;  %v2944_v41 = vld [vmem:[#allocation17 + $0xe00] sm:$0xff] }
 0x7c0   :  { %v2859_v9 = vld [vmem:[#allocation17 + $0xb58] sm:$0xff]  ;;  %v2960_v55 = vld [vmem:[#allocation17 + $0xe80] sm:$0xff] }
 0x7c1   :  { %9133 = vmatpush1.bf16.msra.mxu1 %v9132_v17  ;;  %9261 = vmatpush1.bf16.msra.mxu0 %v9260_v18  ;;  %v2856_v17 = vld [vmem:[#allocation17 + $0xb40] sm:$0xff]  ;;  %v9150_v18 = vpack.c.bf16 %v2857_v7, %v2849_v52  ;;  %v9278_v19 = vpack.c.bf16 %v2859_v9, %v2851_v8  ;;  %v2923_v52 = vld [vmem:[#allocation17 + $0xd58] sm:$0xff] }
 0x7c2   :  { %9135 = vmatprep.subr.bf16.mxu1 %v9134_v21  ;;  %9263 = vmatprep.subr.bf16.mxu0 %v9262_v23  ;;  %v2858_v21 = vld [vmem:[#allocation17 + $0xb50] sm:$0xff]  ;;  %v2865_v23 = vld [vmem:[#allocation17 + $0xb88] sm:$0xff]  ;;  %v9152_v28 = vpack.c.bf16 %v2856_v17, %v2848_v14  ;;  %v2912_v9 = vld [vmem:[#allocation17 + $0xd00] sm:$0xff]  ;;  %v9294_v14 = vpack.c.bf16 %v2923_v52, %v2915_v6 }
 0x7c3   :  { %v9280_v29 = vpack.c.bf16 %v2858_v21, %v2850_v20  ;;  %v2914_v17 = vld [vmem:[#allocation17 + $0xd10] sm:$0xff]  ;;  %v2937_v20 = vld [vmem:[#allocation17 + $0xdc8] sm:$0xff]  ;;  %v2931_v21 = vld [vmem:[#allocation17 + $0xd98] sm:$0xff] }
 0x7c4   :  { %v2976_v52 = vld [vmem:[#allocation17 + $0xf00] sm:$0xff] }
 0x7c5   :  { %9137 = vmatpush1.bf16.msra.mxu1 %v9136_v31  ;;  %9265 = vmatpush1.bf16.msra.mxu0 %v9264_v32  ;;  %v2872_v31 = vld [vmem:[#allocation17 + $0xbc0] sm:$0xff]  ;;  %v9154_v32 = vpack.c.bf16 %v2873_v24, %v2865_v23  ;;  %v2939_v23 = vld [vmem:[#allocation17 + $0xdd8] sm:$0xff] }
 0x7c6   :  { %9139 = vmatprep.subr.bf16.mxu1 %v9138_v35  ;;  %9267 = vmatprep.subr.bf16.mxu0 %v9266_v36  ;;  %v2874_v35 = vld [vmem:[#allocation17 + $0xbd0] sm:$0xff]  ;;  %v2881_v36 = vld [vmem:[#allocation17 + $0xc08] sm:$0xff]  ;;  %v9156_v42 = vpack.c.bf16 %v2872_v31, %v2864_v30  ;;  %v9298_v30 = vpack.c.bf16 %v2939_v23, %v2931_v21 }
 0x7c7   :  { %v9284_v43 = vpack.c.bf16 %v2874_v35, %v2866_v34  ;;  %v2930_v31 = vld [vmem:[#allocation17 + $0xd90] sm:$0xff]  ;;  %v2953_v34 = vld [vmem:[#allocation17 + $0xe48] sm:$0xff]  ;;  %v2947_v35 = vld [vmem:[#allocation17 + $0xe18] sm:$0xff] }
 0x7c9   :  { %9141 = vmatpush1.bf16.msra.mxu1 %v9140_v47  ;;  %9269 = vmatpush1.bf16.msra.mxu0 %v9268_v49  ;;  %v2888_v47 = vld [vmem:[#allocation17 + $0xc40] sm:$0xff]  ;;  %v9158_v49 = vpack.c.bf16 %v2889_v37, %v2881_v36  ;;  %v2955_v36 = vld [vmem:[#allocation17 + $0xe58] sm:$0xff] }
 0x7ca   :  { %9143 = vmatprep.subr.bf16.mxu1 %v9142_v39  ;;  %9271 = vmatprep.subr.bf16.mxu0 %v9270_v53  ;;  %v2890_v39 = vld [vmem:[#allocation17 + $0xc50] sm:$0xff]  ;;  %v2897_v53 = vld [vmem:[#allocation17 + $0xc88] sm:$0xff]  ;;  %v9160_v56 = vpack.c.bf16 %v2888_v47, %v2880_v46  ;;  %v9302_v46 = vpack.c.bf16 %v2955_v36, %v2947_v35 }
 0x7cb   :  { %v9288_v57 = vpack.c.bf16 %v2890_v39, %v2882_v51  ;;  %v2946_v47 = vld [vmem:[#allocation17 + $0xe10] sm:$0xff]  ;;  %v2969_v51 = vld [vmem:[#allocation17 + $0xec8] sm:$0xff]  ;;  %v2963_v39 = vld [vmem:[#allocation17 + $0xe98] sm:$0xff] }
 0x7cd   :  { %9145 = vmatpush1.bf16.msra.mxu1 %v9144_v59  ;;  %9273 = vmatpush1.bf16.msra.mxu0 %v9272_v60  ;;  %v2904_v59 = vld [vmem:[#allocation17 + $0xcc0] sm:$0xff]  ;;  %v9162_v60 = vpack.c.bf16 %v2905_v25, %v2897_v53  ;;  %v2971_v53 = vld [vmem:[#allocation17 + $0xed8] sm:$0xff] }
 0x7ce   :  { %9147 = vmatprep.subr.bf16.mxu1 %v9146_v0  ;;  %9275 = vmatprep.subr.bf16.mxu0 %v9274_v3  ;;  %v2906_v0 = vld [vmem:[#allocation17 + $0xcd0] sm:$0xff]  ;;  %v2913_v3 = vld [vmem:[#allocation17 + $0xd08] sm:$0xff]  ;;  %v9164_v7 = vpack.c.bf16 %v2904_v59, %v2896_v58  ;;  %v9306_v58 = vpack.c.bf16 %v2971_v53, %v2963_v39 }
 0x7cf   :  { %v9292_v8 = vpack.c.bf16 %v2906_v0, %v2898_v63  ;;  %v2962_v59 = vld [vmem:[#allocation17 + $0xe90] sm:$0xff]  ;;  %v2985_v63 = vld [vmem:[#allocation17 + $0xf48] sm:$0xff]  ;;  %v2979_v0 = vld [vmem:[#allocation17 + $0xf18] sm:$0xff] }
 0x7d1   :  { %9149 = vmatpush1.bf16.msra.mxu1 %v9148_v12  ;;  %9277 = vmatpush1.bf16.msra.mxu0 %v9276_v13  ;;  %v2920_v12 = vld [vmem:[#allocation17 + $0xd40] sm:$0xff]  ;;  %v9166_v13 = vpack.c.bf16 %v2921_v1, %v2913_v3  ;;  %v2987_v3 = vld [vmem:[#allocation17 + $0xf58] sm:$0xff] }
 0x7d2   :  { %9151 = vmatprep.subr.bf16.mxu1 %v9150_v18  ;;  %9279 = vmatprep.subr.bf16.mxu0 %v9278_v19  ;;  %v2922_v18 = vld [vmem:[#allocation17 + $0xd50] sm:$0xff]  ;;  %v2929_v19 = vld [vmem:[#allocation17 + $0xd88] sm:$0xff]  ;;  %v9168_v24 = vpack.c.bf16 %v2920_v12, %v2912_v9  ;;  %v9310_v9 = vpack.c.bf16 %v2987_v3, %v2979_v0  ;;  %v2543_v0 = vld [vmem:[#allocation17 + $0x178] sm:$0xff] }
 0x7d3   :  { %v9296_v26 = vpack.c.bf16 %v2922_v18, %v2914_v17  ;;  %v2978_v12 = vld [vmem:[#allocation17 + $0xf10] sm:$0xff]  ;;  %v2333_v17 = vrot.slane %v11563_v38, %v11372_v48  ;;  %v3001_v18 = vld [vmem:[#allocation17 + $0xfc8] sm:$0xff]  ;;  %v2503_v38 = vld [vmem:[#allocation17 + $0x38] sm:$0xff] }
 0x7d5   :  { %9153 = vmatpush1.bf16.msra.mxu1 %v9152_v28  ;;  %9281 = vmatpush1.bf16.msra.mxu0 %v9280_v29  ;;  %v2936_v28 = vld [vmem:[#allocation17 + $0xdc0] sm:$0xff]  ;;  %v9170_v29 = vpack.c.bf16 %v2937_v20, %v2929_v19  ;;  %v2995_v19 = vld [vmem:[#allocation17 + $0xf98] sm:$0xff] }
 0x7d6   :  { %9155 = vmatprep.subr.bf16.mxu1 %v9154_v32  ;;  %9283 = vmatprep.subr.bf16.mxu0 %v9282_v33  ;;  %v2938_v32 = vld [vmem:[#allocation17 + $0xdd0] sm:$0xff]  ;;  %v2945_v33 = vld [vmem:[#allocation17 + $0xe08] sm:$0xff]  ;;  %v9172_v37 = vpack.c.bf16 %v2936_v28, %v2928_v27  ;;  %v3003_v20 = vld [vmem:[#allocation17 + $0xfd8] sm:$0xff] }
 0x7d7   :  { %v9300_v40 = vpack.c.bf16 %v2938_v32, %v2930_v31  ;;  %v9314_v28 = vpack.c.bf16 %v3003_v20, %v2995_v19  ;;  %v2501_v31 = vld [vmem:[#allocation17 + $0x28] sm:$0xff]  ;;  %v2480_v32 = vadd.f32 %v11571_v44, %v2333_v17  ;;  %v2519_v44 = vld [vmem:[#allocation17 + $0xb8] sm:$0xff] }
 0x7d8   :  { %v2551_v17 = vld [vmem:[#allocation17 + $0x1b8] sm:$0xff] }
 0x7d9   :  { %9157 = vmatpush1.bf16.msra.mxu1 %v9156_v42  ;;  %9285 = vmatpush1.bf16.msra.mxu0 %v9284_v43  ;;  %v2952_v42 = vld [vmem:[#allocation17 + $0xe40] sm:$0xff]  ;;  %v9174_v43 = vpack.c.bf16 %v2953_v34, %v2945_v33  ;;  %v2509_v33 = vld [vmem:[#allocation17 + $0x68] sm:$0xff]  ;;  %v2511_v34 = vld [vmem:[#allocation17 + $0x78] sm:$0xff]  ;;  %vm2486_vm5 = vcmp.gt.f32.partialorder %v2480_v32, 0.0 }
 0x7da   :  { %9159 = vmatprep.subr.bf16.mxu1 %v9158_v49  ;;  %9287 = vmatprep.subr.bf16.mxu0 %v9286_v50  ;;  %v2954_v49 = vld [vmem:[#allocation17 + $0xe50] sm:$0xff]  ;;  %v2961_v50 = vld [vmem:[#allocation17 + $0xe88] sm:$0xff]  ;;  %v9176_v25 = vpack.c.bf16 %v2952_v42, %v2944_v41  ;;  %v2500_v41 = vld [vmem:[#allocation17 + $0x20] sm:$0xff] }
 0x7db   :  { %v9304_v54 = vpack.c.bf16 %v2954_v49, %v2946_v47  ;;  %v2508_v42 = vld [vmem:[#allocation17 + $0x60] sm:$0xff]  ;;  %v2510_v47 = vld [vmem:[#allocation17 + $0x70] sm:$0xff]  ;;  %v2517_v49 = vld [vmem:[#allocation17 + $0xa8] sm:$0xff] }
 0x7dc   :  { %v9320_v39 = vpack.c.bf16 %v2508_v42, %v2500_v41  ;;  %v2581_v41 = vld [vmem:[#allocation17 + $0x2a8] sm:$0xff] }
 0x7dd   :  { %9161 = vmatpush1.bf16.msra.mxu1 %v9160_v56  ;;  %9289 = vmatpush1.bf16.msra.mxu0 %v9288_v57  ;;  %v2968_v56 = vld [vmem:[#allocation17 + $0xec0] sm:$0xff]  ;;  %v9178_v57 = vpack.c.bf16 %v2969_v51, %v2961_v50  ;;  %v2525_v50 = vld [vmem:[#allocation17 + $0xe8] sm:$0xff]  ;;  %v2527_v51 = vld [vmem:[#allocation17 + $0xf8] sm:$0xff] }
 0x7de   :  { %9163 = vmatprep.subr.bf16.mxu1 %v9162_v60  ;;  %9291 = vmatprep.subr.bf16.mxu0 %v9290_v62  ;;  %v2970_v60 = vld [vmem:[#allocation17 + $0xed0] sm:$0xff]  ;;  %v2977_v62 = vld [vmem:[#allocation17 + $0xf08] sm:$0xff]  ;;  %v9180_v1 = vpack.c.bf16 %v2968_v56, %v2960_v55 }
 0x7df   :  { %v9308_v6 = vpack.c.bf16 %v2970_v60, %v2962_v59  ;;  %v2518_v55 = vld [vmem:[#allocation17 + $0xb0] sm:$0xff]  ;;  %v2533_v60 = vld [vmem:[#allocation17 + $0x128] sm:$0xff] }
 0x7e0   :  { %v2526_v59 = vld [vmem:[#allocation17 + $0xf0] sm:$0xff]  ;;  %v2589_v42 = vld [vmem:[#allocation17 + $0x2e8] sm:$0xff] }
 0x7e1   :  { %9165 = vmatpush1.bf16.msra.mxu1 %v9164_v7  ;;  %9293 = vmatpush1.bf16.msra.mxu0 %v9292_v8  ;;  %v2984_v7 = vld [vmem:[#allocation17 + $0xf40] sm:$0xff]  ;;  %v9182_v8 = vpack.c.bf16 %v2985_v63, %v2977_v62  ;;  %v2541_v62 = vld [vmem:[#allocation17 + $0x168] sm:$0xff]  ;;  %v2535_v63 = vld [vmem:[#allocation17 + $0x138] sm:$0xff] }
 0x7e2   :  { %9167 = vmatprep.subr.bf16.mxu1 %v9166_v13  ;;  %9295 = vmatprep.subr.bf16.mxu0 %v9294_v14  ;;  %v2986_v13 = vld [vmem:[#allocation17 + $0xf50] sm:$0xff]  ;;  %v2993_v14 = vld [vmem:[#allocation17 + $0xf88] sm:$0xff]  ;;  %v9184_v21 = vpack.c.bf16 %v2984_v7, %v2976_v52  ;;  %v2532_v52 = vld [vmem:[#allocation17 + $0x120] sm:$0xff] }
 0x7e3   :  { %v9312_v23 = vpack.c.bf16 %v2986_v13, %v2978_v12  ;;  %v9186_v27 = vpack.c.bf16 %v3001_v18, %v2993_v14  ;;  %v2540_v7 = vld [vmem:[#allocation17 + $0x160] sm:$0xff]  ;;  %v2542_v12 = vld [vmem:[#allocation17 + $0x170] sm:$0xff]  ;;  %v2549_v13 = vld [vmem:[#allocation17 + $0x1a8] sm:$0xff] }
 0x7e4   :  { %v2557_v14 = vld [vmem:[#allocation17 + $0x1e8] sm:$0xff]  ;;  %v2559_v18 = vld [vmem:[#allocation17 + $0x1f8] sm:$0xff]  ;;  %v9328_v19 = vpack.c.bf16 %v2540_v7, %v2532_v52 }
 0x7e5   :  { %9169 = vmatpush1.bf16.msra.mxu1 %v9168_v24  ;;  %9297 = vmatpush1.bf16.msra.mxu0 %v9296_v26  ;;  %v2992_v24 = vld [vmem:[#allocation17 + $0xf80] sm:$0xff]  ;;  %v2613_v52 = vld [vmem:[#allocation17 + $0x3a8] sm:$0xff] }
 0x7e6   :  { %9171 = vmatprep.subr.bf16.mxu1 %v9170_v29  ;;  %9299 = vmatprep.subr.bf16.mxu0 %v9298_v30  ;;  %v3000_v26 = vld [vmem:[#allocation17 + $0xfc0] sm:$0xff]  ;;  %v2994_v29 = vld [vmem:[#allocation17 + $0xf90] sm:$0xff]  ;;  %v2621_v7 = vld [vmem:[#allocation17 + $0x3e8] sm:$0xff] }
 0x7e7   :  { %v3002_v30 = vld [vmem:[#allocation17 + $0xfd0] sm:$0xff]  ;;  %v9188_v35 = vpack.c.bf16 %v3000_v26, %v2992_v24  ;;  %v9458_v26 = vpack.c.bf16 %v2559_v18, %v2551_v17  ;;  %v2612_v17 = vld [vmem:[#allocation17 + $0x3a0] sm:$0xff] }
 0x7e8   :  { %v9316_v36 = vpack.c.bf16 %v3002_v30, %v2994_v29  ;;  %v2550_v24 = vld [vmem:[#allocation17 + $0x1b0] sm:$0xff]  ;;  %v2573_v29 = vld [vmem:[#allocation17 + $0x268] sm:$0xff]  ;;  %v2567_v30 = vld [vmem:[#allocation17 + $0x238] sm:$0xff] }
 0x7e9   :  { %9173 = vmatpush1.bf16.msra.mxu1 %v9172_v37  ;;  %9301 = vmatpush1.bf16.msra.mxu0 %v9300_v40  ;;  %v9318_v37 = vpack.c.bf16 %v2509_v33, %v2501_v31  ;;  %v9446_v40 = vpack.c.bf16 %v2511_v34, %v2503_v38  ;;  %v2575_v31 = vld [vmem:[#allocation17 + $0x278] sm:$0xff]  ;;  %v2564_v34 = vld [vmem:[#allocation17 + $0x220] sm:$0xff] }
 0x7ea   :  { %9175 = vmatprep.subr.bf16.mxu1 %v9174_v43  ;;  %9303 = vmatprep.subr.bf16.mxu0 %v9302_v46  ;;  %v2490_v43 = vmul.f32 0.2, %v2480_v32  ;;  %v2502_v46 = vld [vmem:[#allocation17 + $0x30] sm:$0xff]  ;;  %v2620_v18 = vld [vmem:[#allocation17 + $0x3e0] sm:$0xff] }
 0x7eb   :  { %v9448_v53 = vpack.c.bf16 %v2510_v47, %v2502_v46  ;;  %v2591_v46 = vld [vmem:[#allocation17 + $0x2f8] sm:$0xff] }
 0x7ec   :  { %v11590_v56 = vsel %vm2486_vm5, %v2480_v32, %v2490_v43  ;;  %v2583_v43 = vld [vmem:[#allocation17 + $0x2b8] sm:$0xff] }
 0x7ed   :  { %9177 = vmatpush1.bf16.msra.mxu1 %v9176_v25  ;;  %9305 = vmatpush1.bf16.msra.mxu0 %v9304_v54  ;;  %v2516_v25 = vld [vmem:[#allocation17 + $0xa0] sm:$0xff] }
 0x7ee   :  { %9179 = vmatprep.subr.bf16.mxu1 %v9178_v57  ;;  %9307 = vmatprep.subr.bf16.mxu0 %v9306_v58  ;;  %v2524_v54 = vld [vmem:[#allocation17 + $0xe0] sm:$0xff]  ;;  %v9322_v57 = vpack.c.bf16 %v2525_v50, %v2517_v49  ;;  %v9450_v58 = vpack.c.bf16 %v2527_v51, %v2519_v44  ;;  %v9338_v50 = vpack.c.bf16 %v2589_v42, %v2581_v41 }
 0x7ef   :  { %v9324_v3 = vpack.c.bf16 %v2524_v54, %v2516_v25  ;;  %v2580_v44 = vld [vmem:[#allocation17 + $0x2a0] sm:$0xff]  ;;  %v2590_v25 = vld [vmem:[#allocation17 + $0x2f0] sm:$0xff]  ;;  %v2597_v54 = vld [vmem:[#allocation17 + $0x328] sm:$0xff] }
 0x7f0   :  { %v2588_v51 = vld [vmem:[#allocation17 + $0x2e0] sm:$0xff] }
 0x7f1   :  { %9181 = vmatpush1.bf16.msra.mxu1 %v9180_v1  ;;  %9309 = vmatpush1.bf16.msra.mxu0 %v9308_v6  ;;  %v9452_v1 = vpack.c.bf16 %v2526_v59, %v2518_v55  ;;  %v9326_v6 = vpack.c.bf16 %v2541_v62, %v2533_v60  ;;  %v2605_v55 = vld [vmem:[#allocation17 + $0x368] sm:$0xff]  ;;  %v9340_v59 = vpack.c.bf16 %v2588_v51, %v2580_v44 }
 0x7f2   :  { %9183 = vmatprep.subr.bf16.mxu1 %v9182_v8  ;;  %9311 = vmatprep.subr.bf16.mxu0 %v9310_v9  ;;  %v2534_v8 = vld [vmem:[#allocation17 + $0x130] sm:$0xff]  ;;  %v9454_v9 = vpack.c.bf16 %v2543_v0, %v2535_v63  ;;  %v9342_v62 = vpack.c.bf16 %v2605_v55, %v2597_v54  ;;  %v2596_v63 = vld [vmem:[#allocation17 + $0x320] sm:$0xff]  ;;  %v2661_v44 = vld [vmem:[#allocation17 + $0x528] sm:$0xff] }
 0x7f3   :  { %v9456_v20 = vpack.c.bf16 %v2542_v12, %v2534_v8  ;;  %v2604_v0 = vld [vmem:[#allocation17 + $0x360] sm:$0xff]  ;;  %v2615_v8 = vld [vmem:[#allocation17 + $0x3b8] sm:$0xff]  ;;  %v2669_v51 = vld [vmem:[#allocation17 + $0x568] sm:$0xff] }
 0x7f4   :  { %v9344_v12 = vpack.c.bf16 %v2604_v0, %v2596_v63  ;;  %v9358_v55 = vpack.c.bf16 %v2669_v51, %v2661_v44  ;;  %v2677_v63 = vld [vmem:[#allocation17 + $0x5a8] sm:$0xff] }
 0x7f5   :  { %9185 = vmatpush1.bf16.msra.mxu1 %v9184_v21  ;;  %9313 = vmatpush1.bf16.msra.mxu0 %v9312_v23  ;;  %v9330_v21 = vpack.c.bf16 %v2557_v14, %v2549_v13  ;;  %v2556_v23 = vld [vmem:[#allocation17 + $0x1e0] sm:$0xff]  ;;  %v9346_v14 = vpack.c.bf16 %v2621_v7, %v2613_v52  ;;  %v2685_v0 = vld [vmem:[#allocation17 + $0x5e8] sm:$0xff] }
 0x7f6   :  { %9187 = vmatprep.subr.bf16.mxu1 %v9186_v27  ;;  %9315 = vmatprep.subr.bf16.mxu0 %v9314_v28  ;;  %v2558_v27 = vld [vmem:[#allocation17 + $0x1f0] sm:$0xff]  ;;  %v2565_v28 = vld [vmem:[#allocation17 + $0x228] sm:$0xff]  ;;  %v9362_v7 = vpack.c.bf16 %v2685_v0, %v2677_v63 }
 0x7f7   :  { %v9460_v33 = vpack.c.bf16 %v2558_v27, %v2550_v24  ;;  %v9334_v38 = vpack.c.bf16 %v2573_v29, %v2565_v28  ;;  %v2631_v24 = vld [vmem:[#allocation17 + $0x438] sm:$0xff]  ;;  %v9348_v27 = vpack.c.bf16 %v2620_v18, %v2612_v17  ;;  %v2693_v17 = vld [vmem:[#allocation17 + $0x628] sm:$0xff] }
 0x7f8   :  { %v2701_v18 = vld [vmem:[#allocation17 + $0x668] sm:$0xff] }
 0x7f9   :  { %9189 = vmatpush1.bf16.msra.mxu1 %v9188_v35  ;;  %9317 = vmatpush1.bf16.msra.mxu0 %v9316_v36  ;;  %v2572_v35 = vld [vmem:[#allocation17 + $0x260] sm:$0xff]  ;;  %v2566_v36 = vld [vmem:[#allocation17 + $0x230] sm:$0xff] }
 0x7fa   :  { %9319 = vmatprep.subr.bf16.mxu1 %v9318_v37  ;;  %9447 = vmatprep.subr.bf16.mxu0 %v9446_v40  ;;  %v9462_v37 = vpack.c.bf16 %v2575_v31, %v2567_v30  ;;  %v2574_v40 = vld [vmem:[#allocation17 + $0x270] sm:$0xff]  ;;  %v9336_v47 = vpack.c.bf16 %v2572_v35, %v2564_v34  ;;  %v2628_v30 = vld [vmem:[#allocation17 + $0x420] sm:$0xff]  ;;  %v2645_v34 = vld [vmem:[#allocation17 + $0x4a8] sm:$0xff] }
 0x7fb   :  { %v9464_v49 = vpack.c.bf16 %v2574_v40, %v2566_v36  ;;  %v2636_v31 = vld [vmem:[#allocation17 + $0x460] sm:$0xff]  ;;  %v2653_v35 = vld [vmem:[#allocation17 + $0x4e8] sm:$0xff]  ;;  %v2647_v36 = vld [vmem:[#allocation17 + $0x4b8] sm:$0xff] }
 0x7fc   :  { %3186 = vmatmul.mubr.f32.vlgmr.msra.gmra.mrb[10].mxu1 %v11590_v56  ;;  %3328 = vmatmul.mubr.f32.vlgmr.msra.gmra.mrb[6].mxu0 %v11590_v56  ;;  %v9352_v40 = vpack.c.bf16 %v2636_v31, %v2628_v30  ;;  %v9354_v42 = vpack.c.bf16 %v2653_v35, %v2645_v34  ;;  %v2709_v30 = vld [vmem:[#allocation17 + $0x6a8] sm:$0xff] }
 0x7fd   :  { %9321 = vmatpush1.bf16.msra.mxu1 %v9320_v39  ;;  %3398 = vmatprep.mubr.f32.mxu1 %v11573_v22  ;;  %v2582_v39 = vld [vmem:[#allocation17 + $0x2b0] sm:$0xff]  ;;  %v2717_v31 = vld [vmem:[#allocation17 + $0x6e8] sm:$0xff] }
 0x7fe   :  { %9449 = vmatpush1.bf16.msra.mxu0 %v9448_v53  ;;  %3540 = vmatprep.mubr.f32.mxu0 %v11573_v22  ;;  %v2548_v22 = vld [vmem:[#allocation17 + $0x1a0] sm:$0xff]  ;;  %v9466_v53 = vpack.c.bf16 %v2591_v46, %v2583_v43  ;;  %v9468_v60 = vpack.c.bf16 %v2590_v25, %v2582_v39  ;;  %v2663_v39 = vld [vmem:[#allocation17 + $0x538] sm:$0xff]  ;;  %v9370_v35 = vpack.c.bf16 %v2717_v31, %v2709_v30 }
 0x7ff   :  { %9323 = vmatprep.subr.bf16.mxu1 %v9322_v57  ;;  %9451 = vmatprep.subr.bf16.mxu0 %v9450_v58  ;;  %v9332_v32 = vpack.c.bf16 %v2556_v23, %v2548_v22  ;;  %v2599_v57 = vld [vmem:[#allocation17 + $0x338] sm:$0xff]  ;;  %v2629_v22 = vld [vmem:[#allocation17 + $0x428] sm:$0xff]  ;;  %v2644_v43 = vld [vmem:[#allocation17 + $0x4a0] sm:$0xff] }
 0x800   :  { %v2607_v58 = vld [vmem:[#allocation17 + $0x378] sm:$0xff]  ;;  %v2637_v23 = vld [vmem:[#allocation17 + $0x468] sm:$0xff]  ;;  %v2652_v46 = vld [vmem:[#allocation17 + $0x4e0] sm:$0xff] }
 0x801   :  { %9325 = vmatpush1.bf16.msra.mxu1 %v9324_v3  ;;  %v2598_v3 = vld [vmem:[#allocation17 + $0x330] sm:$0xff]  ;;  %v9350_v29 = vpack.c.bf16 %v2637_v23, %v2629_v22  ;;  %v9356_v25 = vpack.c.bf16 %v2652_v46, %v2644_v43  ;;  %v9366_v23 = vpack.c.bf16 %v2701_v18, %v2693_v17  ;;  %v2725_v43 = vld [vmem:[#allocation17 + $0x728] sm:$0xff]  ;;  %v2772_v31 = vld [vmem:[#allocation17 + $0x8a0] sm:$0xff] }
 0x802   :  { %9453 = vmatpush1.bf16.msra.mxu0 %v9452_v1  ;;  %9327 = vmatprep.subr.bf16.mxu1 %v9326_v6  ;;  %v9470_v1 = vpack.c.bf16 %v2607_v58, %v2599_v57  ;;  %v2606_v6 = vld [vmem:[#allocation17 + $0x370] sm:$0xff]  ;;  %v2660_v57 = vld [vmem:[#allocation17 + $0x520] sm:$0xff]  ;;  %v2733_v46 = vld [vmem:[#allocation17 + $0x768] sm:$0xff] }
 0x803   :  { %9455 = vmatprep.subr.bf16.mxu0 %v9454_v9  ;;  %v2623_v9 = vld [vmem:[#allocation17 + $0x3f8] sm:$0xff]  ;;  %v9472_v13 = vpack.c.bf16 %v2606_v6, %v2598_v3  ;;  %v2668_v58 = vld [vmem:[#allocation17 + $0x560] sm:$0xff]  ;;  %v9374_v51 = vpack.c.bf16 %v2733_v46, %v2725_v43 }
 0x804   :  { %v2679_v3 = vld [vmem:[#allocation17 + $0x5b8] sm:$0xff]  ;;  %v9360_v6 = vpack.c.bf16 %v2668_v58, %v2660_v57  ;;  %v2741_v57 = vld [vmem:[#allocation17 + $0x7a8] sm:$0xff] }
 0x805   :  { %9329 = vmatpush1.bf16.msra.mxu1 %v9328_v19  ;;  %v2614_v19 = vld [vmem:[#allocation17 + $0x3b0] sm:$0xff]  ;;  %v2749_v58 = vld [vmem:[#allocation17 + $0x7e8] sm:$0xff] }
 0x806   :  { %9457 = vmatpush1.bf16.msra.mxu0 %v9456_v20  ;;  %9331 = vmatprep.subr.bf16.mxu1 %v9330_v21  ;;  %v9474_v20 = vpack.c.bf16 %v2623_v9, %v2615_v8  ;;  %v2622_v21 = vld [vmem:[#allocation17 + $0x3f0] sm:$0xff]  ;;  %v2676_v8 = vld [vmem:[#allocation17 + $0x5a0] sm:$0xff]  ;;  %v9378_v0 = vpack.c.bf16 %v2749_v58, %v2741_v57 }
 0x807   :  { %9459 = vmatprep.subr.bf16.mxu0 %v9458_v26  ;;  %v2639_v26 = vld [vmem:[#allocation17 + $0x478] sm:$0xff]  ;;  %v9476_v28 = vpack.c.bf16 %v2622_v21, %v2614_v19  ;;  %v2684_v9 = vld [vmem:[#allocation17 + $0x5e0] sm:$0xff] }
 0x808   :  { %v2695_v19 = vld [vmem:[#allocation17 + $0x638] sm:$0xff]  ;;  %v9364_v21 = vpack.c.bf16 %v2684_v9, %v2676_v8  ;;  %v2757_v8 = vld [vmem:[#allocation17 + $0x828] sm:$0xff]  ;;  %v2804_v58 = vld [vmem:[#allocation17 + $0x9a0] sm:$0xff] }
 0x809   :  { %9333 = vmatpush1.bf16.msra.mxu1 %v9332_v32  ;;  %v2630_v32 = vld [vmem:[#allocation17 + $0x430] sm:$0xff]  ;;  %v2765_v9 = vld [vmem:[#allocation17 + $0x868] sm:$0xff] }
 0x80a   :  { %9461 = vmatpush1.bf16.msra.mxu0 %v9460_v33  ;;  %9335 = vmatprep.subr.bf16.mxu1 %v9334_v38  ;;  %v9478_v33 = vpack.c.bf16 %v2639_v26, %v2631_v24  ;;  %v2638_v38 = vld [vmem:[#allocation17 + $0x470] sm:$0xff]  ;;  %v2692_v24 = vld [vmem:[#allocation17 + $0x620] sm:$0xff]  ;;  %v9382_v18 = vpack.c.bf16 %v2765_v9, %v2757_v8 }
 0x80b   :  { %9463 = vmatprep.subr.bf16.mxu0 %v9462_v37  ;;  %v2655_v37 = vld [vmem:[#allocation17 + $0x4f8] sm:$0xff]  ;;  %v9480_v41 = vpack.c.bf16 %v2638_v38, %v2630_v32  ;;  %v2700_v26 = vld [vmem:[#allocation17 + $0x660] sm:$0xff] }
 0x80c   :  { %v2711_v32 = vld [vmem:[#allocation17 + $0x6b8] sm:$0xff]  ;;  %v9368_v38 = vpack.c.bf16 %v2700_v26, %v2692_v24  ;;  %v2773_v24 = vld [vmem:[#allocation17 + $0x8a8] sm:$0xff]  ;;  %v2820_v8 = vld [vmem:[#allocation17 + $0xa20] sm:$0xff] }
 0x80d   :  { %9337 = vmatpush1.bf16.msra.mxu1 %v9336_v47  ;;  %v2646_v47 = vld [vmem:[#allocation17 + $0x4b0] sm:$0xff]  ;;  %v2781_v26 = vld [vmem:[#allocation17 + $0x8e8] sm:$0xff]  ;;  %v2828_v9 = vld [vmem:[#allocation17 + $0xa60] sm:$0xff] }
 0x80e   :  { %9465 = vmatpush1.bf16.msra.mxu0 %v9464_v49  ;;  %9339 = vmatprep.subr.bf16.mxu1 %v9338_v50  ;;  %v9482_v49 = vpack.c.bf16 %v2655_v37, %v2647_v36  ;;  %v2654_v50 = vld [vmem:[#allocation17 + $0x4f0] sm:$0xff]  ;;  %v2708_v36 = vld [vmem:[#allocation17 + $0x6a0] sm:$0xff] }
 0x80f   :  { %9467 = vmatprep.subr.bf16.mxu0 %v9466_v53  ;;  %v2671_v53 = vld [vmem:[#allocation17 + $0x578] sm:$0xff]  ;;  %v9484_v54 = vpack.c.bf16 %v2654_v50, %v2646_v47  ;;  %v2716_v37 = vld [vmem:[#allocation17 + $0x6e0] sm:$0xff] }
 0x810   :  { %v2727_v47 = vld [vmem:[#allocation17 + $0x738] sm:$0xff]  ;;  %v9372_v50 = vpack.c.bf16 %v2716_v37, %v2708_v36  ;;  %v2797_v36 = vld [vmem:[#allocation17 + $0x968] sm:$0xff] }
 0x811   :  { %9341 = vmatpush1.bf16.msra.mxu1 %v9340_v59  ;;  %v2662_v59 = vld [vmem:[#allocation17 + $0x530] sm:$0xff] }
 0x812   :  { %9469 = vmatpush1.bf16.msra.mxu0 %v9468_v60  ;;  %9343 = vmatprep.subr.bf16.mxu1 %v9342_v62  ;;  %v9486_v60 = vpack.c.bf16 %v2671_v53, %v2663_v39  ;;  %v2670_v62 = vld [vmem:[#allocation17 + $0x570] sm:$0xff]  ;;  %v2724_v39 = vld [vmem:[#allocation17 + $0x720] sm:$0xff] }
 0x813   :  { %9471 = vmatprep.subr.bf16.mxu0 %v9470_v1  ;;  %v2687_v1 = vld [vmem:[#allocation17 + $0x5f8] sm:$0xff]  ;;  %v9488_v52 = vpack.c.bf16 %v2670_v62, %v2662_v59  ;;  %v2732_v53 = vld [vmem:[#allocation17 + $0x760] sm:$0xff] }
 0x814   :  { %v2743_v59 = vld [vmem:[#allocation17 + $0x7b8] sm:$0xff]  ;;  %v9376_v62 = vpack.c.bf16 %v2732_v53, %v2724_v39  ;;  %v2805_v39 = vld [vmem:[#allocation17 + $0x9a8] sm:$0xff] }
 0x815   :  { %9345 = vmatpush1.bf16.msra.mxu1 %v9344_v12  ;;  %v2678_v12 = vld [vmem:[#allocation17 + $0x5b0] sm:$0xff]  ;;  %v2813_v53 = vld [vmem:[#allocation17 + $0x9e8] sm:$0xff] }
 0x816   :  { %9473 = vmatpush1.bf16.msra.mxu0 %v9472_v13  ;;  %9347 = vmatprep.subr.bf16.mxu1 %v9346_v14  ;;  %v9490_v13 = vpack.c.bf16 %v2687_v1, %v2679_v3  ;;  %v2686_v14 = vld [vmem:[#allocation17 + $0x5f0] sm:$0xff]  ;;  %v2740_v3 = vld [vmem:[#allocation17 + $0x7a0] sm:$0xff]  ;;  %v9394_v57 = vpack.c.bf16 %v2813_v53, %v2805_v39 }
 0x817   :  { %9475 = vmatprep.subr.bf16.mxu0 %v9474_v20  ;;  %v2703_v20 = vld [vmem:[#allocation17 + $0x678] sm:$0xff]  ;;  %v9492_v22 = vpack.c.bf16 %v2686_v14, %v2678_v12  ;;  %v2748_v1 = vld [vmem:[#allocation17 + $0x7e0] sm:$0xff] }
 0x818   :  { %v2759_v12 = vld [vmem:[#allocation17 + $0x838] sm:$0xff]  ;;  %v9380_v14 = vpack.c.bf16 %v2748_v1, %v2740_v3  ;;  %v2868_v39 = vld [vmem:[#allocation17 + $0xba0] sm:$0xff] }
 0x819   :  { %9349 = vmatpush1.bf16.msra.mxu1 %v9348_v27  ;;  %v2694_v27 = vld [vmem:[#allocation17 + $0x630] sm:$0xff]  ;;  %v2823_v3 = vld [vmem:[#allocation17 + $0xa38] sm:$0xff]  ;;  %v2876_v53 = vld [vmem:[#allocation17 + $0xbe0] sm:$0xff] }
 0x81a   :  { %9477 = vmatpush1.bf16.msra.mxu0 %v9476_v28  ;;  %9351 = vmatprep.subr.bf16.mxu1 %v9350_v29  ;;  %v9494_v28 = vpack.c.bf16 %v2703_v20, %v2695_v19  ;;  %v2702_v29 = vld [vmem:[#allocation17 + $0x670] sm:$0xff]  ;;  %v2756_v19 = vld [vmem:[#allocation17 + $0x820] sm:$0xff]  ;;  %v2831_v1 = vld [vmem:[#allocation17 + $0xa78] sm:$0xff] }
 0x81b   :  { %9479 = vmatprep.subr.bf16.mxu0 %v9478_v33  ;;  %v2719_v33 = vld [vmem:[#allocation17 + $0x6f8] sm:$0xff]  ;;  %v9496_v34 = vpack.c.bf16 %v2702_v29, %v2694_v27  ;;  %v2764_v20 = vld [vmem:[#allocation17 + $0x860] sm:$0xff] }
 0x81c   :  { %v9384_v27 = vpack.c.bf16 %v2764_v20, %v2756_v19  ;;  %v2783_v29 = vld [vmem:[#allocation17 + $0x8f8] sm:$0xff] }
 0x81d   :  { %9353 = vmatpush1.bf16.msra.mxu1 %v9352_v40  ;;  %v2710_v40 = vld [vmem:[#allocation17 + $0x6b0] sm:$0xff]  ;;  %v2839_v19 = vld [vmem:[#allocation17 + $0xab8] sm:$0xff] }
 0x81e   :  { %9481 = vmatpush1.bf16.msra.mxu0 %v9480_v41  ;;  %9355 = vmatprep.subr.bf16.mxu1 %v9354_v42  ;;  %v9498_v41 = vpack.c.bf16 %v2719_v33, %v2711_v32  ;;  %v2718_v42 = vld [vmem:[#allocation17 + $0x6f0] sm:$0xff]  ;;  %v2780_v32 = vld [vmem:[#allocation17 + $0x8e0] sm:$0xff]  ;;  %v2847_v20 = vld [vmem:[#allocation17 + $0xaf8] sm:$0xff] }
 0x81f   :  { %9483 = vmatprep.subr.bf16.mxu0 %v9482_v49  ;;  %v2735_v49 = vld [vmem:[#allocation17 + $0x778] sm:$0xff]  ;;  %v9500_v44 = vpack.c.bf16 %v2718_v42, %v2710_v40  ;;  %v2774_v33 = vld [vmem:[#allocation17 + $0x8b0] sm:$0xff]  ;;  %v9388_v42 = vpack.c.bf16 %v2780_v32, %v2772_v31  ;;  %v2861_v31 = vld [vmem:[#allocation17 + $0xb68] sm:$0xff] }
 0x820   :  { %v2791_v40 = vld [vmem:[#allocation17 + $0x938] sm:$0xff] }
 0x821   :  { %9357 = vmatpush1.bf16.msra.mxu1 %v9356_v25  ;;  %v2726_v25 = vld [vmem:[#allocation17 + $0x730] sm:$0xff]  ;;  %v2855_v32 = vld [vmem:[#allocation17 + $0xb38] sm:$0xff] }
 0x822   :  { %9485 = vmatpush1.bf16.msra.mxu0 %v9484_v54  ;;  %9359 = vmatprep.subr.bf16.mxu1 %v9358_v55  ;;  %v9502_v54 = vpack.c.bf16 %v2735_v49, %v2727_v47  ;;  %v2734_v55 = vld [vmem:[#allocation17 + $0x770] sm:$0xff]  ;;  %v2788_v47 = vld [vmem:[#allocation17 + $0x920] sm:$0xff] }
 0x823   :  { %9487 = vmatprep.subr.bf16.mxu0 %v9486_v60  ;;  %v2751_v60 = vld [vmem:[#allocation17 + $0x7f8] sm:$0xff]  ;;  %v9504_v63 = vpack.c.bf16 %v2734_v55, %v2726_v25  ;;  %v2796_v49 = vld [vmem:[#allocation17 + $0x960] sm:$0xff] }
 0x824   :  { %v2807_v25 = vld [vmem:[#allocation17 + $0x9b8] sm:$0xff] }
 0x825   :  { %9361 = vmatpush1.bf16.msra.mxu1 %v9360_v6  ;;  %v2742_v6 = vld [vmem:[#allocation17 + $0x7b0] sm:$0xff] }
 0x826   :  { %9489 = vmatpush1.bf16.msra.mxu0 %v9488_v52  ;;  %9363 = vmatprep.subr.bf16.mxu1 %v9362_v7  ;;  %v9506_v52 = vpack.c.bf16 %v2751_v60, %v2743_v59  ;;  %v2750_v7 = vld [vmem:[#allocation17 + $0x7f0] sm:$0xff]  ;;  %v2812_v59 = vld [vmem:[#allocation17 + $0x9e0] sm:$0xff] }
 0x827   :  { %9491 = vmatprep.subr.bf16.mxu0 %v9490_v13  ;;  %v2767_v13 = vld [vmem:[#allocation17 + $0x878] sm:$0xff]  ;;  %v9508_v17 = vpack.c.bf16 %v2750_v7, %v2742_v6  ;;  %v2806_v60 = vld [vmem:[#allocation17 + $0x9b0] sm:$0xff]  ;;  %v9396_v6 = vpack.c.bf16 %v2812_v59, %v2804_v58 }
 0x828   :  { %v2887_v58 = vld [vmem:[#allocation17 + $0xc38] sm:$0xff] }
 0x829   :  { %9365 = vmatpush1.bf16.msra.mxu1 %v9364_v21  ;;  %v9510_v21 = vpack.c.bf16 %v2767_v13, %v2759_v12  ;;  %v2822_v12 = vld [vmem:[#allocation17 + $0xa30] sm:$0xff]  ;;  %v9526_v13 = vpack.c.bf16 %v2831_v1, %v2823_v3  ;;  %v2895_v59 = vld [vmem:[#allocation17 + $0xc78] sm:$0xff] }
 0x82a   :  { %9493 = vmatpush1.bf16.msra.mxu0 %v9492_v22  ;;  %9367 = vmatprep.subr.bf16.mxu1 %v9366_v23  ;;  %v2758_v22 = vld [vmem:[#allocation17 + $0x830] sm:$0xff]  ;;  %v9542_v1 = vpack.c.bf16 %v2895_v59, %v2887_v58 }
 0x82b   :  { %9495 = vmatprep.subr.bf16.mxu0 %v9494_v28  ;;  %v2766_v23 = vld [vmem:[#allocation17 + $0x870] sm:$0xff]  ;;  %v2775_v28 = vld [vmem:[#allocation17 + $0x8b8] sm:$0xff] }
 0x82c   :  { %v9512_v30 = vpack.c.bf16 %v2766_v23, %v2758_v22  ;;  %v9514_v37 = vpack.c.bf16 %v2783_v29, %v2775_v28  ;;  %v9530_v28 = vpack.c.bf16 %v2847_v20, %v2839_v19  ;;  %v2846_v29 = vld [vmem:[#allocation17 + $0xaf0] sm:$0xff] }
 0x82d   :  { %9369 = vmatpush1.bf16.msra.mxu1 %v9368_v38  ;;  %v9386_v38 = vpack.c.bf16 %v2781_v26, %v2773_v24  ;;  %v2836_v24 = vld [vmem:[#allocation17 + $0xaa0] sm:$0xff]  ;;  %v2886_v3 = vld [vmem:[#allocation17 + $0xc30] sm:$0xff] }
 0x82e   :  { %9497 = vmatpush1.bf16.msra.mxu0 %v9496_v34  ;;  %9371 = vmatprep.subr.bf16.mxu1 %v9370_v35  ;;  %v2782_v34 = vld [vmem:[#allocation17 + $0x8f0] sm:$0xff]  ;;  %v2789_v35 = vld [vmem:[#allocation17 + $0x928] sm:$0xff]  ;;  %v2844_v26 = vld [vmem:[#allocation17 + $0xae0] sm:$0xff] }
 0x82f   :  { %9499 = vmatprep.subr.bf16.mxu0 %v9498_v41  ;;  %v2799_v41 = vld [vmem:[#allocation17 + $0x978] sm:$0xff]  ;;  %v9516_v43 = vpack.c.bf16 %v2782_v34, %v2774_v33  ;;  %v9390_v46 = vpack.c.bf16 %v2797_v36, %v2789_v35  ;;  %v2852_v36 = vld [vmem:[#allocation17 + $0xb20] sm:$0xff]  ;;  %v2902_v19 = vld [vmem:[#allocation17 + $0xcb0] sm:$0xff] }
 0x830   :  { %v2863_v33 = vld [vmem:[#allocation17 + $0xb78] sm:$0xff]  ;;  %v2950_v58 = vld [vmem:[#allocation17 + $0xe30] sm:$0xff] }
 0x831   :  { %9373 = vmatpush1.bf16.msra.mxu1 %v9372_v50  ;;  %v2790_v50 = vld [vmem:[#allocation17 + $0x930] sm:$0xff] }
 0x832   :  { %9501 = vmatpush1.bf16.msra.mxu0 %v9500_v44  ;;  %9375 = vmatprep.subr.bf16.mxu1 %v9374_v51  ;;  %v9518_v44 = vpack.c.bf16 %v2799_v41, %v2791_v40  ;;  %v2798_v51 = vld [vmem:[#allocation17 + $0x970] sm:$0xff]  ;;  %v9534_v41 = vpack.c.bf16 %v2863_v33, %v2855_v32 }
 0x833   :  { %9503 = vmatprep.subr.bf16.mxu0 %v9502_v54  ;;  %v9392_v54 = vpack.c.bf16 %v2796_v49, %v2788_v47  ;;  %v9520_v55 = vpack.c.bf16 %v2798_v51, %v2790_v50  ;;  %v2854_v40 = vld [vmem:[#allocation17 + $0xb30] sm:$0xff]  ;;  %v2871_v47 = vld [vmem:[#allocation17 + $0xbb8] sm:$0xff] }
 0x834   :  { %v2879_v49 = vld [vmem:[#allocation17 + $0xbf8] sm:$0xff]  ;;  %v2918_v32 = vld [vmem:[#allocation17 + $0xd30] sm:$0xff] }
 0x835   :  { %9377 = vmatpush1.bf16.msra.mxu1 %v9376_v62 }
 0x836   :  { %9505 = vmatpush1.bf16.msra.mxu0 %v9504_v63  ;;  %9379 = vmatprep.subr.bf16.mxu1 %v9378_v0  ;;  %v2821_v63 = vld [vmem:[#allocation17 + $0xa28] sm:$0xff] }
 0x837   :  { %9507 = vmatprep.subr.bf16.mxu0 %v9506_v52  ;;  %v2829_v0 = vld [vmem:[#allocation17 + $0xa68] sm:$0xff] }
 0x838   :  { %v9398_v7 = vpack.c.bf16 %v2829_v0, %v2821_v63  ;;  %v2884_v63 = vld [vmem:[#allocation17 + $0xc20] sm:$0xff] }
 0x839   :  { %9381 = vmatpush1.bf16.msra.mxu1 %v9380_v14  ;;  %v2830_v14 = vld [vmem:[#allocation17 + $0xa70] sm:$0xff]  ;;  %v2892_v0 = vld [vmem:[#allocation17 + $0xc60] sm:$0xff] }
 0x83a   :  { %9509 = vmatpush1.bf16.msra.mxu0 %v9508_v17  ;;  %9383 = vmatprep.subr.bf16.mxu1 %v9382_v18  ;;  %v2837_v17 = vld [vmem:[#allocation17 + $0xaa8] sm:$0xff]  ;;  %v9528_v22 = vpack.c.bf16 %v2830_v14, %v2822_v12  ;;  %v9416_v12 = vpack.c.bf16 %v2892_v0, %v2884_v63  ;;  %v2967_v63 = vld [vmem:[#allocation17 + $0xeb8] sm:$0xff] }
 0x83b   :  { %9511 = vmatprep.subr.bf16.mxu0 %v9510_v21  ;;  %v2845_v18 = vld [vmem:[#allocation17 + $0xae8] sm:$0xff]  ;;  %v9400_v21 = vpack.c.bf16 %v2828_v9, %v2820_v8  ;;  %v2903_v8 = vld [vmem:[#allocation17 + $0xcb8] sm:$0xff] }
 0x83c   :  { %3399 = vmatmul.mubr.f32.vlgmr.msra.gmra.mrb[12].mxu1 %v11578_v10  ;;  %v9402_v23 = vpack.c.bf16 %v2845_v18, %v2837_v17  ;;  %v2911_v9 = vld [vmem:[#allocation17 + $0xcf8] sm:$0xff]  ;;  %v2900_v17 = vld [vmem:[#allocation17 + $0xca0] sm:$0xff] }
 0x83d   :  { %3541 = vmatmul.mubr.f32.vlgmr.msra.gmra.mrb[8].mxu0 %v11578_v10  ;;  %9385 = vmatpush1.bf16.msra.mxu1 %v9384_v27  ;;  %v2815_v10 = vld [vmem:[#allocation17 + $0x9f8] sm:$0xff]  ;;  %v2838_v27 = vld [vmem:[#allocation17 + $0xab0] sm:$0xff]  ;;  %v2908_v18 = vld [vmem:[#allocation17 + $0xce0] sm:$0xff]  ;;  %v9546_v20 = vpack.c.bf16 %v2911_v9, %v2903_v8 }
 0x83e   :  { %3469 = vmatprep.mubr.f32.mxu1 %v11583_v15  ;;  %9513 = vmatpush1.bf16.msra.mxu0 %v9512_v30  ;;  %v9522_v62 = vpack.c.bf16 %v2815_v10, %v2807_v25  ;;  %v2853_v30 = vld [vmem:[#allocation17 + $0xb28] sm:$0xff]  ;;  %v9532_v34 = vpack.c.bf16 %v2846_v29, %v2838_v27  ;;  %v2870_v25 = vld [vmem:[#allocation17 + $0xbb0] sm:$0xff]  ;;  %v9538_v10 = vpack.c.bf16 %v2879_v49, %v2871_v47  ;;  %v2975_v0 = vld [vmem:[#allocation17 + $0xef8] sm:$0xff] }
 0x83f   :  { %3611 = vmatprep.mubr.f32.mxu0 %v11583_v15  ;;  %9387 = vmatprep.subr.bf16.mxu1 %v9386_v38  ;;  %v2814_v15 = vld [vmem:[#allocation17 + $0x9f0] sm:$0xff]  ;;  %v9404_v38 = vpack.c.bf16 %v2844_v26, %v2836_v24  ;;  %v9406_v35 = vpack.c.bf16 %v2861_v31, %v2853_v30  ;;  %v2919_v24 = vld [vmem:[#allocation17 + $0xd38] sm:$0xff]  ;;  %v9420_v27 = vpack.c.bf16 %v2908_v18, %v2900_v17  ;;  %v2916_v30 = vld [vmem:[#allocation17 + $0xd20] sm:$0xff] }
 0x840   :  { %9515 = vmatprep.subr.bf16.mxu0 %v9514_v37  ;;  %v9524_v52 = vpack.c.bf16 %v2814_v15, %v2806_v60  ;;  %v2860_v37 = vld [vmem:[#allocation17 + $0xb60] sm:$0xff]  ;;  %v9412_v60 = vpack.c.bf16 %v2876_v53, %v2868_v39  ;;  %v2927_v26 = vld [vmem:[#allocation17 + $0xd78] sm:$0xff]  ;;  %v2934_v47 = vld [vmem:[#allocation17 + $0xdb0] sm:$0xff]  ;;  %v9562_v9 = vpack.c.bf16 %v2975_v0, %v2967_v63 }
 0x841   :  { %9389 = vmatpush1.bf16.msra.mxu1 %v9388_v42  ;;  %v2862_v42 = vld [vmem:[#allocation17 + $0xb70] sm:$0xff]  ;;  %v9408_v50 = vpack.c.bf16 %v2860_v37, %v2852_v36  ;;  %v2924_v31 = vld [vmem:[#allocation17 + $0xd60] sm:$0xff]  ;;  %v9550_v33 = vpack.c.bf16 %v2927_v26, %v2919_v24  ;;  %v2935_v36 = vld [vmem:[#allocation17 + $0xdb8] sm:$0xff] }
 0x842   :  { %9517 = vmatpush1.bf16.msra.mxu0 %v9516_v43  ;;  %9391 = vmatprep.subr.bf16.mxu1 %v9390_v46  ;;  %v2869_v43 = vld [vmem:[#allocation17 + $0xba8] sm:$0xff]  ;;  %v2943_v37 = vld [vmem:[#allocation17 + $0xdf8] sm:$0xff]  ;;  %v2966_v8 = vld [vmem:[#allocation17 + $0xeb0] sm:$0xff] }
 0x843   :  { %9519 = vmatprep.subr.bf16.mxu0 %v9518_v44  ;;  %v2877_v46 = vld [vmem:[#allocation17 + $0xbe8] sm:$0xff]  ;;  %v9536_v44 = vpack.c.bf16 %v2862_v42, %v2854_v40  ;;  %v9424_v40 = vpack.c.bf16 %v2924_v31, %v2916_v30  ;;  %v9554_v49 = vpack.c.bf16 %v2943_v37, %v2935_v36  ;;  %v2951_v39 = vld [vmem:[#allocation17 + $0xe38] sm:$0xff]  ;;  %v2982_v24 = vld [vmem:[#allocation17 + $0xf30] sm:$0xff] }
 0x844   :  { %v9410_v51 = vpack.c.bf16 %v2877_v46, %v2869_v43  ;;  %v2932_v43 = vld [vmem:[#allocation17 + $0xda0] sm:$0xff]  ;;  %v2959_v53 = vld [vmem:[#allocation17 + $0xe78] sm:$0xff]  ;;  %v2998_v37 = vld [vmem:[#allocation17 + $0xfb0] sm:$0xff] }
 0x845   :  { %9393 = vmatpush1.bf16.msra.mxu1 %v9392_v54  ;;  %v2878_v54 = vld [vmem:[#allocation17 + $0xbf0] sm:$0xff]  ;;  %v2940_v46 = vld [vmem:[#allocation17 + $0xde0] sm:$0xff]  ;;  %v9558_v59 = vpack.c.bf16 %v2959_v53, %v2951_v39  ;;  %v2983_v17 = vld [vmem:[#allocation17 + $0xf38] sm:$0xff] }
 0x846   :  { %9521 = vmatpush1.bf16.msra.mxu0 %v9520_v55  ;;  %9395 = vmatprep.subr.bf16.mxu1 %v9394_v57  ;;  %v2885_v55 = vld [vmem:[#allocation17 + $0xc28] sm:$0xff]  ;;  %v2991_v18 = vld [vmem:[#allocation17 + $0xf78] sm:$0xff] }
 0x847   :  { %9523 = vmatprep.subr.bf16.mxu0 %v9522_v62  ;;  %v2893_v57 = vld [vmem:[#allocation17 + $0xc68] sm:$0xff]  ;;  %v9540_v62 = vpack.c.bf16 %v2878_v54, %v2870_v25  ;;  %v9428_v25 = vpack.c.bf16 %v2940_v46, %v2932_v43  ;;  %v9566_v26 = vpack.c.bf16 %v2991_v18, %v2983_v17  ;;  %v2999_v30 = vld [vmem:[#allocation17 + $0xfb8] sm:$0xff] }
 0x848   :  { %v9414_v15 = vpack.c.bf16 %v2893_v57, %v2885_v55  ;;  %v2948_v55 = vld [vmem:[#allocation17 + $0xe20] sm:$0xff]  ;;  %v3007_v31 = vld [vmem:[#allocation17 + $0xff8] sm:$0xff]  ;;  %v3704_v43 = vld [vmem:[%s12326_s17] sm:$0xff] }
 0x849   :  { %9397 = vmatpush1.bf16.msra.mxu1 %v9396_v6  ;;  %v2894_v6 = vld [vmem:[#allocation17 + $0xc70] sm:$0xff]  ;;  %v2956_v57 = vld [vmem:[#allocation17 + $0xe60] sm:$0xff]  ;;  %v9570_v36 = vpack.c.bf16 %v3007_v31, %v2999_v30 }
 0x84a   :  { %9525 = vmatpush1.bf16.msra.mxu0 %v9524_v52  ;;  %9399 = vmatprep.subr.bf16.mxu1 %v9398_v7  ;;  %v2901_v52 = vld [vmem:[#allocation17 + $0xca8] sm:$0xff]  ;;  %v3705_v46 = vld [vmem:[%s12326_s17 + $0x8] sm:$0xff] }
 0x84b   :  { %9527 = vmatprep.subr.bf16.mxu0 %v9526_v13  ;;  %v2909_v7 = vld [vmem:[#allocation17 + $0xce8] sm:$0xff]  ;;  %v9544_v13 = vpack.c.bf16 %v2894_v6, %v2886_v3  ;;  %v9432_v3 = vpack.c.bf16 %v2956_v57, %v2948_v55  ;;  %v3786_v53 = vld [vmem:[%s12327_s2 + $0x8] sm:$0xff] }
 0x84c   :  { %v9418_v14 = vpack.c.bf16 %v2909_v7, %v2901_v52  ;;  %v2964_v52 = vld [vmem:[#allocation17 + $0xea0] sm:$0xff]  ;;  %v3785_v39 = vld [vmem:[%s12327_s2] sm:$0xff]  ;;  %v3867_v57 = vld [vmem:[%s12328_s7 + $0x8] sm:$0xff] }
 0x84d   :  { %9401 = vmatpush1.bf16.msra.mxu1 %v9400_v21  ;;  %v2910_v21 = vld [vmem:[#allocation17 + $0xcf0] sm:$0xff]  ;;  %v2972_v7 = vld [vmem:[#allocation17 + $0xee0] sm:$0xff] }
 0x84e   :  { %9529 = vmatpush1.bf16.msra.mxu0 %v9528_v22  ;;  %9403 = vmatprep.subr.bf16.mxu1 %v9402_v23  ;;  %v2917_v22 = vld [vmem:[#allocation17 + $0xd28] sm:$0xff] }
 0x84f   :  { %9531 = vmatprep.subr.bf16.mxu0 %v9530_v28  ;;  %v2925_v23 = vld [vmem:[#allocation17 + $0xd68] sm:$0xff]  ;;  %v9548_v28 = vpack.c.bf16 %v2910_v21, %v2902_v19  ;;  %v9436_v19 = vpack.c.bf16 %v2972_v7, %v2964_v52 }
 0x850   :  { %v9422_v29 = vpack.c.bf16 %v2925_v23, %v2917_v22  ;;  %v2980_v22 = vld [vmem:[#allocation17 + $0xf20] sm:$0xff]  ;;  %v3866_v55 = vld [vmem:[%s12328_s7] sm:$0xff] }
 0x851   :  { %9405 = vmatpush1.bf16.msra.mxu1 %v9404_v38  ;;  %v2926_v38 = vld [vmem:[#allocation17 + $0xd70] sm:$0xff]  ;;  %v2988_v23 = vld [vmem:[#allocation17 + $0xf60] sm:$0xff] }
 0x852   :  { %9533 = vmatpush1.bf16.msra.mxu0 %v9532_v34  ;;  %9407 = vmatprep.subr.bf16.mxu1 %v9406_v35  ;;  %v2933_v34 = vld [vmem:[#allocation17 + $0xda8] sm:$0xff] }
 0x853   :  { %9535 = vmatprep.subr.bf16.mxu0 %v9534_v41  ;;  %v2941_v35 = vld [vmem:[#allocation17 + $0xde8] sm:$0xff]  ;;  %v9552_v41 = vpack.c.bf16 %v2926_v38, %v2918_v32  ;;  %v9440_v32 = vpack.c.bf16 %v2988_v23, %v2980_v22 }
 0x854   :  { %v9426_v42 = vpack.c.bf16 %v2941_v35, %v2933_v34  ;;  %v2996_v34 = vld [vmem:[#allocation17 + $0xfa0] sm:$0xff] }
 0x855   :  { %9409 = vmatpush1.bf16.msra.mxu1 %v9408_v50  ;;  %v2942_v50 = vld [vmem:[#allocation17 + $0xdf0] sm:$0xff]  ;;  %v3004_v35 = vld [vmem:[#allocation17 + $0xfe0] sm:$0xff] }
 0x856   :  { %9537 = vmatpush1.bf16.msra.mxu0 %v9536_v44  ;;  %9411 = vmatprep.subr.bf16.mxu1 %v9410_v51  ;;  %v2949_v44 = vld [vmem:[#allocation17 + $0xe28] sm:$0xff] }
 0x857   :  { %9539 = vmatprep.subr.bf16.mxu0 %v9538_v10  ;;  %v2957_v51 = vld [vmem:[#allocation17 + $0xe68] sm:$0xff]  ;;  %v9556_v10 = vpack.c.bf16 %v2942_v50, %v2934_v47  ;;  %v9575_v47 = vpack.c.bf16 %v3705_v46, %v3704_v43  ;;  %v3706_v50 = vld [vmem:[%s12326_s17 + $0x10] sm:$0xff]  ;;  %v11652_v46 = vsub.s32 4, %v11157_v61 }
 0x858   :  { %v9430_v54 = vpack.c.bf16 %v2957_v51, %v2949_v44  ;;  %v3707_v44 = vld [vmem:[%s12326_s17 + $0x18] sm:$0xff] }
 0x859   :  { %9413 = vmatpush1.bf16.msra.mxu1 %v9412_v60  ;;  %v2958_v60 = vld [vmem:[#allocation17 + $0xe70] sm:$0xff]  ;;  %v9578_v51 = vpack.c.bf16 %v3707_v44, %v3706_v50  ;;  %v11658_v50 = vsub.s32 5, %v11157_v61  ;;  %v11661_v44 = vsub.s32 7, %v11157_v61 }
 0x85a   :  { %9541 = vmatpush1.bf16.msra.mxu0 %v9540_v62  ;;  %9415 = vmatprep.subr.bf16.mxu1 %v9414_v15  ;;  %v2965_v62 = vld [vmem:[#allocation17 + $0xea8] sm:$0xff] }
 0x85b   :  { %9543 = vmatprep.subr.bf16.mxu0 %v9542_v1  ;;  %v2973_v15 = vld [vmem:[#allocation17 + $0xee8] sm:$0xff]  ;;  %v9560_v1 = vpack.c.bf16 %v2958_v60, %v2950_v58  ;;  %v9587_v58 = vpack.c.bf16 %v3867_v57, %v3866_v55 }
 0x85c   :  { %v9434_v6 = vpack.c.bf16 %v2973_v15, %v2965_v62  ;;  %v3869_v60 = vld [vmem:[%s12328_s7 + $0x18] sm:$0xff] }
 0x85d   :  { %9417 = vmatpush1.bf16.msra.mxu1 %v9416_v12  ;;  %v2974_v12 = vld [vmem:[#allocation17 + $0xef0] sm:$0xff]  ;;  %v11638_v15 = vld [vmem:[#allocation19] sm:$0xff] }
 0x85e   :  { %9545 = vmatpush1.bf16.msra.mxu0 %v9544_v13  ;;  %9419 = vmatprep.subr.bf16.mxu1 %v9418_v14  ;;  %v2981_v13 = vld [vmem:[#allocation17 + $0xf28] sm:$0xff]  ;;  %v3013_v63 = vrot.slane %v11638_v15, %v11297_v2  ;;  %v3021_v0 = vrot.slane %v11638_v15, %v11372_v48 }
 0x85f   :  { %9547 = vmatprep.subr.bf16.mxu0 %v9546_v20  ;;  %v2989_v14 = vld [vmem:[#allocation17 + $0xf68] sm:$0xff]  ;;  %v9564_v20 = vpack.c.bf16 %v2974_v12, %v2966_v8 }
 0x860   :  { %v9438_v21 = vpack.c.bf16 %v2989_v14, %v2981_v13 }
 0x861   :  { %9421 = vmatpush1.bf16.msra.mxu1 %v9420_v27  ;;  %v2990_v27 = vld [vmem:[#allocation17 + $0xf70] sm:$0xff] }
 0x862   :  { %9549 = vmatpush1.bf16.msra.mxu0 %v9548_v28  ;;  %9423 = vmatprep.subr.bf16.mxu1 %v9422_v29  ;;  %v2997_v28 = vld [vmem:[#allocation17 + $0xfa8] sm:$0xff] }
 0x863   :  { %9551 = vmatprep.subr.bf16.mxu0 %v9550_v33  ;;  %v3005_v29 = vld [vmem:[#allocation17 + $0xfe8] sm:$0xff]  ;;  %v9568_v33 = vpack.c.bf16 %v2990_v27, %v2982_v24 }
 0x864   :  { %v9442_v38 = vpack.c.bf16 %v3005_v29, %v2997_v28 }
 0x865   :  { %9425 = vmatpush1.bf16.msra.mxu1 %v9424_v40  ;;  %v3006_v40 = vld [vmem:[#allocation17 + $0xff0] sm:$0xff] }
 0x866   :  { %9553 = vmatpush1.bf16.msra.mxu0 %v9552_v41  ;;  %9427 = vmatprep.subr.bf16.mxu1 %v9426_v42  ;;  %v9444_v41 = vpack.c.bf16 %v3004_v35, %v2996_v34  ;;  %v9572_v42 = vpack.c.bf16 %v3006_v40, %v2998_v37 }
 0x867   :  { %9555 = vmatprep.subr.bf16.mxu0 %v9554_v49  ;;  %v10842_v49 = vmov 0.0|0.0  }
 0x869   :  { %9429 = vmatpush1.bf16.msra.mxu1 %v9428_v25  ;;  %v9581_v25 = vpack.c.bf16 %v3786_v53, %v3785_v39  ;;  %v3033_v53 = vrot.slane %v11638_v15, %v11658_v50 }
 0x86a   :  { %9557 = vmatpush1.bf16.msra.mxu0 %v9556_v10  ;;  %9431 = vmatprep.subr.bf16.mxu1 %v9430_v54  ;;  %v3788_v10 = vld [vmem:[%s12327_s2 + $0x18] sm:$0xff] }
 0x86b   :  { %9559 = vmatprep.subr.bf16.mxu0 %v9558_v59  ;;  %v3868_v59 = vld [vmem:[%s12328_s7 + $0x10] sm:$0xff] }
 0x86c   :  { %v9590_v62 = vpack.c.bf16 %v3869_v60, %v3868_v59 }
 0x86d   :  { %9433 = vmatpush1.bf16.msra.mxu1 %v9432_v3  ;;  %v3017_v3 = vrot.slane %v11638_v15, %v11302_v4 }
 0x86e   :  { %9561 = vmatpush1.bf16.msra.mxu0 %v9560_v1  ;;  %9435 = vmatprep.subr.bf16.mxu1 %v9434_v6  ;;  %v3025_v1 = vrot.slane %v11638_v15, %v11305_v5 }
 0x86f   :  { %9563 = vmatprep.subr.bf16.mxu0 %v9562_v9 }
 0x871   :  { %9437 = vmatpush1.bf16.msra.mxu1 %v9436_v19 }
 0x872   :  { %9565 = vmatpush1.bf16.msra.mxu0 %v9564_v20  ;;  %9439 = vmatprep.subr.bf16.mxu1 %v9438_v21 }
 0x873   :  { %9567 = vmatprep.subr.bf16.mxu0 %v9566_v26 }
 0x875   :  { %9441 = vmatpush1.bf16.msra.mxu1 %v9440_v32 }
 0x876   :  { %9569 = vmatpush1.bf16.msra.mxu0 %v9568_v33  ;;  %9443 = vmatprep.subr.bf16.mxu1 %v9442_v38 }
 0x877   :  { %9571 = vmatprep.subr.bf16.mxu0 %v9570_v36 }
 0x879   :  { %9445 = vmatpush1.bf16.msra.mxu1 %v9444_v41 }
 0x87a   :  { %9573 = vmatpush1.bf16.msra.mxu0 %v9572_v42  ;;  %9574 = vmatprep.subr.bf16.mxu1 %v10842_v49 }
 0x87b   :  { %8105 = vmatprep.subr.mxu0 %v10841_v16 }
 0x87c   :  { %3470 = vmatmul.mubr.f32.vlgmr.msra.gmra.mrb[12].mxu1 %v11590_v56 }
 0x87d   :  { %3612 = vmatmul.mubr.f32.vlgmr.msra.gmra.mrb[8].mxu0 %v11590_v56  ;;  %9576 = vmatpush3.bf16.msra.mxu1 %v9575_v47  ;;  %v3787_v56 = vld [vmem:[%s12327_s2 + $0x10] sm:$0xff]  ;;  %v11655_v47 = vsub.s32 6, %v11157_v61 }
 0x87e   :  { %9577 = vmatprep.subr.bf16.mxu1 %v10842_v49  ;;  %8027 = vmatprep.mubr.msk.f32.mxu1 %vm10843_vm6, %v10841_v16  ;;  %v9584_v54 = vpack.c.bf16 %v3788_v10, %v3787_v56 }
 0x87f   :  { %8107 = vmatprep.mubr.msk.f32.mxu0 %vm10843_vm6, %v10841_v16  ;;  %v3037_v39 = vrot.slane %v11638_v15, %v11655_v47 }
 0x881   :  { %9579 = vmatpush3.bf16.msra.mxu1 %v9578_v51  ;;  %v3029_v51 = vrot.slane %v11638_v15, %v11652_v46 }
 0x882   :  { %9580 = vmatprep.subr.bf16.mxu1 %v10842_v49 }
 0x884   :  { %8028 = vmatmul.mubr.msk.f32.vlgmr.msra.gmra.mrb[14].mxu1 %vm2117_vm1, %v11493_v45 }
 0x885   :  { %9582 = vmatpush3.bf16.msra.mxu1 %v9581_v25  ;;  %8038 = vmatprep.mubr.msk.f32.mxu1 %vm10843_vm6, %v10841_v16  ;;  %v3041_v25 = vrot.slane %v11638_v15, %v11661_v44 }
 0x886   :  { %9583 = vmatprep.subr.bf16.mxu1 %v10842_v49 }
 0x889   :  { %9585 = vmatpush3.bf16.msra.mxu1 %v9584_v54 }
 0x88a   :  { %9586 = vmatprep.subr.bf16.mxu1 %v10842_v49 }
 0x88c   :  { %8039 = vmatmul.mubr.msk.f32.vlgmr.msra.gmra.mrb[16].mxu1 %vm2117_vm1, %v11493_v45 }
 0x88d   :  { %9588 = vmatpush3.bf16.msra.mxu1 %v9587_v58  ;;  %8049 = vmatprep.mubr.msk.f32.mxu1 %vm10843_vm6, %v10841_v16 }
 0x88e   :  { %9589 = vmatprep.subr.bf16.mxu1 %v10842_v49 }
 0x891   :  { %9591 = vmatpush3.bf16.msra.mxu1 %v9590_v62 }
 0x892   :  { %8052 = vmatprep.subr.mxu1 %v10841_v16 }
 0x894   :  { %8050 = vmatmul.mubr.msk.f32.vlgmr.msra.gmra.mrb[18].mxu1 %vm2117_vm1, %v11493_v45 }
 0x895   :  { %8054 = vmatprep.mubr.msk.f32.mxu1 %vm10843_vm6, %v10841_v16 }
 0x8cf   :  { %v3187_v6 = vpop.f32.mrb[10].mxu1  ;;  %v3329_v52 = vpop.f32.mrb[6].mxu0 }
 0x8d0   :  { %v9978_v7 = vadd.f32 %v3187_v6, %v3013_v63  ;;  %v9980_v8 = vadd.f32 %v3329_v52, %v3021_v0  ;;  %v3189_v9 = vpop.f32.mrb[11].mxu1  ;;  %v3331_v12 = vpop.f32.mrb[7].mxu0 }
 0x8d1   :  { %v9979_v13 = vadd.f32 %v3189_v9, %v3017_v3  ;;  %v9981_v14 = vadd.f32 %v3331_v12, %v3025_v1 }
 0x8d2   :  { %v3618_v17 = vsub.f32 0.0, %v9978_v7  ;;  %v3620_v18 = vsub.f32 0.0, %v9980_v8  ;;  %v7486_v8 = vld [vmem:[#allocation22] ss:$0 sm:$0xff] }
 0x8d3   :  { %v3619_v19 = vsub.f32 0.0, %v9979_v13  ;;  %v3621_v20 = vsub.f32 0.0, %v9981_v14  ;;  %v7484_v13 = vld [vmem:[#allocation20] ss:$0 sm:$0xff] }
 0x8d4   :  { %v3626_v21 = vmul.f32 1.442695, %v3618_v17  ;;  %v3630_v22 = vmul.f32 1.442695, %v3620_v18 }
 0x8d5   :  { %v3628_v23 = vmul.f32 1.442695, %v3619_v19  ;;  %v3632_v24 = vmul.f32 1.442695, %v3621_v20 }
 0x8d6   :  { %10090 = vpow2.f32 %v3626_v21 }
 0x8d7   :  { %10092 = vpow2.f32 %v3630_v22 }
 0x8d8   :  { %10094 = vpow2.f32 %v3628_v23 }
 0x8d9   :  { %10096 = vpow2.f32 %v3632_v24 }
 0x8e0   :  { %v10091_v26 = vpop.eup %10090 }
 0x8e1   :  { %v10093_v27 = vpop.eup %10092  ;;  %v3642_v28 = vadd.f32 1.0, %v10091_v26 }
 0x8e2   :  { %v10095_v29 = vpop.eup %10094  ;;  %v3644_v30 = vadd.f32 1.0, %v10093_v27  ;;  %v7488_v27 = vld [vmem:[#allocation23] ss:$0 sm:$0xff] }
 0x8e3   :  { %v10097_v31 = vpop.eup %10096  ;;  %10098 = vrcp.f32 %v3642_v28  ;;  %v3643_v32 = vadd.f32 1.0, %v10095_v29 }
 0x8e4   :  { %10100 = vrcp.f32 %v3644_v30  ;;  %v3645_v33 = vadd.f32 1.0, %v10097_v31 }
 0x8e5   :  { %10102 = vrcp.f32 %v3643_v32 }
 0x8e6   :  { %10104 = vrcp.f32 %v3645_v33 }
 0x8ed   :  { %v10099_v38 = vpop.eup %10098 }
 0x8ee   :  { %v10101_v34 = vpop.eup %10100 }
 0x8ef   :  { %v10103_v35 = vpop.eup %10102 }
 0x8f0   :  { %v10105_v36 = vpop.eup %10104  ;;  %v3666_v37 = vcombine.low %v10099_v38, %v10103_v35 }
 0x8f1   :  { %v3667_v40 = vcombine.low %v10101_v34, %v10105_v36 }
 0x8f2   :  { %v3674_v41 = vrot.slane %v3666_v37, %v11160_v11 }
 0x8f3   :  { %v3681_v42 = vrot.slane %v3667_v40, %v11160_v11 }
 0x8f5   :  { %v3682_v43 = vcombine.low %v3674_v41, %v3681_v42 }
 0x8f7   :  { %3702 = vst [vmem:[%s12329_s10] sm:$0xff] %v3682_v43 }
 0x94f   :  { %v3471_v56 = vpop.f32.mrb[12].mxu1 }
 0x950   :  { %v9982_v10 = vadd.f32 %v3471_v56, %v3029_v51  ;;  %v3613_v54 = vpop.f32.mrb[8].mxu0  ;;  %v3473_v55 = vpop.f32.mrb[13].mxu1 }
 0x951   :  { %v9984_v57 = vadd.f32 %v3613_v54, %v3037_v39  ;;  %v9983_v58 = vadd.f32 %v3473_v55, %v3033_v53  ;;  %v3615_v61 = vpop.f32.mrb[9].mxu0  ;;  %v7494_v54 = vld [vmem:[%s12326_s17 + $0x20] sm:$0xff]  ;;  %v7495_v55 = vld [vmem:[%s12326_s17 + $0x28] sm:$0xff] }
 0x952   :  { %v3622_v59 = vsub.f32 0.0, %v9982_v10  ;;  %v9985_v60 = vadd.f32 %v3615_v61, %v3041_v25 }
 0x953   :  { %v3624_v62 = vsub.f32 0.0, %v9984_v57  ;;  %v3623_v63 = vsub.f32 0.0, %v9983_v58  ;;  %v9593_v58 = vpack.c.bf16 %v7495_v55, %v7494_v54  ;;  %v7518_v55 = vld [vmem:[%s12326_s17 + $0x40] sm:$0xff] }
 0x954   :  { %v3634_v0 = vmul.f32 1.442695, %v3622_v59  ;;  %v3625_v3 = vsub.f32 0.0, %v9985_v60  ;;  %v7496_v59 = vld [vmem:[%s12326_s17 + $0x30] sm:$0xff]  ;;  %v7497_v60 = vld [vmem:[%s12326_s17 + $0x38] sm:$0xff] }
 0x955   :  { %v3638_v1 = vmul.f32 1.442695, %v3624_v62  ;;  %v3636_v6 = vmul.f32 1.442695, %v3623_v63  ;;  %v9596_v62 = vpack.c.bf16 %v7497_v60, %v7496_v59  ;;  %v7500_v63 = vld [vmem:[%s12327_s2 + $0x20] sm:$0xff]  ;;  %v7521_v59 = vld [vmem:[%s12326_s17 + $0x58] sm:$0xff] }
 0x956   :  { %10106 = vpow2.f32 %v3634_v0  ;;  %v3640_v52 = vmul.f32 1.442695, %v3625_v3  ;;  %v7501_v0 = vld [vmem:[%s12327_s2 + $0x28] sm:$0xff] }
 0x957   :  { %10108 = vpow2.f32 %v3638_v1  ;;  %v3781_v7 = vpop.f32.mrb[14].mxu1  ;;  %v9599_v3 = vpack.c.bf16 %v7501_v0, %v7500_v63  ;;  %v7502_v1 = vld [vmem:[%s12327_s2 + $0x30] sm:$0xff]  ;;  %v7530_v0 = vld [vmem:[%s12328_s7 + $0x40] sm:$0xff] }
 0x958   :  { %10110 = vpow2.f32 %v3636_v6  ;;  %v8029_v15 = vpop.f32.mrb[15].mxu1  ;;  %v3782_v24 = vadd.f32 %v7484_v13, %v3781_v7  ;;  %v7503_v6 = vld [vmem:[%s12327_s2 + $0x38] sm:$0xff]  ;;  %v7506_v7 = vld [vmem:[%s12328_s7 + $0x20] sm:$0xff] }
 0x959   :  { %10112 = vpow2.f32 %v3640_v52  ;;  %v9602_v52 = vpack.c.bf16 %v7503_v6, %v7502_v1  ;;  %v7507_v15 = vld [vmem:[%s12328_s7 + $0x28] sm:$0xff] }
 0x95f   :  { %v3862_v9 = vpop.f32.mrb[16].mxu1 }
 0x960   :  { %v10107_v12 = vpop.eup %10106  ;;  %v3863_v14 = vadd.f32 %v7486_v8, %v3862_v9  ;;  %v8040_v17 = vpop.f32.mrb[17].mxu1  ;;  %v9605_v8 = vpack.c.bf16 %v7507_v15, %v7506_v7  ;;  %v7508_v9 = vld [vmem:[%s12328_s7 + $0x30] sm:$0xff]  ;;  %v7533_v15 = vld [vmem:[%s12328_s7 + $0x58] sm:$0xff] }
 0x961   :  { %v10109_v18 = vpop.eup %10108  ;;  %v3646_v19 = vadd.f32 1.0, %v10107_v12  ;;  %v7509_v12 = vld [vmem:[%s12328_s7 + $0x38] sm:$0xff]  ;;  %v7532_v7 = vld [vmem:[%s12328_s7 + $0x50] sm:$0xff] }
 0x962   :  { %v10111_v20 = vpop.eup %10110  ;;  %v3648_v21 = vadd.f32 1.0, %v10109_v18  ;;  %8053 = vmatpush3.xpose.msk.msra.mxu1 %vm3947_vm7, %v3863_v14  ;;  %v9608_v13 = vpack.c.bf16 %v7509_v12, %v7508_v9  ;;  %v9626_v9 = vpack.c.bf16 %v7533_v15, %v7532_v7 }
 0x963   :  { %v10113_v22 = vpop.eup %10112  ;;  %10114 = vrcp.f32 %v3646_v19  ;;  %v3647_v23 = vadd.f32 1.0, %v10111_v20  ;;  %8057 = vmatprep.subr.mxu1 %v10841_v16  ;;  %v7504_v20 = vld [vmem:[#allocation22 + $0x1] ss:$0 sm:$0xff] }
 0x964   :  { %10116 = vrcp.f32 %v3648_v21  ;;  %v3649_v26 = vadd.f32 1.0, %v10113_v22  ;;  %v7498_v22 = vld [vmem:[#allocation20 + $0x1] ss:$0 sm:$0xff] }
 0x965   :  { %10118 = vrcp.f32 %v3647_v23  ;;  %8055 = vmatmul.mubr.msk.f32.vlgmr.msra.gmra.mrb[20].mxu1 %vm3947_vm7, %v3782_v24 }
 0x966   :  { %10120 = vrcp.f32 %v3649_v26  ;;  %8059 = vmatprep.mubr.msk.f32.mxu1 %vm10843_vm6, %v10841_v16 }
 0x967   :  { %v3943_v28 = vpop.f32.mrb[18].mxu1 }
 0x968   :  { %v3944_v29 = vadd.f32 %v7488_v27, %v3943_v28  ;;  %v8051_v30 = vpop.f32.mrb[19].mxu1  ;;  %v7510_v27 = vld [vmem:[#allocation23 + $0x1] ss:$0 sm:$0xff] }
 0x96a   :  { %8058 = vmatpush3.msk.msra.mxu1 %vm4041_vm8, %v3944_v29 }
 0x96b   :  { %9592 = vmatprep.subr.bf16.mxu1 %v10842_v49 }
 0x96d   :  { %v10115_v31 = vpop.eup %10114 }
 0x96e   :  { %v10117_v32 = vpop.eup %10116 }
 0x96f   :  { %v10119_v33 = vpop.eup %10118 }
 0x970   :  { %v10121_v38 = vpop.eup %10120  ;;  %v3683_v34 = vcombine.low %v10115_v31, %v10119_v33 }
 0x971   :  { %v3684_v35 = vcombine.low %v10117_v32, %v10121_v38 }
 0x972   :  { %v3691_v36 = vrot.slane %v3683_v34, %v11160_v11 }
 0x973   :  { %v3698_v37 = vrot.slane %v3684_v35, %v11160_v11 }
 0x975   :  { %v3699_v40 = vcombine.low %v3691_v36, %v3698_v37 }
 0x977   :  { %3703 = vst [vmem:[%s12329_s10 + $0x8] sm:$0xff] %v3699_v40 }
 0xa38   :  { %v4020_v41 = vpop.f32.mrb[20].mxu1 }
 0xa39   :  { %v4024_v42 = vmul.f32 0.35355338, %v4020_v41  ;;  %v8056_v43 = vpop.f32.mrb[21].mxu1  ;;  %v4530_v41 = vld [vmem:[#allocation25 + $0x8] sm:$0xff] }
 0xa3a   :  { %8106 = vmatpush3.msra.mxu0 %v4530_v41  ;;  %v7541_v41 = vld [vmem:[%s12326_s17 + $0x60] sm:$0xff] }
 0xa3b   :  { %v4026_v51 = vsel %vm4025_vm9, %v4024_v42, -inf  ;;  %9610 = vmatprep.subr.bf16.mxu0 %v10842_v49 }
 0xa3c   :  { %4027 = vmax.xlane.f32.xlu0 %v4026_v51 }
 0xac9   :  { %v4028_v39 = vpop.xlane.xlu0 %4027 }
 0xaca   :  { %v4029_v53 = vsub.f32 %v4024_v42, %v4028_v39  ;;  %v4115_v39 = vld [vmem:[#allocation25] sm:$0xff] }
 0xacc   :  { %v4030_v25 = vmul.f32 1.442695, %v4029_v53  ;;  %v7524_v53 = vld [vmem:[%s12327_s2 + $0x40] sm:$0xff] }
 0xace   :  { %10122 = vpow2.f32 %v4030_v25  ;;  %v7525_v25 = vld [vmem:[%s12327_s2 + $0x48] sm:$0xff] }
 0xad8   :  { %v10123_v56 = vpop.eup %10122 }
 0xad9   :  { %v4032_v11 = vsel %vm4025_vm9, %v10123_v56, 0.0 }
 0xada   :  { %4033 = vadd.xlane.f32.xlu0 %v4032_v11  ;;  %v7526_v11 = vld [vmem:[%s12327_s2 + $0x50] sm:$0xff] }
 0xb67   :  { %v4034_v10 = vpop.xlane.xlu0 %4033 }
 0xb68   :  { %10124 = vrcp.f32 %v4034_v10  ;;  %v7527_v10 = vld [vmem:[%s12327_s2 + $0x58] sm:$0xff] }
 0xb69   :  { %v9620_v54 = vpack.c.bf16 %v7527_v10, %v7526_v11  ;;  %v7553_v11 = vld [vmem:[%s12328_s7 + $0x60] sm:$0xff]  ;;  %v7554_v10 = vld [vmem:[%s12328_s7 + $0x68] sm:$0xff] }
 0xb72   :  { %v10125_v57 = vpop.eup %10124 }
 0xb73   :  { %v4036_v61 = vmul.f32 %v10125_v57, %v10123_v56  ;;  %v9617_v56 = vpack.c.bf16 %v7525_v25, %v7524_v53  ;;  %v7519_v57 = vld [vmem:[%s12326_s17 + $0x48] sm:$0xff]  ;;  %v7543_v53 = vld [vmem:[%s12326_s17 + $0x70] sm:$0xff]  ;;  %v7544_v25 = vld [vmem:[%s12326_s17 + $0x78] sm:$0xff] }
 0xb75   :  { %8060 = vmatmul.mubr.msk.f32.vlgmr.msra.gmra.mrb[22].mxu1 %vm4037_vm10, %v4036_v61  ;;  %v7520_v61 = vld [vmem:[%s12326_s17 + $0x50] sm:$0xff] }
 0xb76   :  { %9594 = vmatpush3.bf16.msra.mxu1 %v9593_v58  ;;  %8070 = vmatprep.mubr.msk.f32.mxu1 %vm10843_vm6, %v10841_v16  ;;  %v9611_v58 = vpack.c.bf16 %v7519_v57, %v7518_v55  ;;  %v9614_v63 = vpack.c.bf16 %v7521_v59, %v7520_v61  ;;  %v7555_v55 = vld [vmem:[%s12328_s7 + $0x70] sm:$0xff]  ;;  %v7556_v57 = vld [vmem:[%s12328_s7 + $0x78] sm:$0xff]  ;;  %v7547_v61 = vld [vmem:[%s12327_s2 + $0x60] sm:$0xff] }
 0xb77   :  { %9595 = vmatprep.subr.bf16.mxu1 %v10842_v49  ;;  %v7548_v59 = vld [vmem:[%s12327_s2 + $0x68] sm:$0xff] }
 0xb7a   :  { %9597 = vmatpush3.bf16.msra.mxu1 %v9596_v62 }
 0xb7b   :  { %9598 = vmatprep.subr.bf16.mxu1 %v10842_v49 }
 0xb7d   :  { %8071 = vmatmul.mubr.msk.f32.vlgmr.msra.gmra.mrb[24].mxu1 %vm2117_vm1, %v11493_v45 }
 0xb7e   :  { %9600 = vmatpush3.bf16.msra.mxu1 %v9599_v3  ;;  %8081 = vmatprep.mubr.msk.f32.mxu1 %vm10843_vm6, %v10841_v16  ;;  %v7531_v3 = vld [vmem:[%s12328_s7 + $0x48] sm:$0xff] }
 0xb7f   :  { %9601 = vmatprep.subr.bf16.mxu1 %v10842_v49 }
 0xb82   :  { %9603 = vmatpush3.bf16.msra.mxu1 %v9602_v52  ;;  %v9623_v52 = vpack.c.bf16 %v7531_v3, %v7530_v0 }
 0xb83   :  { %9604 = vmatprep.subr.bf16.mxu1 %v10842_v49 }
 0xb85   :  { %8082 = vmatmul.mubr.msk.f32.vlgmr.msra.gmra.mrb[26].mxu1 %vm2117_vm1, %v11493_v45 }
 0xb86   :  { %9606 = vmatpush3.bf16.msra.mxu1 %v9605_v8  ;;  %8092 = vmatprep.mubr.msk.f32.mxu1 %vm10843_vm6, %v10841_v16  ;;  %v7528_v8 = vld [vmem:[#allocation22 + $0x2] ss:$0 sm:$0xff] }
 0xb87   :  { %9607 = vmatprep.subr.bf16.mxu1 %v10842_v49 }
 0xb8a   :  { %9609 = vmatpush3.bf16.msra.mxu1 %v9608_v13 }
 0xb8b   :  { %8095 = vmatprep.subr.mxu1 %v10841_v16 }
 0xb8d   :  { %8093 = vmatmul.mubr.msk.f32.vlgmr.msra.gmra.mrb[28].mxu1 %vm2117_vm1, %v11493_v45 }
 0xb8e   :  { %8097 = vmatprep.mubr.msk.f32.mxu1 %vm10843_vm6, %v10841_v16 }
 0xc48   :  { %v4111_v14 = vpop.f32.mrb[22].mxu1 }
 0xc49   :  { %v8061_v17 = vpop.f32.mrb[23].mxu1 }
 0xc50   :  { %v4195_v18 = vpop.f32.mrb[24].mxu1 }
 0xc51   :  { %v8072_v19 = vpop.f32.mrb[25].mxu1  ;;  %v4196_v26 = vadd.f32 %v7498_v22, %v4195_v18 }
 0xc58   :  { %v4278_v21 = vpop.f32.mrb[26].mxu1 }
 0xc59   :  { %v4279_v23 = vadd.f32 %v7504_v20, %v4278_v21  ;;  %v8083_v24 = vpop.f32.mrb[27].mxu1  ;;  %v7522_v20 = vld [vmem:[#allocation20 + $0x2] ss:$0 sm:$0xff] }
 0xc5a   :  { %v7534_v24 = vld [vmem:[#allocation23 + $0x2] ss:$0 sm:$0xff] }
 0xc5b   :  { %8096 = vmatpush3.xpose.msk.msra.mxu1 %vm3947_vm7, %v4279_v23 }
 0xc5c   :  { %8100 = vmatprep.subr.mxu1 %v10841_v16 }
 0xc5e   :  { %8098 = vmatmul.mubr.msk.f32.vlgmr.msra.gmra.mrb[30].mxu1 %vm3947_vm7, %v4196_v26 }
 0xc5f   :  { %8102 = vmatprep.mubr.msk.f32.mxu1 %vm10843_vm6, %v10841_v16 }
 0xc60   :  { %v4361_v28 = vpop.f32.mrb[28].mxu1 }
 0xc61   :  { %v4362_v29 = vadd.f32 %v7510_v27, %v4361_v28  ;;  %v8094_v30 = vpop.f32.mrb[29].mxu1 }
 0xc63   :  { %8101 = vmatpush3.msk.msra.mxu1 %vm4041_vm8, %v4362_v29 }
 0xc64   :  { %8110 = vmatprep.subr.mxu1 %v10841_v16 }
 0xd31   :  { %v4437_v31 = vpop.f32.mrb[30].mxu1 }
 0xd32   :  { %v4441_v32 = vmul.f32 0.35355338, %v4437_v31  ;;  %v8099_v33 = vpop.f32.mrb[31].mxu1 }
 0xd34   :  { %v4442_v38 = vsel %vm4025_vm9, %v4441_v32, -inf }
 0xd35   :  { %4443 = vmax.xlane.f32.xlu1 %v4442_v38 }
 0xdc2   :  { %v4444_v34 = vpop.xlane.xlu1 %4443 }
 0xdc3   :  { %v4445_v35 = vsub.f32 %v4441_v32, %v4444_v34 }
 0xdc5   :  { %v4446_v36 = vmul.f32 1.442695, %v4445_v35 }
 0xdc7   :  { %10126 = vpow2.f32 %v4446_v36 }
 0xdd1   :  { %v10127_v37 = vpop.eup %10126 }
 0xdd2   :  { %v4448_v40 = vsel %vm4025_vm9, %v10127_v37, 0.0 }
 0xdd3   :  { %4449 = vadd.xlane.f32.xlu1 %v4448_v40 }
 0xe60   :  { %v4450_v42 = vpop.xlane.xlu1 %4449 }
 0xe61   :  { %10128 = vrcp.f32 %v4450_v42  ;;  %v7542_v42 = vld [vmem:[%s12326_s17 + $0x68] sm:$0xff] }
 0xe6b   :  { %v10129_v43 = vpop.eup %10128 }
 0xe6c   :  { %v4452_v51 = vmul.f32 %v10129_v43, %v10127_v37  ;;  %v5091_v37 = vld [vmem:[#allocation25 + $0x10] sm:$0xff] }
 0xe6e   :  { %8103 = vmatmul.mubr.msk.f32.vlgmr.msra.gmra.mrb[32].mxu1 %vm4037_vm10, %v4452_v51  ;;  %v9629_v51 = vpack.c.bf16 %v7542_v42, %v7541_v41  ;;  %v7564_v41 = vld [vmem:[#allocation26] ss:$0 sm:$0xff] }
 0xe6f   :  { %8111 = vmatpush3.msra.mxu1 %v4115_v39  ;;  %8112 = vmatprep.mubr.msk.f32.mxu1 %vm10843_vm6, %v10841_v16 }
 0xe70   :  { %9616 = vmatprep.subr.bf16.mxu1 %v10842_v49 }
 0xe72   :  { %8113 = vmatmul.mubr.msk.f32.vlgmr.msra.gmra.mrb[34].mxu1 %vm3947_vm7, %v4111_v14 }
 0xe73   :  { %9618 = vmatpush3.bf16.msra.mxu1 %v9617_v56  ;;  %8134 = vmatprep.mubr.msk.f32.mxu1 %vm10843_vm6, %v10841_v16  ;;  %v9632_v56 = vpack.c.bf16 %v7544_v25, %v7543_v53 }
 0xe74   :  { %9619 = vmatprep.subr.bf16.mxu1 %v10842_v49 }
 0xe77   :  { %9621 = vmatpush3.bf16.msra.mxu1 %v9620_v54  ;;  %v9641_v54 = vpack.c.bf16 %v7554_v10, %v7553_v11 }
 0xe78   :  { %8148 = vmatprep.subr.mxu1 %v10841_v16 }
 0xe7a   :  { %8135 = vmatmul.mubr.msk.f32.vlgmr.msra.gmra.mrb[36].mxu1 %vm2117_vm1, %v11493_v45 }
 0xe7b   :  { %8150 = vmatprep.mubr.msk.f32.mxu1 %vm10843_vm6, %v10841_v16 }
 0xf41   :  { %v4525_v60 = vpop.f32.mrb[32].mxu1 }
 0xf42   :  { %v8104_v62 = vpop.f32.mrb[33].mxu1  ;;  %8108 = vmatmul.mubr.msk.f32.vlgmr.msra.gmra.mrb[10].mxu0 %vm3947_vm7, %v4525_v60  ;;  %v9635_v60 = vpack.c.bf16 %v7548_v59, %v7547_v61  ;;  %v5694_v59 = vld [vmem:[%s12330_s13] sm:$0xff] }
 0xf43   :  { %9612 = vmatpush3.bf16.msra.mxu0 %v9611_v58  ;;  %8123 = vmatprep.mubr.msk.f32.mxu0 %vm10843_vm6, %v10841_v16  ;;  %v9644_v58 = vpack.c.bf16 %v7556_v57, %v7555_v55  ;;  %v7549_v62 = vld [vmem:[%s12327_s2 + $0x70] sm:$0xff]  ;;  %v5695_v55 = vld [vmem:[%s12330_s13 + $0x8] sm:$0xff] }
 0xf44   :  { %9613 = vmatprep.subr.bf16.mxu0 %v10842_v49  ;;  %v5711_v57 = vld [vmem:[%s12330_s13 + $0x88] sm:$0xff] }
 0xf45   :  { %v4673_v1 = vpop.f32.mrb[34].mxu1  ;;  %v9646_v61 = vpack.c.bf16 %v5711_v57, %v5695_v55  ;;  %v5748_v55 = vld [vmem:[%s12330_s13 + $0x1b0] sm:$0xff]  ;;  %v5703_v57 = vld [vmem:[%s12330_s13 + $0x48] sm:$0xff] }
 0xf46   :  { %v8114_v6 = vpop.f32.mrb[35].mxu1 }
 0xf47   :  { %9615 = vmatpush3.bf16.msra.mxu0 %v9614_v63  ;;  %v7550_v63 = vld [vmem:[%s12327_s2 + $0x78] sm:$0xff] }
 0xf48   :  { %9622 = vmatprep.subr.bf16.mxu0 %v10842_v49 }
 0xf4a   :  { %8124 = vmatmul.mubr.msk.f32.vlgmr.msra.gmra.mrb[12].mxu0 %vm2117_vm1, %v11493_v45 }
 0xf4b   :  { %9624 = vmatpush3.bf16.msra.mxu0 %v9623_v52  ;;  %8145 = vmatprep.mubr.msk.f32.mxu0 %vm10843_vm6, %v10841_v16 }
 0xf4c   :  { %9625 = vmatprep.subr.bf16.mxu0 %v10842_v49 }
 0xf4d   :  { %v4839_v12 = vpop.f32.mrb[36].mxu1 }
 0xf4e   :  { %v4840_v13 = vadd.f32 %v7528_v8, %v4839_v12  ;;  %v8136_v14 = vpop.f32.mrb[37].mxu1 }
 0xf4f   :  { %9627 = vmatpush3.bf16.msra.mxu0 %v9626_v9 }
 0xf50   :  { %8149 = vmatpush3.xpose.msk.msra.mxu1 %vm3947_vm7, %v4840_v13  ;;  %8158 = vmatprep.subr.mxu0 %v10841_v16  ;;  %v7551_v13 = vld [vmem:[#allocation22 + $0x3] ss:$0 sm:$0xff] }
 0xf51   :  { %8153 = vmatprep.subr.mxu1 %v10841_v16 }
 0xf52   :  { %8146 = vmatmul.mubr.msk.f32.vlgmr.msra.gmra.mrb[14].mxu0 %vm2117_vm1, %v11493_v45 }
 0xf53   :  { %8160 = vmatprep.mubr.msk.f32.mxu0 %vm10843_vm6, %v10841_v16  ;;  %8159 = vmatpush3.msra.mxu0 %v5091_v37 }
 0xf54   :  { %9634 = vmatprep.subr.bf16.mxu0 %v10842_v49 }
0x1015   :  { %v4600_v17 = vpop.f32.mrb[10].mxu0 }
0x1016   :  { %v11768_v18 = vadd.f32 %v4673_v1, %v4600_v17  ;;  %v8109_v19 = vpop.f32.mrb[11].mxu0  ;;  %v9638_v1 = vpack.c.bf16 %v7550_v63, %v7549_v62  ;;  %v7545_v17 = vld [vmem:[#allocation20 + $0x3] ss:$0 sm:$0xff] }
0x101d   :  { %v4756_v21 = vpop.f32.mrb[12].mxu0 }
0x101e   :  { %v4757_v22 = vadd.f32 %v7522_v20, %v4756_v21  ;;  %v8125_v23 = vpop.f32.mrb[13].mxu0  ;;  %v7557_v21 = vld [vmem:[#allocation23 + $0x3] ss:$0 sm:$0xff] }
0x1020   :  { %8151 = vmatmul.mubr.msk.f32.vlgmr.msra.gmra.mrb[38].mxu1 %vm3947_vm7, %v4757_v22 }
0x1021   :  { %8155 = vmatprep.mubr.msk.f32.mxu1 %vm10843_vm6, %v10841_v16 }
0x1025   :  { %v4922_v26 = vpop.f32.mrb[14].mxu0 }
0x1026   :  { %v4923_v27 = vadd.f32 %v7534_v24, %v4922_v26  ;;  %v8147_v28 = vpop.f32.mrb[15].mxu0 }
0x1028   :  { %8154 = vmatpush3.msk.msra.mxu1 %vm4041_vm8, %v4923_v27 }
0x1029   :  { %9628 = vmatprep.subr.bf16.mxu1 %v10842_v49 }
0x10f3   :  { %v4998_v29 = vpop.f32.mrb[38].mxu1 }
0x10f4   :  { %v5002_v30 = vmul.f32 0.35355338, %v4998_v29  ;;  %v8152_v31 = vpop.f32.mrb[39].mxu1 }
0x10f6   :  { %v5003_v32 = vsel %vm4025_vm9, %v5002_v30, -inf }
0x10f7   :  { %5004 = vmax.xlane.f32.xlu0 %v5003_v32 }
0x1184   :  { %v5005_v33 = vpop.xlane.xlu0 %5004 }
0x1185   :  { %v5006_v38 = vsub.f32 %v5002_v30, %v5005_v33  ;;  %v5580_v33 = vld [vmem:[#allocation25 + $0x18] sm:$0xff] }
0x1187   :  { %v5007_v34 = vmul.f32 1.442695, %v5006_v38 }
0x1189   :  { %10130 = vpow2.f32 %v5007_v34 }
0x1193   :  { %v10131_v35 = vpop.eup %10130 }
0x1194   :  { %v5009_v36 = vsel %vm4025_vm9, %v10131_v35, 0.0 }
0x1195   :  { %5010 = vadd.xlane.f32.xlu1 %v5009_v36 }
0x1222   :  { %v5011_v40 = vpop.xlane.xlu1 %5010 }
0x1223   :  { %10132 = vrcp.f32 %v5011_v40 }
0x122d   :  { %v10133_v43 = vpop.eup %10132 }
0x122e   :  { %v5013_v39 = vmul.f32 %v10133_v43, %v10131_v35 }
0x1230   :  { %8156 = vmatmul.mubr.msk.f32.vlgmr.msra.gmra.mrb[40].mxu1 %vm4037_vm10, %v5013_v39 }
0x1231   :  { %9630 = vmatpush3.bf16.msra.mxu1 %v9629_v51  ;;  %8171 = vmatprep.mubr.msk.f32.mxu1 %vm10843_vm6, %v10841_v16 }
0x1232   :  { %9631 = vmatprep.subr.bf16.mxu1 %v10842_v49 }
0x1235   :  { %9633 = vmatpush3.bf16.msra.mxu1 %v9632_v56 }
0x1236   :  { %9640 = vmatprep.subr.bf16.mxu1 %v10842_v49 }
0x1238   :  { %8172 = vmatmul.mubr.msk.f32.vlgmr.msra.gmra.mrb[42].mxu1 %vm2117_vm1, %v11493_v45 }
0x1239   :  { %9642 = vmatpush3.bf16.msra.mxu1 %v9641_v54  ;;  %8193 = vmatprep.mubr.msk.f32.mxu1 %vm10843_vm6, %v10841_v16 }
0x123a   :  { %9643 = vmatprep.subr.bf16.mxu1 %v10842_v49 }
0x123d   :  { %9645 = vmatpush3.bf16.msra.mxu1 %v9644_v58  ;;  %v5697_v58 = vld [vmem:[%s12330_s13 + $0x18] sm:$0xff] }
0x123e   :  { %8206 = vmatprep.subr.mxu1 %v10841_v16 }
0x1240   :  { %8194 = vmatmul.mubr.msk.f32.vlgmr.msra.gmra.mrb[44].mxu1 %vm2117_vm1, %v11493_v45 }
0x1241   :  { %8208 = vmatprep.mubr.msk.f32.mxu1 %vm10843_vm6, %v10841_v16  ;;  %8207 = vmatpush3.msra.mxu1 %v5580_v33  ;;  %v5698_v33 = vld [vmem:[%s12330_s13 + $0x20] sm:$0xff] }
0x1303   :  { %v5086_v0 = vpop.f32.mrb[40].mxu1 }
0x1304   :  { %v8157_v3 = vpop.f32.mrb[41].mxu1  ;;  %8161 = vmatmul.mubr.msk.f32.vlgmr.msra.gmra.mrb[16].mxu0 %vm3947_vm7, %v5086_v0  ;;  %v5696_v0 = vld [vmem:[%s12330_s13 + $0x10] sm:$0xff] }
0x1305   :  { %9636 = vmatpush3.bf16.msra.mxu0 %v9635_v60  ;;  %8182 = vmatprep.mubr.msk.f32.mxu0 %vm10843_vm6, %v10841_v16  ;;  %v5710_v60 = vld [vmem:[%s12330_s13 + $0x80] sm:$0xff]  ;;  %v5712_v3 = vld [vmem:[%s12330_s13 + $0x90] sm:$0xff] }
0x1306   :  { %9637 = vmatprep.subr.bf16.mxu0 %v10842_v49  ;;  %v9648_v63 = vpack.c.bf16 %v5710_v60, %v5694_v59 }
0x1309   :  { %9639 = vmatpush3.bf16.msra.mxu0 %v9638_v1  ;;  %v9656_v1 = vpack.c.bf16 %v5712_v3, %v5696_v0 }
0x130a   :  { %8196 = vmatprep.subr.mxu0 %v10841_v16 }
0x130b   :  { %v5245_v6 = vpop.f32.mrb[42].mxu1 }
0x130c   :  { %v8173_v52 = vpop.f32.mrb[43].mxu1  ;;  %8183 = vmatmul.mubr.msk.f32.vlgmr.msra.gmra.mrb[18].mxu0 %vm2117_vm1, %v11493_v45  ;;  %v5246_v22 = vadd.f32 %v7545_v17, %v5245_v6  ;;  %v5727_v6 = vld [vmem:[%s12330_s13 + $0x108] sm:$0xff]  ;;  %v5728_v17 = vld [vmem:[%s12330_s13 + $0x110] sm:$0xff] }
0x130d   :  { %8198 = vmatprep.mubr.msk.f32.mxu0 %vm10843_vm6, %v10841_v16  ;;  %v5743_v52 = vld [vmem:[%s12330_s13 + $0x188] sm:$0xff] }
0x1313   :  { %v5411_v7 = vpop.f32.mrb[44].mxu1 }
0x1314   :  { %v8195_v15 = vpop.f32.mrb[45].mxu1  ;;  %v5412_v23 = vadd.f32 %v7557_v21, %v5411_v7  ;;  %v5729_v7 = vld [vmem:[%s12330_s13 + $0x118] sm:$0xff]  ;;  %v5699_v21 = vld [vmem:[%s12330_s13 + $0x28] sm:$0xff] }
0x1315   :  { %v9650_v15 = vpack.c.bf16 %v5743_v52, %v5727_v6  ;;  %v5720_v6 = vld [vmem:[%s12330_s13 + $0xd0] sm:$0xff]  ;;  %v5735_v52 = vld [vmem:[%s12330_s13 + $0x148] sm:$0xff] }
0x13d7   :  { %v5161_v8 = vpop.f32.mrb[16].mxu0 }
0x13d8   :  { %v5165_v9 = vadd.f32 %v5161_v8, %v11768_v18  ;;  %v8162_v12 = vpop.f32.mrb[17].mxu0  ;;  %v5745_v8 = vld [vmem:[%s12330_s13 + $0x198] sm:$0xff] }
0x13d9   :  { %v5742_v12 = vld [vmem:[%s12330_s13 + $0x180] sm:$0xff] }
0x13df   :  { %v5328_v14 = vpop.f32.mrb[18].mxu0 }
0x13e0   :  { %v5329_v19 = vadd.f32 %v7551_v13, %v5328_v14  ;;  %v8184_v20 = vpop.f32.mrb[19].mxu0  ;;  %v9658_v13 = vpack.c.bf16 %v5745_v8, %v5729_v7  ;;  %v5751_v7 = vld [vmem:[%s12330_s13 + $0x1c8] sm:$0xff]  ;;  %v5753_v8 = vld [vmem:[%s12330_s13 + $0x1d8] sm:$0xff] }
0x13e2   :  { %8197 = vmatpush3.xpose.msk.msra.mxu0 %vm3947_vm7, %v5329_v19  ;;  %v5744_v19 = vld [vmem:[%s12330_s13 + $0x190] sm:$0xff] }
0x13e3   :  { %8201 = vmatprep.subr.mxu0 %v10841_v16  ;;  %v9660_v20 = vpack.c.bf16 %v5744_v19, %v5728_v17  ;;  %v9682_v17 = vpack.c.bf16 %v5751_v7, %v5735_v52  ;;  %v6431_v7 = vld [vmem:[%s12331_s3 + $0x10] sm:$0xff] }
0x13e5   :  { %8199 = vmatmul.mubr.msk.f32.vlgmr.msra.gmra.mrb[20].mxu0 %vm3947_vm7, %v5246_v22  ;;  %v5715_v22 = vld [vmem:[%s12330_s13 + $0xa8] sm:$0xff] }
0x13e6   :  { %8202 = vmatpush3.msk.msra.mxu0 %vm4041_vm8, %v5412_v23  ;;  %8203 = vmatprep.mubr.msk.f32.mxu0 %vm10843_vm6, %v10841_v16  ;;  %v5701_v23 = vld [vmem:[%s12330_s13 + $0x38] sm:$0xff] }
0x13e7   :  { %9647 = vmatprep.subr.bf16.mxu0 %v9646_v61  ;;  %v5705_v61 = vld [vmem:[%s12330_s13 + $0x58] sm:$0xff] }
0x14b8   :  { %v5487_v18 = vpop.f32.mrb[20].mxu0 }
0x14b9   :  { %v5491_v24 = vmul.f32 0.35355338, %v5487_v18  ;;  %v8200_v26 = vpop.f32.mrb[21].mxu0  ;;  %v9662_v18 = vpack.c.bf16 %v5715_v22, %v5699_v21  ;;  %v5752_v21 = vld [vmem:[%s12330_s13 + $0x1d0] sm:$0xff]  ;;  %v5707_v22 = vld [vmem:[%s12330_s13 + $0x68] sm:$0xff] }
0x14bb   :  { %v5492_v27 = vsel %vm4025_vm9, %v5491_v24, -inf }
0x14bc   :  { %5493 = vmax.xlane.f32.xlu0 %v5492_v27 }
0x1549   :  { %v5494_v28 = vpop.xlane.xlu0 %5493 }
0x154a   :  { %v5495_v29 = vsub.f32 %v5491_v24, %v5494_v28  ;;  %v5717_v24 = vld [vmem:[%s12330_s13 + $0xb8] sm:$0xff] }
0x154b   :  { %v9670_v26 = vpack.c.bf16 %v5717_v24, %v5701_v23  ;;  %v5723_v23 = vld [vmem:[%s12330_s13 + $0xe8] sm:$0xff]  ;;  %v5725_v24 = vld [vmem:[%s12330_s13 + $0xf8] sm:$0xff] }
0x154c   :  { %v5496_v30 = vmul.f32 1.442695, %v5495_v29 }
0x154e   :  { %10134 = vpow2.f32 %v5496_v30  ;;  %v7565_v30 = vld [vmem:[#allocation28] ss:$0 sm:$0xff] }
0x1558   :  { %v10135_v31 = vpop.eup %10134 }
0x1559   :  { %v5498_v32 = vsel %vm4025_vm9, %v10135_v31, 0.0 }
0x155a   :  { %5499 = vadd.xlane.f32.xlu1 %v5498_v32  ;;  %v7566_v32 = vld [vmem:[#allocation29] ss:$0 sm:$0xff] }
0x15e7   :  { %v5500_v38 = vpop.xlane.xlu1 %5499 }
0x15e8   :  { %10136 = vrcp.f32 %v5500_v38  ;;  %v5714_v38 = vld [vmem:[%s12330_s13 + $0xa0] sm:$0xff] }
0x15f2   :  { %v10137_v34 = vpop.eup %10136 }
0x15f3   :  { %v5502_v35 = vmul.f32 %v10137_v34, %v10135_v31 }
0x15f5   :  { %8204 = vmatmul.mubr.msk.f32.vlgmr.msra.gmra.mrb[22].mxu0 %vm4037_vm10, %v5502_v35  ;;  %v5700_v35 = vld [vmem:[%s12330_s13 + $0x30] sm:$0xff] }
0x15f6   :  { %5909 = vmatprep.mubr.f32.mxu0 %v10841_v16  ;;  %9649 = vmatpush1.bf16.msra.mxu0 %v9648_v63  ;;  %v5718_v63 = vld [vmem:[%s12330_s13 + $0xc0] sm:$0xff] }
0x15f7   :  { %9651 = vmatprep.subr.bf16.mxu0 %v9650_v15  ;;  %v5737_v15 = vld [vmem:[%s12330_s13 + $0x158] sm:$0xff] }
0x15f8   :  { %v9690_v19 = vpack.c.bf16 %v5753_v8, %v5737_v15  ;;  %v6432_v15 = vld [vmem:[%s12331_s3 + $0x18] sm:$0xff] }
0x16c8   :  { %v5575_v36 = vpop.f32.mrb[22].mxu0 }
0x16c9   :  { %v8205_v37 = vpop.f32.mrb[23].mxu0  ;;  %8209 = vmatmul.mubr.msk.f32.vlgmr.msra.gmra.mrb[46].mxu1 %vm3947_vm7, %v5575_v36  ;;  %v5716_v36 = vld [vmem:[%s12330_s13 + $0xb0] sm:$0xff] }
0x16ca   :  { %5980 = vmatprep.mubr.f32.mxu1 %v10841_v16  ;;  %v5731_v37 = vld [vmem:[%s12330_s13 + $0x128] sm:$0xff] }
0x179c   :  { %v5650_v40 = vpop.f32.mrb[46].mxu1 }
0x179d   :  { %v5654_v42 = vadd.f32 %v5650_v40, %v5165_v9  ;;  %v8210_v43 = vpop.f32.mrb[47].mxu1  ;;  %v5726_v9 = vld [vmem:[%s12330_s13 + $0x100] sm:$0xff]  ;;  %v5747_v40 = vld [vmem:[%s12330_s13 + $0x1a8] sm:$0xff] }
0x179e   :  { %v9652_v14 = vpack.c.bf16 %v5742_v12, %v5726_v9 }
0x179f   :  { %v5662_v51 = vadd.f32 %v7564_v41, %v5654_v42  ;;  %v5733_v41 = vld [vmem:[%s12330_s13 + $0x138] sm:$0xff] }
0x17a0   :  { %9653 = vmatpush1.bf16.msra.mxu0 %v9652_v14  ;;  %v5749_v42 = vld [vmem:[%s12330_s13 + $0x1b8] sm:$0xff]  ;;  %v5750_v14 = vld [vmem:[%s12330_s13 + $0x1c0] sm:$0xff] }
0x17a1   :  { %v5663_v39 = vadd.f32 %v5662_v51, %v11493_v45  ;;  %v5713_v45 = vld [vmem:[%s12330_s13 + $0x98] sm:$0xff]  ;;  %9663 = vmatprep.subr.bf16.mxu0 %v9662_v18  ;;  %v9664_v51 = vpack.c.bf16 %v5714_v38, %v5698_v33  ;;  %v5724_v33 = vld [vmem:[%s12330_s13 + $0xf0] sm:$0xff]  ;;  %v5739_v38 = vld [vmem:[%s12330_s13 + $0x168] sm:$0xff] }
0x17a2   :  { %v9654_v62 = vpack.c.bf16 %v5713_v45, %v5697_v58  ;;  %v5719_v58 = vld [vmem:[%s12330_s13 + $0xc8] sm:$0xff]  ;;  %v5721_v45 = vld [vmem:[%s12330_s13 + $0xd8] sm:$0xff] }
0x17a3   :  { %v5666_v53 = vsel %vm2093_vm0, %v5663_v39, 0.0  ;;  %v9678_v0 = vpack.c.bf16 %v5719_v58, %v5703_v57  ;;  %v9686_v3 = vpack.c.bf16 %v5721_v45, %v5705_v61  ;;  %v5709_v18 = vld [vmem:[%s12330_s13 + $0x78] sm:$0xff]  ;;  %v6429_v58 = vld [vmem:[%s12331_s3] sm:$0xff]  ;;  %v6430_v61 = vld [vmem:[%s12331_s3 + $0x8] sm:$0xff] }
0x17a4   :  { %5667 = vadd.xlane.f32.xlu0 %v5666_v53  ;;  %9655 = vmatprep.subr.bf16.mxu1 %v9654_v62  ;;  %v5730_v53 = vld [vmem:[%s12330_s13 + $0x120] sm:$0xff] }
0x17a5   :  { %9657 = vmatpush1.bf16.msra.mxu1 %v9656_v1  ;;  %v5702_v62 = vld [vmem:[%s12330_s13 + $0x40] sm:$0xff]  ;;  %v5704_v1 = vld [vmem:[%s12330_s13 + $0x50] sm:$0xff] }
0x17a6   :  { %9659 = vmatprep.subr.bf16.mxu1 %v9658_v13  ;;  %v9680_v9 = vpack.c.bf16 %v5718_v63, %v5702_v62  ;;  %v9688_v12 = vpack.c.bf16 %v5720_v6, %v5704_v1  ;;  %v5734_v13 = vld [vmem:[%s12330_s13 + $0x140] sm:$0xff]  ;;  %v6462_v62 = vld [vmem:[%s12331_s3 + $0x108] sm:$0xff]  ;;  %v6447_v63 = vld [vmem:[%s12331_s3 + $0x90] sm:$0xff]  ;;  %v9712_v6 = vpack.c.bf16 %v6430_v61, %v6429_v58 }
0x17a7   :  { %v6480_v1 = vld [vmem:[%s12331_s3 + $0x198] sm:$0xff]  ;;  %v6470_v58 = vld [vmem:[%s12331_s3 + $0x148] sm:$0xff]  ;;  %v6455_v61 = vld [vmem:[%s12331_s3 + $0xd0] sm:$0xff] }
0x17a9   :  { %9661 = vmatpush1.bf16.msra.mxu1 %v9660_v20  ;;  %v5736_v20 = vld [vmem:[%s12330_s13 + $0x150] sm:$0xff] }
0x17aa   :  { %9671 = vmatprep.subr.bf16.mxu1 %v9670_v26  ;;  %v9684_v26 = vpack.c.bf16 %v5750_v14, %v5734_v13  ;;  %v6464_v13 = vld [vmem:[%s12331_s3 + $0x118] sm:$0xff]  ;;  %v6449_v14 = vld [vmem:[%s12331_s3 + $0xa0] sm:$0xff] }
0x1831   :  { %v5668_v25 = vpop.xlane.xlu0 %5667 }
0x1832   :  { %v5670_v56 = vmul.f32 0.03125, %v5668_v25  ;;  %v5746_v25 = vld [vmem:[%s12330_s13 + $0x1a0] sm:$0xff] }
0x1833   :  { %v9668_v59 = vpack.c.bf16 %v5746_v25, %v5730_v53  ;;  %v5756_v53 = vld [vmem:[%s12330_s13 + $0x1f0] sm:$0xff]  ;;  %v6445_v25 = vld [vmem:[%s12331_s3 + $0x80] sm:$0xff] }
0x1834   :  { %v5671_v11 = vsub.f32 %v5663_v39, %v5670_v56  ;;  %v9672_v39 = vpack.c.bf16 %v5716_v36, %v5700_v35  ;;  %v5741_v35 = vld [vmem:[%s12330_s13 + $0x178] sm:$0xff] }
0x1835   :  { %v5757_v36 = vld [vmem:[%s12330_s13 + $0x1f8] sm:$0xff] }
0x1836   :  { %v5672_v10 = vmul.f32 %v5671_v11, %v5671_v11 }
0x1838   :  { %v5673_v54 = vsel %vm2093_vm0, %v5672_v10, 0.0  ;;  %v9674_v10 = vpack.c.bf16 %v5749_v42, %v5733_v41  ;;  %v5738_v41 = vld [vmem:[%s12330_s13 + $0x160] sm:$0xff] }
0x1839   :  { %5674 = vadd.xlane.f32.xlu1 %v5673_v54  ;;  %v5732_v54 = vld [vmem:[%s12330_s13 + $0x130] sm:$0xff]  ;;  %v5754_v42 = vld [vmem:[%s12330_s13 + $0x1e0] sm:$0xff] }
0x183a   :  { %v9676_v60 = vpack.c.bf16 %v5748_v55, %v5732_v54  ;;  %v6478_v54 = vld [vmem:[%s12331_s3 + $0x188] sm:$0xff]  ;;  %v9700_v55 = vpack.c.bf16 %v5754_v42, %v5738_v41  ;;  %v6468_v41 = vld [vmem:[%s12331_s3 + $0x138] sm:$0xff]  ;;  %v6453_v42 = vld [vmem:[%s12331_s3 + $0xc0] sm:$0xff] }
0x18c6   :  { %v5675_v27 = vpop.xlane.xlu1 %5674 }
0x18c7   :  { %v5676_v28 = vmul.f32 0.03125, %v5675_v27  ;;  %v9692_v27 = vpack.c.bf16 %v5752_v21, %v5736_v20  ;;  %v6482_v20 = vld [vmem:[%s12331_s3 + $0x1a8] sm:$0xff]  ;;  %v9716_v21 = vpack.c.bf16 %v6432_v15, %v6431_v7  ;;  %v6472_v7 = vld [vmem:[%s12331_s3 + $0x158] sm:$0xff]  ;;  %v6457_v15 = vld [vmem:[%s12331_s3 + $0xe0] sm:$0xff] }
0x18c9   :  { %v5677_v29 = vadd.f32 1e-05, %v5676_v28  ;;  %v5706_v28 = vld [vmem:[%s12330_s13 + $0x60] sm:$0xff] }
0x18cb   :  { %10138 = vrsqrt.f32 %v5677_v29  ;;  %v5722_v29 = vld [vmem:[%s12330_s13 + $0xe0] sm:$0xff] }
0x18d5   :  { %v10139_v31 = vpop.eup %10138 }
0x18d6   :  { %v5679_v34 = vmul.f32 %v10139_v31, %v5671_v11  ;;  %v9666_v11 = vpack.c.bf16 %v5747_v40, %v5731_v37  ;;  %v9702_v31 = vpack.c.bf16 %v5725_v24, %v5709_v18  ;;  %v9696_v37 = vpack.c.bf16 %v5722_v29, %v5706_v28  ;;  %v6434_v18 = vld [vmem:[%s12331_s3 + $0x28] sm:$0xff]  ;;  %v6451_v29 = vld [vmem:[%s12331_s3 + $0xb0] sm:$0xff] }
0x18d7   :  { %v6466_v28 = vld [vmem:[%s12331_s3 + $0x128] sm:$0xff] }
0x18d8   :  { %v5686_v43 = vmul.f32 %v7565_v30, %v5679_v34  ;;  %v9694_v30 = vpack.c.bf16 %v5723_v23, %v5707_v22  ;;  %v5755_v34 = vld [vmem:[%s12330_s13 + $0x1e8] sm:$0xff]  ;;  %v6433_v23 = vld [vmem:[%s12331_s3 + $0x20] sm:$0xff] }
0x18da   :  { %v11860_v56 = vadd.f32 %v7566_v32, %v5686_v43  ;;  %v5708_v32 = vld [vmem:[%s12330_s13 + $0x70] sm:$0xff]  ;;  %v9698_v43 = vpack.c.bf16 %v5755_v34, %v5739_v38 }
0x18db   :  { %v9704_v40 = vpack.c.bf16 %v5724_v33, %v5708_v32  ;;  %v6484_v32 = vld [vmem:[%s12331_s3 + $0x1b8] sm:$0xff]  ;;  %v9720_v33 = vpack.c.bf16 %v6434_v18, %v6433_v23  ;;  %v6435_v34 = vld [vmem:[%s12331_s3 + $0x30] sm:$0xff]  ;;  %v6474_v23 = vld [vmem:[%s12331_s3 + $0x168] sm:$0xff] }
0x18dc   :  { %7567 = vmatmul.mubr.msk.f32.vlgmr.msra.gmra.mrb[24].mxu0 %vm2117_vm1, %v11860_v56  ;;  %7568 = vmatmul.mubr.msk.f32.vlgmr.msra.gmra.mrb[48].mxu1 %vm2117_vm1, %v11860_v56 }
0x18dd   :  { %9665 = vmatpush1.bf16.msra.mxu0 %v9664_v51  ;;  %9673 = vmatpush1.bf16.msra.mxu1 %v9672_v39  ;;  %v9706_v51 = vpack.c.bf16 %v5757_v36, %v5741_v35  ;;  %v5740_v39 = vld [vmem:[%s12330_s13 + $0x170] sm:$0xff]  ;;  %v6436_v35 = vld [vmem:[%s12331_s3 + $0x38] sm:$0xff] }
0x18de   :  { %9667 = vmatprep.subr.bf16.mxu0 %v9666_v11  ;;  %9675 = vmatprep.subr.bf16.mxu1 %v9674_v10  ;;  %v6446_v11 = vld [vmem:[%s12331_s3 + $0x88] sm:$0xff]  ;;  %v6477_v10 = vld [vmem:[%s12331_s3 + $0x180] sm:$0xff]  ;;  %v9708_v57 = vpack.c.bf16 %v5756_v53, %v5740_v39  ;;  %v9724_v53 = vpack.c.bf16 %v6436_v35, %v6435_v34  ;;  %v6475_v34 = vld [vmem:[%s12331_s3 + $0x170] sm:$0xff] }
0x18df   :  { %6051 = vmatprep.mubr.f32.mxu0 %v10841_v16  ;;  %6122 = vmatprep.mubr.f32.mxu1 %v10841_v16  ;;  %v9710_v45 = vpack.c.bf16 %v6446_v11, %v6445_v25  ;;  %v6486_v39 = vld [vmem:[%s12331_s3 + $0x1c8] sm:$0xff]  ;;  %v6437_v11 = vld [vmem:[%s12331_s3 + $0x40] sm:$0xff]  ;;  %v6476_v35 = vld [vmem:[%s12331_s3 + $0x178] sm:$0xff] }
0x18e1   :  { %9669 = vmatpush1.bf16.msra.mxu0 %v9668_v59  ;;  %9677 = vmatpush1.bf16.msra.mxu1 %v9676_v60  ;;  %v9742_v59 = vpack.c.bf16 %v6478_v54, %v6477_v10  ;;  %v6461_v60 = vld [vmem:[%s12331_s3 + $0x100] sm:$0xff]  ;;  %v6438_v10 = vld [vmem:[%s12331_s3 + $0x48] sm:$0xff] }
0x18e2   :  { %9679 = vmatprep.subr.bf16.mxu0 %v9678_v0  ;;  %9687 = vmatprep.subr.bf16.mxu1 %v9686_v3  ;;  %v6448_v0 = vld [vmem:[%s12331_s3 + $0x98] sm:$0xff]  ;;  %v6479_v3 = vld [vmem:[%s12331_s3 + $0x190] sm:$0xff]  ;;  %v9744_v52 = vpack.c.bf16 %v6462_v62, %v6461_v60  ;;  %v9728_v62 = vpack.c.bf16 %v6438_v10, %v6437_v11 }
0x18e3   :  { %v9714_v8 = vpack.c.bf16 %v6448_v0, %v6447_v63  ;;  %v6488_v60 = vld [vmem:[%s12331_s3 + $0x1d8] sm:$0xff]  ;;  %v6439_v0 = vld [vmem:[%s12331_s3 + $0x50] sm:$0xff] }
0x18e4   :  { %7569 = vmatmul.mubr.msk.f32.vlgmr.msra.gmra.mrb[26].mxu0 %vm2117_vm1, %v11860_v56  ;;  %7570 = vmatmul.mubr.msk.f32.vlgmr.msra.gmra.mrb[50].mxu1 %vm2117_vm1, %v11860_v56 }
0x18e5   :  { %9681 = vmatpush1.bf16.msra.mxu0 %v9680_v9  ;;  %9689 = vmatpush1.bf16.msra.mxu1 %v9688_v12  ;;  %v9746_v9 = vpack.c.bf16 %v6480_v1, %v6479_v3  ;;  %v6463_v12 = vld [vmem:[%s12331_s3 + $0x110] sm:$0xff]  ;;  %v6440_v3 = vld [vmem:[%s12331_s3 + $0x58] sm:$0xff] }
0x18e6   :  { %9683 = vmatprep.subr.bf16.mxu0 %v9682_v17  ;;  %9691 = vmatprep.subr.bf16.mxu1 %v9690_v19  ;;  %v6450_v17 = vld [vmem:[%s12331_s3 + $0xa8] sm:$0xff]  ;;  %v6481_v19 = vld [vmem:[%s12331_s3 + $0x1a0] sm:$0xff]  ;;  %v9748_v22 = vpack.c.bf16 %v6464_v13, %v6463_v12  ;;  %v9732_v13 = vpack.c.bf16 %v6440_v3, %v6439_v0  ;;  %v6511_v0 = vld [vmem:[%s12331_s3 + $0x290] sm:$0xff] }
0x18e7   :  { %6193 = vmatprep.mubr.f32.mxu0 %v10841_v16  ;;  %6264 = vmatprep.mubr.f32.mxu1 %v10841_v16  ;;  %v9718_v24 = vpack.c.bf16 %v6450_v17, %v6449_v14  ;;  %v6490_v12 = vld [vmem:[%s12331_s3 + $0x1e8] sm:$0xff]  ;;  %v6441_v17 = vld [vmem:[%s12331_s3 + $0x60] sm:$0xff] }
0x18e9   :  { %9685 = vmatpush1.bf16.msra.mxu0 %v9684_v26  ;;  %9693 = vmatpush1.bf16.msra.mxu1 %v9692_v27  ;;  %v9750_v26 = vpack.c.bf16 %v6482_v20, %v6481_v19  ;;  %v6465_v27 = vld [vmem:[%s12331_s3 + $0x120] sm:$0xff] }
0x18ea   :  { %9695 = vmatprep.subr.bf16.mxu0 %v9694_v30  ;;  %9703 = vmatprep.subr.bf16.mxu1 %v9702_v31  ;;  %v6452_v30 = vld [vmem:[%s12331_s3 + $0xb8] sm:$0xff]  ;;  %v6483_v31 = vld [vmem:[%s12331_s3 + $0x1b0] sm:$0xff]  ;;  %v9752_v38 = vpack.c.bf16 %v6466_v28, %v6465_v27 }
0x18eb   :  { %v9722_v36 = vpack.c.bf16 %v6452_v30, %v6451_v29  ;;  %v6460_v27 = vld [vmem:[%s12331_s3 + $0xf8] sm:$0xff]  ;;  %v6491_v28 = vld [vmem:[%s12331_s3 + $0x1f0] sm:$0xff] }
0x18ec   :  { %7571 = vmatmul.mubr.msk.f32.vlgmr.msra.gmra.mrb[28].mxu0 %vm2117_vm1, %v11860_v56  ;;  %7572 = vmatmul.mubr.msk.f32.vlgmr.msra.gmra.mrb[52].mxu1 %vm2117_vm1, %v11860_v56  ;;  %v6492_v30 = vld [vmem:[%s12331_s3 + $0x1f8] sm:$0xff] }
0x18ed   :  { %9697 = vmatpush1.bf16.msra.mxu0 %v9696_v37  ;;  %9705 = vmatpush1.bf16.msra.mxu1 %v9704_v40  ;;  %v9754_v37 = vpack.c.bf16 %v6484_v32, %v6483_v31  ;;  %v6467_v40 = vld [vmem:[%s12331_s3 + $0x130] sm:$0xff]  ;;  %v6444_v32 = vld [vmem:[%s12331_s3 + $0x78] sm:$0xff] }
0x18ee   :  { %9699 = vmatprep.subr.bf16.mxu0 %v9698_v43  ;;  %9707 = vmatprep.subr.bf16.mxu1 %v9706_v51  ;;  %v6454_v43 = vld [vmem:[%s12331_s3 + $0xc8] sm:$0xff]  ;;  %v6485_v51 = vld [vmem:[%s12331_s3 + $0x1c0] sm:$0xff]  ;;  %v9756_v25 = vpack.c.bf16 %v6468_v41, %v6467_v40  ;;  %v6443_v31 = vld [vmem:[%s12331_s3 + $0x70] sm:$0xff] }
0x18ef   :  { %6335 = vmatprep.mubr.f32.mxu0 %v10841_v16  ;;  %6406 = vmatprep.mubr.f32.mxu1 %v10841_v16  ;;  %v9726_v54 = vpack.c.bf16 %v6454_v43, %v6453_v42  ;;  %v6510_v40 = vld [vmem:[%s12331_s3 + $0x288] sm:$0xff]  ;;  %v6541_v41 = vld [vmem:[%s12331_s3 + $0x380] sm:$0xff] }
0x18f0   :  { %v6542_v43 = vld [vmem:[%s12331_s3 + $0x388] sm:$0xff] }
0x18f1   :  { %9701 = vmatpush1.bf16.msra.mxu0 %v9700_v55  ;;  %9709 = vmatpush1.bf16.msra.mxu1 %v9708_v57  ;;  %v9758_v55 = vpack.c.bf16 %v6486_v39, %v6485_v51  ;;  %v6469_v57 = vld [vmem:[%s12331_s3 + $0x140] sm:$0xff]  ;;  %v9806_v51 = vpack.c.bf16 %v6542_v43, %v6541_v41  ;;  %v11986_v39 = vld [vmem:[#allocation31] sm:$0xff] }
0x18f2   :  { %9711 = vmatprep.subr.bf16.mxu0 %v9710_v45  ;;  %9743 = vmatprep.subr.bf16.mxu1 %v9742_v59  ;;  %v6456_v45 = vld [vmem:[%s12331_s3 + $0xd8] sm:$0xff]  ;;  %v6487_v59 = vld [vmem:[%s12331_s3 + $0x1d0] sm:$0xff]  ;;  %v9760_v63 = vpack.c.bf16 %v6470_v58, %v6469_v57  ;;  %v5769_v11 = vrot.slane %v11986_v39, %v11302_v4  ;;  %v5777_v10 = vrot.slane %v11986_v39, %v11305_v5  ;;  %v6493_v57 = vld [vmem:[%s12331_s3 + $0x200] sm:$0xff] }
0x18f3   :  { %v9730_v1 = vpack.c.bf16 %v6456_v45, %v6455_v61  ;;  %v6494_v58 = vld [vmem:[%s12331_s3 + $0x208] sm:$0xff]  ;;  %v6529_v41 = vld [vmem:[%s12331_s3 + $0x320] sm:$0xff]  ;;  %v6515_v43 = vld [vmem:[%s12331_s3 + $0x2b0] sm:$0xff] }
0x18f4   :  { %7573 = vmatmul.mubr.msk.f32.vlgmr.msra.gmra.mrb[30].mxu0 %vm2117_vm1, %v11860_v56  ;;  %7574 = vmatmul.mubr.msk.f32.vlgmr.msra.gmra.mrb[54].mxu1 %vm2117_vm1, %v11860_v56 }
0x18f5   :  { %9713 = vmatpush3.bf16.msra.mxu0 %v9712_v6  ;;  %9745 = vmatpush3.bf16.msra.mxu1 %v9744_v52  ;;  %v9762_v6 = vpack.c.bf16 %v6488_v60, %v6487_v59  ;;  %v6471_v52 = vld [vmem:[%s12331_s3 + $0x150] sm:$0xff] }
0x18f6   :  { %9715 = vmatprep.subr.bf16.mxu0 %v9714_v8  ;;  %9747 = vmatprep.subr.bf16.mxu1 %v9746_v9  ;;  %v6458_v8 = vld [vmem:[%s12331_s3 + $0xe8] sm:$0xff]  ;;  %v6489_v9 = vld [vmem:[%s12331_s3 + $0x1e0] sm:$0xff]  ;;  %v9764_v14 = vpack.c.bf16 %v6472_v7, %v6471_v52  ;;  %v6543_v52 = vld [vmem:[%s12331_s3 + $0x390] sm:$0xff] }
0x18f7   :  { %v9734_v19 = vpack.c.bf16 %v6458_v8, %v6457_v15  ;;  %v9766_v20 = vpack.c.bf16 %v6490_v12, %v6489_v9  ;;  %v6544_v7 = vld [vmem:[%s12331_s3 + $0x398] sm:$0xff]  ;;  %v9776_v9 = vpack.c.bf16 %v6494_v58, %v6493_v57 }
0x18f9   :  { %9717 = vmatpush3.bf16.msra.mxu0 %v9716_v21  ;;  %9749 = vmatpush3.bf16.msra.mxu1 %v9748_v22  ;;  %v6442_v21 = vld [vmem:[%s12331_s3 + $0x68] sm:$0xff]  ;;  %v6473_v22 = vld [vmem:[%s12331_s3 + $0x160] sm:$0xff] }
0x18fa   :  { %9719 = vmatprep.subr.bf16.mxu0 %v9718_v24  ;;  %9751 = vmatprep.subr.bf16.mxu1 %v9750_v26  ;;  %v9736_v18 = vpack.c.bf16 %v6442_v21, %v6441_v17  ;;  %v9768_v24 = vpack.c.bf16 %v6474_v23, %v6473_v22  ;;  %v6459_v26 = vld [vmem:[%s12331_s3 + $0xf0] sm:$0xff]  ;;  %v9810_v21 = vpack.c.bf16 %v6544_v7, %v6543_v52  ;;  %v6528_v23 = vld [vmem:[%s12331_s3 + $0x318] sm:$0xff] }
0x18fb   :  { %v9738_v29 = vpack.c.bf16 %v6460_v27, %v6459_v26  ;;  %v6527_v22 = vld [vmem:[%s12331_s3 + $0x310] sm:$0xff]  ;;  %v5793_v26 = vrot.slane %v11986_v39, %v11661_v44  ;;  %v6514_v27 = vld [vmem:[%s12331_s3 + $0x2a8] sm:$0xff] }
0x18fd   :  { %9721 = vmatpush3.bf16.msra.mxu0 %v9720_v33  ;;  %9753 = vmatpush3.bf16.msra.mxu1 %v9752_v38  ;;  %v9770_v33 = vpack.c.bf16 %v6492_v30, %v6491_v28  ;;  %v9740_v38 = vpack.c.bf16 %v6444_v32, %v6443_v31  ;;  %v6545_v28 = vld [vmem:[%s12331_s3 + $0x3a0] sm:$0xff] }
0x18fe   :  { %9723 = vmatprep.subr.bf16.mxu0 %v9722_v36  ;;  %9755 = vmatprep.subr.bf16.mxu1 %v9754_v37  ;;  %v9772_v36 = vpack.c.bf16 %v6476_v35, %v6475_v34  ;;  %v6509_v37 = vld [vmem:[%s12331_s3 + $0x280] sm:$0xff]  ;;  %v6498_v34 = vld [vmem:[%s12331_s3 + $0x228] sm:$0xff] }
0x18ff   :  { %v9774_v42 = vpack.c.bf16 %v6510_v40, %v6509_v37 }
0x1901   :  { %9725 = vmatpush3.bf16.msra.mxu0 %v9724_v53  ;;  %9757 = vmatpush3.bf16.msra.mxu1 %v9756_v25  ;;  %v5765_v53 = vrot.slane %v11986_v39, %v11297_v2  ;;  %v5773_v25 = vrot.slane %v11986_v39, %v11372_v48 }
0x1902   :  { %9727 = vmatprep.subr.bf16.mxu0 %v9726_v54  ;;  %9759 = vmatprep.subr.bf16.mxu1 %v9758_v55 }
0x1905   :  { %9729 = vmatpush3.bf16.msra.mxu0 %v9728_v62  ;;  %9761 = vmatpush3.bf16.msra.mxu1 %v9760_v63  ;;  %v6525_v62 = vld [vmem:[%s12331_s3 + $0x300] sm:$0xff]  ;;  %v6526_v63 = vld [vmem:[%s12331_s3 + $0x308] sm:$0xff] }
0x1906   :  { %9731 = vmatprep.subr.bf16.mxu0 %v9730_v1  ;;  %9763 = vmatprep.subr.bf16.mxu1 %v9762_v6  ;;  %v6512_v6 = vld [vmem:[%s12331_s3 + $0x298] sm:$0xff]  ;;  %v9808_v12 = vpack.c.bf16 %v6526_v63, %v6525_v62  ;;  %v6531_v62 = vld [vmem:[%s12331_s3 + $0x330] sm:$0xff] }
0x1907   :  { %v6532_v63 = vld [vmem:[%s12331_s3 + $0x338] sm:$0xff] }
0x1909   :  { %9733 = vmatpush3.bf16.msra.mxu0 %v9732_v13  ;;  %9765 = vmatpush3.bf16.msra.mxu1 %v9764_v14  ;;  %v6495_v13 = vld [vmem:[%s12331_s3 + $0x210] sm:$0xff]  ;;  %v6496_v14 = vld [vmem:[%s12331_s3 + $0x218] sm:$0xff] }
0x190a   :  { %9735 = vmatprep.subr.bf16.mxu0 %v9734_v19  ;;  %9767 = vmatprep.subr.bf16.mxu1 %v9766_v20  ;;  %v9778_v20 = vpack.c.bf16 %v6512_v6, %v6511_v0  ;;  %v9780_v32 = vpack.c.bf16 %v6496_v14, %v6495_v13  ;;  %v6517_v0 = vld [vmem:[%s12331_s3 + $0x2c0] sm:$0xff]  ;;  %v6550_v6 = vld [vmem:[%s12331_s3 + $0x3c8] sm:$0xff] }
0x190d   :  { %9737 = vmatpush3.bf16.msra.mxu0 %v9736_v18  ;;  %9769 = vmatpush3.bf16.msra.mxu1 %v9768_v24  ;;  %v6513_v18 = vld [vmem:[%s12331_s3 + $0x2a0] sm:$0xff]  ;;  %v5785_v24 = vrot.slane %v11986_v39, %v11658_v50 }
0x190e   :  { %9739 = vmatprep.subr.bf16.mxu0 %v9738_v29  ;;  %9771 = vmatprep.subr.bf16.mxu1 %v9770_v33  ;;  %v6546_v29 = vld [vmem:[%s12331_s3 + $0x3a8] sm:$0xff]  ;;  %v9812_v33 = vpack.c.bf16 %v6528_v23, %v6527_v22  ;;  %v9782_v37 = vpack.c.bf16 %v6514_v27, %v6513_v18  ;;  %v6519_v22 = vld [vmem:[%s12331_s3 + $0x2d0] sm:$0xff]  ;;  %v6520_v23 = vld [vmem:[%s12331_s3 + $0x2d8] sm:$0xff] }
0x190f   :  { %v9814_v40 = vpack.c.bf16 %v6546_v29, %v6545_v28  ;;  %v6551_v18 = vld [vmem:[%s12331_s3 + $0x3d0] sm:$0xff] }
0x1910   :  { %v6503_v29 = vld [vmem:[%s12331_s3 + $0x250] sm:$0xff] }
0x1911   :  { %9741 = vmatpush3.bf16.msra.mxu0 %v9740_v38  ;;  %9773 = vmatpush3.bf16.msra.mxu1 %v9772_v36  ;;  %v6497_v38 = vld [vmem:[%s12331_s3 + $0x220] sm:$0xff] }
0x1912   :  { %9775 = vmatprep.subr.bf16.mxu0 %v9774_v42  ;;  %9807 = vmatprep.subr.bf16.mxu1 %v9806_v51  ;;  %v6530_v42 = vld [vmem:[%s12331_s3 + $0x328] sm:$0xff]  ;;  %v9784_v57 = vpack.c.bf16 %v6498_v34, %v6497_v38  ;;  %v9794_v38 = vpack.c.bf16 %v6520_v23, %v6519_v22 }
0x1913   :  { %v9816_v58 = vpack.c.bf16 %v6530_v42, %v6529_v41  ;;  %v6553_v41 = vld [vmem:[%s12331_s3 + $0x3e0] sm:$0xff]  ;;  %v6554_v42 = vld [vmem:[%s12331_s3 + $0x3e8] sm:$0xff] }
0x1914   :  { %v6574_v22 = vld [vmem:[%s12331_s3 + $0x488] sm:$0xff] }
0x19af   :  { %v5911_v54 = vpop.f32.mrb[24].mxu0  ;;  %v5982_v55 = vpop.f32.mrb[48].mxu1 }
0x19b0   :  { %v5912_v61 = vadd.f32 %v5911_v54, %v5765_v53  ;;  %v5983_v45 = vadd.f32 %v5982_v55, %v5773_v25  ;;  %v5913_v59 = vpop.f32.mrb[25].mxu0  ;;  %v5984_v60 = vpop.f32.mrb[49].mxu1  ;;  %v6516_v25 = vld [vmem:[%s12331_s3 + $0x2b8] sm:$0xff] }
0x19b1   :  { %v5914_v3 = vadd.f32 %v5913_v59, %v5769_v11  ;;  %v5985_v1 = vadd.f32 %v5984_v60, %v5777_v10  ;;  %v6547_v11 = vld [vmem:[%s12331_s3 + $0x3b0] sm:$0xff]  ;;  %v6548_v10 = vld [vmem:[%s12331_s3 + $0x3b8] sm:$0xff]  ;;  %v9786_v59 = vpack.c.bf16 %v6516_v25, %v6515_v43 }
0x19b2   :  { %v6413_v17 = vmax.f32 %v5912_v61, 0.0  ;;  %v6415_v19 = vmax.f32 %v5983_v45, 0.0  ;;  %v6499_v61 = vld [vmem:[%s12331_s3 + $0x230] sm:$0xff]  ;;  %v6500_v45 = vld [vmem:[%s12331_s3 + $0x238] sm:$0xff]  ;;  %v9818_v60 = vpack.c.bf16 %v6548_v10, %v6547_v11  ;;  %v6505_v11 = vld [vmem:[%s12331_s3 + $0x260] sm:$0xff] }
0x19b3   :  { %v6414_v15 = vmax.f32 %v5914_v3, 0.0  ;;  %v6416_v8 = vmax.f32 %v5985_v1, 0.0  ;;  %v6518_v3 = vld [vmem:[%s12331_s3 + $0x2c8] sm:$0xff]  ;;  %v6549_v1 = vld [vmem:[%s12331_s3 + $0x3c0] sm:$0xff] }
0x19b4   :  { %v6506_v10 = vld [vmem:[%s12331_s3 + $0x268] sm:$0xff] }
0x19b5   :  { %6756 = vmatprep.mubr.f32.mxu0 %v6414_v15  ;;  %6826 = vmatprep.mubr.f32.mxu1 %v6416_v8  ;;  %v9788_v15 = vpack.c.bf16 %v6500_v45, %v6499_v61  ;;  %v9820_v8 = vpack.c.bf16 %v6532_v63, %v6531_v62  ;;  %v9830_v61 = vpack.c.bf16 %v6554_v42, %v6553_v41  ;;  %v6537_v45 = vld [vmem:[%s12331_s3 + $0x360] sm:$0xff]  ;;  %v6524_v62 = vld [vmem:[%s12331_s3 + $0x2f8] sm:$0xff]  ;;  %v6555_v63 = vld [vmem:[%s12331_s3 + $0x3f0] sm:$0xff] }
0x19b6   :  { %6757 = vmatmul.mubr.f32.vlgmr.msra.gmra.mrb[32].mxu0 %v6413_v17  ;;  %6827 = vmatmul.mubr.f32.vlgmr.msra.gmra.mrb[56].mxu1 %v6415_v19  ;;  %v9790_v17 = vpack.c.bf16 %v6518_v3, %v6517_v0  ;;  %v9822_v19 = vpack.c.bf16 %v6550_v6, %v6549_v1  ;;  %v6556_v0 = vld [vmem:[%s12331_s3 + $0x3f8] sm:$0xff]  ;;  %v5781_v3 = vrot.slane %v11986_v39, %v11652_v46  ;;  %v6607_v41 = vld [vmem:[%s12331_s3 + $0x590] sm:$0xff] }
0x19b7   :  { %v12016_v30 = vpop.f32.mrb[26].mxu0  ;;  %v12018_v31 = vpop.f32.mrb[50].mxu1  ;;  %9777 = vmatpush3.bf16.msra.mxu0 %v9776_v9  ;;  %9809 = vmatpush3.bf16.msra.mxu1 %v9808_v12  ;;  %v6501_v9 = vld [vmem:[%s12331_s3 + $0x240] sm:$0xff]  ;;  %v6502_v12 = vld [vmem:[%s12331_s3 + $0x248] sm:$0xff]  ;;  %v9800_v1 = vpack.c.bf16 %v6506_v10, %v6505_v11  ;;  %v6591_v11 = vld [vmem:[%s12331_s3 + $0x510] sm:$0xff] }
0x19b8   :  { %v6055_v35 = vpop.f32.mrb[27].mxu0  ;;  %v6126_v36 = vpop.f32.mrb[51].mxu1  ;;  %9779 = vmatprep.subr.bf16.mxu0 %v9778_v20  ;;  %9811 = vmatprep.subr.bf16.mxu1 %v9810_v21  ;;  %v6533_v20 = vld [vmem:[%s12331_s3 + $0x340] sm:$0xff]  ;;  %v6534_v21 = vld [vmem:[%s12331_s3 + $0x348] sm:$0xff]  ;;  %v9792_v27 = vpack.c.bf16 %v6502_v12, %v6501_v9  ;;  %v6539_v9 = vld [vmem:[%s12331_s3 + $0x370] sm:$0xff]  ;;  %v5789_v12 = vrot.slane %v11986_v39, %v11655_v47 }
0x19b9   :  { %v6056_v51 = vadd.f32 %v6055_v35, %v5785_v24  ;;  %v6127_v53 = vadd.f32 %v6126_v36, %v5793_v26  ;;  %v6552_v24 = vld [vmem:[%s12331_s3 + $0x3d8] sm:$0xff]  ;;  %v9824_v28 = vpack.c.bf16 %v6534_v21, %v6533_v20  ;;  %v6535_v35 = vld [vmem:[%s12331_s3 + $0x350] sm:$0xff]  ;;  %v6573_v21 = vld [vmem:[%s12331_s3 + $0x480] sm:$0xff] }
0x19ba   :  { %v12052_v26 = vld [vmem:[#allocation31 + $0x8] sm:$0xff]  ;;  %v9826_v34 = vpack.c.bf16 %v6552_v24, %v6551_v18  ;;  %v6605_v18 = vld [vmem:[%s12331_s3 + $0x580] sm:$0xff]  ;;  %v6606_v24 = vld [vmem:[%s12331_s3 + $0x588] sm:$0xff] }
0x19bb   :  { %v6418_v54 = vmax.f32 %v6056_v51, 0.0  ;;  %v6420_v55 = vmax.f32 %v6127_v53, 0.0  ;;  %9781 = vmatpush3.bf16.msra.mxu0 %v9780_v32  ;;  %9813 = vmatpush3.bf16.msra.mxu1 %v9812_v33  ;;  %v6504_v32 = vld [vmem:[%s12331_s3 + $0x258] sm:$0xff]  ;;  %v5821_v33 = vrot.slane %v12052_v26, %v11655_v47  ;;  %v5801_v23 = vrot.slane %v12052_v26, %v11302_v4 }
0x19bc   :  { %9783 = vmatprep.subr.bf16.mxu0 %v9782_v37  ;;  %9815 = vmatprep.subr.bf16.mxu1 %v9814_v40  ;;  %v6536_v36 = vld [vmem:[%s12331_s3 + $0x358] sm:$0xff]  ;;  %v6521_v37 = vld [vmem:[%s12331_s3 + $0x2e0] sm:$0xff]  ;;  %v6522_v40 = vld [vmem:[%s12331_s3 + $0x2e8] sm:$0xff]  ;;  %v9796_v53 = vpack.c.bf16 %v6504_v32, %v6503_v29  ;;  %v6054_v29 = vadd.f32 %v12016_v30, %v5781_v3  ;;  %v6125_v4 = vadd.f32 %v12018_v31, %v5789_v12 }
0x19bd   :  { %6896 = vmatprep.mubr.f32.mxu0 %v6418_v54  ;;  %6966 = vmatprep.mubr.f32.mxu1 %v6420_v55  ;;  %v9828_v25 = vpack.c.bf16 %v6536_v36, %v6535_v35  ;;  %v6540_v20 = vld [vmem:[%s12331_s3 + $0x378] sm:$0xff]  ;;  %v9870_v32 = vpack.c.bf16 %v6606_v24, %v6605_v18  ;;  %v6590_v35 = vld [vmem:[%s12331_s3 + $0x508] sm:$0xff]  ;;  %v6575_v36 = vld [vmem:[%s12331_s3 + $0x490] sm:$0xff] }
0x19be   :  { %v9836_v39 = vpack.c.bf16 %v6540_v20, %v6539_v9  ;;  %v6608_v30 = vld [vmem:[%s12331_s3 + $0x598] sm:$0xff]  ;;  %v6417_v42 = vmax.f32 %v6054_v29, 0.0  ;;  %v6594_v12 = vld [vmem:[%s12331_s3 + $0x528] sm:$0xff]  ;;  %v6611_v20 = vld [vmem:[%s12331_s3 + $0x5b0] sm:$0xff] }
0x19bf   :  { %v12036_v52 = vpop.f32.mrb[28].mxu0  ;;  %v12038_v7 = vpop.f32.mrb[52].mxu1  ;;  %9785 = vmatpush3.bf16.msra.mxu0 %v9784_v57  ;;  %9817 = vmatpush3.bf16.msra.mxu1 %v9816_v58  ;;  %v9798_v58 = vpack.c.bf16 %v6522_v40, %v6521_v37  ;;  %v6576_v40 = vld [vmem:[%s12331_s3 + $0x498] sm:$0xff]  ;;  %v6563_v24 = vld [vmem:[%s12331_s3 + $0x430] sm:$0xff]  ;;  %v6581_v29 = vld [vmem:[%s12331_s3 + $0x4c0] sm:$0xff] }
0x19c0   :  { %v12042_v13 = vpop.f32.mrb[29].mxu0  ;;  %v12044_v14 = vpop.f32.mrb[53].mxu1  ;;  %9787 = vmatprep.subr.bf16.mxu0 %v9786_v59  ;;  %9819 = vmatprep.subr.bf16.mxu1 %v9818_v60  ;;  %v6538_v59 = vld [vmem:[%s12331_s3 + $0x368] sm:$0xff]  ;;  %v6523_v60 = vld [vmem:[%s12331_s3 + $0x2f0] sm:$0xff]  ;;  %v9842_v10 = vpack.c.bf16 %v6576_v40, %v6575_v36 }
0x19c1   :  { %v9832_v6 = vpack.c.bf16 %v6538_v59, %v6537_v45  ;;  %v6577_v45 = vld [vmem:[%s12331_s3 + $0x4a0] sm:$0xff]  ;;  %v6578_v59 = vld [vmem:[%s12331_s3 + $0x4a8] sm:$0xff] }
0x19c2   :  { %v6566_v36 = vld [vmem:[%s12331_s3 + $0x448] sm:$0xff] }
0x19c3   :  { %9789 = vmatpush3.bf16.msra.mxu0 %v9788_v15  ;;  %9821 = vmatpush3.bf16.msra.mxu1 %v9820_v8  ;;  %v6507_v15 = vld [vmem:[%s12331_s3 + $0x270] sm:$0xff]  ;;  %v6508_v8 = vld [vmem:[%s12331_s3 + $0x278] sm:$0xff] }
0x19c4   :  { %9791 = vmatprep.subr.bf16.mxu0 %v9790_v17  ;;  %9823 = vmatprep.subr.bf16.mxu1 %v9822_v19  ;;  %v9802_v17 = vpack.c.bf16 %v6524_v62, %v6523_v60  ;;  %v9834_v19 = vpack.c.bf16 %v6556_v0, %v6555_v63  ;;  %v9804_v47 = vpack.c.bf16 %v6508_v8, %v6507_v15  ;;  %v6609_v62 = vld [vmem:[%s12331_s3 + $0x5a0] sm:$0xff]  ;;  %v6610_v63 = vld [vmem:[%s12331_s3 + $0x5a8] sm:$0xff] }
0x19c5   :  { %v6562_v15 = vld [vmem:[%s12331_s3 + $0x428] sm:$0xff]  ;;  %v6593_v8 = vld [vmem:[%s12331_s3 + $0x520] sm:$0xff]  ;;  %v9878_v9 = vpack.c.bf16 %v6610_v63, %v6609_v62 }
0x19c6   :  { %v6618_v62 = vld [vmem:[%s12331_s3 + $0x5e8] sm:$0xff] }
0x19c7   :  { %v12064_v43 = vpop.f32.mrb[30].mxu0  ;;  %v6408_v51 = vpop.f32.mrb[54].mxu1  ;;  %9793 = vmatpush3.bf16.msra.mxu0 %v9792_v27  ;;  %9825 = vmatpush3.bf16.msra.mxu1 %v9824_v28  ;;  %v5809_v27 = vrot.slane %v12052_v26, %v11305_v5  ;;  %v9838_v28 = vpack.c.bf16 %v6574_v22, %v6573_v21  ;;  %v6198_v5 = vadd.f32 %v12042_v13, %v5801_v23  ;;  %v6612_v21 = vld [vmem:[%s12331_s3 + $0x5b8] sm:$0xff] }
0x19c8   :  { %v12068_v54 = vadd.f32 %v6408_v51, %v5821_v33  ;;  %v12070_v55 = vpop.f32.mrb[31].mxu0  ;;  %v12072_v57 = vpop.f32.mrb[55].mxu1  ;;  %9795 = vmatprep.subr.bf16.mxu0 %v9794_v38  ;;  %9827 = vmatprep.subr.bf16.mxu1 %v9826_v34  ;;  %v6557_v33 = vld [vmem:[%s12331_s3 + $0x400] sm:$0xff]  ;;  %v6558_v38 = vld [vmem:[%s12331_s3 + $0x408] sm:$0xff]  ;;  %v6419_v51 = vmax.f32 %v6125_v4, 0.0  ;;  %v9880_v23 = vpack.c.bf16 %v6594_v12, %v6593_v8  ;;  %v6587_v12 = vld [vmem:[%s12331_s3 + $0x4f0] sm:$0xff] }
0x19c9   :  { %v6589_v34 = vld [vmem:[%s12331_s3 + $0x500] sm:$0xff]  ;;  %v6269_v37 = vadd.f32 %v12044_v14, %v5809_v27  ;;  %v9840_v31 = vpack.c.bf16 %v6558_v38, %v6557_v33  ;;  %v6422_v14 = vmax.f32 %v6198_v5, 0.0  ;;  %v6564_v27 = vld [vmem:[%s12331_s3 + $0x438] sm:$0xff]  ;;  %v6582_v4 = vld [vmem:[%s12331_s3 + $0x4c8] sm:$0xff] }
0x19ca   :  { %v9872_v13 = vpack.c.bf16 %v6590_v35, %v6589_v34  ;;  %v6614_v33 = vld [vmem:[%s12331_s3 + $0x5c8] sm:$0xff]  ;;  %v9852_v38 = vpack.c.bf16 %v6564_v27, %v6563_v24  ;;  %v9854_v34 = vpack.c.bf16 %v6582_v4, %v6581_v29  ;;  %v6565_v35 = vld [vmem:[%s12331_s3 + $0x440] sm:$0xff]  ;;  %v6571_v24 = vld [vmem:[%s12331_s3 + $0x470] sm:$0xff] }
0x19cb   :  { %9797 = vmatpush3.bf16.msra.mxu0 %v9796_v53  ;;  %9829 = vmatpush3.bf16.msra.mxu1 %v9828_v25  ;;  %v6559_v53 = vld [vmem:[%s12331_s3 + $0x410] sm:$0xff]  ;;  %v6560_v25 = vld [vmem:[%s12331_s3 + $0x418] sm:$0xff]  ;;  %v6424_v60 = vmax.f32 %v6269_v37, 0.0  ;;  %v6597_v37 = vld [vmem:[%s12331_s3 + $0x540] sm:$0xff] }
0x19cc   :  { %9799 = vmatprep.subr.bf16.mxu0 %v9798_v58  ;;  %9831 = vmatprep.subr.bf16.mxu1 %v9830_v61  ;;  %v9874_v58 = vpack.c.bf16 %v6608_v30, %v6607_v41  ;;  %v6592_v61 = vld [vmem:[%s12331_s3 + $0x518] sm:$0xff]  ;;  %v9844_v0 = vpack.c.bf16 %v6560_v25, %v6559_v53  ;;  %v6598_v41 = vld [vmem:[%s12331_s3 + $0x548] sm:$0xff]  ;;  %v6583_v30 = vld [vmem:[%s12331_s3 + $0x4d0] sm:$0xff] }
0x19cd   :  { %v9876_v3 = vpack.c.bf16 %v6592_v61, %v6591_v11  ;;  %v9888_v53 = vpack.c.bf16 %v6598_v41, %v6597_v37  ;;  %v6567_v11 = vld [vmem:[%s12331_s3 + $0x450] sm:$0xff]  ;;  %v6600_v61 = vld [vmem:[%s12331_s3 + $0x558] sm:$0xff]  ;;  %v6637_v4 = vld [vmem:[%s12331_s3 + $0x680] sm:$0xff] }
0x19ce   :  { %v6572_v27 = vld [vmem:[%s12331_s3 + $0x478] sm:$0xff]  ;;  %v6622_v37 = vld [vmem:[%s12331_s3 + $0x608] sm:$0xff] }
0x19cf   :  { %9801 = vmatpush3.bf16.msra.mxu0 %v9800_v1  ;;  %9833 = vmatpush3.bf16.msra.mxu1 %v9832_v6  ;;  %v9846_v1 = vpack.c.bf16 %v6578_v59, %v6577_v45  ;;  %v6561_v6 = vld [vmem:[%s12331_s3 + $0x420] sm:$0xff]  ;;  %v6586_v59 = vld [vmem:[%s12331_s3 + $0x4e8] sm:$0xff]  ;;  %v6604_v29 = vld [vmem:[%s12331_s3 + $0x578] sm:$0xff] }
0x19d0   :  { %9803 = vmatprep.subr.bf16.mxu0 %v9802_v17  ;;  %9835 = vmatprep.subr.bf16.mxu1 %v9834_v19  ;;  %v6579_v17 = vld [vmem:[%s12331_s3 + $0x4b0] sm:$0xff]  ;;  %v6580_v19 = vld [vmem:[%s12331_s3 + $0x4b8] sm:$0xff]  ;;  %v9848_v22 = vpack.c.bf16 %v6562_v15, %v6561_v6  ;;  %v6585_v45 = vld [vmem:[%s12331_s3 + $0x4e0] sm:$0xff] }
0x19d1   :  { %v9850_v18 = vpack.c.bf16 %v6580_v19, %v6579_v17  ;;  %v6570_v6 = vld [vmem:[%s12331_s3 + $0x468] sm:$0xff]  ;;  %v6601_v15 = vld [vmem:[%s12331_s3 + $0x560] sm:$0xff]  ;;  %v6588_v17 = vld [vmem:[%s12331_s3 + $0x4f8] sm:$0xff] }
0x19d2   :  { %v6619_v19 = vld [vmem:[%s12331_s3 + $0x5f0] sm:$0xff] }
0x19d3   :  { %9805 = vmatpush3.bf16.msra.mxu0 %v9804_v47  ;;  %9837 = vmatpush3.bf16.msra.mxu1 %v9836_v39  ;;  %v6595_v47 = vld [vmem:[%s12331_s3 + $0x530] sm:$0xff]  ;;  %v9882_v39 = vpack.c.bf16 %v6612_v21, %v6611_v20  ;;  %v6620_v20 = vld [vmem:[%s12331_s3 + $0x5f8] sm:$0xff] }
0x19d4   :  { %9839 = vmatprep.subr.bf16.mxu0 %v9838_v28  ;;  %9871 = vmatprep.subr.bf16.mxu1 %v9870_v32  ;;  %v6596_v28 = vld [vmem:[%s12331_s3 + $0x538] sm:$0xff]  ;;  %v6613_v32 = vld [vmem:[%s12331_s3 + $0x5c0] sm:$0xff] }
0x19d5   :  { %v9884_v5 = vpack.c.bf16 %v6596_v28, %v6595_v47  ;;  %v9886_v40 = vpack.c.bf16 %v6614_v33, %v6613_v32  ;;  %v6603_v47 = vld [vmem:[%s12331_s3 + $0x570] sm:$0xff]  ;;  %v9898_v28 = vpack.c.bf16 %v6620_v20, %v6619_v19  ;;  %v6638_v32 = vld [vmem:[%s12331_s3 + $0x688] sm:$0xff]  ;;  %v6669_v33 = vld [vmem:[%s12331_s3 + $0x780] sm:$0xff] }
0x19d6   :  { %6897 = vmatmul.mubr.f32.vlgmr.msra.gmra.mrb[34].mxu0 %v6417_v42  ;;  %6967 = vmatmul.mubr.f32.vlgmr.msra.gmra.mrb[58].mxu1 %v6419_v51  ;;  %v6615_v42 = vld [vmem:[%s12331_s3 + $0x5d0] sm:$0xff]  ;;  %v6616_v51 = vld [vmem:[%s12331_s3 + $0x5d8] sm:$0xff]  ;;  %v6658_v19 = vld [vmem:[%s12331_s3 + $0x728] sm:$0xff] }
0x19d7   :  { %9841 = vmatpush3.bf16.msra.mxu0 %v9840_v31  ;;  %7036 = vmatprep.mubr.f32.mxu0 %v6422_v14  ;;  %v6584_v31 = vld [vmem:[%s12331_s3 + $0x4d8] sm:$0xff]  ;;  %v6643_v20 = vld [vmem:[%s12331_s3 + $0x6b0] sm:$0xff] }
0x19d8   :  { %9873 = vmatpush3.bf16.msra.mxu1 %v9872_v13  ;;  %7106 = vmatprep.mubr.f32.mxu1 %v6424_v60  ;;  %v9856_v13 = vpack.c.bf16 %v6566_v36, %v6565_v35  ;;  %v9858_v25 = vpack.c.bf16 %v6584_v31, %v6583_v30  ;;  %v6568_v14 = vld [vmem:[%s12331_s3 + $0x458] sm:$0xff]  ;;  %v6617_v60 = vld [vmem:[%s12331_s3 + $0x5e0] sm:$0xff]  ;;  %v9900_v35 = vpack.c.bf16 %v6604_v29, %v6603_v47  ;;  %v6654_v30 = vld [vmem:[%s12331_s3 + $0x708] sm:$0xff] }
0x19d9   :  { %9843 = vmatprep.subr.bf16.mxu0 %v9842_v10  ;;  %9875 = vmatprep.subr.bf16.mxu1 %v9874_v58  ;;  %v6599_v10 = vld [vmem:[%s12331_s3 + $0x550] sm:$0xff]  ;;  %v9890_v58 = vpack.c.bf16 %v6616_v51, %v6615_v42  ;;  %v9860_v63 = vpack.c.bf16 %v6568_v14, %v6567_v11  ;;  %v9894_v8 = vpack.c.bf16 %v6618_v62, %v6617_v60  ;;  %v6640_v42 = vld [vmem:[%s12331_s3 + $0x698] sm:$0xff] }
0x19da   :  { %v9902_v36 = vpack.c.bf16 %v6638_v32, %v6637_v4  ;;  %v6623_v14 = vld [vmem:[%s12331_s3 + $0x610] sm:$0xff]  ;;  %v6660_v4 = vld [vmem:[%s12331_s3 + $0x738] sm:$0xff]  ;;  %v6645_v32 = vld [vmem:[%s12331_s3 + $0x6c0] sm:$0xff] }
0x19db   :  { %9845 = vmatpush3.bf16.msra.mxu0 %v9844_v0  ;;  %v9892_v0 = vpack.c.bf16 %v6600_v61, %v6599_v10  ;;  %v6624_v10 = vld [vmem:[%s12331_s3 + $0x618] sm:$0xff]  ;;  %v6627_v47 = vld [vmem:[%s12331_s3 + $0x630] sm:$0xff] }
0x19dc   :  { %9877 = vmatpush3.bf16.msra.mxu1 %v9876_v3  ;;  %9847 = vmatprep.subr.bf16.mxu0 %v9846_v1  ;;  %v9862_v3 = vpack.c.bf16 %v6586_v59, %v6585_v45  ;;  %v6569_v1 = vld [vmem:[%s12331_s3 + $0x460] sm:$0xff]  ;;  %v6656_v45 = vld [vmem:[%s12331_s3 + $0x718] sm:$0xff]  ;;  %v6642_v59 = vld [vmem:[%s12331_s3 + $0x6a8] sm:$0xff] }
0x19dd   :  { %9879 = vmatprep.subr.bf16.mxu1 %v9878_v9  ;;  %v6602_v9 = vld [vmem:[%s12331_s3 + $0x568] sm:$0xff]  ;;  %v9864_v21 = vpack.c.bf16 %v6570_v6, %v6569_v1  ;;  %v9908_v1 = vpack.c.bf16 %v6624_v10, %v6623_v14  ;;  %v6649_v14 = vld [vmem:[%s12331_s3 + $0x6e0] sm:$0xff] }
0x19de   :  { %v6650_v10 = vld [vmem:[%s12331_s3 + $0x6e8] sm:$0xff] }
0x19df   :  { %9849 = vmatpush3.bf16.msra.mxu0 %v9848_v22  ;;  %v5797_v22 = vrot.slane %v12052_v26, %v11297_v2  ;;  %v5817_v2 = vrot.slane %v12052_v26, %v11658_v50  ;;  %v6621_v50 = vld [vmem:[%s12331_s3 + $0x600] sm:$0xff] }
0x19e0   :  { %9881 = vmatpush3.bf16.msra.mxu1 %v9880_v23  ;;  %9851 = vmatprep.subr.bf16.mxu0 %v9850_v18  ;;  %v9896_v23 = vpack.c.bf16 %v6602_v9, %v6601_v15  ;;  %v9866_v18 = vpack.c.bf16 %v6588_v17, %v6587_v12  ;;  %v6626_v9 = vld [vmem:[%s12331_s3 + $0x628] sm:$0xff]  ;;  %v6657_v12 = vld [vmem:[%s12331_s3 + $0x720] sm:$0xff] }
0x19e1   :  { %9883 = vmatprep.subr.bf16.mxu1 %v9882_v39  ;;  %v5805_v39 = vrot.slane %v12052_v26, %v11372_v48  ;;  %v9868_v48 = vpack.c.bf16 %v6572_v27, %v6571_v24  ;;  %v6340_v31 = vadd.f32 %v12070_v55, %v5817_v2  ;;  %v6655_v55 = vld [vmem:[%s12331_s3 + $0x710] sm:$0xff]  ;;  %v9944_v24 = vpack.c.bf16 %v6658_v19, %v6657_v12  ;;  %v6646_v2 = vld [vmem:[%s12331_s3 + $0x6c8] sm:$0xff] }
0x19e2   :  { %v9940_v6 = vpack.c.bf16 %v6656_v45, %v6655_v55  ;;  %v6681_v55 = vld [vmem:[%s12331_s3 + $0x7e0] sm:$0xff]  ;;  %v6635_v19 = vld [vmem:[%s12331_s3 + $0x670] sm:$0xff] }
0x19e3   :  { %9853 = vmatpush3.bf16.msra.mxu0 %v9852_v38  ;;  %v6670_v38 = vld [vmem:[%s12331_s3 + $0x788] sm:$0xff]  ;;  %v6426_v60 = vmax.f32 %v6340_v31, 0.0  ;;  %v6680_v31 = vld [vmem:[%s12331_s3 + $0x7d8] sm:$0xff] }
0x19e4   :  { %9885 = vmatpush3.bf16.msra.mxu1 %v9884_v5  ;;  %9855 = vmatprep.subr.bf16.mxu0 %v9854_v34  ;;  %v5825_v5 = vrot.slane %v12052_v26, %v11661_v44  ;;  %v6196_v34 = vadd.f32 %v12036_v52, %v5797_v22  ;;  %v9934_v41 = vpack.c.bf16 %v6670_v38, %v6669_v33  ;;  %v6653_v44 = vld [vmem:[%s12331_s3 + $0x700] sm:$0xff]  ;;  %v6639_v52 = vld [vmem:[%s12331_s3 + $0x690] sm:$0xff]  ;;  %v6678_v38 = vld [vmem:[%s12331_s3 + $0x7c8] sm:$0xff] }
0x19e5   :  { %9887 = vmatprep.subr.bf16.mxu1 %v9886_v40  ;;  %v6267_v40 = vadd.f32 %v12038_v7, %v5805_v39  ;;  %v6672_v7 = vld [vmem:[%s12331_s3 + $0x798] sm:$0xff]  ;;  %v9936_v11 = vpack.c.bf16 %v6654_v30, %v6653_v44  ;;  %v9906_v61 = vpack.c.bf16 %v6640_v42, %v6639_v52  ;;  %v6675_v22 = vld [vmem:[%s12331_s3 + $0x7b0] sm:$0xff]  ;;  %v6677_v33 = vld [vmem:[%s12331_s3 + $0x7c0] sm:$0xff] }
0x19e6   :  { %v6411_v51 = vadd.f32 %v12072_v57, %v5825_v5  ;;  %v6641_v57 = vld [vmem:[%s12331_s3 + $0x6a0] sm:$0xff]  ;;  %v6628_v39 = vld [vmem:[%s12331_s3 + $0x638] sm:$0xff]  ;;  %v6679_v30 = vld [vmem:[%s12331_s3 + $0x7d0] sm:$0xff] }
0x19e7   :  { %9857 = vmatpush3.bf16.msra.mxu0 %v9856_v13  ;;  %v9904_v13 = vpack.c.bf16 %v6622_v37, %v6621_v50  ;;  %v9910_v15 = vpack.c.bf16 %v6642_v59, %v6641_v57  ;;  %v9916_v5 = vpack.c.bf16 %v6628_v39, %v6627_v47  ;;  %v6661_v50 = vld [vmem:[%s12331_s3 + $0x740] sm:$0xff]  ;;  %v9950_v37 = vpack.c.bf16 %v6678_v38, %v6677_v33  ;;  %v6648_v44 = vld [vmem:[%s12331_s3 + $0x6d8] sm:$0xff] }
0x19e8   :  { %9889 = vmatpush3.bf16.msra.mxu1 %v9888_v53  ;;  %9859 = vmatprep.subr.bf16.mxu0 %v9858_v25  ;;  %v6671_v53 = vld [vmem:[%s12331_s3 + $0x790] sm:$0xff]  ;;  %v6421_v25 = vmax.f32 %v6196_v34, 0.0  ;;  %v9918_v34 = vpack.c.bf16 %v6646_v2, %v6645_v32  ;;  %v9926_v57 = vpack.c.bf16 %v6650_v10, %v6649_v14  ;;  %v6633_v59 = vld [vmem:[%s12331_s3 + $0x660] sm:$0xff] }
0x19e9   :  { %9891 = vmatprep.subr.bf16.mxu1 %v9890_v58  ;;  %v6423_v58 = vmax.f32 %v6267_v40, 0.0  ;;  %v9938_v62 = vpack.c.bf16 %v6672_v7, %v6671_v53  ;;  %v6662_v40 = vld [vmem:[%s12331_s3 + $0x748] sm:$0xff]  ;;  %v6632_v53 = vld [vmem:[%s12331_s3 + $0x658] sm:$0xff]  ;;  %v6663_v7 = vld [vmem:[%s12331_s3 + $0x750] sm:$0xff] }
0x19ea   :  { %v9952_v42 = vpack.c.bf16 %v6662_v40, %v6661_v50 }
0x19eb   :  { %9861 = vmatpush3.bf16.msra.mxu0 %v9860_v63  ;;  %v6673_v63 = vld [vmem:[%s12331_s3 + $0x7a0] sm:$0xff] }
0x19ec   :  { %9893 = vmatpush3.bf16.msra.mxu1 %v9892_v0  ;;  %9863 = vmatprep.subr.bf16.mxu0 %v9862_v3  ;;  %v6674_v0 = vld [vmem:[%s12331_s3 + $0x7a8] sm:$0xff]  ;;  %v6428_v3 = vmax.f32 %v6411_v51, 0.0 }
0x19ed   :  { %9895 = vmatprep.subr.bf16.mxu1 %v9894_v8  ;;  %v6625_v8 = vld [vmem:[%s12331_s3 + $0x620] sm:$0xff]  ;;  %v9942_v17 = vpack.c.bf16 %v6674_v0, %v6673_v63  ;;  %v6666_v0 = vld [vmem:[%s12331_s3 + $0x768] sm:$0xff] }
0x19ef   :  { %9865 = vmatpush3.bf16.msra.mxu0 %v9864_v21  ;;  %v6644_v21 = vld [vmem:[%s12331_s3 + $0x6b8] sm:$0xff] }
0x19f0   :  { %9897 = vmatpush3.bf16.msra.mxu1 %v9896_v23  ;;  %9867 = vmatprep.subr.bf16.mxu0 %v9866_v18  ;;  %v6676_v23 = vld [vmem:[%s12331_s3 + $0x7b8] sm:$0xff]  ;;  %v9912_v18 = vpack.c.bf16 %v6626_v9, %v6625_v8  ;;  %v9914_v27 = vpack.c.bf16 %v6644_v21, %v6643_v20  ;;  %v5813_v9 = vrot.slane %v12052_v26, %v11652_v46  ;;  %v6427_v26 = vmax.f32 %v12068_v54, 0.0 }
0x19f1   :  { %9899 = vmatprep.subr.bf16.mxu1 %v9898_v28  ;;  %v6659_v28 = vld [vmem:[%s12331_s3 + $0x730] sm:$0xff]  ;;  %v9946_v29 = vpack.c.bf16 %v6676_v23, %v6675_v22  ;;  %v6636_v20 = vld [vmem:[%s12331_s3 + $0x678] sm:$0xff] }
0x19f2   :  { %v6667_v22 = vld [vmem:[%s12331_s3 + $0x770] sm:$0xff]  ;;  %v6668_v23 = vld [vmem:[%s12331_s3 + $0x778] sm:$0xff] }
0x19f3   :  { %9869 = vmatpush3.bf16.msra.mxu0 %v9868_v48  ;;  %v9948_v48 = vpack.c.bf16 %v6660_v4, %v6659_v28  ;;  %v7575_v28 = vld [vmem:[#allocation32] ss:$0 sm:$0xff] }
0x19f4   :  { %9901 = vmatpush3.bf16.msra.mxu1 %v9900_v35  ;;  %9903 = vmatprep.subr.bf16.mxu0 %v9902_v36  ;;  %v6629_v35 = vld [vmem:[%s12331_s3 + $0x640] sm:$0xff]  ;;  %v6630_v36 = vld [vmem:[%s12331_s3 + $0x648] sm:$0xff] }
0x19f5   :  { %9935 = vmatprep.subr.bf16.mxu1 %v9934_v41  ;;  %v6647_v41 = vld [vmem:[%s12331_s3 + $0x6d0] sm:$0xff]  ;;  %v9920_v52 = vpack.c.bf16 %v6630_v36, %v6629_v35 }
0x19f6   :  { %7037 = vmatmul.mubr.f32.vlgmr.msra.gmra.mrb[36].mxu0 %v6421_v25  ;;  %v9922_v51 = vpack.c.bf16 %v6648_v44, %v6647_v41  ;;  %v9954_v25 = vpack.c.bf16 %v6680_v31, %v6679_v30 }
0x19f7   :  { %7107 = vmatmul.mubr.f32.vlgmr.msra.gmra.mrb[60].mxu1 %v6423_v58  ;;  %9905 = vmatpush3.bf16.msra.mxu0 %v9904_v13  ;;  %v6631_v13 = vld [vmem:[%s12331_s3 + $0x650] sm:$0xff]  ;;  %v6682_v58 = vld [vmem:[%s12331_s3 + $0x7e8] sm:$0xff] }
0x19f8   :  { %7176 = vmatprep.mubr.f32.mxu0 %v6426_v60  ;;  %9937 = vmatpush3.bf16.msra.mxu1 %v9936_v11  ;;  %v6664_v11 = vld [vmem:[%s12331_s3 + $0x758] sm:$0xff]  ;;  %v6634_v60 = vld [vmem:[%s12331_s3 + $0x668] sm:$0xff]  ;;  %v9958_v63 = vpack.c.bf16 %v6682_v58, %v6681_v55 }
0x19f9   :  { %7246 = vmatprep.mubr.f32.mxu1 %v6428_v3  ;;  %9907 = vmatprep.subr.bf16.mxu0 %v9906_v61  ;;  %v9924_v61 = vpack.c.bf16 %v6632_v53, %v6631_v13  ;;  %v9956_v45 = vpack.c.bf16 %v6664_v11, %v6663_v7  ;;  %v6651_v3 = vld [vmem:[%s12331_s3 + $0x6f0] sm:$0xff]  ;;  %v9928_v8 = vpack.c.bf16 %v6634_v60, %v6633_v59  ;;  %v7282_v60 = vld [vmem:[%s12332_s11] sm:$0xff] }
0x19fa   :  { %9939 = vmatprep.subr.bf16.mxu1 %v9938_v62  ;;  %v6665_v62 = vld [vmem:[%s12331_s3 + $0x760] sm:$0xff] }
0x19fb   :  { %9909 = vmatpush3.bf16.msra.mxu0 %v9908_v1  ;;  %v6652_v1 = vld [vmem:[%s12331_s3 + $0x6f8] sm:$0xff]  ;;  %v9960_v12 = vpack.c.bf16 %v6666_v0, %v6665_v62  ;;  %v7283_v62 = vld [vmem:[%s12332_s11 + $0x8] sm:$0xff]  ;;  %v7284_v0 = vld [vmem:[%s12332_s11 + $0x10] sm:$0xff] }
0x19fc   :  { %9941 = vmatpush3.bf16.msra.mxu1 %v9940_v6  ;;  %9911 = vmatprep.subr.bf16.mxu0 %v9910_v15  ;;  %v6683_v6 = vld [vmem:[%s12331_s3 + $0x7f0] sm:$0xff]  ;;  %v6684_v15 = vld [vmem:[%s12331_s3 + $0x7f8] sm:$0xff] }
0x19fd   :  { %9943 = vmatprep.subr.bf16.mxu1 %v9942_v17  ;;  %v9930_v17 = vpack.c.bf16 %v6652_v1, %v6651_v3  ;;  %v9962_v21 = vpack.c.bf16 %v6684_v15, %v6683_v6  ;;  %v7285_v3 = vld [vmem:[%s12332_s11 + $0x18] sm:$0xff] }
0x19fe   :  { %v9970_v1 = vpack.c.bf16 %v7285_v3, %v7284_v0 }
0x19ff   :  { %9913 = vmatpush3.bf16.msra.mxu0 %v9912_v18  ;;  %v9932_v18 = vpack.c.bf16 %v6636_v20, %v6635_v19 }
0x1a00   :  { %9945 = vmatpush3.bf16.msra.mxu1 %v9944_v24  ;;  %9915 = vmatprep.subr.bf16.mxu0 %v9914_v27  ;;  %v6338_v24 = vadd.f32 %v12064_v43, %v5813_v9  ;;  %v9964_v27 = vpack.c.bf16 %v6668_v23, %v6667_v22  ;;  %v7576_v9 = vld [vmem:[#allocation34] ss:$0 sm:$0xff] }
0x1a01   :  { %9947 = vmatprep.subr.bf16.mxu1 %v9946_v29 }
0x1a02   :  { %v6425_v46 = vmax.f32 %v6338_v24, 0.0 }
0x1a03   :  { %9917 = vmatpush3.bf16.msra.mxu0 %v9916_v5 }
0x1a04   :  { %9949 = vmatpush3.bf16.msra.mxu1 %v9948_v48  ;;  %9919 = vmatprep.subr.bf16.mxu0 %v9918_v34 }
0x1a05   :  { %9951 = vmatprep.subr.bf16.mxu1 %v9950_v37 }
0x1a07   :  { %9921 = vmatpush3.bf16.msra.mxu0 %v9920_v52 }
0x1a08   :  { %9953 = vmatpush3.bf16.msra.mxu1 %v9952_v42  ;;  %9923 = vmatprep.subr.bf16.mxu0 %v9922_v51 }
0x1a09   :  { %9955 = vmatprep.subr.bf16.mxu1 %v9954_v25 }
0x1a0b   :  { %9925 = vmatpush3.bf16.msra.mxu0 %v9924_v61 }
0x1a0c   :  { %9957 = vmatpush3.bf16.msra.mxu1 %v9956_v45  ;;  %9927 = vmatprep.subr.bf16.mxu0 %v9926_v57 }
0x1a0d   :  { %9959 = vmatprep.subr.bf16.mxu1 %v9958_v63  ;;  %v9967_v63 = vpack.c.bf16 %v7283_v62, %v7282_v60 }
0x1a0f   :  { %9929 = vmatpush3.bf16.msra.mxu0 %v9928_v8 }
0x1a10   :  { %9961 = vmatpush3.bf16.msra.mxu1 %v9960_v12  ;;  %9931 = vmatprep.subr.bf16.mxu0 %v9930_v17  ;;  %v7577_v17 = vld [vmem:[#allocation35] ss:$0 sm:$0xff] }
0x1a11   :  { %9963 = vmatprep.subr.bf16.mxu1 %v9962_v21 }
0x1a13   :  { %9933 = vmatpush3.bf16.msra.mxu0 %v9932_v18 }
0x1a14   :  { %9965 = vmatpush3.bf16.msra.mxu1 %v9964_v27  ;;  %9966 = vmatprep.subr.bf16.mxu0 %v10842_v49 }
0x1a16   :  { %7177 = vmatmul.mubr.f32.vlgmr.msra.gmra.mrb[38].mxu0 %v6425_v46 }
0x1a17   :  { %7247 = vmatmul.mubr.f32.vlgmr.msra.gmra.mrb[62].mxu1 %v6427_v26  ;;  %8219 = vmatprep.mubr.msk.f32.mxu0 %vm10843_vm6, %v10841_v16 }
0x1a18   :  { %9968 = vmatpush3.bf16.msra.mxu0 %v9967_v63 }
0x1a19   :  { %9969 = vmatprep.subr.bf16.mxu0 %v10842_v49 }
0x1a1c   :  { %9971 = vmatpush3.bf16.msra.mxu0 %v9970_v1 }
0x1a89   :  { %v7766_v47 = vpop.f32.mrb[32].mxu0  ;;  %v7801_v39 = vpop.f32.mrb[56].mxu1 }
0x1a8a   :  { %v7767_v43 = vpop.f32.mrb[33].mxu0  ;;  %v7802_v29 = vpop.f32.mrb[57].mxu1 }
0x1a8b   :  { %v7768_v4 = vadd.f32 %v7767_v43, %v7766_v47  ;;  %v7803_v32 = vadd.f32 %v7802_v29, %v7801_v39 }
0x1a8d   :  { %v6759_v2 = vadd.f32 %v7768_v4, %v7575_v28 }
0x1a8f   :  { %v6829_v33 = vadd.f32 %v7803_v32, %v6759_v2 }
0x1aa9   :  { %v7836_v38 = vpop.f32.mrb[34].mxu0  ;;  %v7871_v5 = vpop.f32.mrb[58].mxu1 }
0x1aaa   :  { %v7837_v48 = vpop.f32.mrb[35].mxu0  ;;  %v7872_v34 = vpop.f32.mrb[59].mxu1 }
0x1aab   :  { %v7838_v35 = vadd.f32 %v7837_v48, %v7836_v38  ;;  %v7873_v54 = vadd.f32 %v7872_v34, %v7871_v5 }
0x1aad   :  { %v6899_v36 = vadd.f32 %v7838_v35, %v6829_v33 }
0x1aaf   :  { %v6969_v50 = vadd.f32 %v7873_v54, %v6899_v36 }
0x1ac9   :  { %v7906_v37 = vpop.f32.mrb[36].mxu0 }
0x1aca   :  { %v7941_v40 = vpop.f32.mrb[60].mxu1  ;;  %v7907_v16 = vpop.f32.mrb[37].mxu0 }
0x1acb   :  { %v7908_v41 = vadd.f32 %v7907_v16, %v7906_v37  ;;  %v7942_v44 = vpop.f32.mrb[61].mxu1 }
0x1acc   :  { %v7943_v30 = vadd.f32 %v7942_v44, %v7941_v40 }
0x1acd   :  { %v7039_v31 = vadd.f32 %v7908_v41, %v6969_v50 }
0x1acf   :  { %v7109_v52 = vadd.f32 %v7943_v30, %v7039_v31 }
0x1ae9   :  { %v7976_v42 = vpop.f32.mrb[38].mxu0 }
0x1aea   :  { %v8011_v51 = vpop.f32.mrb[62].mxu1  ;;  %v7977_v13 = vpop.f32.mrb[39].mxu0 }
0x1aeb   :  { %v7978_v53 = vadd.f32 %v7977_v13, %v7976_v42  ;;  %v8012_v7 = vpop.f32.mrb[63].mxu1 }
0x1aec   :  { %v8013_v25 = vadd.f32 %v8012_v7, %v8011_v51 }
0x1aed   :  { %v7179_v11 = vadd.f32 %v7978_v53, %v7109_v52 }
0x1aef   :  { %v7249_v14 = vadd.f32 %v8013_v25, %v7179_v11 }
0x1af1   :  { %v7252_v10 = vadd.f32 %v7249_v14, %v11860_v56 }
0x1af3   :  { %v7255_v55 = vsel %vm2093_vm0, %v7252_v10, 0.0 }
0x1af4   :  { %7256 = vadd.xlane.f32.xlu0 %v7255_v55 }
0x1b81   :  { %v7257_v58 = vpop.xlane.xlu0 %7256 }
0x1b82   :  { %v7258_v61 = vmul.f32 0.03125, %v7257_v58 }
0x1b84   :  { %v7259_v45 = vsub.f32 %v7252_v10, %v7258_v61 }
0x1b86   :  { %v7260_v57 = vmul.f32 %v7259_v45, %v7259_v45 }
0x1b88   :  { %v7261_v59 = vsel %vm2093_vm0, %v7260_v57, 0.0 }
0x1b89   :  { %7262 = vadd.xlane.f32.xlu1 %v7261_v59 }
0x1c16   :  { %v7263_v56 = vpop.xlane.xlu1 %7262 }
0x1c17   :  { %v7264_v6 = vmul.f32 0.03125, %v7263_v56 }
0x1c19   :  { %v7265_v15 = vadd.f32 1e-05, %v7264_v6 }
0x1c1b   :  { %10140 = vrsqrt.f32 %v7265_v15 }
0x1c25   :  { %v10141_v8 = vpop.eup %10140 }
0x1c26   :  { %v7267_v12 = vmul.f32 %v10141_v8, %v7259_v45 }
0x1c28   :  { %v7274_v19 = vmul.f32 %v7576_v9, %v7267_v12 }
0x1c2a   :  { %v7281_v20 = vadd.f32 %v7577_v17, %v7274_v19 }
0x1c2c   :  { %8220 = vmatmul.mubr.msk.f32.vlgmr.msra.gmra.mrb[40].mxu0 %vm2117_vm1, %v7281_v20 }
0x1c2d   :  { %10663 = shalt.err (!%p10660_p6)
}
0x1c2e   :  { %s10664_s16 = scalar_lea.hbm %s11036_s27, 32 }
0x1c2f   :  { %p10665_p7 = scmp.ne.s32.totalorder %s11036_s27, %s10664_s16  ;;  %p10668_p8 = scmp.lt.u32.totalorder %s10664_s16, %s11036_s27 }
0x1c31   :  { %p10670_p9 = pnand %p10668_p8, %p10665_p7 }
0x1c33   :  { %10673 = shalt.err (!%p10670_p9)
}
0x1c34   :  { %7393 = dma.vmem_to_hbm [thread:$0]  %s7391_s25, 32, %s11036_s27, [#allocation40]  }
0x1c35   :  { %s10674_s18 = scalar_lea.vmem %s7381_s20, 32  ;;  %p10679_p11 = scmp.lt.s32.totalorder %s7381_s20, %s7381_s20 }
0x1c36   :  { %p10675_p10 = scmp.ne.s32.totalorder %s7381_s20, %s10674_s18  ;;  %p10680_p12 = scmp.lt.s32.totalorder %s10674_s18, %s10674_s18 }
0x1c38   :  { %p10681_p13 = por %p10680_p12, %p10679_p11 }
0x1c3a   :  { %p10682_p0 = pnand %p10681_p13, %p10675_p10 }
0x1c3c   :  { %10685 = shalt.err (!%p10682_p0)
}
0x1c3d   :  { %s10686_s22 = scalar_lea.hbm %s11031_s19, 32 }
0x1c3e   :  { %p10687_p1 = scmp.ne.s32.totalorder %s11031_s19, %s10686_s22  ;;  %p10690_p2 = scmp.lt.u32.totalorder %s10686_s22, %s11031_s19 }
0x1c40   :  { %p10692_p3 = pnand %p10690_p2, %p10687_p1 }
0x1c42   :  { %10695 = shalt.err (!%p10692_p3)
}
0x1c43   :  { %7383 = dma.vmem_to_hbm [thread:$0]  %s7381_s20, 32, %s11031_s19, [#allocation4]  }
0x1c44   :  { %s10846_s23 = smov [#allocation41]  }
0x1c45   :  { %s7400_s27 = sshll.u32 %s10846_s23, 4  ;;  %s7401_s27 = int_to_ptr.vmem [resolvable:$true] %s7400_s27 }
0x1c46   :  { %s10696_s8 = scalar_lea.vmem %s7401_s27, 32  ;;  %p10701_p5 = scmp.lt.s32.totalorder %s7401_s27, %s7401_s27 }
0x1c47   :  { %p10697_p4 = scmp.ne.s32.totalorder %s7401_s27, %s10696_s8  ;;  %p10702_p6 = scmp.lt.s32.totalorder %s10696_s8, %s10696_s8 }
0x1c49   :  { %p10703_p7 = por %p10702_p6, %p10701_p5 }
0x1c4b   :  { %p10704_p8 = pnand %p10703_p7, %p10697_p4 }
0x1c4d   :  { %10707 = shalt.err (!%p10704_p8)
}
0x1c4e   :  { %s10708_s14 = scalar_lea.hbm %s11041_s6, 32 }
0x1c4f   :  { %p10709_p9 = scmp.ne.s32.totalorder %s11041_s6, %s10708_s14  ;;  %p10712_p10 = scmp.lt.u32.totalorder %s10708_s14, %s11041_s6 }
0x1c51   :  { %p10714_p11 = pnand %p10712_p10, %p10709_p9 }
0x1c53   :  { %10717 = shalt.err (!%p10714_p11)
}
0x1c54   :  { %7403 = dma.vmem_to_hbm [thread:$0]  %s7401_s27, 32, %s11041_s6, [#allocation40]   ;;  %v7578_v49 = vld [vmem:[#allocation37] ss:$0 sm:$0xff] }
0x1c55   :  { %s10847_s19 = smov [#allocation42]  }
0x1c56   :  { %s7410_s26 = sshll.u32 %s10847_s19, 4  ;;  %s7411_s26 = int_to_ptr.vmem [resolvable:$true] %s7410_s26 }
0x1c57   :  { %s10718_s9 = scalar_lea.vmem %s7411_s26, 32  ;;  %p10723_p13 = scmp.lt.s32.totalorder %s7411_s26, %s7411_s26 }
0x1c58   :  { %p10719_p12 = scmp.ne.s32.totalorder %s7411_s26, %s10718_s9  ;;  %p10724_p0 = scmp.lt.s32.totalorder %s10718_s9, %s10718_s9 }
0x1c5a   :  { %p10725_p1 = por %p10724_p0, %p10723_p13 }
0x1c5c   :  { %p10726_p2 = pnand %p10725_p1, %p10719_p12 }
0x1cff   :  { %v7362_v21 = vpop.f32.mrb[40].mxu0 }
0x1d00   :  { %v7363_v22 = vadd.f32 %v7578_v49, %v7362_v21  ;;  %v8221_v23 = vpop.f32.mrb[41].mxu0 }
0x1d02   :  { %v7366_v18 = vsub.f32 0.0, %v7363_v22 }
0x1d04   :  { %v7367_v24 = vmul.f32 1.442695, %v7366_v18 }
0x1d06   :  { %10142 = vpow2.f32 %v7367_v24 }
0x1d10   :  { %v10143_v27 = vpop.eup %10142 }
0x1d11   :  { %v7369_v46 = vadd.f32 1.0, %v10143_v27 }
0x1d13   :  { %10144 = vrcp.f32 %v7369_v46 }
0x1d1d   :  { %v10145_v26 = vpop.eup %10144 }
0x1d1e   :  { %7371 = vst.msk [vmem:[#allocation42] sm:$0x3] %vm4025_vm9, %v10145_v26 }
0x1d1f   :  { %10729 = shalt.err (!%p10726_p2)
}
0x1d20   :  { %s10730_s6 = scalar_lea.hbm %s11046_s30, 32 }
0x1d21   :  { %p10731_p3 = scmp.ne.s32.totalorder %s11046_s30, %s10730_s6  ;;  %p10734_p4 = scmp.lt.u32.totalorder %s10730_s6, %s11046_s30 }
0x1d23   :  { %p10736_p5 = pnand %p10734_p4, %p10731_p3 }
0x1d25   :  { %10739 = shalt.err (!%p10736_p5)
}
0x1d26   :  { %7413 = dma.vmem_to_hbm [thread:$0]  %s7411_s26, 32, %s11046_s30, [#allocation43]  }
0x1d27   :  { %10764 = dma.done.wait [#allocation4], 32  }
0x1d28   :  { %10765 = vsyncadd [#allocation4], 4294967264 }
0x1d29   :  { %10766 = dma.done.wait [#allocation40], 64  }
0x1d2a   :  { %10767 = vsyncadd [#allocation40], 4294967232 }
0x1d2b   :  { %10768 = dma.done.wait [#allocation43], 32  }
0x1d2c   :  { %10769 = vsyncadd [#allocation43], 4294967264 }
0x1d2d   :  { %7428 = vsyncpa [#allocation3], 1 }
0x1d2e   :  { %7429 = vsyncpa [#allocation6], 1 }
0x1d2f   :  { %7430 = vsyncpa [#allocation9], 1 }
0x1d30   :  { %7431 = vsyncpa [#allocation12], 1 }
0x1d31   :  { %7432 = vsyncpa [#allocation15], 1 }
0x1d32   :  { %7433 = vsyncpa [#allocation18], 1 }
0x1d33   :  { %7434 = vsyncpa [#allocation21], 1 }
0x1d34   :  { %7435 = vsyncpa [#allocation24], 1 }
0x1d35   :  { %7436 = vsyncpa [#allocation27], 1 }
0x1d36   :  { %7437 = vsyncpa [#allocation30], 1 }
0x1d37   :  { %7438 = vsyncpa [#allocation33], 1 }
0x1d38   :  { %7439 = vsyncpa [#allocation36], 1 }
0x1d39   :  { %7440 = vsyncpa [#allocation4], 1 }
0x1d3a   :  { %7441 = vsyncpa [#allocation40], 1 }
0x1d3b   :  { %7442 = vsyncpa [#allocation43], 1 }

</bundles_post_ra>
